<compile_context>
chip_gen: v7x
topology: tpu7x:2x2x1
jax: 0.10.0
libtpu: 0.0.40
codegen_flags: <defaults>
</compile_context>

<pallas_src>
import math

import numpy as np

import jax
import jax.numpy as jnp
from jax.experimental import pallas as pl
from jax.experimental.pallas import tpu as pltpu


# ----------------------------------------------------------------------------
# Host-side packing: lift ConvTranspose2d(k=4, s=2, p=1) to the 8x8 base grid.
# ----------------------------------------------------------------------------
def _phase_convt_weight(wk, f_in):
    """Polyphase lift of ConvTranspose2d(kernel=4, stride=2, padding=1).

    Activations are stored phase-major on the base grid:
        X_full[f*h + py, f*w + px, c] = Y[h, w, (py*f + px)*C + c].
    The returned matrix maps a 3x3-shift im2col of Y (columns ordered
    (dy, dx, py_in, px_in, ci); shift (dy, dx) means base offset (dy-1, dx-1))
    to the output, phase-major with f_out = 2*f_in.

    Derivation (1-D): full-res o = 2*i + k - 1.  With i = f_in*h_in + p_in,
    o = 2*f_in*h_out + p_out and h_in = h_out + dy - 1 this gives
        k = p_out - 2*p_in + 1 - 2*f_in*(dy - 1),   valid iff 0 <= k < 4.
    """
    cin, cout = wk.shape[2], wk.shape[3]
    f_out = 2 * f_in
    w = np.zeros((9 * f_in * f_in * cin, f_out * f_out * cout), np.float32)
    for dy in range(3):
        for dx in range(3):
            for piy in range(f_in):
                for pix in range(f_in):
                    k0 = (((dy * 3 + dx) * f_in + piy) * f_in + pix) * cin
                    for poy in range(f_out):
                        ky = poy - 2 * piy + 1 - 2 * f_in * (dy - 1)
                        if not 0 <= ky < 4:
                            continue
                        for pox in range(f_out):
                            kx = pox - 2 * pix + 1 - 2 * f_in * (dx - 1)
                            if not 0 <= kx < 4:
                                continue
                            n0 = (poy * f_out + pox) * cout
                            w[k0:k0 + cin, n0:n0 + cout] = wk[ky, kx]
    return w


def _fold_bn(bn, conv_bias, eps=1e-5):
    """Fold eval-mode BatchNorm (+ conv bias) into per-channel scale/bias."""
    g, be, m, v = bn
    s = g / jnp.sqrt(v + eps)
    return s, be + s * (conv_bias - m)


# ----------------------------------------------------------------------------
# Synthetic (deterministic) parameters, kept both raw (for the XLA reference)
# and packed (for the fused Pallas kernel).
# ----------------------------------------------------------------------------
def init_decoder_params(key, dim_z, num_rb, num_class):
    n_class = int(math.ceil(num_class / 2) * 2)
    keys = iter(jax.random.split(key, 128))

    def nrm(shape, scale=0.05):
        return scale * jax.random.normal(next(keys), shape, jnp.float32)

    def bn_stats(c):
        gamma = 1.0 + 0.1 * jax.random.normal(next(keys), (c,), jnp.float32)
        beta = 0.1 * jax.random.normal(next(keys), (c,), jnp.float32)
        mean = 0.1 * jax.random.normal(next(keys), (c,), jnp.float32)
        var = 1.0 + 0.1 * jax.random.uniform(next(keys), (c,), jnp.float32)
        return gamma, beta, mean, var

    C = dim_z
    raw = {"resblocks": [], "convt": []}
    for _ in range(num_rb - 1):
        w3 = nrm((3, 3, C, C))                      # [ky, kx, ci, co]
        cb3 = nrm((C,))
        bn1 = bn_stats(C)
        w1 = nrm((C, C))                            # [ci, co]  (1x1 conv)
        cb1 = nrm((C,))
        bn2 = bn_stats(C)
        raw["resblocks"].append((w3, cb3, bn1, w1, cb1, bn2))

    stages = [(C, C, True), (C, C // 2, True), (C // 2, n_class, False)]
    for cin, cout, has_bn in stages:
        wk = nrm((4, 4, cin, cout))                 # [ky, kx, ci, co]
        cb = nrm((cout,))
        bn = bn_stats(cout) if has_bn else None
        raw["convt"].append((wk, cb, bn))
    return raw, n_class


def pack_kernel_params(raw):
    """Pack raw params into the flat list consumed by the fused kernel."""
    packed = []
    for (w3, cb3, bn1, w1, cb1, bn2) in raw["resblocks"]:
        C = w3.shape[-1]
        s1, b1 = _fold_bn(bn1, cb3)
        s2, b2 = _fold_bn(bn2, cb1)
        packed += [
            w3.reshape(9 * C, C).astype(jnp.bfloat16),         # im2col weight
            s1.reshape(1, C).astype(jnp.float32),
            b1.reshape(1, C).astype(jnp.float32),
            w1.astype(jnp.bfloat16),                            # 1x1 conv
            s2.reshape(1, C).astype(jnp.float32),
            b2.reshape(1, C).astype(jnp.float32),
        ]
    f_in = 1
    for (wk, cb, bn) in raw["convt"]:
        f_out = 2 * f_in
        w_eff = jnp.asarray(_phase_convt_weight(np.asarray(wk), f_in))
        w_eff = w_eff.astype(jnp.bfloat16)
        if bn is not None:
            s, b = _fold_bn(bn, cb)
            packed += [
                w_eff,
                jnp.tile(s, f_out * f_out).reshape(1, -1).astype(jnp.float32),
                jnp.tile(b, f_out * f_out).reshape(1, -1).astype(jnp.float32),
            ]
        else:   # last stage: linear head, bias only
            packed += [
                w_eff,
                jnp.tile(cb, f_out * f_out).reshape(1, -1).astype(jnp.float32),
            ]
        f_in = f_out
    return packed


# ----------------------------------------------------------------------------
# The single fused decoder kernel (per image).
# ----------------------------------------------------------------------------
def _make_decoder_kernel(n_res, H, W):
    M = H * W

    def im2col3x3(y):
        """(H, W, C) -> (H*W, 9*C) with zero padding, shift order (dy, dx)."""
        Hh, Ww, C = y.shape
        zr = jnp.zeros((1, Ww, C), y.dtype)
        t = jnp.concatenate([zr, y, zr], axis=0)                 # (H+2, W, C)
        zc = jnp.zeros((Hh + 2, 1, C), y.dtype)
        p = jnp.concatenate([zc, t, zc], axis=1)                 # (H+2, W+2, C)
        cols = [p[dy:dy + Hh, dx:dx + Ww, :].reshape(Hh * Ww, C)
                for dy in range(3) for dx in range(3)]
        return jnp.concatenate(cols, axis=-1)                    # (H*W, 9C)

    def kernel(*refs):
        z_ref = refs[0]
        out_ref = refs[-1]
        idx = 1

        x = z_ref[...]                                           # (H, W, C) f32
        C = x.shape[-1]

        # --- residual blocks: x + BN(Conv1x1(ReLU(BN(Conv3x3(ReLU(x)))))) ---
        for _ in range(n_res):
            w1p, s1, b1, w2, s2, b2 = refs[idx:idx + 6]
            idx += 6
            a = jnp.maximum(x, 0.0)
            im = im2col3x3(a).astype(jnp.bfloat16)               # (M, 9C)
            h = jnp.dot(im, w1p[...], preferred_element_type=jnp.float32)
            h = jnp.maximum(h * s1[...] + b1[...], 0.0)
            h = jnp.dot(h.astype(jnp.bfloat16), w2[...],
                        preferred_element_type=jnp.float32)
            h = h * s2[...] + b2[...]
            x = (x.reshape(M, C) + h).reshape(H, W, C)

        # --- ConvTranspose stack, lifted to polyphase form on the base grid ---
        wt1, st1, bt1, wt2, st2, bt2, wt3, bt3 = refs[idx:idx + 8]
        y = x
        for (w_r, s_r, b_r) in ((wt1, st1, bt1), (wt2, st2, bt2)):
            im = im2col3x3(y).astype(jnp.bfloat16)               # (M, 9*Cin_phase)
            t = jnp.dot(im, w_r[...], preferred_element_type=jnp.float32)
            t = jnp.maximum(t * s_r[...] + b_r[...], 0.0)        # BN(eval) + ReLU
            y = t.reshape(H, W, t.shape[-1])
        im = im2col3x3(y).astype(jnp.bfloat16)
        t = jnp.dot(im, wt3[...], preferred_element_type=jnp.float32)
        out_ref[...] = t + bt3[...]                              # linear head

    return kernel


def decoder_forward(z_nchw, packed, n_class, n_res):
    """z_nchw: (N, dim_z, H, W) -> (N, n_class, 8H, 8W), matching the PyTorch module."""
    N, C, H, W = z_nchw.shape
    F = 8                                        # 2**3 ConvTranspose stages
    out_ch = F * F * n_class                     # lane-dense (640 = 5*128 for n_class=10)
    z = jnp.transpose(z_nchw, (0, 2, 3, 1)).astype(jnp.float32)   # NCHW -> NHWC

    def const_spec(a):
        zeros = (0,) * a.ndim
        return pl.BlockSpec(a.shape, lambda b, _z=zeros: _z)

    in_specs = [pl.BlockSpec((None, H, W, C), lambda b: (b, 0, 0, 0))]
    in_specs += [const_spec(a) for a in packed]

    out = pl.pallas_call(
        _make_decoder_kernel(n_res, H, W),
        out_shape=jax.ShapeDtypeStruct((N, H * W, out_ch), jnp.float32),
        grid=(N,),
        in_specs=in_specs,
        out_specs=pl.BlockSpec((None, H * W, out_ch), lambda b: (b, 0, 0)),
        compiler_params=pltpu.CompilerParams(
            dimension_semantics=("parallel",),
            vmem_limit_bytes=48 * 1024 * 1024),
    )(z, *packed)

    # Single depth-to-space + NHWC -> NCHW on the final output only.
    o = out.reshape(N, H, W, F, F, n_class)              # (n, h, w, py, px, c)
    o = jnp.transpose(o, (0, 5, 1, 3, 2, 4))             # (n, c, h, py, w, px)
    return o.reshape(N, n_class, H * F, W * F)


# ----------------------------------------------------------------------------
# Pure-XLA f32 reference (eval-mode BN), for in-script validation.
# ----------------------------------------------------------------------------
def decoder_reference(z_nchw, raw):
    eps = 1e-5
    hp = jax.lax.Precision.HIGHEST
    x = jnp.transpose(z_nchw, (0, 2, 3, 1)).astype(jnp.float32)
    for (w3, cb3, bn1, w1, cb1, bn2) in raw["resblocks"]:
        a = jax.nn.relu(x)
        h = jax.lax.conv_general_dilated(
            a, w3, (1, 1), ((1, 1), (1, 1)),
            dimension_numbers=("NHWC", "HWIO", "NHWC"), precision=hp) + cb3
        g, be, m, v = bn1
        h = (h - m) / jnp.sqrt(v + eps) * g + be
        h = jax.nn.relu(h)
        h = jnp.einsum("nhwc,cd->nhwd", h, w1, precision=hp) + cb1
        g, be, m, v = bn2
        h = (h - m) / jnp.sqrt(v + eps) * g + be
        x = x + h
    for (wk, cb, bn) in raw["convt"]:
        # ConvTranspose2d(4, s=2, p=1) == lhs-dilated conv, flipped kernel, pad k-1-p=2.
        x = jax.lax.conv_general_dilated(
            x, wk[::-1, ::-1, :, :], (1, 1), ((2, 2), (2, 2)),
            lhs_dilation=(2, 2),
            dimension_numbers=("NHWC", "HWIO", "NHWC"), precision=hp) + cb
        if bn is not None:
            g, be, m, v = bn
            x = (x - m) / jnp.sqrt(v + eps) * g + be
            x = jax.nn.relu(x)
    return jnp.transpose(x, (0, 3, 1, 2))


if __name__ == "__main__":
    key = jax.random.PRNGKey(0)
    k_params, k_z = jax.random.split(key)

    dim_z, num_rb, num_class = 32, 2, 10          # cfgs.num_rb=2, cfgs.num_class=10
    raw, n_class = init_decoder_params(k_params, dim_z, num_rb, num_class)
    packed = pack_kernel_params(raw)

    # PyTorch-style NCHW latent: (batch=2, dim_z=32, 8, 8) -> output (2, 10, 64, 64)
    z = jax.random.normal(k_z, (2, dim_z, 8, 8), jnp.float32)

    fwd = jax.jit(decoder_forward, static_argnums=(2, 3))
    out = jax.block_until_ready(fwd(z, packed, n_class, num_rb - 1))

    assert out.shape == (2, n_class, 64, 64), out.shape
    assert bool(jnp.all(jnp.isfinite(out)))

    # Validate the fused bf16 Pallas kernel against the pure-XLA f32 reference.
    ref = jax.block_until_ready(jax.jit(decoder_reference)(z, raw))
    err = float(jnp.max(jnp.abs(out - ref)))
    assert err < 1e-1, f"kernel vs reference max abs error {err}"

    print("KERNEL_OK")
</pallas_src>

<mosaic_0001>
module attributes {stable_mosaic.version = 11 : i64} {
  func.func @kernel(%arg0: i32, %arg1: memref<1x8x8x32xf32, #tpu.memory_space<vmem>>, %arg2: memref<288x32xbf16, #tpu.memory_space<vmem>>, %arg3: memref<1x32xf32, #tpu.memory_space<vmem>>, %arg4: memref<1x32xf32, #tpu.memory_space<vmem>>, %arg5: memref<32x32xbf16, #tpu.memory_space<vmem>>, %arg6: memref<1x32xf32, #tpu.memory_space<vmem>>, %arg7: memref<1x32xf32, #tpu.memory_space<vmem>>, %arg8: memref<288x128xbf16, #tpu.memory_space<vmem>>, %arg9: memref<1x128xf32, #tpu.memory_space<vmem>>, %arg10: memref<1x128xf32, #tpu.memory_space<vmem>>, %arg11: memref<1152x256xbf16, #tpu.memory_space<vmem>>, %arg12: memref<1x256xf32, #tpu.memory_space<vmem>>, %arg13: memref<1x256xf32, #tpu.memory_space<vmem>>, %arg14: memref<2304x640xbf16, #tpu.memory_space<vmem>>, %arg15: memref<1x640xf32, #tpu.memory_space<vmem>>, %arg16: memref<1x64x640xf32, #tpu.memory_space<vmem>>) attributes {dimension_semantics = [#tpu.dimension_semantics<parallel>], iteration_bounds = array<i64: 2>, scalar_prefetch = 0 : i64, scratch_operands = 0 : i64, tpu.core_type = #tpu.core_type<tc>, window_params = [{transform_indices = @transform_0, window_bounds = array<i64: 1, 8, 8, 32>}, {pipeline_mode = #tpu.pipeline_mode<synchronous>, transform_indices = @transform_1, window_bounds = array<i64: 288, 32>}, {pipeline_mode = #tpu.pipeline_mode<synchronous>, transform_indices = @transform_2, window_bounds = array<i64: 1, 32>}, {pipeline_mode = #tpu.pipeline_mode<synchronous>, transform_indices = @transform_3, window_bounds = array<i64: 1, 32>}, {pipeline_mode = #tpu.pipeline_mode<synchronous>, transform_indices = @transform_4, window_bounds = array<i64: 32, 32>}, {pipeline_mode = #tpu.pipeline_mode<synchronous>, transform_indices = @transform_5, window_bounds = array<i64: 1, 32>}, {pipeline_mode = #tpu.pipeline_mode<synchronous>, transform_indices = @transform_6, window_bounds = array<i64: 1, 32>}, {pipeline_mode = #tpu.pipeline_mode<synchronous>, transform_indices = @transform_7, window_bounds = array<i64: 288, 128>}, {pipeline_mode = #tpu.pipeline_mode<synchronous>, transform_indices = @transform_8, window_bounds = array<i64: 1, 128>}, {pipeline_mode = #tpu.pipeline_mode<synchronous>, transform_indices = @transform_9, window_bounds = array<i64: 1, 128>}, {pipeline_mode = #tpu.pipeline_mode<synchronous>, transform_indices = @transform_10, window_bounds = array<i64: 1152, 256>}, {pipeline_mode = #tpu.pipeline_mode<synchronous>, transform_indices = @transform_11, window_bounds = array<i64: 1, 256>}, {pipeline_mode = #tpu.pipeline_mode<synchronous>, transform_indices = @transform_12, window_bounds = array<i64: 1, 256>}, {pipeline_mode = #tpu.pipeline_mode<synchronous>, transform_indices = @transform_13, window_bounds = array<i64: 2304, 640>}, {pipeline_mode = #tpu.pipeline_mode<synchronous>, transform_indices = @transform_14, window_bounds = array<i64: 1, 640>}, {transform_indices = @transform_15, window_bounds = array<i64: 1, 64, 640>}]} {
    %c0 = arith.constant 0 : index
    %c0_0 = arith.constant 0 : index
    %c0_1 = arith.constant 0 : index
    %c0_2 = arith.constant 0 : index
    %0 = vector.load %arg1[%c0, %c0_0, %c0_1, %c0_2] : memref<1x8x8x32xf32, #tpu.memory_space<vmem>>, vector<1x8x8x32xf32>
    %1 = vector.shape_cast %0 : vector<1x8x8x32xf32> to vector<8x8x32xf32>
    %cst = arith.constant 0.000000e+00 : f32
    %2 = vector.broadcast %cst : f32 to vector<8x8x32xf32>
    %3 = arith.maximumf %1, %2 : vector<8x8x32xf32>
    %cst_3 = arith.constant 0.000000e+00 : f32
    %4 = vector.broadcast %cst_3 : f32 to vector<1x8x32xf32>
    %5 = tpu.concatenate %4, %3, %4 in 0 : vector<1x8x32xf32>, vector<8x8x32xf32>, vector<1x8x32xf32> -> vector<10x8x32xf32>
    %cst_4 = arith.constant 0.000000e+00 : f32
    %6 = vector.broadcast %cst_4 : f32 to vector<10x1x32xf32>
    %7 = tpu.concatenate %6, %5, %6 in 1 : vector<10x1x32xf32>, vector<10x8x32xf32>, vector<10x1x32xf32> -> vector<10x10x32xf32>
    %8 = vector.extract_strided_slice %7 {offsets = [0, 0, 0], sizes = [8, 8, 32], strides = [1, 1, 1]} : vector<10x10x32xf32> to vector<8x8x32xf32>
    %9 = vector.shape_cast %8 : vector<8x8x32xf32> to vector<64x32xf32>
    %10 = vector.extract_strided_slice %7 {offsets = [0, 1, 0], sizes = [8, 8, 32], strides = [1, 1, 1]} : vector<10x10x32xf32> to vector<8x8x32xf32>
    %11 = vector.shape_cast %10 : vector<8x8x32xf32> to vector<64x32xf32>
    %12 = vector.extract_strided_slice %7 {offsets = [0, 2, 0], sizes = [8, 8, 32], strides = [1, 1, 1]} : vector<10x10x32xf32> to vector<8x8x32xf32>
    %13 = vector.shape_cast %12 : vector<8x8x32xf32> to vector<64x32xf32>
    %14 = vector.extract_strided_slice %7 {offsets = [1, 0, 0], sizes = [8, 8, 32], strides = [1, 1, 1]} : vector<10x10x32xf32> to vector<8x8x32xf32>
    %15 = vector.shape_cast %14 : vector<8x8x32xf32> to vector<64x32xf32>
    %16 = vector.extract_strided_slice %7 {offsets = [1, 1, 0], sizes = [8, 8, 32], strides = [1, 1, 1]} : vector<10x10x32xf32> to vector<8x8x32xf32>
    %17 = vector.shape_cast %16 : vector<8x8x32xf32> to vector<64x32xf32>
    %18 = vector.extract_strided_slice %7 {offsets = [1, 2, 0], sizes = [8, 8, 32], strides = [1, 1, 1]} : vector<10x10x32xf32> to vector<8x8x32xf32>
    %19 = vector.shape_cast %18 : vector<8x8x32xf32> to vector<64x32xf32>
    %20 = vector.extract_strided_slice %7 {offsets = [2, 0, 0], sizes = [8, 8, 32], strides = [1, 1, 1]} : vector<10x10x32xf32> to vector<8x8x32xf32>
    %21 = vector.shape_cast %20 : vector<8x8x32xf32> to vector<64x32xf32>
    %22 = vector.extract_strided_slice %7 {offsets = [2, 1, 0], sizes = [8, 8, 32], strides = [1, 1, 1]} : vector<10x10x32xf32> to vector<8x8x32xf32>
    %23 = vector.shape_cast %22 : vector<8x8x32xf32> to vector<64x32xf32>
    %24 = vector.extract_strided_slice %7 {offsets = [2, 2, 0], sizes = [8, 8, 32], strides = [1, 1, 1]} : vector<10x10x32xf32> to vector<8x8x32xf32>
    %25 = vector.shape_cast %24 : vector<8x8x32xf32> to vector<64x32xf32>
    %26 = tpu.concatenate %9, %11, %13, %15, %17, %19, %21, %23, %25 in 1 : vector<64x32xf32>, vector<64x32xf32>, vector<64x32xf32>, vector<64x32xf32>, vector<64x32xf32>, vector<64x32xf32>, vector<64x32xf32>, vector<64x32xf32>, vector<64x32xf32> -> vector<64x288xf32>
    %27 = arith.truncf %26 : vector<64x288xf32> to vector<64x288xbf16>
    %c0_5 = arith.constant 0 : index
    %c0_6 = arith.constant 0 : index
    %28 = vector.load %arg2[%c0_5, %c0_6] : memref<288x32xbf16, #tpu.memory_space<vmem>>, vector<288x32xbf16>
    %cst_7 = arith.constant dense<0.000000e+00> : vector<64x32xf32>
    %29 = tpu.matmul %27, %28, %cst_7 {dimension_numbers = #tpu.dot_dimension_numbers<[1], [0], [0], [1], [0, 0, 1, 1], [], []>} : vector<64x288xbf16>, vector<288x32xbf16>, vector<64x32xf32> -> vector<64x32xf32>
    %c0_8 = arith.constant 0 : index
    %c0_9 = arith.constant 0 : index
    %30 = vector.load %arg3[%c0_8, %c0_9] : memref<1x32xf32, #tpu.memory_space<vmem>>, vector<1x32xf32>
    %31 = vector.broadcast %30 : vector<1x32xf32> to vector<64x32xf32>
    %32 = arith.mulf %29, %31 : vector<64x32xf32>
    %c0_10 = arith.constant 0 : index
    %c0_11 = arith.constant 0 : index
    %33 = vector.load %arg4[%c0_10, %c0_11] : memref<1x32xf32, #tpu.memory_space<vmem>>, vector<1x32xf32>
    %34 = vector.broadcast %33 : vector<1x32xf32> to vector<64x32xf32>
    %35 = arith.addf %32, %34 : vector<64x32xf32>
    %cst_12 = arith.constant 0.000000e+00 : f32
    %36 = vector.broadcast %cst_12 : f32 to vector<64x32xf32>
    %37 = arith.maximumf %35, %36 : vector<64x32xf32>
    %38 = arith.truncf %37 : vector<64x32xf32> to vector<64x32xbf16>
    %c0_13 = arith.constant 0 : index
    %c0_14 = arith.constant 0 : index
    %39 = vector.load %arg5[%c0_13, %c0_14] : memref<32x32xbf16, #tpu.memory_space<vmem>>, vector<32x32xbf16>
    %cst_15 = arith.constant dense<0.000000e+00> : vector<64x32xf32>
    %40 = tpu.matmul %38, %39, %cst_15 {dimension_numbers = #tpu.dot_dimension_numbers<[1], [0], [0], [1], [0, 0, 1, 1], [], []>} : vector<64x32xbf16>, vector<32x32xbf16>, vector<64x32xf32> -> vector<64x32xf32>
    %c0_16 = arith.constant 0 : index
    %c0_17 = arith.constant 0 : index
    %41 = vector.load %arg6[%c0_16, %c0_17] : memref<1x32xf32, #tpu.memory_space<vmem>>, vector<1x32xf32>
    %42 = vector.broadcast %41 : vector<1x32xf32> to vector<64x32xf32>
    %43 = arith.mulf %40, %42 : vector<64x32xf32>
    %c0_18 = arith.constant 0 : index
    %c0_19 = arith.constant 0 : index
    %44 = vector.load %arg7[%c0_18, %c0_19] : memref<1x32xf32, #tpu.memory_space<vmem>>, vector<1x32xf32>
    %45 = vector.broadcast %44 : vector<1x32xf32> to vector<64x32xf32>
    %46 = arith.addf %43, %45 : vector<64x32xf32>
    %47 = vector.shape_cast %1 : vector<8x8x32xf32> to vector<64x32xf32>
    %48 = arith.addf %47, %46 : vector<64x32xf32>
    %49 = vector.shape_cast %48 : vector<64x32xf32> to vector<8x8x32xf32>
    %cst_20 = arith.constant 0.000000e+00 : f32
    %50 = vector.broadcast %cst_20 : f32 to vector<1x8x32xf32>
    %51 = tpu.concatenate %50, %49, %50 in 0 : vector<1x8x32xf32>, vector<8x8x32xf32>, vector<1x8x32xf32> -> vector<10x8x32xf32>
    %cst_21 = arith.constant 0.000000e+00 : f32
    %52 = vector.broadcast %cst_21 : f32 to vector<10x1x32xf32>
    %53 = tpu.concatenate %52, %51, %52 in 1 : vector<10x1x32xf32>, vector<10x8x32xf32>, vector<10x1x32xf32> -> vector<10x10x32xf32>
    %54 = vector.extract_strided_slice %53 {offsets = [0, 0, 0], sizes = [8, 8, 32], strides = [1, 1, 1]} : vector<10x10x32xf32> to vector<8x8x32xf32>
    %55 = vector.shape_cast %54 : vector<8x8x32xf32> to vector<64x32xf32>
    %56 = vector.extract_strided_slice %53 {offsets = [0, 1, 0], sizes = [8, 8, 32], strides = [1, 1, 1]} : vector<10x10x32xf32> to vector<8x8x32xf32>
    %57 = vector.shape_cast %56 : vector<8x8x32xf32> to vector<64x32xf32>
    %58 = vector.extract_strided_slice %53 {offsets = [0, 2, 0], sizes = [8, 8, 32], strides = [1, 1, 1]} : vector<10x10x32xf32> to vector<8x8x32xf32>
    %59 = vector.shape_cast %58 : vector<8x8x32xf32> to vector<64x32xf32>
    %60 = vector.extract_strided_slice %53 {offsets = [1, 0, 0], sizes = [8, 8, 32], strides = [1, 1, 1]} : vector<10x10x32xf32> to vector<8x8x32xf32>
    %61 = vector.shape_cast %60 : vector<8x8x32xf32> to vector<64x32xf32>
    %62 = vector.extract_strided_slice %53 {offsets = [1, 1, 0], sizes = [8, 8, 32], strides = [1, 1, 1]} : vector<10x10x32xf32> to vector<8x8x32xf32>
    %63 = vector.shape_cast %62 : vector<8x8x32xf32> to vector<64x32xf32>
    %64 = vector.extract_strided_slice %53 {offsets = [1, 2, 0], sizes = [8, 8, 32], strides = [1, 1, 1]} : vector<10x10x32xf32> to vector<8x8x32xf32>
    %65 = vector.shape_cast %64 : vector<8x8x32xf32> to vector<64x32xf32>
    %66 = vector.extract_strided_slice %53 {offsets = [2, 0, 0], sizes = [8, 8, 32], strides = [1, 1, 1]} : vector<10x10x32xf32> to vector<8x8x32xf32>
    %67 = vector.shape_cast %66 : vector<8x8x32xf32> to vector<64x32xf32>
    %68 = vector.extract_strided_slice %53 {offsets = [2, 1, 0], sizes = [8, 8, 32], strides = [1, 1, 1]} : vector<10x10x32xf32> to vector<8x8x32xf32>
    %69 = vector.shape_cast %68 : vector<8x8x32xf32> to vector<64x32xf32>
    %70 = vector.extract_strided_slice %53 {offsets = [2, 2, 0], sizes = [8, 8, 32], strides = [1, 1, 1]} : vector<10x10x32xf32> to vector<8x8x32xf32>
    %71 = vector.shape_cast %70 : vector<8x8x32xf32> to vector<64x32xf32>
    %72 = tpu.concatenate %55, %57, %59, %61, %63, %65, %67, %69, %71 in 1 : vector<64x32xf32>, vector<64x32xf32>, vector<64x32xf32>, vector<64x32xf32>, vector<64x32xf32>, vector<64x32xf32>, vector<64x32xf32>, vector<64x32xf32>, vector<64x32xf32> -> vector<64x288xf32>
    %73 = arith.truncf %72 : vector<64x288xf32> to vector<64x288xbf16>
    %c0_22 = arith.constant 0 : index
    %c0_23 = arith.constant 0 : index
    %74 = vector.load %arg8[%c0_22, %c0_23] : memref<288x128xbf16, #tpu.memory_space<vmem>>, vector<288x128xbf16>
    %cst_24 = arith.constant dense<0.000000e+00> : vector<64x128xf32>
    %75 = tpu.matmul %73, %74, %cst_24 {dimension_numbers = #tpu.dot_dimension_numbers<[1], [0], [0], [1], [0, 0, 1, 1], [], []>} : vector<64x288xbf16>, vector<288x128xbf16>, vector<64x128xf32> -> vector<64x128xf32>
    %c0_25 = arith.constant 0 : index
    %c0_26 = arith.constant 0 : index
    %76 = vector.load %arg9[%c0_25, %c0_26] : memref<1x128xf32, #tpu.memory_space<vmem>>, vector<1x128xf32>
    %77 = vector.broadcast %76 : vector<1x128xf32> to vector<64x128xf32>
    %78 = arith.mulf %75, %77 : vector<64x128xf32>
    %c0_27 = arith.constant 0 : index
    %c0_28 = arith.constant 0 : index
    %79 = vector.load %arg10[%c0_27, %c0_28] : memref<1x128xf32, #tpu.memory_space<vmem>>, vector<1x128xf32>
    %80 = vector.broadcast %79 : vector<1x128xf32> to vector<64x128xf32>
    %81 = arith.addf %78, %80 : vector<64x128xf32>
    %cst_29 = arith.constant 0.000000e+00 : f32
    %82 = vector.broadcast %cst_29 : f32 to vector<64x128xf32>
    %83 = arith.maximumf %81, %82 : vector<64x128xf32>
    %84 = vector.shape_cast %83 : vector<64x128xf32> to vector<8x8x128xf32>
    %cst_30 = arith.constant 0.000000e+00 : f32
    %85 = vector.broadcast %cst_30 : f32 to vector<1x8x128xf32>
    %86 = tpu.concatenate %85, %84, %85 in 0 : vector<1x8x128xf32>, vector<8x8x128xf32>, vector<1x8x128xf32> -> vector<10x8x128xf32>
    %cst_31 = arith.constant 0.000000e+00 : f32
    %87 = vector.broadcast %cst_31 : f32 to vector<10x1x128xf32>
    %88 = tpu.concatenate %87, %86, %87 in 1 : vector<10x1x128xf32>, vector<10x8x128xf32>, vector<10x1x128xf32> -> vector<10x10x128xf32>
    %89 = vector.extract_strided_slice %88 {offsets = [0, 0, 0], sizes = [8, 8, 128], strides = [1, 1, 1]} : vector<10x10x128xf32> to vector<8x8x128xf32>
    %90 = vector.shape_cast %89 : vector<8x8x128xf32> to vector<64x128xf32>
    %91 = vector.extract_strided_slice %88 {offsets = [0, 1, 0], sizes = [8, 8, 128], strides = [1, 1, 1]} : vector<10x10x128xf32> to vector<8x8x128xf32>
    %92 = vector.shape_cast %91 : vector<8x8x128xf32> to vector<64x128xf32>
    %93 = vector.extract_strided_slice %88 {offsets = [0, 2, 0], sizes = [8, 8, 128], strides = [1, 1, 1]} : vector<10x10x128xf32> to vector<8x8x128xf32>
    %94 = vector.shape_cast %93 : vector<8x8x128xf32> to vector<64x128xf32>
    %95 = vector.extract_strided_slice %88 {offsets = [1, 0, 0], sizes = [8, 8, 128], strides = [1, 1, 1]} : vector<10x10x128xf32> to vector<8x8x128xf32>
    %96 = vector.shape_cast %95 : vector<8x8x128xf32> to vector<64x128xf32>
    %97 = vector.extract_strided_slice %88 {offsets = [1, 1, 0], sizes = [8, 8, 128], strides = [1, 1, 1]} : vector<10x10x128xf32> to vector<8x8x128xf32>
    %98 = vector.shape_cast %97 : vector<8x8x128xf32> to vector<64x128xf32>
    %99 = vector.extract_strided_slice %88 {offsets = [1, 2, 0], sizes = [8, 8, 128], strides = [1, 1, 1]} : vector<10x10x128xf32> to vector<8x8x128xf32>
    %100 = vector.shape_cast %99 : vector<8x8x128xf32> to vector<64x128xf32>
    %101 = vector.extract_strided_slice %88 {offsets = [2, 0, 0], sizes = [8, 8, 128], strides = [1, 1, 1]} : vector<10x10x128xf32> to vector<8x8x128xf32>
    %102 = vector.shape_cast %101 : vector<8x8x128xf32> to vector<64x128xf32>
    %103 = vector.extract_strided_slice %88 {offsets = [2, 1, 0], sizes = [8, 8, 128], strides = [1, 1, 1]} : vector<10x10x128xf32> to vector<8x8x128xf32>
    %104 = vector.shape_cast %103 : vector<8x8x128xf32> to vector<64x128xf32>
    %105 = vector.extract_strided_slice %88 {offsets = [2, 2, 0], sizes = [8, 8, 128], strides = [1, 1, 1]} : vector<10x10x128xf32> to vector<8x8x128xf32>
    %106 = vector.shape_cast %105 : vector<8x8x128xf32> to vector<64x128xf32>
    %107 = tpu.concatenate %90, %92, %94, %96, %98, %100, %102, %104, %106 in 1 : vector<64x128xf32>, vector<64x128xf32>, vector<64x128xf32>, vector<64x128xf32>, vector<64x128xf32>, vector<64x128xf32>, vector<64x128xf32>, vector<64x128xf32>, vector<64x128xf32> -> vector<64x1152xf32>
    %108 = arith.truncf %107 : vector<64x1152xf32> to vector<64x1152xbf16>
    %c0_32 = arith.constant 0 : index
    %c0_33 = arith.constant 0 : index
    %109 = vector.load %arg11[%c0_32, %c0_33] : memref<1152x256xbf16, #tpu.memory_space<vmem>>, vector<1152x256xbf16>
    %cst_34 = arith.constant dense<0.000000e+00> : vector<64x256xf32>
    %110 = tpu.matmul %108, %109, %cst_34 {dimension_numbers = #tpu.dot_dimension_numbers<[1], [0], [0], [1], [0, 0, 1, 1], [], []>} : vector<64x1152xbf16>, vector<1152x256xbf16>, vector<64x256xf32> -> vector<64x256xf32>
    %c0_35 = arith.constant 0 : index
    %c0_36 = arith.constant 0 : index
    %111 = vector.load %arg12[%c0_35, %c0_36] : memref<1x256xf32, #tpu.memory_space<vmem>>, vector<1x256xf32>
    %112 = vector.broadcast %111 : vector<1x256xf32> to vector<64x256xf32>
    %113 = arith.mulf %110, %112 : vector<64x256xf32>
    %c0_37 = arith.constant 0 : index
    %c0_38 = arith.constant 0 : index
    %114 = vector.load %arg13[%c0_37, %c0_38] : memref<1x256xf32, #tpu.memory_space<vmem>>, vector<1x256xf32>
    %115 = vector.broadcast %114 : vector<1x256xf32> to vector<64x256xf32>
    %116 = arith.addf %113, %115 : vector<64x256xf32>
    %cst_39 = arith.constant 0.000000e+00 : f32
    %117 = vector.broadcast %cst_39 : f32 to vector<64x256xf32>
    %118 = arith.maximumf %116, %117 : vector<64x256xf32>
    %119 = vector.shape_cast %118 : vector<64x256xf32> to vector<8x8x256xf32>
    %cst_40 = arith.constant 0.000000e+00 : f32
    %120 = vector.broadcast %cst_40 : f32 to vector<1x8x256xf32>
    %121 = tpu.concatenate %120, %119, %120 in 0 : vector<1x8x256xf32>, vector<8x8x256xf32>, vector<1x8x256xf32> -> vector<10x8x256xf32>
    %cst_41 = arith.constant 0.000000e+00 : f32
    %122 = vector.broadcast %cst_41 : f32 to vector<10x1x256xf32>
    %123 = tpu.concatenate %122, %121, %122 in 1 : vector<10x1x256xf32>, vector<10x8x256xf32>, vector<10x1x256xf32> -> vector<10x10x256xf32>
    %124 = vector.extract_strided_slice %123 {offsets = [0, 0, 0], sizes = [8, 8, 256], strides = [1, 1, 1]} : vector<10x10x256xf32> to vector<8x8x256xf32>
    %125 = vector.shape_cast %124 : vector<8x8x256xf32> to vector<64x256xf32>
    %126 = vector.extract_strided_slice %123 {offsets = [0, 1, 0], sizes = [8, 8, 256], strides = [1, 1, 1]} : vector<10x10x256xf32> to vector<8x8x256xf32>
    %127 = vector.shape_cast %126 : vector<8x8x256xf32> to vector<64x256xf32>
    %128 = vector.extract_strided_slice %123 {offsets = [0, 2, 0], sizes = [8, 8, 256], strides = [1, 1, 1]} : vector<10x10x256xf32> to vector<8x8x256xf32>
    %129 = vector.shape_cast %128 : vector<8x8x256xf32> to vector<64x256xf32>
    %130 = vector.extract_strided_slice %123 {offsets = [1, 0, 0], sizes = [8, 8, 256], strides = [1, 1, 1]} : vector<10x10x256xf32> to vector<8x8x256xf32>
    %131 = vector.shape_cast %130 : vector<8x8x256xf32> to vector<64x256xf32>
    %132 = vector.extract_strided_slice %123 {offsets = [1, 1, 0], sizes = [8, 8, 256], strides = [1, 1, 1]} : vector<10x10x256xf32> to vector<8x8x256xf32>
    %133 = vector.shape_cast %132 : vector<8x8x256xf32> to vector<64x256xf32>
    %134 = vector.extract_strided_slice %123 {offsets = [1, 2, 0], sizes = [8, 8, 256], strides = [1, 1, 1]} : vector<10x10x256xf32> to vector<8x8x256xf32>
    %135 = vector.shape_cast %134 : vector<8x8x256xf32> to vector<64x256xf32>
    %136 = vector.extract_strided_slice %123 {offsets = [2, 0, 0], sizes = [8, 8, 256], strides = [1, 1, 1]} : vector<10x10x256xf32> to vector<8x8x256xf32>
    %137 = vector.shape_cast %136 : vector<8x8x256xf32> to vector<64x256xf32>
    %138 = vector.extract_strided_slice %123 {offsets = [2, 1, 0], sizes = [8, 8, 256], strides = [1, 1, 1]} : vector<10x10x256xf32> to vector<8x8x256xf32>
    %139 = vector.shape_cast %138 : vector<8x8x256xf32> to vector<64x256xf32>
    %140 = vector.extract_strided_slice %123 {offsets = [2, 2, 0], sizes = [8, 8, 256], strides = [1, 1, 1]} : vector<10x10x256xf32> to vector<8x8x256xf32>
    %141 = vector.shape_cast %140 : vector<8x8x256xf32> to vector<64x256xf32>
    %142 = tpu.concatenate %125, %127, %129, %131, %133, %135, %137, %139, %141 in 1 : vector<64x256xf32>, vector<64x256xf32>, vector<64x256xf32>, vector<64x256xf32>, vector<64x256xf32>, vector<64x256xf32>, vector<64x256xf32>, vector<64x256xf32>, vector<64x256xf32> -> vector<64x2304xf32>
    %143 = arith.truncf %142 : vector<64x2304xf32> to vector<64x2304xbf16>
    %c0_42 = arith.constant 0 : index
    %c0_43 = arith.constant 0 : index
    %144 = vector.load %arg14[%c0_42, %c0_43] : memref<2304x640xbf16, #tpu.memory_space<vmem>>, vector<2304x640xbf16>
    %cst_44 = arith.constant dense<0.000000e+00> : vector<64x640xf32>
    %145 = tpu.matmul %143, %144, %cst_44 {dimension_numbers = #tpu.dot_dimension_numbers<[1], [0], [0], [1], [0, 0, 1, 1], [], []>} : vector<64x2304xbf16>, vector<2304x640xbf16>, vector<64x640xf32> -> vector<64x640xf32>
    %c0_45 = arith.constant 0 : index
    %c0_46 = arith.constant 0 : index
    %146 = vector.load %arg15[%c0_45, %c0_46] : memref<1x640xf32, #tpu.memory_space<vmem>>, vector<1x640xf32>
    %147 = vector.broadcast %146 : vector<1x640xf32> to vector<64x640xf32>
    %148 = arith.addf %145, %147 : vector<64x640xf32>
    %c0_47 = arith.constant 0 : index
    %c0_48 = arith.constant 0 : index
    %c0_49 = arith.constant 0 : index
    %149 = vector.load %arg16[%c0_47, %c0_48, %c0_49] : memref<1x64x640xf32, #tpu.memory_space<vmem>>, vector<1x64x640xf32>
    %150 = vector.shape_cast %149 : vector<1x64x640xf32> to vector<64x640xf32>
    %151 = vector.shape_cast %148 : vector<64x640xf32> to vector<1x64x640xf32>
    tpu.vector_store %arg16[%c0_47, %c0_48, %c0_49], %151 {strides = array<i32>} : memref<1x64x640xf32, #tpu.memory_space<vmem>>, vector<1x64x640xf32>,
    return
  }
  func.func @transform_0(%arg0: i32) -> (i32, i32, i32, i32) {
    %c0_i32 = arith.constant 0 : i32
    %c0_i32_0 = arith.constant 0 : i32
    %c0_i32_1 = arith.constant 0 : i32
    %c0_i32_2 = arith.constant 0 : i32
    return %arg0, %c0_i32, %c0_i32_0, %c0_i32_1 : i32, i32, i32, i32
  }
  func.func @transform_1(%arg0: i32) -> (i32, i32) {
    %c0_i32 = arith.constant 0 : i32
    %c0_i32_0 = arith.constant 0 : i32
    %c0_i32_1 = arith.constant 0 : i32
    return %c0_i32, %c0_i32_0 : i32, i32
  }
  func.func @transform_2(%arg0: i32) -> (i32, i32) {
    %c0_i32 = arith.constant 0 : i32
    %c0_i32_0 = arith.constant 0 : i32
    %c0_i32_1 = arith.constant 0 : i32
    return %c0_i32, %c0_i32_0 : i32, i32
  }
  func.func @transform_3(%arg0: i32) -> (i32, i32) {
    %c0_i32 = arith.constant 0 : i32
    %c0_i32_0 = arith.constant 0 : i32
    %c0_i32_1 = arith.constant 0 : i32
    return %c0_i32, %c0_i32_0 : i32, i32
  }
  func.func @transform_4(%arg0: i32) -> (i32, i32) {
    %c0_i32 = arith.constant 0 : i32
    %c0_i32_0 = arith.constant 0 : i32
    %c0_i32_1 = arith.constant 0 : i32
    return %c0_i32, %c0_i32_0 : i32, i32
  }
  func.func @transform_5(%arg0: i32) -> (i32, i32) {
    %c0_i32 = arith.constant 0 : i32
    %c0_i32_0 = arith.constant 0 : i32
    %c0_i32_1 = arith.constant 0 : i32
    return %c0_i32, %c0_i32_0 : i32, i32
  }
  func.func @transform_6(%arg0: i32) -> (i32, i32) {
    %c0_i32 = arith.constant 0 : i32
    %c0_i32_0 = arith.constant 0 : i32
    %c0_i32_1 = arith.constant 0 : i32
    return %c0_i32, %c0_i32_0 : i32, i32
  }
  func.func @transform_7(%arg0: i32) -> (i32, i32) {
    %c0_i32 = arith.constant 0 : i32
    %c0_i32_0 = arith.constant 0 : i32
    %c0_i32_1 = arith.constant 0 : i32
    return %c0_i32, %c0_i32_0 : i32, i32
  }
  func.func @transform_8(%arg0: i32) -> (i32, i32) {
    %c0_i32 = arith.constant 0 : i32
    %c0_i32_0 = arith.constant 0 : i32
    %c0_i32_1 = arith.constant 0 : i32
    return %c0_i32, %c0_i32_0 : i32, i32
  }
  func.func @transform_9(%arg0: i32) -> (i32, i32) {
    %c0_i32 = arith.constant 0 : i32
    %c0_i32_0 = arith.constant 0 : i32
    %c0_i32_1 = arith.constant 0 : i32
    return %c0_i32, %c0_i32_0 : i32, i32
  }
  func.func @transform_10(%arg0: i32) -> (i32, i32) {
    %c0_i32 = arith.constant 0 : i32
    %c0_i32_0 = arith.constant 0 : i32
    %c0_i32_1 = arith.constant 0 : i32
    return %c0_i32, %c0_i32_0 : i32, i32
  }
  func.func @transform_11(%arg0: i32) -> (i32, i32) {
    %c0_i32 = arith.constant 0 : i32
    %c0_i32_0 = arith.constant 0 : i32
    %c0_i32_1 = arith.constant 0 : i32
    return %c0_i32, %c0_i32_0 : i32, i32
  }
  func.func @transform_12(%arg0: i32) -> (i32, i32) {
    %c0_i32 = arith.constant 0 : i32
    %c0_i32_0 = arith.constant 0 : i32
    %c0_i32_1 = arith.constant 0 : i32
    return %c0_i32, %c0_i32_0 : i32, i32
  }
  func.func @transform_13(%arg0: i32) -> (i32, i32) {
    %c0_i32 = arith.constant 0 : i32
    %c0_i32_0 = arith.constant 0 : i32
    %c0_i32_1 = arith.constant 0 : i32
    return %c0_i32, %c0_i32_0 : i32, i32
  }
  func.func @transform_14(%arg0: i32) -> (i32, i32) {
    %c0_i32 = arith.constant 0 : i32
    %c0_i32_0 = arith.constant 0 : i32
    %c0_i32_1 = arith.constant 0 : i32
    return %c0_i32, %c0_i32_0 : i32, i32
  }
  func.func @transform_15(%arg0: i32) -> (i32, i32, i32) {
    %c0_i32 = arith.constant 0 : i32
    %c0_i32_0 = arith.constant 0 : i32
    %c0_i32_1 = arith.constant 0 : i32
    return %arg0, %c0_i32, %c0_i32_0 : i32, i32, i32
  }
}

</mosaic_0001>

<bundles_post_ra>
// kernel: decoder_forward.1
= control target key start
LH: loop header
LB: loop body
LE: loop exit
PB: predicated region body
PF: predicated region fallthrough
CT: control target
= control target key end

     0   :  { %s17389_s0 = inlined_call_operand.hbm [shape: f32[2,8,8,32], index: 0, kind: input, shape index: {}]   ;;  %s17390_s1 = inlined_call_operand.vmem [shape: bf16[288,32], index: 1, kind: input, shape index: {}]   ;;  %s17391_s2 = inlined_call_operand.hbm [shape: f32[1,32], index: 2, kind: input, shape index: {}]   ;;  %s17392_s3 = inlined_call_operand.hbm [shape: f32[1,32], index: 3, kind: input, shape index: {}]   ;;  %s17393_s4 = inlined_call_operand.hbm [shape: bf16[32,32], index: 4, kind: input, shape index: {}]   ;;  %s17394_s5 = inlined_call_operand.hbm [shape: f32[1,32], index: 5, kind: input, shape index: {}]   ;;  %s17395_s6 = inlined_call_operand.hbm [shape: f32[1,32], index: 6, kind: input, shape index: {}]   ;;  %s17396_s7 = inlined_call_operand.hbm [shape: bf16[288,128], index: 7, kind: input, shape index: {}]   ;;  %s17397_s8 = inlined_call_operand.hbm [shape: f32[1,128], index: 8, kind: input, shape index: {}]   ;;  %s17398_s9 = inlined_call_operand.hbm [shape: f32[1,128], index: 9, kind: input, shape index: {}]   ;;  %s17399_s10 = inlined_call_operand.hbm [shape: bf16[1152,256], index: 10, kind: input, shape index: {}]   ;;  %s17400_s11 = inlined_call_operand.hbm [shape: f32[1,256], index: 11, kind: input, shape index: {}]   ;;  %s17401_s12 = inlined_call_operand.hbm [shape: f32[1,256], index: 12, kind: input, shape index: {}]   ;;  %s17402_s13 = inlined_call_operand.hbm [shape: bf16[2304,640], index: 13, kind: input, shape index: {}]   ;;  %s17403_s14 = inlined_call_operand.hbm [shape: f32[1,640], index: 14, kind: input, shape index: {}]   ;;  %s17404_s15 = inlined_call_operand.vmem [shape: f32[2,64,640], index: 15, kind: output, shape index: {}]  }
   0x1   :  { %17446 = sst [smem:[#allocation54_spill]] %s17389_s0 }
   0x2   :  { %17447 = sst [smem:[#allocation55_spill]] %s17390_s1 }
   0x3   :  { %17448 = sst [smem:[#allocation56_spill]] %s17391_s2 }
   0x4   :  { %17449 = sst [smem:[#allocation57_spill]] %s17393_s4 }
   0x5   :  { %17450 = sst [smem:[#allocation58_spill]] %s17395_s6 }
   0x6   :  { %17451 = sst [smem:[#allocation59_spill]] %s17397_s8 }
   0x7   :  { %17452 = sst [smem:[#allocation60_spill]] %s17404_s15 }
   0x8   :  { %20 = vsyncpa [#allocation3], 0 }
   0x9   :  { %22 = vsyncpa [#allocation3 + $0x1], 0 }
   0xa   :  { %23 = vsyncpa [#allocation5], 0 }
   0xb   :  { %24 = vsyncpa [#allocation8], 0 }
   0xc   :  { %25 = vsyncpa [#allocation11], 0 }
   0xd   :  { %26 = vsyncpa [#allocation14], 0 }
   0xe   :  { %27 = vsyncpa [#allocation17], 0 }
   0xf   :  { %28 = vsyncpa [#allocation20], 0 }
  0x10   :  { %29 = vsyncpa [#allocation23], 0  ;;  %s15110_s18 = smov 0   ;;  %s15112_s19 = smov 0  }
  0x11   :  { %s15114_s20 = smov 0   ;;  %s15116_s21 = smov 0  }
  0x12 LB: > { %s15005_s22 = smov [#allocation4]   ;;  %s15131_s24 = sadd.s32 4294967295, %s15003_s21   ;;  %s15003_s21 = sphi %s15116_s21, %s17542_s21   ;;  %s14999_s20 = sphi %s15114_s20, %s17541_s20   ;;  %s14995_s19 = sphi %s15112_s19, %s17540_s19   ;;  %s14991_s18 = sphi %s15110_s18, %s17539_s18  }
  0x13   : > { %s402_s23 = sshll.u32 %s15005_s22, 4  ;;  %17453 = sst [smem:[#allocation32_spill]] %s15131_s24  ;;  %s403_s23 = int_to_ptr.vmem [resolvable:$true] %s402_s23 }
  0x14   : > { %p10647_p0 = scmp.ge.s32.totalorder %s15003_s21, 1  ;;  %p17407_p1 = scmp.eq.s32.totalorder %s15131_s24, 0 }
  0x15   : > { %p386_p2 = scmp.lt.s32.totalorder %s15003_s21, 3  ;;  %s15006_s26 = smov [#allocation7]  }
  0x16   : > { %s423_s27 = sshll.u32 %s15006_s26, 4  ;;  %s15007_s29 = smov [#allocation10]   ;;  %s15142_s27 = int_to_ptr.vmem [resolvable:$true] %s423_s27 }
  0x17   : > { %p15136_p3 = pnand %p10647_p0, %p386_p2  ;;  %s448_s30 = sshll.u32 %s15007_s29, 4  ;;  %s15150_s30 = int_to_ptr.vmem [resolvable:$true] %s448_s30 }
  0x18   : > { %s17457_s2 = sld [smem:[#allocation56_spill]] }
  0x19   : > { %s17454_s25 = scalar_select %p15136_p3, 1, 0 }
  0x1a   : > { %p12925_p4 = pneg %p15136_p3 }
  0x1b   : > { %17455 = sst [smem:[#allocation33_spill]] %s17454_s25 }
  0x1c   : > { %p15146_p5 = pnand %p12925_p4, %p17407_p1 }
  0x1e   : > { %s14547_s22 = scalar_lea.hbm %s17457_s2, 16  ;;  %p15160_p7 = pneg %p15146_p5 }
  0x1f   : > { %p14548_p6 = scmp.ne.s32.totalorder %s17457_s2, %s14547_s22  ;;  %p14554_p10 = scmp.lt.u32.totalorder %s14547_s22, %s17457_s2 }
  0x21   : > { %p14550_p8 = pnand %p15160_p7, %p14548_p6 }
  0x23   : > { %p14551_p9 = pneg %p14550_p8 }
  0x25   : > { %p14556_p11 = pnand %p14554_p10, %p14551_p9 }
  0x27   : > { %14559 = shalt.err (!%p14556_p11)
}
  0x28   : > { %s14560_s16 = scalar_lea.vmem %s403_s23, 16  ;;  %s14567_s1 = scalar_lea.vmem %s403_s23, 32 }
  0x29   : > { %p14561_p12 = scmp.ne.s32.totalorder %s403_s23, %s14560_s16  ;;  %p14568_p2 = scmp.lt.s32.totalorder %s403_s23, %s403_s23 }
  0x2a   : > { %p14569_p4 = scmp.lt.s32.totalorder %s14567_s1, %s14560_s16 }
  0x2b   : > { %p14563_p13 = pnand %p14561_p12, %p15160_p7 }
  0x2c   : > { %p14570_p1 = por %p14569_p4, %p14568_p2 }
  0x2d   : > { %p14564_p0 = pneg %p14563_p13 }
  0x2f   : > { %p14571_p3 = pnand %p14570_p1, %p14564_p0 }
  0x31   : > { %14574 = shalt.err (!%p14571_p3)
}
  0x32   : > { %12928 = dma.hbm_to_vmem [thread:$0]  (!%p15146_p5), %s17457_s2, 16, %s403_s23, [#allocation5]  }
  0x33   : > { %s17459_s4 = sld [smem:[#allocation57_spill]] }
  0x39   : > { %s14575_s29 = scalar_lea.hbm %s17459_s4, 256 }
  0x3a   : > { %p14576_p6 = scmp.ne.s32.totalorder %s17459_s4, %s14575_s29  ;;  %p14582_p1 = scmp.lt.u32.totalorder %s14575_s29, %s17459_s4 }
  0x3c   : > { %p14578_p8 = pnand %p14576_p6, %p15160_p7 }
  0x3e   : > { %p14579_p9 = pneg %p14578_p8 }
  0x40   : > { %p14584_p3 = pnand %p14582_p1, %p14579_p9 }
  0x42   : > { %14587 = shalt.err (!%p14584_p3)
}
  0x43   : > { %s14588_s23 = scalar_lea.vmem %s15142_s27, 256  ;;  %p14596_p13 = scmp.lt.s32.totalorder %s15142_s27, %s15142_s27 }
  0x44   : > { %p14589_p10 = scmp.ne.s32.totalorder %s15142_s27, %s14588_s23  ;;  %p14597_p0 = scmp.lt.s32.totalorder %s14588_s23, %s14588_s23 }
  0x46   : > { %p14591_p11 = pnand %p14589_p10, %p15160_p7  ;;  %p14598_p2 = por %p14597_p0, %p14596_p13 }
  0x48   : > { %p14592_p12 = pneg %p14591_p11 }
  0x4a   : > { %p14599_p4 = pnand %p14598_p2, %p14592_p12 }
  0x4c   : > { %14602 = shalt.err (!%p14599_p4)
}
  0x4d   : > { %s17412_s0 = smov 64   ;;  %s17413_s24 = smov 4  }
  0x4e   : > { %12934 = dma.hbm_to_vmem [thread:$0]  (!%p15146_p5), %s17459_s4, 256, %s15142_s27, [#allocation8], %s17412_s0, %s17412_s0, %s17413_s24  }
  0x4f   : > { %s17460_s6 = sld [smem:[#allocation58_spill]] }
  0x55   : > { %s14603_s29 = scalar_lea.hbm %s17460_s6, 16 }
  0x56   : > { %p14604_p6 = scmp.ne.s32.totalorder %s17460_s6, %s14603_s29  ;;  %p14610_p1 = scmp.lt.u32.totalorder %s14603_s29, %s17460_s6 }
  0x58   : > { %p14606_p8 = pnand %p14604_p6, %p15160_p7 }
  0x5a   : > { %p14607_p9 = pneg %p14606_p8 }
  0x5c   : > { %p14612_p3 = pnand %p14610_p1, %p14607_p9 }
  0x5e   : > { %14615 = shalt.err (!%p14612_p3)
}
  0x5f   : > { %s14616_s27 = scalar_lea.vmem %s15150_s30, 16  ;;  %s14623_s15 = scalar_lea.vmem %s15150_s30, 32 }
  0x60   : > { %p14617_p10 = scmp.ne.s32.totalorder %s15150_s30, %s14616_s27  ;;  %p14624_p13 = scmp.lt.s32.totalorder %s15150_s30, %s15150_s30 }
  0x61   : > { %p14625_p0 = scmp.lt.s32.totalorder %s14623_s15, %s14616_s27 }
  0x62   : > { %p14619_p11 = pnand %p14617_p10, %p15160_p7 }
  0x63   : > { %p14626_p2 = por %p14625_p0, %p14624_p13 }
  0x64   : > { %p14620_p12 = pneg %p14619_p11 }
  0x66   : > { %p14627_p4 = pnand %p14626_p2, %p14620_p12 }
  0x68   : > { %14630 = shalt.err (!%p14627_p4)
}
  0x69   : > { %12940 = dma.hbm_to_vmem [thread:$0]  (!%p15146_p5), %s17460_s6, 16, %s15150_s30, [#allocation11]  }
  0x6a   : > { %s15010_s25 = smov [#allocation13]   ;;  %s15011_s29 = smov [#allocation16]  }
  0x6b   : > { %s472_s22 = sshll.u32 %s15010_s25, 4  ;;  %s493_s16 = sshll.u32 %s15011_s29, 4  ;;  %s473_s22 = int_to_ptr.vmem [resolvable:$true] %s472_s22  ;;  %s494_s16 = int_to_ptr.vmem [resolvable:$true] %s493_s16 }
  0x6c   : > { %s17461_s8 = sld [smem:[#allocation59_spill]] }
  0x72   : > { %s14631_s27 = scalar_lea.hbm %s17461_s8, 16 }
  0x73   : > { %p14632_p6 = scmp.ne.s32.totalorder %s17461_s8, %s14631_s27  ;;  %p14638_p1 = scmp.lt.u32.totalorder %s14631_s27, %s17461_s8 }
  0x75   : > { %p14634_p8 = pnand %p14632_p6, %p15160_p7 }
  0x77   : > { %p14635_p9 = pneg %p14634_p8 }
  0x79   : > { %p14640_p3 = pnand %p14638_p1, %p14635_p9 }
  0x7b   : > { %14643 = shalt.err (!%p14640_p3)
}
  0x7c   : > { %s14644_s30 = scalar_lea.vmem %s473_s22, 16  ;;  %s14651_s17 = scalar_lea.vmem %s473_s22, 32 }
  0x7d   : > { %p14645_p10 = scmp.ne.s32.totalorder %s473_s22, %s14644_s30  ;;  %p14652_p13 = scmp.lt.s32.totalorder %s473_s22, %s473_s22 }
  0x7e   : > { %p14653_p0 = scmp.lt.s32.totalorder %s14651_s17, %s14644_s30 }
  0x7f   : > { %p14647_p11 = pnand %p14645_p10, %p15160_p7 }
  0x80   : > { %p14654_p2 = por %p14653_p0, %p14652_p13 }
  0x81   : > { %p14648_p12 = pneg %p14647_p11 }
  0x83   : > { %p14655_p4 = pnand %p14654_p2, %p14648_p12 }
  0x85   : > { %14658 = shalt.err (!%p14655_p4)
}
  0x86   : > { %12946 = dma.hbm_to_vmem [thread:$0]  (!%p15146_p5), %s17461_s8, 16, %s473_s22, [#allocation14]  }
  0x87   : > { %s14659_s1 = scalar_lea.hbm %s17399_s10, 18432 }
  0x88   : > { %p14660_p6 = scmp.ne.s32.totalorder %s17399_s10, %s14659_s1  ;;  %p14666_p1 = scmp.lt.u32.totalorder %s14659_s1, %s17399_s10 }
  0x8a   : > { %p14662_p8 = pnand %p14660_p6, %p15160_p7 }
  0x8c   : > { %p14663_p9 = pneg %p14662_p8 }
  0x8e   : > { %p14668_p3 = pnand %p14666_p1, %p14663_p9 }
  0x90   : > { %14671 = shalt.err (!%p14668_p3)
}
  0x91   : > { %s14672_s30 = scalar_lea.vmem %s494_s16, 18432  ;;  %p14680_p13 = scmp.lt.s32.totalorder %s494_s16, %s494_s16 }
  0x92   : > { %p14673_p10 = scmp.ne.s32.totalorder %s494_s16, %s14672_s30  ;;  %p14681_p0 = scmp.lt.s32.totalorder %s14672_s30, %s14672_s30 }
  0x94   : > { %p14675_p11 = pnand %p14673_p10, %p15160_p7  ;;  %p14682_p2 = por %p14681_p0, %p14680_p13 }
  0x96   : > { %p14676_p12 = pneg %p14675_p11 }
  0x98   : > { %p14683_p4 = pnand %p14682_p2, %p14676_p12 }
  0x9a   : > { %14686 = shalt.err (!%p14683_p4)
}
  0x9b   : > { %s17414_s22 = smov 128   ;;  %s15013_s17 = smov 8  }
  0x9c   : > { %12952 = dma.hbm_to_vmem [thread:$0]  (!%p15146_p5), %s17399_s10, 18432, %s494_s16, [#allocation17], %s17414_s22, %s17414_s22, %s15013_s17  }
  0x9d   : > { %s15014_s24 = smov [#allocation19]   ;;  %s15015_s1 = smov [#allocation6]  }
  0x9e   : > { %s518_s29 = sshll.u32 %s15014_s24, 4  ;;  %s413_s23 = sshll.u32 %s15015_s1, 4  ;;  %s519_s29 = int_to_ptr.vmem [resolvable:$true] %s518_s29  ;;  %s414_s23 = int_to_ptr.vmem [resolvable:$true] %s413_s23 }
  0x9f   : > { %s14687_s2 = scalar_lea.hbm %s17401_s12, 32 }
  0xa0   : > { %p14688_p6 = scmp.ne.s32.totalorder %s17401_s12, %s14687_s2  ;;  %p14694_p1 = scmp.lt.u32.totalorder %s14687_s2, %s17401_s12 }
  0xa2   : > { %p14690_p8 = pnand %p14688_p6, %p15160_p7 }
  0xa4   : > { %p14691_p9 = pneg %p14690_p8 }
  0xa6   : > { %p14696_p3 = pnand %p14694_p1, %p14691_p9 }
  0xa8   : > { %14699 = shalt.err (!%p14696_p3)
}
  0xa9   : > { %s14700_s16 = scalar_lea.vmem %s519_s29, 32  ;;  %p14708_p13 = scmp.lt.s32.totalorder %s519_s29, %s519_s29 }
  0xaa   : > { %p14701_p10 = scmp.ne.s32.totalorder %s519_s29, %s14700_s16  ;;  %p14709_p0 = scmp.lt.s32.totalorder %s14700_s16, %s14700_s16 }
  0xac   : > { %p14703_p11 = pnand %p14701_p10, %p15160_p7  ;;  %p14710_p2 = por %p14709_p0, %p14708_p13 }
  0xae   : > { %p14704_p12 = pneg %p14703_p11 }
  0xb0   : > { %p14711_p4 = pnand %p14710_p2, %p14704_p12 }
  0xb2   : > { %14714 = shalt.err (!%p14711_p4)
}
  0xb3   : > { %12958 = dma.hbm_to_vmem [thread:$0]  (!%p15146_p5), %s17401_s12, 32, %s519_s29, [#allocation20]  }
  0xb4   : > { %s14715_s25 = scalar_lea.hbm %s17392_s3, 16 }
  0xb5   : > { %p14716_p6 = scmp.ne.s32.totalorder %s17392_s3, %s14715_s25  ;;  %p14722_p1 = scmp.lt.u32.totalorder %s14715_s25, %s17392_s3 }
  0xb7   : > { %p14718_p8 = pnand %p14716_p6, %p15160_p7 }
  0xb9   : > { %p14719_p9 = pneg %p14718_p8 }
  0xbb   : > { %p14724_p3 = pnand %p14722_p1, %p14719_p9 }
  0xbd   : > { %14727 = shalt.err (!%p14724_p3)
}
  0xbe   : > { %s14728_s2 = scalar_lea.vmem %s414_s23, 16  ;;  %s14735_s29 = scalar_lea.vmem %s414_s23, 32 }
  0xbf   : > { %p14729_p10 = scmp.ne.s32.totalorder %s414_s23, %s14728_s2  ;;  %p14736_p13 = scmp.lt.s32.totalorder %s414_s23, %s414_s23 }
  0xc0   : > { %p14737_p0 = scmp.lt.s32.totalorder %s14735_s29, %s14728_s2 }
  0xc1   : > { %p14731_p11 = pnand %p14729_p10, %p15160_p7 }
  0xc2   : > { %p14738_p2 = por %p14737_p0, %p14736_p13 }
  0xc3   : > { %p14732_p12 = pneg %p14731_p11 }
  0xc5   : > { %p14739_p4 = pnand %p14738_p2, %p14732_p12 }
  0xc7   : > { %14742 = shalt.err (!%p14739_p4)
}
  0xc8   : > { %12931 = dma.hbm_to_vmem [thread:$0]  (!%p15146_p5), %s17392_s3, 16, %s414_s23, [#allocation5]  }
  0xc9   : > { %s15016_s4 = smov [#allocation9]   ;;  %s15017_s6 = smov [#allocation12]  }
  0xca   : > { %s437_s0 = sshll.u32 %s15016_s4, 4  ;;  %s458_s8 = sshll.u32 %s15017_s6, 4  ;;  %s438_s0 = int_to_ptr.vmem [resolvable:$true] %s437_s0  ;;  %s459_s8 = int_to_ptr.vmem [resolvable:$true] %s458_s8 }
  0xcb   : > { %s14743_s1 = scalar_lea.hbm %s17394_s5, 16 }
  0xcc   : > { %p14744_p6 = scmp.ne.s32.totalorder %s17394_s5, %s14743_s1  ;;  %p14750_p1 = scmp.lt.u32.totalorder %s14743_s1, %s17394_s5 }
  0xce   : > { %p14746_p8 = pnand %p14744_p6, %p15160_p7 }
  0xd0   : > { %p14747_p9 = pneg %p14746_p8 }
  0xd2   : > { %p14752_p3 = pnand %p14750_p1, %p14747_p9 }
  0xd4   : > { %14755 = shalt.err (!%p14752_p3)
}
  0xd5   : > { %s14756_s23 = scalar_lea.vmem %s438_s0, 16  ;;  %s14763_s30 = scalar_lea.vmem %s438_s0, 32 }
  0xd6   : > { %p14757_p10 = scmp.ne.s32.totalorder %s438_s0, %s14756_s23  ;;  %p14764_p13 = scmp.lt.s32.totalorder %s438_s0, %s438_s0 }
  0xd7   : > { %p14765_p0 = scmp.lt.s32.totalorder %s14763_s30, %s14756_s23 }
  0xd8   : > { %p14759_p11 = pnand %p14757_p10, %p15160_p7 }
  0xd9   : > { %p14766_p2 = por %p14765_p0, %p14764_p13 }
  0xda   : > { %p14760_p12 = pneg %p14759_p11 }
  0xdc   : > { %p14767_p4 = pnand %p14766_p2, %p14760_p12 }
  0xde   : > { %14770 = shalt.err (!%p14767_p4)
}
  0xdf   : > { %12937 = dma.hbm_to_vmem [thread:$0]  (!%p15146_p5), %s17394_s5, 16, %s438_s0, [#allocation8]  }
  0xe0   : > { %s14771_s24 = scalar_lea.hbm %s17396_s7, 2304 }
  0xe1   : > { %p14772_p6 = scmp.ne.s32.totalorder %s17396_s7, %s14771_s24  ;;  %p14778_p1 = scmp.lt.u32.totalorder %s14771_s24, %s17396_s7 }
  0xe3   : > { %p14774_p8 = pnand %p14772_p6, %p15160_p7 }
  0xe5   : > { %p14775_p9 = pneg %p14774_p8 }
  0xe7   : > { %p14780_p3 = pnand %p14778_p1, %p14775_p9 }
  0xe9   : > { %14783 = shalt.err (!%p14780_p3)
}
  0xea   : > { %s14784_s29 = scalar_lea.vmem %s459_s8, 2304  ;;  %p14792_p13 = scmp.lt.s32.totalorder %s459_s8, %s459_s8 }
  0xeb   : > { %p14785_p10 = scmp.ne.s32.totalorder %s459_s8, %s14784_s29  ;;  %p14793_p0 = scmp.lt.s32.totalorder %s14784_s29, %s14784_s29 }
  0xed   : > { %p14787_p11 = pnand %p14785_p10, %p15160_p7  ;;  %p14794_p2 = por %p14793_p0, %p14792_p13 }
  0xef   : > { %p14788_p12 = pneg %p14787_p11 }
  0xf1   : > { %p14795_p4 = pnand %p14794_p2, %p14788_p12 }
  0xf3   : > { %14798 = shalt.err (!%p14795_p4)
}
  0xf4   : > { %s17462_s0 = smov 4   ;;  %s17463_s23 = smov 64  }
  0xf5   : > { %12943 = dma.hbm_to_vmem [thread:$0]  (!%p15146_p5), %s17396_s7, 2304, %s459_s8, [#allocation11], %s17463_s23, %s17463_s23, %s17462_s0  }
  0xf6   : > { %s15018_s4 = smov [#allocation15]   ;;  %s15019_s25 = smov [#allocation18]  }
  0xf7   : > { %s483_s6 = sshll.u32 %s15018_s4, 4  ;;  %s507_s24 = sshll.u32 %s15019_s25, 4  ;;  %s484_s6 = int_to_ptr.vmem [resolvable:$true] %s483_s6  ;;  %s508_s24 = int_to_ptr.vmem [resolvable:$true] %s507_s24 }
  0xf8   : > { %s14799_s15 = scalar_lea.hbm %s17398_s9, 16 }
  0xf9   : > { %p14800_p6 = scmp.ne.s32.totalorder %s17398_s9, %s14799_s15  ;;  %p14806_p1 = scmp.lt.u32.totalorder %s14799_s15, %s17398_s9 }
  0xfb   : > { %p14802_p8 = pnand %p14800_p6, %p15160_p7 }
  0xfd   : > { %p14803_p9 = pneg %p14802_p8 }
  0xff   : > { %p14808_p3 = pnand %p14806_p1, %p14803_p9 }
 0x101   : > { %14811 = shalt.err (!%p14808_p3)
}
 0x102   : > { %s14812_s8 = scalar_lea.vmem %s484_s6, 16  ;;  %s14819_s0 = scalar_lea.vmem %s484_s6, 32 }
 0x103   : > { %p14813_p10 = scmp.ne.s32.totalorder %s484_s6, %s14812_s8  ;;  %p14820_p13 = scmp.lt.s32.totalorder %s484_s6, %s484_s6 }
 0x104   : > { %p14821_p0 = scmp.lt.s32.totalorder %s14819_s0, %s14812_s8 }
 0x105   : > { %p14815_p11 = pnand %p14813_p10, %p15160_p7 }
 0x106   : > { %p14822_p2 = por %p14821_p0, %p14820_p13 }
 0x107   : > { %p14816_p12 = pneg %p14815_p11 }
 0x109   : > { %p14823_p4 = pnand %p14822_p2, %p14816_p12 }
 0x10b   : > { %14826 = shalt.err (!%p14823_p4)
}
 0x10c   : > { %12949 = dma.hbm_to_vmem [thread:$0]  (!%p15146_p5), %s17398_s9, 16, %s484_s6, [#allocation14]  }
 0x10d   : > { %s14827_s25 = scalar_lea.hbm %s17400_s11, 32 }
 0x10e   : > { %p14828_p6 = scmp.ne.s32.totalorder %s17400_s11, %s14827_s25  ;;  %p14834_p1 = scmp.lt.u32.totalorder %s14827_s25, %s17400_s11 }
 0x110   : > { %p14830_p8 = pnand %p14828_p6, %p15160_p7 }
 0x112   : > { %p14831_p9 = pneg %p14830_p8 }
 0x114   : > { %p14836_p3 = pnand %p14834_p1, %p14831_p9 }
 0x116   : > { %14839 = shalt.err (!%p14836_p3)
}
 0x117   : > { %s14840_s29 = scalar_lea.vmem %s508_s24, 32  ;;  %p14848_p13 = scmp.lt.s32.totalorder %s508_s24, %s508_s24 }
 0x118   : > { %p14841_p10 = scmp.ne.s32.totalorder %s508_s24, %s14840_s29  ;;  %p14849_p0 = scmp.lt.s32.totalorder %s14840_s29, %s14840_s29 }
 0x11a   : > { %p14843_p11 = pnand %p14841_p10, %p15160_p7  ;;  %p14850_p2 = por %p14849_p0, %p14848_p13 }
 0x11c   : > { %p14844_p12 = pneg %p14843_p11 }
 0x11e   : > { %p14851_p4 = pnand %p14850_p2, %p14844_p12 }
 0x120   : > { %14854 = shalt.err (!%p14851_p4)
}
 0x121   : > { %12955 = dma.hbm_to_vmem [thread:$0]  (!%p15146_p5), %s17400_s11, 32, %s508_s24, [#allocation17]  }
 0x122   : > { %s15020_s8 = smov [#allocation21]   ;;  %s14855_s22 = scalar_lea.hbm %s17402_s13, 92160 }
 0x123   : > { %s528_s0 = sshll.u32 %s15020_s8, 4  ;;  %p14856_p6 = scmp.ne.s32.totalorder %s17402_s13, %s14855_s22  ;;  %s529_s0 = int_to_ptr.vmem [resolvable:$true] %s528_s0 }
 0x124   : > { %p14862_p1 = scmp.lt.u32.totalorder %s14855_s22, %s17402_s13 }
 0x125   : > { %p14858_p8 = pnand %p14856_p6, %p15160_p7 }
 0x127   : > { %p14859_p9 = pneg %p14858_p8 }
 0x129   : > { %p14864_p3 = pnand %p14862_p1, %p14859_p9 }
 0x12b   : > { %14867 = shalt.err (!%p14864_p3)
}
 0x12c   : > { %s14868_s24 = scalar_lea.vmem %s529_s0, 92160  ;;  %p14876_p13 = scmp.lt.s32.totalorder %s529_s0, %s529_s0 }
 0x12d   : > { %p14869_p10 = scmp.ne.s32.totalorder %s529_s0, %s14868_s24  ;;  %p14877_p0 = scmp.lt.s32.totalorder %s14868_s24, %s14868_s24 }
 0x12f   : > { %p14871_p11 = pnand %p14869_p10, %p15160_p7  ;;  %p14878_p2 = por %p14877_p0, %p14876_p13 }
 0x131   : > { %p14872_p12 = pneg %p14871_p11 }
 0x133   : > { %p14879_p4 = pnand %p14878_p2, %p14872_p12 }
 0x135   : > { %14882 = shalt.err (!%p14879_p4)
}
 0x136   : > { %s15021_s15 = smov 320   ;;  %s15022_s2 = smov 20  }
 0x137   : > { %12961 = dma.hbm_to_vmem [thread:$0]  (!%p15146_p5), %s17402_s13, 92160, %s529_s0, [#allocation20], %s15021_s15, %s15021_s15, %s15022_s2  }
 0x138   : > { %s15023_s30 = smov [#allocation22]   ;;  %s14883_s22 = scalar_lea.hbm %s17403_s14, 80 }
 0x139   : > { %s542_s8 = sshll.u32 %s15023_s30, 4  ;;  %p14884_p6 = scmp.ne.s32.totalorder %s17403_s14, %s14883_s22  ;;  %s543_s8 = int_to_ptr.vmem [resolvable:$true] %s542_s8 }
 0x13a   : > { %p14890_p1 = scmp.lt.u32.totalorder %s14883_s22, %s17403_s14 }
 0x13b   : > { %p14886_p8 = pnand %p14884_p6, %p15160_p7 }
 0x13d   : > { %p14887_p9 = pneg %p14886_p8 }
 0x13f   : > { %p14892_p3 = pnand %p14890_p1, %p14887_p9 }
 0x141   : > { %14895 = shalt.err (!%p14892_p3)
}
 0x142   : > { %s14896_s0 = scalar_lea.vmem %s543_s8, 80  ;;  %s14903_s24 = scalar_lea.vmem %s543_s8, 96 }
 0x143   : > { %p14897_p10 = scmp.ne.s32.totalorder %s543_s8, %s14896_s0  ;;  %p14904_p13 = scmp.lt.s32.totalorder %s543_s8, %s543_s8 }
 0x144   : > { %p14905_p0 = scmp.lt.s32.totalorder %s14903_s24, %s14896_s0 }
 0x145   : > { %p14899_p11 = pnand %p14897_p10, %p15160_p7 }
 0x146   : > { %p14906_p2 = por %p14905_p0, %p14904_p13 }
 0x147   : > { %p14900_p12 = pneg %p14899_p11 }
 0x149   : > { %p14907_p4 = pnand %p14906_p2, %p14900_p12 }
 0x14b   : > { %14910 = shalt.err (!%p14907_p4)
}
 0x14c   : > { %s17464_s26 = sld [smem:[#allocation32_spill]]  ;;  %s15413_s29 = sadd.s32 1, %s15003_s21  }
 0x14d   : > { %12964 = dma.hbm_to_vmem [thread:$0]  (!%p15146_p5), %s17403_s14, 80, %s543_s8, [#allocation23]  }
 0x14e   : > { %s39_s28 = ssub.s32 %s15003_s21, %s15413_s29  ;;  %s42_s6 = sadd.s32 1, %s14999_s20 }
 0x14f   : > { %p40_p7 = scmp.eq.s32.totalorder %s39_s28, 0  ;;  %p49_p6 = scmp.ne.s32.totalorder %s14999_s20, %s14995_s19 }
 0x150   : > { %p50_p8 = scmp.eq.s32.totalorder %s15003_s21, 0  ;;  %p55_p9 = scmp.ne.s32.totalorder %s14995_s19, %s14991_s18 }
 0x151   : > { %s15424_s30 = scalar_select %p40_p7, %s14999_s20, %s42_s6  }
 0x152   : > { %p51_p1 = por %p50_p8, %p49_p6  ;;  %p17465_p3 = scmp.eq.s32.totalorder %s17464_s26, 0 }
 0x153   : > { %p12982_p11 = scmp.lt.s32.totalorder %s15003_s21, 2  ;;  %s553_s16 = sand.u32 1, %s14999_s20  }
 0x154   : > { %p15428_p10 = por %p17465_p3, %p55_p9  ;;  %s10662_s8 = sshll.u32 %s553_s16, 6 }
 0x155   : > { %s12023_s22 = sshll.u32 %s15003_s21, 10  ;;  %s17467_s1 = sld [smem:[#allocation54_spill]] }
 0x156   : > { %s557_s18 = scalar_lea.vmem [#allocation2], %s10662_s8  ;;  %p15442_p5 = pnand %p12982_p11, %p51_p1 }
 0x157   : > { %s564_s0 = sshll.u32 %s557_s18, 4  ;;  %s15446_s21 = scalar_lea.sflag [#allocation3], %s553_s16  ;;  %s15440_s0 = int_to_ptr.vmem [resolvable:$true] %s564_s0 }
 0x158   : > { %p14913_p13 = pneg %p15442_p5 }
 0x15b   : > { %s15438_s27 = scalar_lea.hbm %s17467_s1, %s12023_s22  ;;  %s14916_s28 = scalar_lea.hbm %s17467_s1, 2048 }
 0x15c   : > { %s14911_s15 = scalar_lea.hbm %s15438_s27, 1024  ;;  %p14917_p4 = scmp.lt.u32.totalorder %s15438_s27, %s17467_s1 }
 0x15d   : > { %p14912_p12 = scmp.ne.s32.totalorder %s15438_s27, %s14911_s15  ;;  %p14918_p7 = scmp.lt.u32.totalorder %s14916_s28, %s14911_s15 }
 0x15e   : > { %p14920_p8 = scmp.lt.u32.totalorder %s14911_s15, %s15438_s27 }
 0x15f   : > { %p14914_p0 = pnand %p14913_p13, %p14912_p12  ;;  %p14919_p6 = por %p14918_p7, %p14917_p4 }
 0x161   : > { %p14915_p2 = pneg %p14914_p0  ;;  %p14921_p9 = por %p14920_p8, %p14919_p6 }
 0x163   : > { %p14922_p1 = pnand %p14921_p9, %p14915_p2 }
 0x165   : > { %14925 = shalt.err (!%p14922_p1)
}
 0x166   : > { %s14926_s16 = scalar_lea.vmem %s15440_s0, 1024  ;;  %s15024_s22 = smov [#allocation2]  }
 0x167   : > { %p14927_p3 = scmp.ne.s32.totalorder %s15440_s0, %s14926_s16  ;;  %s14931_s4 = sshll.u32 %s15024_s22, 4  ;;  %s14932_s4 = int_to_ptr.vmem [resolvable:$false] %s14931_s4 }
 0x168   : > { %s14933_s25 = scalar_lea.vmem %s14932_s4, 2048  ;;  %p14934_p0 = scmp.lt.s32.totalorder %s15440_s0, %s14932_s4 }
 0x169   : > { %p14929_p11 = pnand %p14927_p3, %p14913_p13  ;;  %p14935_p4 = scmp.lt.s32.totalorder %s14933_s25, %s14926_s16 }
 0x16b   : > { %p14930_p12 = pneg %p14929_p11  ;;  %p14936_p7 = por %p14935_p4, %p14934_p0 }
 0x16d   : > { %p14937_p6 = pnand %p14936_p7, %p14930_p12 }
 0x16f   : > { %14940 = shalt.err (!%p14937_p6)
}
 0x170   : > { %s17469_s18 = smov 128   ;;  %s17470_s15 = sld [smem:[#allocation33_spill]] }
 0x171   : > { %12968 = dma.hbm_to_vmem [thread:$0]  (!%p15442_p5), %s15438_s27, 1024, %s15440_s0, %s15446_s21, %s17469_s18, %s17469_s18, %s15013_s17  }
 0x176   : > { %p17471_p13 = scmp.ne.s32.totalorder %s17470_s15, 0 }
 0x178   : > { %576 = sbr.rel (%p17471_p13) target bundleno = 2883 (0xb43), region = 80 }
 0x17f   : > { %s578_s2 = sand.u32 1, %s14995_s19  }
 0x180   : > { %s10666_s26 = sshll.u32 %s578_s2, 6  ;;  %s579_s28 = scalar_lea.sflag [#allocation3], %s578_s2 }
 0x181   : > { %s15480_s6 = scalar_lea.vmem [#allocation2], %s10666_s26 }
 0x182   : > { %14958 = dma.done.wait (%p15428_p10), %s579_s28, 1024  }
 0x183   : > { %14960 = vsyncadd (%p15428_p10), %s579_s28, 4294966272  ;;  %s17472_s24 = sld [smem:[#allocation32_spill]] }
 0x189   : > { %p17473_p2 = scmp.eq.s32.totalorder %s17472_s24, 0 }
 0x18b   : > { %14962 = dma.done.wait (%p17473_p2), [#allocation5], 32   ;;  %p17474_p5 = pmov %p17473_p2 }
 0x18c   : > { %p17475_p8 = pmov %p17473_p2 }
 0x18d   : > { %14964 = vsyncadd (%p17474_p5), [#allocation5], 4294967264 }
 0x18e   : > { %14966 = dma.done.wait (%p17475_p8), [#allocation8], 272   ;;  %p17476_p9 = pmov %p17473_p2 }
 0x18f   : > { %p17477_p1 = pmov %p17473_p2 }
 0x190   : > { %14968 = vsyncadd (%p17476_p9), [#allocation8], 4294967024 }
 0x191   : > { %14970 = dma.done.wait (%p17477_p1), [#allocation11], 2320   ;;  %p17478_p3 = pmov %p17477_p1 }
 0x192   : > { %p17479_p10 = pmov %p17477_p1 }
 0x193   : > { %14972 = vsyncadd (%p17478_p3), [#allocation11], 4294964976 }
 0x194   : > { %14974 = dma.done.wait (%p17479_p10), [#allocation14], 32   ;;  %p17480_p11 = pmov %p17477_p1 }
 0x195   : > { %p17481_p12 = pmov %p17477_p1 }
 0x196   : > { %14976 = vsyncadd (%p17480_p11), [#allocation14], 4294967264 }
 0x197   : > { %14978 = dma.done.wait (%p17481_p12), [#allocation17], 18464   ;;  %p17482_p0 = pmov %p17477_p1 }
 0x199   : > { %14980 = vsyncadd (%p17482_p0), [#allocation17], 4294948832  ;;  %p17483_p4 = pmov %p17482_p0 }
 0x19a   : > { %p17484_p7 = pmov %p17482_p0 }
 0x19b   : > { %14982 = dma.done.wait (%p17483_p4), [#allocation20], 92192  }
 0x19c   : > { %14984 = vsyncadd (%p17484_p7), [#allocation20], 4294875104  ;;  %p17485_p6 = pmov %p17482_p0 }
 0x19d   : > { %p17486_p13 = pmov %p17482_p0 }
 0x19e   : > { %14986 = dma.done.wait (%p17485_p6), [#allocation23], 80  }
 0x19f   : > { %14988 = vsyncadd (%p17486_p13), [#allocation23], 4294967216  ;;  %v15025_v0 = vmov 0.0   ;;  %vm730_vm0 = vcmask 1040384   ;;  %v690_v6 = vld [vmem:[%s15480_s6 + $0x18] sm:$0xff]  ;;  %v691_v7 = vld [vmem:[%s15480_s6 + $0x20] sm:$0xff] }
 0x1a0   : > { %v15514_v1 = vrot.slane %v15025_v0, 7  ;;  %v688_v8 = vld [vmem:[%s15480_s6 + $0x8] sm:$0xff]  ;;  %vm790_vm1 = vcmask 1045504   ;;  %vm765_vm2 = vcmask 1046528   ;;  %v698_v10 = vmax.f32 %v690_v6, 0.0  ;;  %v689_v12 = vld [vmem:[%s15480_s6 + $0x10] sm:$0xff]  ;;  %vm10881_vm6 = vmneg %vm730_vm0 }
 0x1a1   : > { %v699_v11 = vmax.f32 %v691_v7, 0.0  ;;  %v696_v13 = vmax.f32 %v688_v8, 0.0  ;;  %v687_v14 = vld [vmem:[%s15480_s6] sm:$0xff]  ;;  %v692_v15 = vld [vmem:[%s15480_s6 + $0x28] sm:$0xff]  ;;  %v697_v16 = vmax.f32 %v689_v12, 0.0  ;;  %v15531_v20 = vld [vmem:[%s15480_s6 + $0x30] sm:$0xff] }
 0x1a2   : > { %17487 = vst [vmem:[#allocation34_spill] sm:$0xff] %v15514_v1  ;;  %v15518_v2 = vsel %vm730_vm0, 0.0, %v15514_v1  ;;  %v740_v3 = vsel %vm730_vm0, %v15514_v1, 0.0  ;;  %v695_v17 = vmax.f32 %v687_v14, 0.0  ;;  %v700_v19 = vmax.f32 %v692_v15, 0.0  ;;  %s17488_s27 = sld [smem:[#allocation55_spill]]  ;;  %vm16128_vm7 = vmpackc.low %vm10881_vm6, %vm10881_vm6 }
 0x1a3   : > { %v791_v4 = vrot.slane %v15518_v2, 2  ;;  %v792_v5 = vrot.slane %v740_v3, 2  ;;  %v766_v9 = vrot.slane %v15518_v2, 1  ;;  %v767_v18 = vrot.slane %v740_v3, 1  ;;  %s15026_s8 = smov 64   ;;  %v694_v57 = vld [vmem:[%s15480_s6 + $0x38] sm:$0xff] }
 0x1a4   : > { %v716_v22 = vrot.slane %v698_v10, 7  ;;  %v717_v23 = vrot.slane %v699_v11, 7  ;;  %v714_v24 = vrot.slane %v696_v13, 7  ;;  %v715_v26 = vrot.slane %v697_v16, 7  ;;  %s15027_s23 = smov 96   ;;  %s15028_s0 = smov 32  }
 0x1a5   : > { %v15537_v25 = vsel %vm790_vm1, %v791_v4, %v792_v5  ;;  %v713_v27 = vrot.slane %v695_v17, 7  ;;  %v15539_v28 = vrot.slane %v700_v19, 7  ;;  %v701_v29 = vmax.f32 %v15531_v20, 0.0  ;;  %p681_p2 = scmp.lt.s32.totalorder %s17472_s24, 1 }
 0x1a6   : > { %v15543_v30 = vsel %vm730_vm0, 0.0, %v716_v22  ;;  %v15546_v31 = vsel %vm730_vm0, 0.0, %v717_v23  ;;  %v15549_v32 = vsel %vm730_vm0, 0.0, %v714_v24  ;;  %v742_v33 = vsel %vm730_vm0, %v714_v24, 0.0 }
 0x1a7   : > { %v13062_v34 = vpack.i.bf16 %v15546_v31, %v15543_v30  ;;  %v15555_v35 = vsel %vm730_vm0, 0.0, %v715_v26  ;;  %v15558_v36 = vsel %vm730_vm0, 0.0, %v713_v27  ;;  %v741_v37 = vsel %vm730_vm0, %v713_v27, 0.0  ;;  %s17544_s24 = smov (!%p681_p2, %s17472_s24), 1 }
 0x1a8   : > { %v13277_v21 = vld [vmem:[%s17488_s27 + $0x40] sm:$0xff]   ;;  %v13052_v39 = vpack.i.bf16 %v15555_v35, %v15549_v32  ;;  %v13057_v40 = vpack.i.bf16 %v15549_v32, %v15558_v36  ;;  %v794_v41 = vrot.slane %v15558_v36, 2  ;;  %v795_v42 = vrot.slane %v741_v37, 2  ;;  %v13279_v47 = vld [vmem:[%s17488_s27 + $0x48] sm:$0xff]   ;;  %v13281_v58 = vld [vmem:[%s17488_s27 + $0x50] sm:$0xff]  }
 0x1a9   : > { %12024 = vmatprep.subr.bf16.mxu0 %v13277_v21  ;;  %v13278_v38 = vld [vmem:[%s17488_s27] sm:$0xff]   ;;  %13063 = vrot.lane.b32.xlu0 %v13062_v34, %s15026_s8  ;;  %v797_v43 = vrot.slane %v15549_v32, 2  ;;  %v798_v44 = vrot.slane %v742_v33, 2  ;;  %v769_v45 = vrot.slane %v15558_v36, 1  ;;  %v770_v46 = vrot.slane %v741_v37, 1  ;;  %v13280_v48 = vld [vmem:[%s17488_s27 + $0x8] sm:$0xff]  }
 0x1aa   : > { %12025 = vmatpush3.bf16.msra.mxu0 %v13278_v38  ;;  %13053 = vrot.lane.b32.xlu1 %v13052_v39, %s15026_s8  ;;  %v796_v49 = vsel %vm790_vm1, %v794_v41, %v795_v42  ;;  %v743_v50 = vsel %vm730_vm0, %v715_v26, 0.0  ;;  %v772_v51 = vrot.slane %v15549_v32, 1  ;;  %v773_v52 = vrot.slane %v742_v33, 1  ;;  %v13282_v61 = vld [vmem:[%s17488_s27 + $0x10] sm:$0xff]   ;;  %v13283_v4 = vld [vmem:[%s17488_s27 + $0x58] sm:$0xff]   ;;  %v13285_v26 = vld [vmem:[%s17488_s27 + $0x60] sm:$0xff]  }
 0x1ab   : > { %v15583_v53 = vsel %vm790_vm1, %v797_v43, %v798_v44  ;;  %v15586_v54 = vsel %vm765_vm2, %v766_v9, %v767_v18  ;;  %v15589_v55 = vsel %vm765_vm2, %v769_v45, %v770_v46  ;;  %v775_v56 = vrot.slane %v15555_v35, 1  ;;  %12026 = vmatprep.subr.bf16.mxu0 %v13279_v47  ;;  %v13284_v15 = vld [vmem:[%s17488_s27 + $0x18] sm:$0xff]   ;;  %v13287_v44 = vld [vmem:[%s17488_s27 + $0x68] sm:$0xff]  }
 0x1ac   : > { %v13067_v59 = vpack.i.bf16 %v15583_v53, %v796_v49  ;;  %v776_v60 = vrot.slane %v743_v50, 1  ;;  %v13077_v62 = vpack.i.bf16 %v796_v49, %v15537_v25  ;;  %v800_v63 = vrot.slane %v15555_v35, 2  ;;  %v13288_v46 = vld [vmem:[%s17488_s27 + $0x28] sm:$0xff]  }
 0x1ad   : > { %v801_v0 = vrot.slane %v743_v50, 2  ;;  %v744_v3 = vsel %vm730_vm0, %v716_v22, 0.0  ;;  %v13072_v5 = vpack.i.bf16 %v15589_v55, %v15586_v54  ;;  %v15611_v6 = vsel %vm765_vm2, %v772_v51, %v773_v52  ;;  %v13289_v50 = vld [vmem:[%s17488_s27 + $0x70] sm:$0xff]   ;;  %v13291_v51 = vld [vmem:[%s17488_s27 + $0x80] sm:$0xff]  }
 0x1ae   : > { %12027 = vmatpush3.bf16.msra.mxu0 %v13280_v48  ;;  %13058 = vrot.lane.b32.xlu1 %v13057_v40, %s15027_s23  ;;  %v15614_v7 = vsel %vm765_vm2, %v775_v56, %v776_v60  ;;  %v803_v8 = vrot.slane %v15543_v30, 2  ;;  %v804_v9 = vrot.slane %v744_v3, 2  ;;  %v745_v10 = vsel %vm730_vm0, %v717_v23, 0.0  ;;  %v13290_v60 = vld [vmem:[%s17488_s27 + $0x30] sm:$0xff]  }
 0x1af   : > { %13068 = vrot.lane.b32.xlu0 %v13067_v59, %s15028_s0  ;;  %12028 = vmatprep.subr.bf16.mxu0 %v13281_v58  ;;  %v702_v11 = vmax.f32 %v694_v57, 0.0  ;;  %v13092_v12 = vpack.i.bf16 %v15614_v7, %v15611_v6  ;;  %v802_v13 = vsel %vm790_vm1, %v800_v63, %v801_v0  ;;  %v15623_v14 = vsel %vm730_vm0, 0.0, %v15539_v28  ;;  %v13292_v0 = vld [vmem:[%s17488_s27 + $0x78] sm:$0xff]  }
 0x1b0   : > { %v778_v16 = vrot.slane %v15543_v30, 1  ;;  %v779_v17 = vrot.slane %v744_v3, 1  ;;  %v781_v18 = vrot.slane %v15546_v31, 1  ;;  %v782_v19 = vrot.slane %v745_v10, 1  ;;  %12482 = vmatprep.subr.bf16.mxu1 %v13291_v51  ;;  %v13294_v3 = vld [vmem:[%s17488_s27 + $0x88] sm:$0xff]  }
 0x1b1   : > { %v15633_v21 = vsel %vm790_vm1, %v803_v8, %v804_v9  ;;  %v15637_v22 = vsel %vm730_vm0, %v15539_v28, 0.0  ;;  %v806_v23 = vrot.slane %v15546_v31, 2  ;;  %v719_v24 = vrot.slane %v701_v29, 7  ;;  %v13286_v28 = vld [vmem:[%s17488_s27 + $0x20] sm:$0xff]   ;;  %12483 = vmatpush3.bf16.msra.mxu1 %v13291_v51 }
 0x1b2   : > { %12029 = vmatpush3.bf16.msra.mxu0 %v13282_v61  ;;  %13078 = vrot.lane.b32.xlu1 %v13077_v62, %s15026_s8  ;;  %v807_v27 = vrot.slane %v745_v10, 2  ;;  %v809_v33 = vrot.slane %v15623_v14, 2  ;;  %v13097_v34 = vpack.i.bf16 %v802_v13, %v15583_v53  ;;  %v13087_v20 = vpack.i.bf16 %v15633_v21, %v802_v13 }
 0x1b3   : > { %13073 = vrot.lane.b32.xlu0 %v13072_v5, %s15028_s0  ;;  %12030 = vmatprep.subr.bf16.mxu0 %v13283_v4  ;;  %v15648_v37 = vsel %vm730_vm0, 0.0, %v719_v24  ;;  %v15657_v29 = vsel %vm765_vm2, %v778_v16, %v779_v17  ;;  %v810_v38 = vrot.slane %v15637_v22, 2  ;;  %v747_v39 = vsel %vm730_vm0, %v719_v24, 0.0  ;;  %v13293_v5 = vld [vmem:[%s17488_s27 + $0x38] sm:$0xff]  }
 0x1b4   : > { %v15662_v40 = vsel %vm765_vm2, %v781_v18, %v782_v19  ;;  %v784_v41 = vrot.slane %v15623_v14, 1  ;;  %v785_v42 = vrot.slane %v15637_v22, 1  ;;  %v720_v43 = vrot.slane %v702_v11, 7  ;;  %12484 = vmatprep.subr.bf16.mxu1 %v13294_v3 }
 0x1b5   : > { %v787_v45 = vrot.slane %v15648_v37, 1  ;;  %v1036_v47 = vpack.c.bf16 %v802_v13, %v15583_v53  ;;  %v788_v48 = vrot.slane %v747_v39, 1  ;;  %v13107_v52 = vpack.i.bf16 %v15543_v30, %v15555_v35  ;;  %12485 = vmatpush3.bf16.msra.mxu1 %v13294_v3 }
 0x1b6   : > { %12031 = vmatpush3.bf16.msra.mxu0 %v13284_v15  ;;  %13093 = vrot.lane.b32.xlu1 %v13092_v12, %s15028_s0  ;;  %v15675_v49 = vsel %vm730_vm0, 0.0, %v720_v43  ;;  %v13102_v53 = vpack.i.bf16 %v15662_v40, %v15657_v29  ;;  %v748_v56 = vsel %vm730_vm0, %v720_v43, 0.0  ;;  %v812_v57 = vrot.slane %v15648_v37, 2 }
 0x1b7   : > { %13083 = vrot.lane.b32.xlu0 %v13092_v12, %s15027_s23  ;;  %12032 = vmatprep.subr.bf16.mxu0 %v13285_v26  ;;  %v808_v58 = vsel %vm790_vm1, %v806_v23, %v807_v27  ;;  %v811_v59 = vsel %vm790_vm1, %v809_v33, %v810_v38  ;;  %vm983_vm3 = vcmask 261120   ;;  %v813_v61 = vrot.slane %v747_v39, 2 }
 0x1b8   : > { %v828_v62 = vrot.slane %v15675_v49, 2  ;;  %12486 = vmatprep.mubr.msk.bf16.mxu1 %vm983_vm3, %v1036_v47  ;;  %v829_v63 = vrot.slane %v748_v56, 2  ;;  %v13112_v4 = vpack.i.bf16 %v811_v59, %v808_v58  ;;  %v1039_v8 = vpack.c.bf16 %v808_v58, %v15633_v21 }
 0x1b9   : > { %v13122_v9 = vpack.i.bf16 %v15648_v37, %v15623_v14  ;;  %v13127_v10 = vpack.i.bf16 %v808_v58, %v15633_v21  ;;  %v15716_v11 = vsel %vm765_vm2, %v784_v41, %v785_v42  ;;  %v15719_v12 = vsel %vm765_vm2, %v787_v45, %v788_v48 }
 0x1ba   : > { %12033 = vmatpush3.bf16.msra.mxu0 %v13286_v28  ;;  %13098 = vrot.lane.b32.xlu1 %v13097_v34, %s15026_s8  ;;  %v13132_v13 = vpack.i.bf16 %v15719_v12, %v15716_v11  ;;  %v13137_v15 = vpack.i.bf16 %v15623_v14, %v15546_v31  ;;  %v814_v16 = vsel %vm790_vm1, %v812_v57, %v813_v61  ;;  %v817_v22 = vrot.slane %v15675_v49, 1 }
 0x1bb   : > { %13088 = vrot.lane.b32.xlu0 %v13087_v20, %s15028_s0  ;;  %12034 = vmatprep.subr.bf16.mxu0 %v13287_v44  ;;  %v830_v17 = vsel %vm790_vm1, %v828_v62, %v829_v63  ;;  %v1042_v19 = vpack.c.bf16 %v814_v16, %v811_v59  ;;  %v818_v23 = vrot.slane %v748_v56, 1  ;;  %v13152_v24 = vpack.i.bf16 %v15518_v2, %v15675_v49 }
 0x1bc   : > { %12487 = vmatmul.mubr.msk.bf16.vlgmr.msra.gmra.mrb[0].mxu1 %vm983_vm3, %v1039_v8  ;;  %v1045_v18 = vpack.c.bf16 %v15537_v25, %v830_v17  ;;  %v13142_v21 = vpack.i.bf16 %v830_v17, %v814_v16  ;;  %v13157_v26 = vpack.i.bf16 %v814_v16, %v811_v59  ;;  %v13167_v34 = vpack.i.bf16 %v15675_v49, %v15648_v37 }
 0x1bd   : > { %12490 = vmatprep.mubr.msk.bf16.mxu1 %vm983_vm3, %v1042_v19  ;;  %v15741_v27 = vsel %vm765_vm2, %v817_v22, %v818_v23  ;;  %vm992_vm4 = vcmask 523264   ;;  %vm1001_vm5 = vcmask 785408  }
 0x1be   : > { %12035 = vmatpush3.bf16.msra.mxu0 %v13288_v46  ;;  %13108 = vrot.lane.b32.xlu1 %v13107_v52, %s15027_s23  ;;  %v13162_v33 = vpack.i.bf16 %v15586_v54, %v15741_v27 }
 0x1bf   : > { %13103 = vrot.lane.b32.xlu0 %v13102_v53, %s15027_s23  ;;  %12036 = vmatprep.subr.bf16.mxu0 %v13289_v50 }
 0x1c2   : > { %12037 = vmatpush3.bf16.msra.mxu0 %v13290_v60  ;;  %13118 = vrot.lane.b32.xlu1 %v13102_v53, %s15028_s0 }
 0x1c3   : > { %13113 = vrot.lane.b32.xlu0 %v13112_v4, %s15028_s0  ;;  %12038 = vmatprep.subr.bf16.mxu0 %v13292_v0 }
 0x1c4   : > { %12491 = vmatmul.mubr.msk.bf16.gmra.mrb[4].mxu1 %vm983_vm3, %v1045_v18 }
 0x1c6   : > { %12039 = vmatpush3.bf16.msra.mxu0 %v13293_v5  ;;  %13128 = vrot.lane.b32.xlu1 %v13127_v10, %s15026_s8 }
 0x1c7   : > { %13123 = vrot.lane.b32.xlu0 %v13122_v9, %s15026_s8 }
 0x1ca   : > { %13138 = vrot.lane.b32.xlu1 %v13137_v15, %s15027_s23 }
 0x1cb   : > { %13133 = vrot.lane.b32.xlu0 %v13132_v13, %s15027_s23 }
 0x1ce   : > { %13148 = vrot.lane.b32.xlu1 %v13132_v13, %s15028_s0 }
 0x1cf   : > { %13143 = vrot.lane.b32.xlu0 %v13142_v21, %s15028_s0 }
 0x1d2   : > { %13158 = vrot.lane.b32.xlu1 %v13157_v26, %s15026_s8 }
 0x1d3   : > { %13153 = vrot.lane.b32.xlu0 %v13152_v24, %s15026_s8 }
 0x1d6   : > { %13168 = vrot.lane.b32.xlu1 %v13167_v34, %s15027_s23 }
 0x1d7   : > { %13163 = vrot.lane.b32.xlu0 %v13162_v33, %s15027_s23 }
 0x21b   : > { %v15751_v28 = vpop.permute.xlu0 %13063 }
 0x21c   : > { %v13054_v20 = vpop.permute.xlu1 %13053  ;;  %v13066_v23 = vunpack.i.h.bf16 %v15751_v28  ;;  %v13065_v24 = vunpack.i.l.bf16 %v15751_v28 }
 0x21d   : > { %v13056_v50 = vunpack.i.h.bf16 %v13054_v20  ;;  %v13055_v51 = vunpack.i.l.bf16 %v13054_v20 }
 0x220   : > { %v13059_v38 = vpop.permute.xlu1 %13058 }
 0x221   : > { %v13069_v39 = vpop.permute.xlu0 %13068  ;;  %v13061_v57 = vunpack.i.h.bf16 %v13059_v38  ;;  %v13060_v58 = vunpack.i.l.bf16 %v13059_v38 }
 0x222   : > { %v13071_v41 = vunpack.i.h.bf16 %v13069_v39  ;;  %v13070_v42 = vunpack.i.l.bf16 %v13069_v39 }
 0x224   : > { %v13079_v43 = vpop.permute.xlu1 %13078  ;;  %v1010_v53 = vsel %vm983_vm3, %v15589_v55, %v13070_v42  ;;  %v1011_v56 = vsel %vm983_vm3, %v15611_v6, %v13071_v41 }
 0x225   : > { %v13074_v44 = vpop.permute.xlu0 %13073  ;;  %v13081_v45 = vunpack.i.h.bf16 %v13079_v43  ;;  %v13080_v46 = vunpack.i.l.bf16 %v13079_v43  ;;  %v1018_v0 = vsel %vm992_vm4, %v1010_v53, %v13055_v51 }
 0x226   : > { %v13076_v47 = vunpack.i.h.bf16 %v13074_v44  ;;  %v13075_v48 = vunpack.i.l.bf16 %v13074_v44 }
 0x228   : > { %v985_v49 = vsel %vm983_vm3, %v15558_v36, %v13076_v47  ;;  %v984_v52 = vsel %vm983_vm3, %v15518_v2, %v13075_v48  ;;  %v13094_v59 = vpop.permute.xlu1 %13093  ;;  %v1019_v2 = vsel %vm992_vm4, %v1011_v56, %v13056_v50 }
 0x229   : > { %v13084_v60 = vpop.permute.xlu0 %13083  ;;  %v15762_v61 = vsel %vm992_vm4, %v984_v52, %v13080_v46  ;;  %v994_v62 = vsel %vm992_vm4, %v985_v49, %v13081_v45  ;;  %v13096_v5 = vunpack.i.h.bf16 %v13094_v59  ;;  %v13095_v8 = vunpack.i.l.bf16 %v13094_v59 }
 0x22a   : > { %v13086_v63 = vunpack.i.h.bf16 %v13084_v60  ;;  %v13085_v36 = vunpack.i.l.bf16 %v13084_v60  ;;  %v1002_v55 = vsel %vm1001_vm5, %v15762_v61, %v13060_v58  ;;  %v1003_v6 = vsel %vm1001_vm5, %v994_v62, %v13061_v57 }
 0x22b   : > { %v1034_v17 = vpack.c.bf16 %v1003_v6, %v1002_v55  ;;  %v987_v26 = vsel %vm983_vm3, %v15555_v35, %v13096_v5  ;;  %v986_v33 = vsel %vm983_vm3, %v15549_v32, %v13095_v8 }
 0x22c   : > { %v1026_v3 = vsel %vm1001_vm5, %v1018_v0, %v13085_v36  ;;  %v1027_v4 = vsel %vm1001_vm5, %v1019_v2, %v13086_v63  ;;  %v13099_v9 = vpop.permute.xlu1 %13098 }
 0x22d   : > { %v13089_v10 = vpop.permute.xlu0 %13088  ;;  %v1035_v13 = vpack.c.bf16 %v1027_v4, %v1026_v3  ;;  %v13101_v18 = vunpack.i.h.bf16 %v13099_v9  ;;  %v13100_v19 = vunpack.i.l.bf16 %v13099_v9 }
 0x22e   : > { %v13091_v15 = vunpack.i.h.bf16 %v13089_v10  ;;  %v13090_v16 = vunpack.i.l.bf16 %v13089_v10 }
 0x22f   : > { %1234 = vmatprep.mubr.bf16.mxu0 %v1035_v13  ;;  %v995_v42 = vsel %vm992_vm4, %v986_v33, %v13100_v19 }
 0x230   : > { %v1013_v21 = vsel %vm983_vm3, %v15657_v29, %v13091_v15  ;;  %v1012_v22 = vsel %vm983_vm3, %v15614_v7, %v13090_v16  ;;  %1235 = vmatmul.mubr.bf16.vlgmr.msra.gmra.mrb[0].mxu0 %v1034_v17  ;;  %v13109_v34 = vpop.permute.xlu1 %13108  ;;  %v996_v7 = vsel %vm992_vm4, %v987_v26, %v13101_v18 }
 0x231   : > { %v13104_v20 = vpop.permute.xlu0 %13103  ;;  %v13111_v38 = vunpack.i.h.bf16 %v13109_v34  ;;  %v13110_v39 = vunpack.i.l.bf16 %v13109_v34  ;;  %v1020_v43 = vsel %vm992_vm4, %v1012_v22, %v13065_v24  ;;  %v1021_v28 = vsel %vm992_vm4, %v1013_v21, %v13066_v23 }
 0x232   : > { %v13106_v41 = vunpack.i.h.bf16 %v13104_v20  ;;  %v13105_v29 = vunpack.i.l.bf16 %v13104_v20 }
 0x233   : > { %v1004_v32 = vsel %vm1001_vm5, %v995_v42, %v13110_v39  ;;  %v1005_v45 = vsel %vm1001_vm5, %v996_v7, %v13111_v38 }
 0x234   : > { %v1028_v44 = vsel %vm1001_vm5, %v1020_v43, %v13105_v29  ;;  %v1029_v35 = vsel %vm1001_vm5, %v1021_v28, %v13106_v41  ;;  %v13119_v47 = vpop.permute.xlu1 %13118  ;;  %v1037_v50 = vpack.c.bf16 %v1005_v45, %v1004_v32 }
 0x235   : > { %v13114_v46 = vpop.permute.xlu0 %13113  ;;  %v1038_v48 = vpack.c.bf16 %v1029_v35, %v1028_v44  ;;  %v13121_v52 = vunpack.i.h.bf16 %v13119_v47  ;;  %v13120_v53 = vunpack.i.l.bf16 %v13119_v47 }
 0x236   : > { %v13116_v51 = vunpack.i.h.bf16 %v13114_v46  ;;  %v13115_v49 = vunpack.i.l.bf16 %v13114_v46 }
 0x237   : > { %1242 = vmatprep.mubr.bf16.mxu0 %v1038_v48  ;;  %v989_v58 = vsel %vm983_vm3, %v15546_v31, %v13121_v52  ;;  %v988_v59 = vsel %vm983_vm3, %v15543_v30, %v13120_v53  ;;  %v13295_v52 = vld [vmem:[#allocation7] sm:$0xff]  }
 0x238   : > { %1243 = vmatmul.mubr.bf16.gmra.mrb[4].mxu0 %v1037_v50  ;;  %v1015_v56 = vsel %vm983_vm3, %v15716_v11, %v13116_v51  ;;  %v1014_v57 = vsel %vm983_vm3, %v15662_v40, %v13115_v49  ;;  %v13129_v62 = vpop.permute.xlu1 %13128  ;;  %12494 = vmatprep.subr.bf16.mxu1 %v13295_v52 }
 0x239   : > { %v13124_v60 = vpop.permute.xlu0 %13123  ;;  %v13131_v0 = vunpack.i.h.bf16 %v13129_v62  ;;  %v13130_v2 = vunpack.i.l.bf16 %v13129_v62  ;;  %12495 = vmatpush3.bf16.msra.mxu1 %v13295_v52 }
 0x23a   : > { %v13126_v63 = vunpack.i.h.bf16 %v13124_v60  ;;  %v13125_v36 = vunpack.i.l.bf16 %v13124_v60 }
 0x23b   : > { %v997_v11 = vsel %vm992_vm4, %v988_v59, %v13130_v2  ;;  %v998_v40 = vsel %vm992_vm4, %v989_v58, %v13131_v0 }
 0x23c   : > { %v1022_v55 = vsel %vm992_vm4, %v1014_v57, %v13125_v36  ;;  %v1023_v6 = vsel %vm992_vm4, %v1015_v56, %v13126_v63  ;;  %v13139_v4 = vpop.permute.xlu1 %13138  ;;  %v13296_v56 = vld [vmem:[#allocation7 + $0x8] sm:$0xff]  }
 0x23d   : > { %v13134_v3 = vpop.permute.xlu0 %13133  ;;  %v13141_v8 = vunpack.i.h.bf16 %v13139_v4  ;;  %v13140_v30 = vunpack.i.l.bf16 %v13139_v4  ;;  %12496 = vmatprep.subr.bf16.mxu1 %v13296_v56 }
 0x23e   : > { %v13136_v31 = vunpack.i.h.bf16 %v13134_v3  ;;  %v13135_v5 = vunpack.i.l.bf16 %v13134_v3  ;;  %12497 = vmatpush3.bf16.msra.mxu1 %v13296_v56  ;;  %v10704_v3 = vld [vmem:[#allocation6] ss:$0 sm:$0xff] }
 0x23f   : > { %v1006_v13 = vsel %vm1001_vm5, %v997_v11, %v13140_v30  ;;  %v1007_v15 = vsel %vm1001_vm5, %v998_v40, %v13141_v8 }
 0x240   : > { %v1030_v9 = vsel %vm1001_vm5, %v1022_v55, %v13135_v5  ;;  %v1031_v10 = vsel %vm1001_vm5, %v1023_v6, %v13136_v31  ;;  %v13149_v17 = vpop.permute.xlu1 %13148  ;;  %v1040_v19 = vpack.c.bf16 %v1007_v15, %v1006_v13  ;;  %v10703_v55 = vld [vmem:[#allocation4] ss:$0 sm:$0xff] }
 0x241   : > { %v13144_v16 = vpop.permute.xlu0 %13143  ;;  %v1041_v18 = vpack.c.bf16 %v1031_v10, %v1030_v9  ;;  %v13151_v23 = vunpack.i.h.bf16 %v13149_v17  ;;  %v13150_v24 = vunpack.i.l.bf16 %v13149_v17 }
 0x242   : > { %v13146_v21 = vunpack.i.h.bf16 %v13144_v16  ;;  %v13145_v22 = vunpack.i.l.bf16 %v13144_v16 }
 0x243   : > { %1250 = vmatprep.mubr.bf16.mxu0 %v1041_v18  ;;  %v991_v34 = vsel %vm983_vm3, %v15648_v37, %v13151_v23  ;;  %v990_v20 = vsel %vm983_vm3, %v15623_v14, %v13150_v24 }
 0x244   : > { %1251 = vmatmul.mubr.bf16.gmra.mrb[8].mxu0 %v1040_v19  ;;  %v1017_v26 = vsel %vm983_vm3, %v15741_v27, %v13146_v21  ;;  %v1016_v33 = vsel %vm983_vm3, %v15719_v12, %v13145_v22  ;;  %v13159_v39 = vpop.permute.xlu1 %13158 }
 0x245   : > { %v15814_v38 = vpop.permute.xlu0 %13153  ;;  %v13161_v42 = vunpack.i.h.bf16 %v13159_v39  ;;  %v13160_v7 = vunpack.i.l.bf16 %v13159_v39 }
 0x246   : > { %v13156_v41 = vunpack.i.h.bf16 %v15814_v38  ;;  %v13155_v29 = vunpack.i.l.bf16 %v15814_v38  ;;  %v13347_v38 = vld [vmem:[#allocation16 + $0xa4] ss:$8 sps:$4 sm:$0xff]  }
 0x247   : > { %v999_v37 = vsel %vm992_vm4, %v990_v20, %v13160_v7  ;;  %v1000_v43 = vsel %vm992_vm4, %v991_v34, %v13161_v42 }
 0x248   : > { %v1024_v27 = vsel %vm992_vm4, %v1016_v33, %v13155_v29  ;;  %v1025_v12 = vsel %vm992_vm4, %v1017_v26, %v13156_v41  ;;  %v13169_v28 = vpop.permute.xlu1 %13168 }
 0x249   : > { %v15824_v14 = vpop.permute.xlu0 %13163  ;;  %v13171_v32 = vunpack.i.h.bf16 %v13169_v28  ;;  %v13170_v45 = vunpack.i.l.bf16 %v13169_v28 }
 0x24a   : > { %v13166_v44 = vunpack.i.h.bf16 %v15824_v14  ;;  %v13165_v35 = vunpack.i.l.bf16 %v15824_v14  ;;  %v13354_v14 = vld [vmem:[#allocation16 + $0xd0] ss:$8 sps:$4 sm:$0xff]  }
 0x24b   : > { %v1008_v48 = vsel %vm1001_vm5, %v999_v37, %v13170_v45  ;;  %v1009_v50 = vsel %vm1001_vm5, %v1000_v43, %v13171_v32 }
 0x24c   : > { %v1032_v46 = vsel %vm1001_vm5, %v1024_v27, %v13165_v35  ;;  %v1033_v47 = vsel %vm1001_vm5, %v1025_v12, %v13166_v44  ;;  %v1043_v49 = vpack.c.bf16 %v1009_v50, %v1008_v48 }
 0x24d   : > { %v1044_v51 = vpack.c.bf16 %v1033_v47, %v1032_v46 }
 0x24f   : > { %1258 = vmatprep.mubr.bf16.mxu0 %v1044_v51 }
 0x250   : > { %1259 = vmatmul.mubr.bf16.gmra.mrb[12].mxu0 %v1043_v49 }
 0x28f   : > { %v12488_v53 = vpop.f32.mrb[0].mxu1 }
 0x290   : > { %v1301_v57 = vpop.f32.mrb[1].mxu1 }
 0x291   : > { %v12489_v58 = vpop.f32.mrb[2].mxu1 }
 0x292   : > { %v1304_v59 = vpop.f32.mrb[3].mxu1 }
 0x297   : > { %v12492_v60 = vpop.f32.mrb[4].mxu1 }
 0x298   : > { %v1317_v62 = vpop.f32.mrb[5].mxu1 }
 0x299   : > { %v12493_v63 = vpop.f32.mrb[6].mxu1 }
 0x29a   : > { %v1320_v36 = vpop.f32.mrb[7].mxu1 }
 0x303   : > { %v12040_v0 = vpop.f32.mrb[0].mxu0 }
 0x304   : > { %v12041_v2 = vpop.f32.mrb[1].mxu0 }
 0x305   : > { %v12042_v6 = vadd.f32 %v12041_v2, %v12040_v0  ;;  %v12043_v11 = vpop.f32.mrb[2].mxu0 }
 0x306   : > { %v12044_v40 = vpop.f32.mrb[3].mxu0 }
 0x307   : > { %v12045_v4 = vadd.f32 %v12044_v40, %v12043_v11  ;;  %v1302_v31 = vadd.f32 %v12042_v6, %v1301_v57 }
 0x309   : > { %v1339_v5 = vmul.f32 %v10703_v55, %v1302_v31  ;;  %v1305_v8 = vadd.f32 %v12045_v4, %v1304_v59 }
 0x30b   : > { %v1354_v30 = vadd.f32 %v10704_v3, %v1339_v5  ;;  %v1340_v9 = vmul.f32 %v10703_v55, %v1305_v8  ;;  %v12046_v10 = vpop.f32.mrb[4].mxu0  ;;  %v13297_v8 = vld [vmem:[#allocation12 + $0x80] sm:$0xff]  }
 0x30c   : > { %v12047_v13 = vpop.f32.mrb[5].mxu0  ;;  %12506 = vmatprep.subr.bf16.mxu0 %v13297_v8 }
 0x30d   : > { %v1355_v15 = vadd.f32 %v10704_v3, %v1340_v9  ;;  %v12048_v16 = vadd.f32 %v12047_v13, %v12046_v10  ;;  %v12049_v17 = vpop.f32.mrb[6].mxu0  ;;  %v1362_v19 = vmax.f32 %v1354_v30, 0.0  ;;  %12507 = vmatpush3.bf16.msra.mxu0 %v13297_v8  ;;  %v13298_v30 = vld [vmem:[#allocation12 + $0x88] sm:$0xff]   ;;  %v13300_v9 = vld [vmem:[#allocation12] sm:$0xff]   ;;  %v13305_v13 = vld [vmem:[#allocation12 + $0x58] sm:$0xff]  }
 0x30e   : > { %v12050_v18 = vpop.f32.mrb[7].mxu0  ;;  %12508 = vmatprep.subr.bf16.mxu0 %v13298_v30  ;;  %v13301_v10 = vld [vmem:[#allocation12 + $0x48] sm:$0xff]  }
 0x30f   : > { %v1363_v21 = vmax.f32 %v1355_v15, 0.0  ;;  %v1310_v22 = vadd.f32 %v12488_v53, %v12048_v16  ;;  %v12051_v23 = vadd.f32 %v12050_v18, %v12049_v17  ;;  %v13306_v15 = vld [vmem:[#allocation12 + $0x18] sm:$0xff]   ;;  %v13307_v16 = vld [vmem:[#allocation12 + $0x60] sm:$0xff]  }
 0x310   : > { %v13308_v17 = vld [vmem:[#allocation12 + $0x20] sm:$0xff]   ;;  %v15838_v18 = vld [vmem:[#allocation9] ss:$0 sm:$0xff] }
 0x311   : > { %v1370_v24 = vpack.c.bf16 %v1363_v21, %v1362_v19  ;;  %v1341_v26 = vmul.f32 %v10703_v55, %v1310_v22  ;;  %v1313_v33 = vadd.f32 %v12489_v58, %v12051_v23  ;;  %12509 = vmatpush3.bf16.msra.mxu0 %v13298_v30  ;;  %v15840_v21 = vld [vmem:[#allocation10] ss:$0 sm:$0xff] }
 0x313   : > { %v1356_v34 = vadd.f32 %v10704_v3, %v1341_v26  ;;  %v1342_v20 = vmul.f32 %v10703_v55, %v1313_v33  ;;  %12498 = vmatprep.mubr.msk.bf16.mxu1 %vm983_vm3, %v1370_v24 }
 0x315   : > { %v1364_v39 = vmax.f32 %v1356_v34, 0.0  ;;  %v1357_v29 = vadd.f32 %v10704_v3, %v1342_v20 }
 0x317   : > { %v1365_v42 = vmax.f32 %v1357_v29, 0.0  ;;  %v12052_v7 = vpop.f32.mrb[8].mxu0 }
 0x318   : > { %v12053_v27 = vpop.f32.mrb[9].mxu0 }
 0x319   : > { %v1371_v12 = vpack.c.bf16 %v1365_v42, %v1364_v39  ;;  %v12054_v37 = vadd.f32 %v12053_v27, %v12052_v7  ;;  %v12055_v43 = vpop.f32.mrb[10].mxu0  ;;  %v14539_v42 = vld [vmem:[%s15480_s6 + $0x10] sm:$0xff] }
 0x31a   : > { %v12056_v28 = vpop.f32.mrb[11].mxu0 }
 0x31b   : > { %12499 = vmatmul.mubr.msk.bf16.vlgmr.msra.gmra.mrb[8].mxu1 %vm983_vm3, %v1371_v12  ;;  %v12057_v35 = vadd.f32 %v12056_v28, %v12055_v43  ;;  %v1318_v32 = vadd.f32 %v12054_v37, %v1317_v62  ;;  %v14540_v12 = vld [vmem:[%s15480_s6] sm:$0xff] }
 0x31d   : > { %v1343_v45 = vmul.f32 %v10703_v55, %v1318_v32  ;;  %v1321_v46 = vadd.f32 %v12057_v35, %v1320_v36  ;;  %v14541_v32 = vld [vmem:[%s15480_s6 + $0x18] sm:$0xff] }
 0x31f   : > { %v1358_v47 = vadd.f32 %v10704_v3, %v1343_v45  ;;  %v1344_v48 = vmul.f32 %v10703_v55, %v1321_v46  ;;  %v14542_v46 = vld [vmem:[%s15480_s6 + $0x8] sm:$0xff] }
 0x321   : > { %v1366_v50 = vmax.f32 %v1358_v47, 0.0  ;;  %v1359_v51 = vadd.f32 %v10704_v3, %v1344_v48  ;;  %v13309_v48 = vld [vmem:[#allocation12 + $0x68] sm:$0xff]  }
 0x323   : > { %v12058_v49 = vpop.f32.mrb[12].mxu0  ;;  %v1367_v52 = vmax.f32 %v1359_v51, 0.0 }
 0x324   : > { %v12059_v53 = vpop.f32.mrb[13].mxu0 }
 0x325   : > { %v1372_v56 = vpack.c.bf16 %v1367_v52, %v1366_v50  ;;  %v12060_v57 = vadd.f32 %v12059_v53, %v12058_v49  ;;  %v12061_v58 = vpop.f32.mrb[14].mxu0  ;;  %v13310_v50 = vld [vmem:[#allocation12 + $0x28] sm:$0xff]  }
 0x326   : > { %v12062_v59 = vpop.f32.mrb[15].mxu0 }
 0x327   : > { %v1326_v0 = vadd.f32 %v12492_v60, %v12060_v57  ;;  %v12063_v2 = vadd.f32 %v12062_v59, %v12061_v58  ;;  %12502 = vmatprep.mubr.msk.bf16.mxu1 %vm983_vm3, %v1372_v56  ;;  %v13299_v60 = vld [vmem:[#allocation12 + $0x40] sm:$0xff]  }
 0x328   : > { %12076 = vmatprep.subr.bf16.mxu1 %v13299_v60 }
 0x329   : > { %v1345_v6 = vmul.f32 %v10703_v55, %v1326_v0  ;;  %v1329_v11 = vadd.f32 %v12493_v63, %v12063_v2  ;;  %12077 = vmatpush3.bf16.msra.mxu1 %v13300_v9  ;;  %v13302_v63 = vld [vmem:[#allocation12 + $0x8] sm:$0xff]   ;;  %v13311_v2 = vld [vmem:[#allocation12 + $0x70] sm:$0xff]  }
 0x32a   : > { %12078 = vmatprep.subr.bf16.mxu1 %v13301_v10 }
 0x32b   : > { %v1360_v62 = vadd.f32 %v10704_v3, %v1345_v6  ;;  %v1346_v40 = vmul.f32 %v10703_v55, %v1329_v11  ;;  %v13303_v55 = vld [vmem:[#allocation12 + $0x50] sm:$0xff]  }
 0x32c   : > { %v13312_v6 = vld [vmem:[#allocation12 + $0x30] sm:$0xff]  }
 0x32d   : > { %v1368_v36 = vmax.f32 %v1360_v62, 0.0  ;;  %v1361_v4 = vadd.f32 %v10704_v3, %v1346_v40  ;;  %12079 = vmatpush3.bf16.msra.mxu1 %v13302_v63  ;;  %v13304_v3 = vld [vmem:[#allocation12 + $0x10] sm:$0xff]  }
 0x32e   : > { %12080 = vmatprep.subr.bf16.mxu1 %v13303_v55 }
 0x32f   : > { %v1369_v31 = vmax.f32 %v1361_v4, 0.0 }
 0x331   : > { %v1373_v5 = vpack.c.bf16 %v1369_v31, %v1368_v36  ;;  %12081 = vmatpush3.bf16.msra.mxu1 %v13304_v3 }
 0x332   : > { %12082 = vmatprep.subr.bf16.mxu1 %v13305_v13 }
 0x333   : > { %12503 = vmatmul.mubr.msk.bf16.gmra.mrb[12].mxu1 %vm983_vm3, %v1373_v5 }
 0x335   : > { %12083 = vmatpush3.bf16.msra.mxu1 %v13306_v15 }
 0x336   : > { %12084 = vmatprep.subr.bf16.mxu1 %v13307_v16  ;;  %v13313_v16 = vld [vmem:[#allocation12 + $0x78] sm:$0xff]  }
 0x339   : > { %12085 = vmatpush3.bf16.msra.mxu1 %v13308_v17  ;;  %v13314_v17 = vld [vmem:[#allocation12 + $0x38] sm:$0xff]  }
 0x33a   : > { %12086 = vmatprep.subr.bf16.mxu1 %v13309_v48 }
 0x33d   : > { %12087 = vmatpush3.bf16.msra.mxu1 %v13310_v50  ;;  %v14543_v50 = vld [vmem:[%s15480_s6 + $0x30] sm:$0xff] }
 0x33e   : > { %12088 = vmatprep.subr.bf16.mxu1 %v13311_v2  ;;  %v14545_v2 = vld [vmem:[%s15480_s6 + $0x38] sm:$0xff] }
 0x341   : > { %12089 = vmatpush3.bf16.msra.mxu1 %v13312_v6 }
 0x342   : > { %12090 = vmatprep.subr.bf16.mxu1 %v13313_v16 }
 0x345   : > { %12091 = vmatpush3.bf16.msra.mxu1 %v13314_v17 }
 0x3ee   : > { %v12500_v19 = vpop.f32.mrb[8].mxu1 }
 0x3ef   : > { %v1476_v22 = vmul.f32 %v12500_v19, %v15838_v18  ;;  %v1436_v23 = vpop.f32.mrb[9].mxu1 }
 0x3f0   : > { %v1474_v24 = vmul.f32 %v15838_v18, %v1436_v23  ;;  %v12501_v26 = vpop.f32.mrb[10].mxu1 }
 0x3f1   : > { %v1491_v33 = vadd.f32 %v15840_v21, %v1476_v22  ;;  %v1477_v34 = vmul.f32 %v12501_v26, %v15838_v18  ;;  %v1439_v20 = vpop.f32.mrb[11].mxu1 }
 0x3f2   : > { %v1489_v39 = vadd.f32 %v15840_v21, %v1474_v24  ;;  %v1475_v29 = vmul.f32 %v15838_v18, %v1439_v20 }
 0x3f3   : > { %v1499_v7 = vadd.f32 %v14539_v42, %v1491_v33  ;;  %v1492_v27 = vadd.f32 %v15840_v21, %v1477_v34 }
 0x3f4   : > { %v1497_v37 = vadd.f32 %v14540_v12, %v1489_v39  ;;  %v1490_v43 = vadd.f32 %v15840_v21, %v1475_v29 }
 0x3f5   : > { %v1515_v28 = vrot.slane %v1499_v7, 7  ;;  %v1500_v45 = vadd.f32 %v14541_v32, %v1492_v27 }
 0x3f6   : > { %v1513_v35 = vrot.slane %v1497_v37, 7  ;;  %v1498_v47 = vadd.f32 %v14542_v46, %v1490_v43 }
 0x3f7   : > { %v1539_v51 = vsel %vm730_vm0, %v1515_v28, 0.0  ;;  %v15856_v49 = vsel %vm730_vm0, 0.0, %v1515_v28  ;;  %v1516_v58 = vrot.slane %v1500_v45, 7 }
 0x3f8   : > { %v15859_v52 = vsel %vm730_vm0, 0.0, %v1513_v35  ;;  %v1537_v53 = vsel %vm730_vm0, %v1513_v35, 0.0  ;;  %v1587_v57 = vrot.slane %v1539_v51, 2  ;;  %v1514_v59 = vrot.slane %v1498_v47, 7 }
 0x3f9   : > { %v1560_v56 = vrot.slane %v1537_v53, 1  ;;  %v1559_v0 = vrot.slane %v15859_v52, 1  ;;  %v1581_v11 = vrot.slane %v1537_v53, 2  ;;  %v1586_v62 = vrot.slane %v15856_v49, 2 }
 0x3fa   : > { %v1580_v40 = vrot.slane %v15859_v52, 2  ;;  %v15866_v36 = vsel %vm730_vm0, 0.0, %v1514_v59  ;;  %v1538_v4 = vsel %vm730_vm0, %v1514_v59, 0.0  ;;  %v15876_v60 = vsel %vm730_vm0, 0.0, %v1516_v58 }
 0x3fb   : > { %v15870_v31 = vsel %vm765_vm2, %v1559_v0, %v1560_v56  ;;  %v1583_v5 = vrot.slane %v15866_v36, 2  ;;  %v1584_v8 = vrot.slane %v1538_v4, 2  ;;  %v13172_v30 = vpack.i.bf16 %v15856_v49, %v15866_v36 }
 0x3fc   : > { %v1563_v9 = vrot.slane %v1538_v4, 1  ;;  %v15879_v10 = vsel %vm790_vm1, %v1586_v62, %v1587_v57  ;;  %v1562_v63 = vrot.slane %v15866_v36, 1  ;;  %v15883_v55 = vsel %vm730_vm0, %v1516_v58, 0.0  ;;  %v14544_v57 = vld [vmem:[%s15480_s6 + $0x20] sm:$0xff] }
 0x3fd   : > { %13173 = vrot.lane.b32.xlu0 %v13172_v30, %s15026_s8  ;;  %v13177_v3 = vpack.i.bf16 %v15879_v10, %v15870_v31  ;;  %v15889_v13 = vsel %vm790_vm1, %v1583_v5, %v1584_v8  ;;  %v1582_v15 = vsel %vm790_vm1, %v1580_v40, %v1581_v11  ;;  %v1566_v19 = vrot.slane %v1539_v51, 1  ;;  %v14546_v40 = vld [vmem:[%s15480_s6 + $0x28] sm:$0xff]  ;;  %s12870_s6 = smul.u32 320, %s17544_s24 }
 0x3fe   : > { %v1804_v22 = vpack.c.bf16 %v15879_v10, %v15889_v13  ;;  %v13187_v23 = vpack.i.bf16 %v15889_v13, %v1582_v15  ;;  %v1565_v24 = vrot.slane %v15856_v49, 1  ;;  %v1590_v26 = vrot.slane %v15883_v55, 2 }
 0x3ff   : > { %13178 = vrot.lane.b32.xlu1 %v13177_v3, %s15028_s0  ;;  %v15900_v33 = vsel %vm765_vm2, %v1562_v63, %v1563_v9  ;;  %v1589_v34 = vrot.slane %v15876_v60, 2  ;;  %v13182_v20 = vpack.i.bf16 %v15876_v60, %v1582_v15  ;;  %v13197_v27 = vpack.i.bf16 %v15866_v36, %v15859_v52 }
 0x400   : > { %12510 = vmatprep.mubr.msk.bf16.mxu0 %vm983_vm3, %v1804_v22  ;;  %v15906_v39 = vsel %vm765_vm2, %v1565_v24, %v1566_v19  ;;  %v13202_v56 = vpack.i.bf16 %v15876_v60, %v15856_v49  ;;  %v1569_v30 = vrot.slane %v15883_v55, 1  ;;  %v1568_v16 = vrot.slane %v15876_v60, 1 }
 0x401   : > { %13188 = vrot.lane.b32.xlu0 %v13187_v23, %s15028_s0  ;;  %v13192_v29 = vpack.i.bf16 %v15906_v39, %v15900_v33  ;;  %v1591_v7 = vsel %vm790_vm1, %v1589_v34, %v1590_v26 }
 0x402   : > { %v13207_v45 = vpack.i.bf16 %v15900_v33, %v1591_v7 }
 0x403   : > { %13183 = vrot.lane.b32.xlu1 %v13182_v20, %s15026_s8 }
 0x405   : > { %13193 = vrot.lane.b32.xlu0 %v13192_v29, %s15027_s23 }
 0x406   : > { %v12504_v42 = vpop.f32.mrb[12].mxu1 }
 0x407   : > { %v1480_v12 = vmul.f32 %v12504_v42, %v15838_v18  ;;  %v1452_v37 = vpop.f32.mrb[13].mxu1  ;;  %13198 = vrot.lane.b32.xlu1 %v13197_v27, %s15027_s23 }
 0x408   : > { %v1478_v43 = vmul.f32 %v15838_v18, %v1452_v37  ;;  %v12505_v28 = vpop.f32.mrb[14].mxu1 }
 0x409   : > { %v1495_v35 = vadd.f32 %v15840_v21, %v1480_v12  ;;  %v1481_v32 = vmul.f32 %v12505_v28, %v15838_v18  ;;  %v1455_v46 = vpop.f32.mrb[15].mxu1  ;;  %13208 = vrot.lane.b32.xlu0 %v13207_v45, %s15028_s0  ;;  %v15969_v45 = vsel %vm765_vm2, %v1568_v16, %v1569_v30 }
 0x40a   : > { %v1493_v47 = vadd.f32 %v15840_v21, %v1478_v43  ;;  %v1479_v48 = vmul.f32 %v15838_v18, %v1455_v46 }
 0x40b   : > { %v1503_v51 = vadd.f32 %v14543_v50, %v1495_v35  ;;  %v1496_v53 = vadd.f32 %v15840_v21, %v1481_v32  ;;  %13203 = vrot.lane.b32.xlu1 %v13202_v56, %s15027_s23 }
 0x40c   : > { %v1501_v58 = vadd.f32 %v14544_v57, %v1493_v47  ;;  %v1494_v59 = vadd.f32 %v15840_v21, %v1479_v48 }
 0x40d   : > { %v1519_v0 = vrot.slane %v1503_v51, 7  ;;  %v1504_v6 = vadd.f32 %v14545_v2, %v1496_v53 }
 0x40e   : > { %v1517_v18 = vrot.slane %v1501_v58, 7  ;;  %v1502_v4 = vadd.f32 %v14546_v40, %v1494_v59 }
 0x40f   : > { %v1543_v11 = vsel %vm730_vm0, %v1519_v0, 0.0  ;;  %v1520_v62 = vrot.slane %v1504_v6, 7  ;;  %v15935_v5 = vsel %vm730_vm0, 0.0, %v1519_v0 }
 0x410   : > { %v15938_v8 = vsel %vm730_vm0, 0.0, %v1517_v18  ;;  %v1541_v21 = vsel %vm730_vm0, %v1517_v18, 0.0  ;;  %v1598_v63 = vrot.slane %v15935_v5, 2  ;;  %v1599_v3 = vrot.slane %v1543_v11, 2 }
 0x411   : > { %v1592_v9 = vrot.slane %v15938_v8, 2  ;;  %v1593_v15 = vrot.slane %v1541_v21, 2  ;;  %v1536_v17 = vsel %vm730_vm0, 0.0, %v1520_v62  ;;  %v1544_v19 = vsel %vm730_vm0, %v1520_v62, 0.0 }
 0x412   : > { %v1518_v22 = vrot.slane %v1502_v4, 7  ;;  %v13212_v23 = vpack.i.bf16 %v1591_v7, %v15935_v5  ;;  %v1572_v24 = vrot.slane %v1541_v21, 1  ;;  %v1614_v26 = vrot.slane %v1536_v17, 2 }
 0x413   : > { %v1594_v55 = vsel %vm790_vm1, %v1592_v9, %v1593_v15  ;;  %v1571_v34 = vrot.slane %v15938_v8, 1  ;;  %v1615_v20 = vrot.slane %v1544_v19, 2  ;;  %v1600_v28 = vsel %vm790_vm1, %v1598_v63, %v1599_v3  ;;  %v13317_v15 = vld [vmem:[#allocation16 + $0x4] ss:$8 sps:$4 sm:$0xff]  }
 0x414   : > { %v1807_v29 = vpack.c.bf16 %v1594_v55, %v1591_v7  ;;  %v15951_v42 = vsel %vm730_vm0, 0.0, %v1518_v22  ;;  %v1542_v27 = vsel %vm730_vm0, %v1518_v22, 0.0  ;;  %13213 = vrot.lane.b32.xlu0 %v13212_v23, %s15026_s8  ;;  %v13217_v35 = vpack.i.bf16 %v15889_v13, %v15938_v8  ;;  %3150 = vmatprep.subr.bf16.mxu1 %v13317_v15 }
 0x415   : > { %v1595_v12 = vrot.slane %v15951_v42, 2  ;;  %v1596_v37 = vrot.slane %v1542_v27, 2  ;;  %v13222_v43 = vpack.i.bf16 %v15951_v42, %v15879_v10  ;;  %v15964_v7 = vsel %vm765_vm2, %v1571_v34, %v1572_v24 }
 0x416   : > { %12511 = vmatmul.mubr.msk.bf16.vlgmr.msra.gmra.mrb[16].mxu0 %vm983_vm3, %v1807_v29  ;;  %v13227_v46 = vpack.i.bf16 %v1594_v55, %v15906_v39  ;;  %v1616_v47 = vsel %vm790_vm1, %v1614_v26, %v1615_v20  ;;  %v13247_v13 = vpack.i.bf16 %v1536_v17, %v1594_v55  ;;  %v13237_v50 = vpack.i.bf16 %v15964_v7, %v15969_v45 }
 0x417   : > { %13223 = vrot.lane.b32.xlu1 %v13222_v43, %s15026_s8  ;;  %v1597_v32 = vsel %vm790_vm1, %v1595_v12, %v1596_v37  ;;  %v1578_v51 = vrot.slane %v1543_v11, 1  ;;  %v1575_v53 = vrot.slane %v1542_v27, 1  ;;  %v1574_v56 = vrot.slane %v15951_v42, 1 }
 0x418   : > { %13218 = vrot.lane.b32.xlu0 %v13217_v35, %s15026_s8  ;;  %v1810_v10 = vpack.c.bf16 %v1600_v28, %v1597_v32  ;;  %v13267_v48 = vpack.i.bf16 %v1600_v28, %v1597_v32  ;;  %v1577_v57 = vrot.slane %v15935_v5, 1  ;;  %v1813_v58 = vpack.c.bf16 %v15537_v25, %v1616_v47 }
 0x419   : > { %v13232_v59 = vpack.i.bf16 %v15951_v42, %v15938_v8  ;;  %v13252_v0 = vpack.i.bf16 %v15969_v45, %v1597_v32  ;;  %v15987_v2 = vsel %vm765_vm2, %v1574_v56, %v1575_v53  ;;  %v13242_v18 = vpack.i.bf16 %v1600_v28, %v15964_v7  ;;  %v13323_v56 = vld [vmem:[#allocation16 + $0x24] ss:$8 sps:$4 sm:$0xff]  }
 0x41a   : > { %12514 = vmatprep.mubr.msk.bf16.mxu0 %vm983_vm3, %v1810_v10  ;;  %v15990_v6 = vsel %vm765_vm2, %v1577_v57, %v1578_v51  ;;  %v1604_v62 = vrot.slane %v1544_v19, 1  ;;  %v13262_v40 = vpack.i.bf16 %v15987_v2, %v1616_v47  ;;  %v1603_v4 = vrot.slane %v1536_v17, 1  ;;  %v13318_v51 = vld [vmem:[#allocation16 + $0x10] ss:$8 sps:$4 sm:$0xff]  }
 0x41b   : > { %13228 = vrot.lane.b32.xlu1 %v13227_v46, %s15028_s0  ;;  %v13257_v11 = vpack.i.bf16 %v15990_v6, %v15987_v2 }
 0x41c   : > { %13238 = vrot.lane.b32.xlu0 %v13237_v50, %s15027_s23  ;;  %v16002_v30 = vsel %vm765_vm2, %v1603_v4, %v1604_v62  ;;  %v13320_v50 = vld [vmem:[#allocation16 + $0x14] ss:$8 sps:$4 sm:$0xff]  }
 0x41d   : > { %v13272_v21 = vpack.i.bf16 %v15935_v5, %v16002_v30 }
 0x41e   : > { %12515 = vmatmul.mubr.msk.bf16.gmra.mrb[20].mxu0 %vm983_vm3, %v1813_v58  ;;  %v13321_v58 = vld [vmem:[#allocation16 + $0x20] ss:$8 sps:$4 sm:$0xff]  }
 0x41f   : > { %13233 = vrot.lane.b32.xlu1 %v13232_v59, %s15027_s23 }
 0x420   : > { %13253 = vrot.lane.b32.xlu0 %v13252_v0, %s15028_s0  ;;  %v13326_v0 = vld [vmem:[#allocation16 + $0x34] ss:$8 sps:$4 sm:$0xff]  }
 0x423   : > { %13243 = vrot.lane.b32.xlu1 %v13242_v18, %s15028_s0 }
 0x424   : > { %13258 = vrot.lane.b32.xlu0 %v13257_v11, %s15027_s23 }
 0x427   : > { %13248 = vrot.lane.b32.xlu1 %v13247_v13, %s15026_s8 }
 0x428   : > { %13263 = vrot.lane.b32.xlu0 %v13262_v40, %s15028_s0 }
 0x42b   : > { %1636 = vrot.lane.b32.xlu1 %v15990_v6, %s15028_s0 }
 0x42c   : > { %13268 = vrot.lane.b32.xlu0 %v13267_v48, %s15026_s8 }
 0x42f   : > { %13273 = vrot.lane.b32.xlu1 %v13272_v21, %s15027_s23 }
 0x430   : > { %1680 = vrot.lane.b32.xlu0 %v1536_v17, %s15027_s23  ;;  %s17535_s23 = sld [smem:[#allocation60_spill]] }
 0x436   : > { %s17234_s0 = scalar_lea.vmem %s17535_s23, %s12870_s6 }
 0x46f   : > { %v13174_v9 = vpop.permute.xlu0 %13173 }
 0x470   : > { %v13176_v55 = vunpack.i.h.bf16 %v13174_v9  ;;  %v13175_v34 = vunpack.i.l.bf16 %v13174_v9  ;;  %v13329_v9 = vld [vmem:[#allocation16 + $0x44] ss:$8 sps:$4 sm:$0xff]  }
 0x471   : > { %v13179_v63 = vpop.permute.xlu1 %13178 }
 0x472   : > { %v13180_v22 = vunpack.i.l.bf16 %v13179_v63  ;;  %v13181_v18 = vunpack.i.h.bf16 %v13179_v63 }
 0x473   : > { %v13189_v3 = vpop.permute.xlu0 %13188 }
 0x474   : > { %v13191_v16 = vunpack.i.h.bf16 %v13189_v3  ;;  %v13190_v19 = vunpack.i.l.bf16 %v13189_v3  ;;  %v1756_v12 = vsel %vm983_vm3, %v15859_v52, %v13180_v22  ;;  %v13315_v52 = vld [vmem:[#allocation16] ss:$8 sps:$4 sm:$0xff]  }
 0x475   : > { %v13184_v23 = vpop.permute.xlu1 %13183  ;;  %v13327_v22 = vld [vmem:[#allocation16 + $0x40] ss:$8 sps:$4 sm:$0xff]  }
 0x476   : > { %v1778_v24 = vsel %vm983_vm3, %v15870_v31, %v13190_v19  ;;  %v1779_v26 = vsel %vm983_vm3, %v15900_v33, %v13191_v16  ;;  %v13185_v20 = vunpack.i.l.bf16 %v13184_v23  ;;  %v13186_v62 = vunpack.i.h.bf16 %v13184_v23 }
 0x477   : > { %v13194_v29 = vpop.permute.xlu0 %13193  ;;  %v1786_v43 = vsel %vm992_vm4, %v1778_v24, %v13175_v34  ;;  %v1787_v28 = vsel %vm992_vm4, %v1779_v26, %v13176_v55  ;;  %v1780_v16 = vsel %vm983_vm3, %v15906_v39, %v13181_v18  ;;  %v13332_v34 = vld [vmem:[#allocation16 + $0x54] ss:$8 sps:$4 sm:$0xff]  }
 0x478   : > { %v13196_v17 = vunpack.i.h.bf16 %v13194_v29  ;;  %v13195_v27 = vunpack.i.l.bf16 %v13194_v29  ;;  %v1763_v10 = vsel %vm992_vm4, %v1756_v12, %v13185_v20  ;;  %v1788_v63 = vsel %vm992_vm4, %v1780_v16, %v13186_v62 }
 0x479   : > { %v13199_v37 = vpop.permute.xlu1 %13198 }
 0x47a   : > { %v13201_v35 = vunpack.i.h.bf16 %v13199_v37  ;;  %v13200_v32 = vunpack.i.l.bf16 %v13199_v37  ;;  %v1794_v31 = vsel %vm1001_vm5, %v1786_v43, %v13195_v27  ;;  %v1795_v33 = vsel %vm1001_vm5, %v1787_v28, %v13196_v17 }
 0x47b   : > { %v1803_v46 = vpack.c.bf16 %v1795_v33, %v1794_v31  ;;  %v13209_v53 = vpop.permute.xlu0 %13208 }
 0x47c   : > { %v1771_v47 = vsel %vm1001_vm5, %v1763_v10, %v13201_v35  ;;  %v1770_v13 = vsel %vm1001_vm5, %v15762_v61, %v13200_v32  ;;  %v13324_v61 = vld [vmem:[#allocation16 + $0x30] ss:$8 sps:$4 sm:$0xff]   ;;  %v13211_v40 = vunpack.i.h.bf16 %v13209_v53  ;;  %v13210_v4 = vunpack.i.l.bf16 %v13209_v53 }
 0x47d   : > { %v1802_v48 = vpack.c.bf16 %v1771_v47, %v1770_v13  ;;  %2002 = vmatprep.mubr.bf16.mxu1 %v1803_v46  ;;  %v13204_v57 = vpop.permute.xlu1 %13203  ;;  %v13330_v47 = vld [vmem:[#allocation16 + $0x50] ss:$8 sps:$4 sm:$0xff]  }
 0x47e   : > { %v1757_v24 = vsel %vm983_vm3, %v15866_v36, %v13211_v40  ;;  %v1781_v23 = vsel %vm983_vm3, %v15969_v45, %v13210_v4  ;;  %v13206_v27 = vunpack.i.h.bf16 %v13204_v57  ;;  %v13205_v12 = vunpack.i.l.bf16 %v13204_v57 }
 0x47f   : > { %2003 = vmatmul.mubr.bf16.vlgmr.msra.gmra.mrb[16].mxu1 %v1802_v48  ;;  %v13335_v48 = vld [vmem:[#allocation16 + $0x64] ss:$8 sps:$4 sm:$0xff]  }
 0x480   : > { %3151 = vmatpush1.bf16.msra.mxu1 %v13315_v52 }
 0x481   : > { %3152 = vmatprep.subr.bf16.mxu1 %v13320_v50 }
 0x484   : > { %3153 = vmatpush1.bf16.msra.mxu1 %v13318_v51 }
 0x485   : > { %3154 = vmatprep.subr.bf16.mxu1 %v13323_v56 }
 0x486   : > { %v16025_v59 = vpop.permute.xlu0 %13213 }
 0x487   : > { %v13215_v56 = vunpack.i.l.bf16 %v16025_v59  ;;  %v13216_v4 = vunpack.i.h.bf16 %v16025_v59 }
 0x488   : > { %3155 = vmatpush1.bf16.msra.mxu1 %v13321_v58 }
 0x489   : > { %v16027_v11 = vpop.permute.xlu1 %13223  ;;  %3156 = vmatprep.subr.bf16.mxu1 %v13326_v0  ;;  %v13333_v0 = vld [vmem:[#allocation16 + $0x60] ss:$8 sps:$4 sm:$0xff]  }
 0x48a   : > { %v13219_v21 = vpop.permute.xlu0 %13218  ;;  %v13225_v20 = vunpack.i.l.bf16 %v16027_v11  ;;  %v13226_v57 = vunpack.i.h.bf16 %v16027_v11 }
 0x48b   : > { %v13221_v3 = vunpack.i.h.bf16 %v13219_v21  ;;  %v13220_v15 = vunpack.i.l.bf16 %v13219_v21 }
 0x48c   : > { %3157 = vmatpush1.bf16.msra.mxu1 %v13324_v61 }
 0x48d   : > { %v13229_v19 = vpop.permute.xlu1 %13228  ;;  %3158 = vmatprep.subr.bf16.mxu1 %v13329_v9  ;;  %v1764_v29 = vsel %vm992_vm4, %v1757_v24, %v13221_v3  ;;  %v1789_v37 = vsel %vm992_vm4, %v1781_v23, %v13220_v15 }
 0x48e   : > { %v13230_v26 = vunpack.i.l.bf16 %v13229_v19  ;;  %v13239_v55 = vpop.permute.xlu0 %13238  ;;  %v13231_v43 = vunpack.i.h.bf16 %v13229_v19  ;;  %v1772_v10 = vsel %vm1001_vm5, %v1764_v29, %v13205_v12 }
 0x48f   : > { %v13241_v39 = vunpack.i.h.bf16 %v13239_v55  ;;  %v13240_v17 = vunpack.i.l.bf16 %v13239_v55 }
 0x490   : > { %v1758_v36 = vsel %vm983_vm3, %v15856_v49, %v13230_v26  ;;  %3159 = vmatpush1.bf16.msra.mxu1 %v13327_v22  ;;  %v1782_v50 = vsel %vm983_vm3, %v15964_v7, %v13231_v43  ;;  %v13338_v7 = vld [vmem:[#allocation16 + $0x74] ss:$8 sps:$4 sm:$0xff]   ;;  %v13336_v22 = vld [vmem:[#allocation16 + $0x70] ss:$8 sps:$4 sm:$0xff]   ;;  %v13341_v26 = vld [vmem:[#allocation16 + $0x84] ss:$8 sps:$4 sm:$0xff]  }
 0x491   : > { %v13234_v28 = vpop.permute.xlu1 %13233  ;;  %v1796_v45 = vsel %vm1001_vm5, %v1788_v63, %v13240_v17  ;;  %v1797_v35 = vsel %vm1001_vm5, %v1789_v37, %v13241_v39  ;;  %v1765_v32 = vsel %vm992_vm4, %v1758_v36, %v13225_v20  ;;  %3160 = vmatprep.subr.bf16.mxu1 %v13332_v34 }
 0x492   : > { %v13254_v31 = vpop.permute.xlu0 %13253  ;;  %v1806_v33 = vpack.c.bf16 %v1797_v35, %v1796_v45  ;;  %v1773_v46 = vsel %vm1001_vm5, %v1765_v32, %v13206_v27  ;;  %v13236_v63 = vunpack.i.h.bf16 %v13234_v28  ;;  %v13235_v24 = vunpack.i.l.bf16 %v13234_v28  ;;  %v13344_v45 = vld [vmem:[#allocation16 + $0x94] ss:$8 sps:$4 sm:$0xff]  }
 0x493   : > { %v13256_v13 = vunpack.i.h.bf16 %v13254_v31  ;;  %v13255_v52 = vunpack.i.l.bf16 %v13254_v31  ;;  %v1805_v49 = vpack.c.bf16 %v1773_v46, %v1772_v10 }
 0x494   : > { %2010 = vmatprep.mubr.bf16.mxu1 %v1806_v33  ;;  %3161 = vmatpush1.bf16.msra.mxu1 %v13330_v47 }
 0x495   : > { %v1783_v51 = vsel %vm983_vm3, %v15987_v2, %v13255_v52  ;;  %v13244_v53 = vpop.permute.xlu1 %13243  ;;  %2011 = vmatmul.mubr.bf16.gmra.mrb[20].mxu1 %v1805_v49  ;;  %v1759_v18 = vsel %vm983_vm3, %v15876_v60, %v13256_v13  ;;  %3162 = vmatprep.subr.bf16.mxu1 %v13335_v48  ;;  %v1790_v2 = vsel %vm992_vm4, %v1782_v50, %v13226_v57  ;;  %v13342_v52 = vld [vmem:[#allocation16 + $0x90] ss:$8 sps:$4 sm:$0xff]   ;;  %v13350_v57 = vld [vmem:[#allocation16 + $0xb4] ss:$8 sps:$4 sm:$0xff]  }
 0x496   : > { %v13259_v58 = vpop.permute.xlu0 %13258  ;;  %v13245_v61 = vunpack.i.l.bf16 %v13244_v53  ;;  %v1791_v21 = vsel %vm992_vm4, %v1783_v51, %v13215_v56  ;;  %v1766_v60 = vsel %vm992_vm4, %v1759_v18, %v13216_v4  ;;  %v13246_v39 = vunpack.i.h.bf16 %v13244_v53  ;;  %v13345_v53 = vld [vmem:[#allocation16 + $0xa0] ss:$8 sps:$4 sm:$0xff]   ;;  %v13348_v56 = vld [vmem:[#allocation16 + $0xb0] ss:$8 sps:$4 sm:$0xff]   ;;  %v13356_v18 = vld [vmem:[#allocation16 + $0xd4] ss:$8 sps:$4 sm:$0xff]  }
 0x497   : > { %v13261_v62 = vunpack.i.h.bf16 %v13259_v58  ;;  %v13260_v40 = vunpack.i.l.bf16 %v13259_v58  ;;  %v1774_v20 = vsel %vm1001_vm5, %v1766_v60, %v13235_v24  ;;  %v13353_v58 = vld [vmem:[#allocation16 + $0xc4] ss:$8 sps:$4 sm:$0xff]   ;;  %v16097_v24 = vld [vmem:[#allocation13] ss:$0 sm:$0xff] }
 0x498   : > { %3163 = vmatpush1.bf16.msra.mxu1 %v13333_v0  ;;  %v1760_v59 = vsel %vm983_vm3, %v15938_v8, %v13245_v61  ;;  %v13339_v8 = vld [vmem:[#allocation16 + $0x80] ss:$8 sps:$4 sm:$0xff]   ;;  %v1784_v33 = vsel %vm983_vm3, %v15990_v6, %v13246_v39  ;;  %v13359_v61 = vld [vmem:[#allocation16 + $0xe4] ss:$8 sps:$4 sm:$0xff]  }
 0x499   : > { %v13249_v9 = vpop.permute.xlu1 %13248  ;;  %v1798_v11 = vsel %vm1001_vm5, %v1790_v2, %v13260_v40  ;;  %v1799_v3 = vsel %vm1001_vm5, %v1791_v21, %v13261_v62  ;;  %3164 = vmatprep.subr.bf16.mxu1 %v13338_v7  ;;  %v13351_v0 = vld [vmem:[#allocation16 + $0xc0] ss:$8 sps:$4 sm:$0xff]   ;;  %v13362_v62 = vld [vmem:[#allocation16 + $0xf4] ss:$8 sps:$4 sm:$0xff]   ;;  %v13360_v40 = vld [vmem:[#allocation16 + $0xf0] ss:$8 sps:$4 sm:$0xff]  }
 0x49a   : > { %v13250_v15 = vunpack.i.l.bf16 %v13249_v9  ;;  %v13264_v16 = vpop.permute.xlu0 %13263  ;;  %v1809_v19 = vpack.c.bf16 %v1799_v3, %v1798_v11  ;;  %v13251_v36 = vunpack.i.h.bf16 %v13249_v9  ;;  %v13365_v7 = vld [vmem:[#allocation16 + $0x104] ss:$8 sps:$4 sm:$0xff]  }
 0x49b   : > { %v13265_v23 = vunpack.i.l.bf16 %v13264_v16  ;;  %v13266_v17 = vunpack.i.h.bf16 %v13264_v16 }
 0x49c   : > { %v1767_v55 = vsel %vm992_vm4, %v1760_v59, %v13250_v15  ;;  %2018 = vmatprep.mubr.bf16.mxu1 %v1809_v19  ;;  %3165 = vmatpush1.bf16.msra.mxu1 %v13336_v22 }
 0x49d   : > { %v1637_v34 = vpop.permute.xlu1 %1636  ;;  %v1775_v29 = vsel %vm1001_vm5, %v1767_v55, %v13236_v63  ;;  %v1785_v27 = vsel %vm983_vm3, %v16002_v30, %v13265_v23  ;;  %3166 = vmatprep.subr.bf16.mxu1 %v13341_v26  ;;  %v1761_v10 = vsel %vm983_vm3, %v15951_v42, %v13266_v17  ;;  %v16099_v55 = vld [vmem:[#allocation15] ss:$0 sm:$0xff] }
 0x49e   : > { %v13269_v12 = vpop.permute.xlu0 %13268  ;;  %v1808_v37 = vpack.c.bf16 %v1775_v29, %v1774_v20  ;;  %v1762_v35 = vsel %vm983_vm3, %v15935_v5, %v1637_v34  ;;  %v1793_v30 = vsel %vm992_vm4, %v1785_v27, %v13156_v41  ;;  %v1792_v5 = vsel %vm992_vm4, %v1784_v33, %v13251_v36 }
 0x49f   : > { %v13271_v43 = vunpack.i.h.bf16 %v13269_v12  ;;  %v13270_v28 = vunpack.i.l.bf16 %v13269_v12  ;;  %v1801_v42 = vsel %vm1001_vm5, %v1793_v30, %v13166_v44  ;;  %v13357_v44 = vld [vmem:[#allocation16 + $0xe0] ss:$8 sps:$4 sm:$0xff]  }
 0x4a0   : > { %2019 = vmatmul.mubr.bf16.gmra.mrb[24].mxu1 %v1808_v37 }
 0x4a1   : > { %v13274_v32 = vpop.permute.xlu1 %13273  ;;  %v1769_v31 = vsel %vm992_vm4, %v1762_v35, %v13271_v43  ;;  %3167 = vmatpush1.bf16.msra.mxu1 %v13339_v8  ;;  %v1768_v49 = vsel %vm992_vm4, %v1761_v10, %v13270_v28 }
 0x4a2   : > { %v13276_v46 = vunpack.i.h.bf16 %v13274_v32  ;;  %v13275_v47 = vunpack.i.l.bf16 %v13274_v32  ;;  %v1681_v13 = vpop.permute.xlu0 %1680  ;;  %3168 = vmatprep.subr.bf16.mxu1 %v13344_v45 }
 0x4a3   : > { %v1777_v48 = vsel %vm1001_vm5, %v1769_v31, %v1681_v13 }
 0x4a4   : > { %v1776_v41 = vsel %vm1001_vm5, %v1768_v49, %v13276_v46  ;;  %v1800_v6 = vsel %vm1001_vm5, %v1792_v5, %v13275_v47  ;;  %v13363_v5 = vld [vmem:[#allocation16 + $0x100] ss:$8 sps:$4 sm:$0xff]   ;;  %v17489_v49 = vmov 0 }
 0x4a5   : > { %v1811_v50 = vpack.c.bf16 %v1777_v48, %v1776_v41  ;;  %v1812_v51 = vpack.c.bf16 %v1801_v42, %v1800_v6  ;;  %3169 = vmatpush1.bf16.msra.mxu1 %v13342_v52  ;;  %v17490_v49 = vsel %vm16128_vm7, 4294967295, %v17489_v49  ;;  %v13368_v6 = vld [vmem:[#allocation16 + $0x114] ss:$8 sps:$4 sm:$0xff]  }
 0x4a6   : > { %3170 = vmatprep.subr.bf16.mxu1 %v13347_v38  ;;  %17491 = vst [vmem:[#allocation35_spill] sm:$0xff] %v17490_v49 }
 0x4a7   : > { %2026 = vmatprep.mubr.bf16.mxu1 %v1812_v51 }
 0x4a8   : > { %2027 = vmatmul.mubr.bf16.gmra.mrb[28].mxu1 %v1811_v50 }
 0x4a9   : > { %3171 = vmatpush1.bf16.msra.mxu1 %v13345_v53 }
 0x4aa   : > { %3172 = vmatprep.subr.bf16.mxu1 %v13350_v57 }
 0x4ad   : > { %3173 = vmatpush1.bf16.msra.mxu1 %v13348_v56 }
 0x4ae   : > { %3174 = vmatprep.subr.bf16.mxu1 %v13353_v58  ;;  %v13366_v58 = vld [vmem:[#allocation16 + $0x110] ss:$8 sps:$4 sm:$0xff]  }
 0x4b1   : > { %3175 = vmatpush1.bf16.msra.mxu1 %v13351_v0 }
 0x4b2   : > { %3176 = vmatprep.subr.bf16.mxu1 %v13356_v18 }
 0x4b5   : > { %3177 = vmatpush1.bf16.msra.mxu1 %v13354_v14  ;;  %v13371_v14 = vld [vmem:[#allocation16 + $0x124] ss:$8 sps:$4 sm:$0xff]  }
 0x4b6   : > { %3178 = vmatprep.subr.bf16.mxu1 %v13359_v61 }
 0x4b9   : > { %3179 = vmatpush1.bf16.msra.mxu1 %v13357_v44 }
 0x4ba   : > { %3180 = vmatprep.subr.bf16.mxu1 %v13362_v62 }
 0x4bd   : > { %3181 = vmatpush1.bf16.msra.mxu1 %v13360_v40  ;;  %v13369_v40 = vld [vmem:[#allocation16 + $0x120] ss:$8 sps:$4 sm:$0xff]  }
 0x4be   : > { %3223 = vmatprep.subr.bf16.mxu1 %v13365_v7 }
 0x4e9   : > { %v16085_v4 = vpop.f32.mrb[16].mxu0 }
 0x4ea   : > { %v2069_v2 = vpop.f32.mrb[17].mxu0 }
 0x4eb   : > { %v16087_v21 = vpop.f32.mrb[18].mxu0 }
 0x4ec   : > { %v2072_v9 = vpop.f32.mrb[19].mxu0 }
 0x4f1   : > { %v16089_v11 = vpop.f32.mrb[20].mxu0 }
 0x4f2   : > { %v16091_v3 = vpop.f32.mrb[21].mxu0 }
 0x4f3   : > { %v16093_v15 = vpop.f32.mrb[22].mxu0 }
 0x4f4   : > { %v16095_v16 = vpop.f32.mrb[23].mxu0 }
 0x552   : > { %v12092_v19 = vpop.f32.mrb[16].mxu1 }
 0x553   : > { %v12093_v60 = vpop.f32.mrb[17].mxu1 }
 0x554   : > { %v12094_v22 = vadd.f32 %v12093_v60, %v12092_v19  ;;  %v12095_v63 = vpop.f32.mrb[18].mxu1 }
 0x555   : > { %v12096_v59 = vpop.f32.mrb[19].mxu1 }
 0x556   : > { %v2070_v23 = vadd.f32 %v12094_v22, %v2069_v2  ;;  %v12097_v26 = vadd.f32 %v12096_v59, %v12095_v63  ;;  %v13372_v22 = vld [vmem:[#allocation16 + $0x130] ss:$8 sps:$4 sm:$0xff]  }
 0x558   : > { %v2107_v34 = vmul.f32 %v16097_v24, %v2070_v23  ;;  %v2073_v20 = vadd.f32 %v12097_v26, %v2072_v9  ;;  %v13374_v9 = vld [vmem:[#allocation16 + $0x134] ss:$8 sps:$4 sm:$0xff]  }
 0x55a   : > { %v2122_v29 = vadd.f32 %v16099_v55, %v2107_v34  ;;  %v2108_v39 = vmul.f32 %v16097_v24, %v2073_v20 }
 0x55c   : > { %v2130_v17 = vmax.f32 %v2122_v29, 0.0  ;;  %v2123_v27 = vadd.f32 %v16099_v55, %v2108_v39  ;;  %v13375_v39 = vld [vmem:[#allocation16 + $0x140] ss:$8 sps:$4 sm:$0xff]  }
 0x55e   : > { %v16105_v12 = vrot.slane %v2130_v17, 7  ;;  %v2131_v37 = vmax.f32 %v2123_v27, 0.0 }
 0x560   : > { %v16107_v8 = vrot.slane %v2131_v37, 7  ;;  %v2162_v36 = vsel %vm730_vm0, 0.0, %v16105_v12  ;;  %v2170_v43 = vsel %vm730_vm0, %v16105_v12, 0.0  ;;  %v10884_v41 = vpack.c.bf16 %v16105_v12, %v15514_v1  ;;  %v13380_v37 = vld [vmem:[#allocation16 + $0x154] ss:$8 sps:$4 sm:$0xff]  }
 0x561   : > { %v2192_v28 = vrot.slane %v2162_v36, 1  ;;  %v2193_v45 = vrot.slane %v2170_v43, 1  ;;  %v2221_v35 = vrot.slane %v2162_v36, 2  ;;  %v2222_v32 = vrot.slane %v2170_v43, 2 }
 0x562   : > { %v2163_v31 = vsel %vm730_vm0, 0.0, %v16107_v8  ;;  %v2171_v30 = vsel %vm730_vm0, %v16107_v8, 0.0  ;;  %v10904_v33 = vpack.c.bf16 %v16107_v8, %v16105_v12  ;;  %v13408_v12 = vld [vmem:[#allocation16 + $0x1f0] ss:$8 sps:$4 sm:$0xff]  }
 0x563   : > { %v16121_v10 = vsel %vm765_vm2, %v2192_v28, %v2193_v45  ;;  %v2195_v46 = vrot.slane %v2163_v31, 1  ;;  %v2196_v47 = vrot.slane %v2171_v30, 1  ;;  %v16124_v13 = vsel %vm790_vm1, %v2221_v35, %v2222_v32 }
 0x564   : > { %v2260_v52 = vpack.c.bf16 %v16121_v10, %v15586_v54  ;;  %v2224_v48 = vrot.slane %v2163_v31, 2  ;;  %v2225_v38 = vrot.slane %v2171_v30, 2 }
 0x565   : > { %v16135_v42 = vsel %vm765_vm2, %v2195_v46, %v2196_v47 }
 0x566   : > { %3182 = vmatprep.mubr.bf16.mxu1 %v2260_v52  ;;  %v2263_v50 = vpack.c.bf16 %v16135_v42, %v16121_v10  ;;  %v16140_v51 = vsel %vm790_vm1, %v2224_v48, %v2225_v38  ;;  %v13378_v38 = vld [vmem:[#allocation16 + $0x150] ss:$8 sps:$4 sm:$0xff]  }
 0x567   : > { %10885 = vmatmul.mubr.msk.bf16.vlgmr.msra.gmra.mrb[32].mxu1 %vm16128_vm7, %v10884_v41  ;;  %v2264_v56 = vpack.c.bf16 %v16140_v51, %v16124_v13  ;;  %v13555_v10 = vld [vmem:[#allocation21 + $0xa0] ss:$20 sps:$4 sm:$0xff]  }
 0x568   : > { %v12098_v53 = vpop.f32.mrb[20].mxu1  ;;  %3224 = vmatpush1.bf16.msra.mxu1 %v13363_v5 }
 0x569   : > { %v12099_v57 = vpop.f32.mrb[21].mxu1  ;;  %3225 = vmatprep.subr.bf16.mxu1 %v13368_v6 }
 0x56a   : > { %v12100_v0 = vadd.f32 %v12099_v57, %v12098_v53  ;;  %v12101_v18 = vpop.f32.mrb[22].mxu1  ;;  %v13383_v53 = vld [vmem:[#allocation16 + $0x164] ss:$8 sps:$4 sm:$0xff]  }
 0x56b   : > { %v12102_v44 = vpop.f32.mrb[23].mxu1 }
 0x56c   : > { %v2078_v61 = vadd.f32 %v16085_v4, %v12100_v0  ;;  %v12103_v62 = vadd.f32 %v12102_v44, %v12101_v18  ;;  %3226 = vmatpush1.bf16.msra.mxu1 %v13366_v58  ;;  %v13377_v4 = vld [vmem:[#allocation16 + $0x144] ss:$8 sps:$4 sm:$0xff]  }
 0x56d   : > { %3227 = vmatprep.subr.bf16.mxu1 %v13371_v14 }
 0x56e   : > { %v2109_v7 = vmul.f32 %v16097_v24, %v2078_v61  ;;  %v2081_v2 = vadd.f32 %v16087_v21, %v12103_v62 }
 0x570   : > { %v2124_v19 = vadd.f32 %v16099_v55, %v2109_v7  ;;  %v2110_v60 = vmul.f32 %v16097_v24, %v2081_v2  ;;  %3228 = vmatpush1.bf16.msra.mxu1 %v13369_v40 }
 0x571   : > { %3229 = vmatprep.subr.bf16.mxu1 %v13374_v9 }
 0x572   : > { %v2132_v63 = vmax.f32 %v2124_v19, 0.0  ;;  %v2125_v59 = vadd.f32 %v16099_v55, %v2110_v60  ;;  %v13381_v60 = vld [vmem:[#allocation16 + $0x160] ss:$8 sps:$4 sm:$0xff]  }
 0x573   : > { %v12104_v23 = vpop.f32.mrb[24].mxu1 }
 0x574   : > { %v16152_v26 = vrot.slane %v2132_v63, 7  ;;  %v2133_v34 = vmax.f32 %v2125_v59, 0.0  ;;  %v12105_v20 = vpop.f32.mrb[25].mxu1  ;;  %3230 = vmatpush1.bf16.msra.mxu1 %v13372_v22  ;;  %v13386_v59 = vld [vmem:[#allocation16 + $0x174] ss:$8 sps:$4 sm:$0xff]  }
 0x575   : > { %v12106_v29 = vadd.f32 %v12105_v20, %v12104_v23  ;;  %v12107_v21 = vpop.f32.mrb[26].mxu1  ;;  %3231 = vmatprep.subr.bf16.mxu1 %v13377_v4 }
 0x576   : > { %v16154_v17 = vrot.slane %v2133_v34, 7  ;;  %v12108_v27 = vpop.f32.mrb[27].mxu1  ;;  %v2164_v36 = vsel %vm730_vm0, 0.0, %v16152_v26  ;;  %v2172_v43 = vsel %vm730_vm0, %v16152_v26, 0.0  ;;  %v16162_v28 = vpack.c.bf16 %v16152_v26, %v16107_v8  ;;  %v13413_v8 = vld [vmem:[#allocation16 + $0x204] ss:$8 sps:$4 sm:$0xff]  }
 0x577   : > { %v2086_v45 = vadd.f32 %v12106_v29, %v16091_v3  ;;  %v12109_v35 = vadd.f32 %v12108_v27, %v12107_v21  ;;  %v2198_v32 = vrot.slane %v2164_v36, 1  ;;  %v2199_v31 = vrot.slane %v2172_v43, 1 }
 0x578   : > { %v2165_v30 = vsel %vm730_vm0, 0.0, %v16154_v17  ;;  %v2173_v46 = vsel %vm730_vm0, %v16154_v17, 0.0  ;;  %v10909_v47 = vpack.c.bf16 %v16154_v17, %v16152_v26  ;;  %v2227_v52 = vrot.slane %v2164_v36, 2  ;;  %3232 = vmatpush1.bf16.msra.mxu1 %v13375_v39  ;;  %v13420_v26 = vld [vmem:[#allocation16 + $0x230] ss:$8 sps:$4 sm:$0xff]  }
 0x579   : > { %v2111_v5 = vmul.f32 %v16097_v24, %v2086_v45  ;;  %v2089_v48 = vadd.f32 %v12109_v35, %v16095_v16  ;;  %v16174_v3 = vsel %vm765_vm2, %v2198_v32, %v2199_v31  ;;  %v2201_v41 = vrot.slane %v2165_v30, 1  ;;  %3233 = vmatprep.subr.bf16.mxu1 %v13380_v37  ;;  %v13389_v32 = vld [vmem:[#allocation16 + $0x184] ss:$8 sps:$4 sm:$0xff]  }
 0x57a   : > { %v16178_v6 = vpack.c.bf16 %v16174_v3, %v16135_v42  ;;  %v2202_v57 = vrot.slane %v2173_v46, 1  ;;  %v2228_v58 = vrot.slane %v2172_v43, 2  ;;  %v2230_v0 = vrot.slane %v2165_v30, 2  ;;  %v13384_v43 = vld [vmem:[#allocation16 + $0x170] ss:$8 sps:$4 sm:$0xff]  }
 0x57b   : > { %v2126_v18 = vadd.f32 %v16099_v55, %v2111_v5  ;;  %v2112_v14 = vmul.f32 %v16097_v24, %v2089_v48  ;;  %v12110_v16 = vpop.f32.mrb[28].mxu1  ;;  %v2231_v44 = vrot.slane %v2173_v46, 2  ;;  %v13563_v42 = vld [vmem:[#allocation21 + $0xcc] ss:$20 sps:$4 sm:$0xff]  }
 0x57c   : > { %v12111_v61 = vpop.f32.mrb[29].mxu1  ;;  %3192 = vmatprep.mubr.bf16.mxu1 %v16178_v6  ;;  %v16184_v62 = vsel %vm765_vm2, %v2201_v41, %v2202_v57  ;;  %v16187_v40 = vsel %vm790_vm1, %v2227_v52, %v2228_v58  ;;  %3234 = vmatpush1.bf16.msra.mxu1 %v13378_v38 }
 0x57d   : > { %v2134_v7 = vmax.f32 %v2126_v18, 0.0  ;;  %v2127_v2 = vadd.f32 %v16099_v55, %v2112_v14  ;;  %v12112_v9 = vadd.f32 %v12111_v61, %v12110_v16  ;;  %v12113_v19 = vpop.f32.mrb[30].mxu1  ;;  %v16192_v22 = vpack.c.bf16 %v16187_v40, %v16140_v51  ;;  %10890 = vmatmul.mubr.msk.bf16.gmra.mrb[36].mxu1 %vm16128_vm7, %v16162_v28  ;;  %3235 = vmatprep.subr.bf16.mxu1 %v13383_v53  ;;  %v13387_v14 = vld [vmem:[#allocation16 + $0x180] ss:$8 sps:$4 sm:$0xff]  }
 0x57e   : > { %v12114_v63 = vpop.f32.mrb[31].mxu1  ;;  %v16198_v4 = vsel %vm790_vm1, %v2230_v0, %v2231_v44  ;;  %v2269_v23 = vpack.c.bf16 %v16184_v62, %v16174_v3  ;;  %v13447_v51 = vld [vmem:[#allocation16 + $0x2c0] ss:$8 sps:$4 sm:$0xff]  }
 0x57f   : > { %v16202_v34 = vrot.slane %v2134_v7, 7  ;;  %v2135_v20 = vmax.f32 %v2127_v2, 0.0  ;;  %v2094_v29 = vadd.f32 %v16089_v11, %v12112_v9  ;;  %v12115_v21 = vadd.f32 %v12114_v63, %v12113_v19  ;;  %v13567_v3 = vld [vmem:[#allocation21 + $0xf0] ss:$20 sps:$4 sm:$0xff]  }
 0x580   : > { %v2270_v39 = vpack.c.bf16 %v16198_v4, %v16187_v40  ;;  %3236 = vmatpush1.bf16.msra.mxu1 %v13381_v60  ;;  %v13473_v40 = vld [vmem:[#allocation16 + $0x344] ss:$8 sps:$4 sm:$0xff]  }
 0x581   : > { %v16207_v27 = vrot.slane %v2135_v20, 7  ;;  %v2113_v37 = vmul.f32 %v16097_v24, %v2094_v29  ;;  %v2097_v36 = vadd.f32 %v16093_v15, %v12115_v21  ;;  %v2166_v45 = vsel %vm730_vm0, 0.0, %v16202_v34  ;;  %3237 = vmatprep.subr.bf16.mxu1 %v13386_v59 }
 0x582   : > { %v2174_v35 = vsel %vm730_vm0, %v16202_v34, 0.0  ;;  %v2204_v11 = vrot.slane %v2166_v45, 1  ;;  %v16217_v31 = vpack.c.bf16 %v16202_v34, %v16154_v17  ;;  %v2233_v30 = vrot.slane %v2166_v45, 2  ;;  %v13425_v17 = vld [vmem:[#allocation16 + $0x244] ss:$8 sps:$4 sm:$0xff]  }
 0x583   : > { %v2128_v46 = vadd.f32 %v16099_v55, %v2113_v37  ;;  %v2114_v15 = vmul.f32 %v16097_v24, %v2097_v36  ;;  %v2205_v52 = vrot.slane %v2174_v35, 1  ;;  %v2167_v5 = vsel %vm730_vm0, 0.0, %v16207_v27  ;;  %v13390_v37 = vld [vmem:[#allocation16 + $0x190] ss:$8 sps:$4 sm:$0xff]  }
 0x584   : > { %v2175_v48 = vsel %vm730_vm0, %v16207_v27, 0.0  ;;  %v2207_v38 = vrot.slane %v2167_v5, 1  ;;  %v10914_v41 = vpack.c.bf16 %v16207_v27, %v16202_v34  ;;  %v2234_v53 = vrot.slane %v2174_v35, 2  ;;  %3238 = vmatpush1.bf16.msra.mxu1 %v13384_v43  ;;  %v13426_v34 = vld [vmem:[#allocation16 + $0x250] ss:$8 sps:$4 sm:$0xff]  }
 0x585   : > { %v2136_v57 = vmax.f32 %v2128_v46, 0.0  ;;  %v2129_v58 = vadd.f32 %v16099_v55, %v2114_v15  ;;  %v16229_v0 = vsel %vm765_vm2, %v2204_v11, %v2205_v52  ;;  %v2208_v24 = vrot.slane %v2175_v48, 1  ;;  %3239 = vmatprep.subr.bf16.mxu1 %v13389_v32  ;;  %v13392_v55 = vld [vmem:[#allocation16 + $0x194] ss:$8 sps:$4 sm:$0xff]   ;;  %v13395_v11 = vld [vmem:[#allocation16 + $0x1a4] ss:$8 sps:$4 sm:$0xff]  }
 0x586   : > { %v16233_v18 = vpack.c.bf16 %v16229_v0, %v16184_v62  ;;  %v16236_v16 = vsel %vm790_vm1, %v2233_v30, %v2234_v53  ;;  %v2236_v44 = vrot.slane %v2167_v5, 2  ;;  %v2237_v61 = vrot.slane %v2175_v48, 2  ;;  %v13575_v62 = vld [vmem:[#allocation21 + $0x11c] ss:$20 sps:$4 sm:$0xff]  }
 0x587   : > { %v16238_v7 = vrot.slane %v2136_v57, 7  ;;  %v2137_v2 = vmax.f32 %v2129_v58, 0.0  ;;  %v16241_v9 = vsel %vm765_vm2, %v2207_v38, %v2208_v24  ;;  %v16245_v19 = vpack.c.bf16 %v16236_v16, %v16198_v4  ;;  %v13561_v4 = vld [vmem:[#allocation21 + $0xc8] ss:$20 sps:$4 sm:$0xff]  }
 0x588   : > { %3202 = vmatprep.mubr.bf16.mxu1 %v16233_v18  ;;  %v16249_v60 = vsel %vm790_vm1, %v2236_v44, %v2237_v61  ;;  %v2275_v63 = vpack.c.bf16 %v16241_v9, %v16229_v0  ;;  %3240 = vmatpush1.bf16.msra.mxu1 %v13387_v14  ;;  %v13393_v14 = vld [vmem:[#allocation16 + $0x1a0] ss:$8 sps:$4 sm:$0xff]   ;;  %v13398_v61 = vld [vmem:[#allocation16 + $0x1b4] ss:$8 sps:$4 sm:$0xff]   ;;  %v13579_v0 = vld [vmem:[#allocation21 + $0x140] ss:$20 sps:$4 sm:$0xff]  }
 0x589   : > { %v16253_v59 = vrot.slane %v2137_v2, 7  ;;  %10895 = vmatmul.mubr.msk.bf16.gmra.mrb[40].mxu1 %vm16128_vm7, %v16217_v31  ;;  %v2168_v20 = vsel %vm730_vm0, 0.0, %v16238_v7  ;;  %v2176_v29 = vsel %vm730_vm0, %v16238_v7, 0.0  ;;  %v16264_v21 = vpack.c.bf16 %v16238_v7, %v16207_v27  ;;  %3241 = vmatprep.subr.bf16.mxu1 %v13392_v55  ;;  %v13431_v27 = vld [vmem:[#allocation16 + $0x264] ss:$8 sps:$4 sm:$0xff]  }
 0x58a   : > { %v2210_v36 = vrot.slane %v2168_v20, 1  ;;  %v2211_v43 = vrot.slane %v2176_v29, 1  ;;  %v2239_v45 = vrot.slane %v2168_v20, 2  ;;  %v2240_v35 = vrot.slane %v2176_v29, 2  ;;  %v13396_v29 = vld [vmem:[#allocation16 + $0x1b0] ss:$8 sps:$4 sm:$0xff]  }
 0x58b   : > { %v10919_v32 = vpack.c.bf16 %v16253_v59, %v16238_v7  ;;  %v2276_v30 = vpack.c.bf16 %v16249_v60, %v16236_v16  ;;  %v2169_v46 = vsel %vm730_vm0, 0.0, %v16253_v59  ;;  %v2177_v15 = vsel %vm730_vm0, %v16253_v59, 0.0  ;;  %v13437_v7 = vld [vmem:[#allocation16 + $0x284] ss:$8 sps:$4 sm:$0xff]  }
 0x58c   : > { %v16275_v52 = vsel %vm765_vm2, %v2210_v36, %v2211_v43  ;;  %v16278_v5 = vsel %vm790_vm1, %v2239_v45, %v2240_v35  ;;  %v2255_v48 = vrot.slane %v2169_v46, 2  ;;  %v2256_v38 = vrot.slane %v2177_v15, 2  ;;  %3242 = vmatpush1.bf16.msra.mxu1 %v13390_v37  ;;  %v13401_v37 = vld [vmem:[#allocation16 + $0x1c4] ss:$8 sps:$4 sm:$0xff]   ;;  %v13399_v36 = vld [vmem:[#allocation16 + $0x1c0] ss:$8 sps:$4 sm:$0xff]  }
 0x58d   : > { %v16282_v53 = vpack.c.bf16 %v16275_v52, %v16241_v9  ;;  %v16286_v57 = vpack.c.bf16 %v16278_v5, %v16249_v60  ;;  %v2251_v58 = vrot.slane %v2169_v46, 1  ;;  %v2252_v24 = vrot.slane %v2177_v15, 1  ;;  %3243 = vmatprep.subr.bf16.mxu1 %v13395_v11  ;;  %v13404_v43 = vld [vmem:[#allocation16 + $0x1d4] ss:$8 sps:$4 sm:$0xff]   ;;  %v13402_v45 = vld [vmem:[#allocation16 + $0x1d0] ss:$8 sps:$4 sm:$0xff]  }
 0x58e   : > { %v16289_v44 = vsel %vm790_vm1, %v2255_v48, %v2256_v38  ;;  %v13407_v35 = vld [vmem:[#allocation16 + $0x1e4] ss:$8 sps:$4 sm:$0xff]   ;;  %v13405_v11 = vld [vmem:[#allocation16 + $0x1e0] ss:$8 sps:$4 sm:$0xff]   ;;  %v13410_v46 = vld [vmem:[#allocation16 + $0x1f4] ss:$8 sps:$4 sm:$0xff]   ;;  %v2261_v15 = vpack.c.bf16 %v16124_v13, %v15537_v25 }
 0x58f   : > { %3212 = vmatprep.mubr.bf16.mxu1 %v16282_v53  ;;  %v2282_v2 = vpack.c.bf16 %v16289_v44, %v16278_v5  ;;  %v16295_v55 = vsel %vm765_vm2, %v2251_v58, %v2252_v24  ;;  %v13416_v48 = vld [vmem:[#allocation16 + $0x214] ss:$8 sps:$4 sm:$0xff]   ;;  %v13414_v38 = vld [vmem:[#allocation16 + $0x210] ss:$8 sps:$4 sm:$0xff]   ;;  %v13419_v58 = vld [vmem:[#allocation16 + $0x224] ss:$8 sps:$4 sm:$0xff]  }
 0x590   : > { %v2281_v20 = vpack.c.bf16 %v16295_v55, %v16275_v52  ;;  %3244 = vmatpush1.bf16.msra.mxu1 %v13393_v14  ;;  %v13417_v24 = vld [vmem:[#allocation16 + $0x220] ss:$8 sps:$4 sm:$0xff]   ;;  %v13422_v14 = vld [vmem:[#allocation16 + $0x234] ss:$8 sps:$4 sm:$0xff]   ;;  %v13449_v13 = vld [vmem:[#allocation16 + $0x2c4] ss:$8 sps:$4 sm:$0xff]  }
 0x591   : > { %10900 = vmatmul.mubr.msk.bf16.gmra.mrb[44].mxu1 %vm16128_vm7, %v16264_v21  ;;  %3245 = vmatprep.subr.bf16.mxu1 %v13398_v61  ;;  %v13428_v61 = vld [vmem:[#allocation16 + $0x254] ss:$8 sps:$4 sm:$0xff]   ;;  %v13479_v16 = vld [vmem:[#allocation16 + $0x364] ss:$8 sps:$4 sm:$0xff]  }
 0x592   : > { %10905 = vmatprep.mubr.msk.bf16.mxu1 %vm16128_vm7, %v10904_v33  ;;  %v13411_v33 = vld [vmem:[#allocation16 + $0x200] ss:$8 sps:$4 sm:$0xff]   ;;  %v13573_v60 = vld [vmem:[#allocation21 + $0x118] ss:$20 sps:$4 sm:$0xff]   ;;  %v13485_v5 = vld [vmem:[#allocation16 + $0x384] ss:$8 sps:$4 sm:$0xff]  }
 0x593   : > { %v13587_v9 = vld [vmem:[#allocation21 + $0x16c] ss:$20 sps:$4 sm:$0xff]   ;;  %v13599_v52 = vld [vmem:[#allocation21 + $0x1bc] ss:$20 sps:$4 sm:$0xff]  }
 0x594   : > { %3246 = vmatpush1.bf16.msra.mxu1 %v13396_v29  ;;  %v13434_v29 = vld [vmem:[#allocation16 + $0x274] ss:$8 sps:$4 sm:$0xff]  }
 0x595   : > { %3247 = vmatprep.subr.bf16.mxu1 %v13401_v37  ;;  %v13432_v37 = vld [vmem:[#allocation16 + $0x270] ss:$8 sps:$4 sm:$0xff]  }
 0x598   : > { %3248 = vmatpush1.bf16.msra.mxu1 %v13399_v36  ;;  %v13440_v36 = vld [vmem:[#allocation16 + $0x294] ss:$8 sps:$4 sm:$0xff]  }
 0x599   : > { %3249 = vmatprep.subr.bf16.mxu1 %v13404_v43  ;;  %v13438_v43 = vld [vmem:[#allocation16 + $0x290] ss:$8 sps:$4 sm:$0xff]  }
 0x59c   : > { %3250 = vmatpush1.bf16.msra.mxu1 %v13402_v45  ;;  %v13443_v45 = vld [vmem:[#allocation16 + $0x2a4] ss:$8 sps:$4 sm:$0xff]  }
 0x59d   : > { %3251 = vmatprep.subr.bf16.mxu1 %v13407_v35  ;;  %v13441_v35 = vld [vmem:[#allocation16 + $0x2a0] ss:$8 sps:$4 sm:$0xff]  }
 0x5a0   : > { %3252 = vmatpush1.bf16.msra.mxu1 %v13405_v11  ;;  %v13446_v11 = vld [vmem:[#allocation16 + $0x2b4] ss:$8 sps:$4 sm:$0xff]  }
 0x5a1   : > { %3253 = vmatprep.subr.bf16.mxu1 %v13410_v46  ;;  %v13444_v46 = vld [vmem:[#allocation16 + $0x2b0] ss:$8 sps:$4 sm:$0xff]  }
 0x5a4   : > { %3254 = vmatpush1.bf16.msra.mxu1 %v13408_v12  ;;  %v13450_v12 = vld [vmem:[#allocation16 + $0x2d0] ss:$8 sps:$4 sm:$0xff]  }
 0x5a5   : > { %3296 = vmatprep.subr.bf16.mxu1 %v13413_v8  ;;  %v13455_v8 = vld [vmem:[#allocation16 + $0x2e4] ss:$8 sps:$4 sm:$0xff]  }
 0x5a7   : > { %3256 = vmatmul.mubr.bf16.vlgmr.msra.gmra.mrb[32].mxu1 %v2261_v15  ;;  %v13458_v15 = vld [vmem:[#allocation16 + $0x2f4] ss:$8 sps:$4 sm:$0xff]  }
 0x5a8   : > { %10910 = vmatprep.mubr.msk.bf16.mxu1 %vm16128_vm7, %v10909_v47  ;;  %3297 = vmatpush1.bf16.msra.mxu1 %v13411_v33  ;;  %v13423_v47 = vld [vmem:[#allocation16 + $0x240] ss:$8 sps:$4 sm:$0xff]  }
 0x5a9   : > { %3298 = vmatprep.subr.bf16.mxu1 %v13416_v48  ;;  %v13453_v33 = vld [vmem:[#allocation16 + $0x2e0] ss:$8 sps:$4 sm:$0xff]   ;;  %v13531_v48 = vld [vmem:[#allocation21] ss:$20 sps:$4 sm:$0xff]  }
 0x5ac   : > { %3299 = vmatpush1.bf16.msra.mxu1 %v13414_v38  ;;  %v13533_v38 = vld [vmem:[#allocation21 + $0x4] ss:$20 sps:$4 sm:$0xff]  }
 0x5ad   : > { %3300 = vmatprep.subr.bf16.mxu1 %v13419_v58  ;;  %v13456_v58 = vld [vmem:[#allocation16 + $0x2f0] ss:$8 sps:$4 sm:$0xff]   ;;  %8516 = vmatprep.subr.bf16.mxu0 %v13533_v38 }
 0x5ae   : > { %8517 = vmatpush1.bf16.msra.mxu0 %v13531_v48  ;;  %v13603_v48 = vld [vmem:[#allocation21 + $0x1e0] ss:$20 sps:$4 sm:$0xff]  }
 0x5af   : > { %3266 = vmatmul.mubr.bf16.gmra.mrb[36].mxu1 %v16192_v22  ;;  %v13492_v38 = vld [vmem:[#allocation16 + $0x3b0] ss:$8 sps:$4 sm:$0xff]  }
 0x5b0   : > { %10915 = vmatprep.mubr.msk.bf16.mxu1 %vm16128_vm7, %v10914_v41  ;;  %3301 = vmatpush1.bf16.msra.mxu1 %v13417_v24  ;;  %v13429_v41 = vld [vmem:[#allocation16 + $0x260] ss:$8 sps:$4 sm:$0xff]   ;;  %v13539_v24 = vld [vmem:[#allocation21 + $0x2c] ss:$20 sps:$4 sm:$0xff]  }
 0x5b1   : > { %3302 = vmatprep.subr.bf16.mxu1 %v13422_v14  ;;  %v13461_v14 = vld [vmem:[#allocation16 + $0x304] ss:$8 sps:$4 sm:$0xff]   ;;  %8518 = vmatprep.subr.bf16.mxu0 %v13539_v24  ;;  %v13495_v24 = vld [vmem:[#allocation16 + $0x3c0] ss:$8 sps:$4 sm:$0xff]  }
 0x5b4   : > { %3303 = vmatpush1.bf16.msra.mxu1 %v13420_v26  ;;  %v13537_v26 = vld [vmem:[#allocation21 + $0x28] ss:$20 sps:$4 sm:$0xff]  }
 0x5b5   : > { %3304 = vmatprep.subr.bf16.mxu1 %v13425_v17  ;;  %v13545_v17 = vld [vmem:[#allocation21 + $0x54] ss:$20 sps:$4 sm:$0xff]   ;;  %8519 = vmatpush1.bf16.msra.mxu0 %v13537_v26 }
 0x5b6   : > { %8520 = vmatprep.subr.bf16.mxu0 %v13545_v17  ;;  %v13498_v26 = vld [vmem:[#allocation16 + $0x3d0] ss:$8 sps:$4 sm:$0xff]   ;;  %v13503_v17 = vld [vmem:[#allocation16 + $0x3e4] ss:$8 sps:$4 sm:$0xff]  }
 0x5b7   : > { %3276 = vmatmul.mubr.bf16.gmra.mrb[40].mxu1 %v16245_v19 }
 0x5b8   : > { %10920 = vmatprep.mubr.msk.bf16.mxu1 %vm16128_vm7, %v10919_v32  ;;  %3305 = vmatpush1.bf16.msra.mxu1 %v13423_v47  ;;  %v13435_v32 = vld [vmem:[#allocation16 + $0x280] ss:$8 sps:$4 sm:$0xff]  }
 0x5b9   : > { %3306 = vmatprep.subr.bf16.mxu1 %v13428_v61  ;;  %v13459_v47 = vld [vmem:[#allocation16 + $0x300] ss:$8 sps:$4 sm:$0xff]   ;;  %v13464_v61 = vld [vmem:[#allocation16 + $0x314] ss:$8 sps:$4 sm:$0xff]  }
 0x5bc   : > { %3307 = vmatpush1.bf16.msra.mxu1 %v13426_v34  ;;  %v13543_v34 = vld [vmem:[#allocation21 + $0x50] ss:$20 sps:$4 sm:$0xff]  }
 0x5bd   : > { %3308 = vmatprep.subr.bf16.mxu1 %v13431_v27  ;;  %v13551_v27 = vld [vmem:[#allocation21 + $0x7c] ss:$20 sps:$4 sm:$0xff]   ;;  %8521 = vmatpush1.bf16.msra.mxu0 %v13543_v34  ;;  %v13504_v34 = vld [vmem:[#allocation16 + $0x3f0] ss:$8 sps:$4 sm:$0xff]  }
 0x5be   : > { %8522 = vmatprep.subr.bf16.mxu0 %v13551_v27  ;;  %v13509_v27 = vld [vmem:[#allocation16 + $0x404] ss:$8 sps:$4 sm:$0xff]  }
 0x5bf   : > { %3286 = vmatmul.mubr.bf16.gmra.mrb[44].mxu1 %v16286_v57 }
 0x5c0   : > { %3309 = vmatpush1.bf16.msra.mxu1 %v13429_v41  ;;  %3328 = vmatprep.mubr.bf16.mxu1 %v2264_v56  ;;  %v13452_v56 = vld [vmem:[#allocation16 + $0x2d4] ss:$8 sps:$4 sm:$0xff]   ;;  %v13462_v41 = vld [vmem:[#allocation16 + $0x310] ss:$8 sps:$4 sm:$0xff]  }
 0x5c1   : > { %3310 = vmatprep.subr.bf16.mxu1 %v13434_v29  ;;  %v13467_v29 = vld [vmem:[#allocation16 + $0x324] ss:$8 sps:$4 sm:$0xff]  }
 0x5c4   : > { %3311 = vmatpush1.bf16.msra.mxu1 %v13432_v37  ;;  %v13549_v37 = vld [vmem:[#allocation21 + $0x78] ss:$20 sps:$4 sm:$0xff]  }
 0x5c5   : > { %3312 = vmatprep.subr.bf16.mxu1 %v13437_v7  ;;  %v13557_v7 = vld [vmem:[#allocation21 + $0xa4] ss:$20 sps:$4 sm:$0xff]   ;;  %8523 = vmatpush1.bf16.msra.mxu0 %v13549_v37  ;;  %v13510_v37 = vld [vmem:[#allocation16 + $0x410] ss:$8 sps:$4 sm:$0xff]  }
 0x5c6   : > { %8524 = vmatprep.subr.bf16.mxu0 %v13557_v7  ;;  %v13515_v7 = vld [vmem:[#allocation16 + $0x424] ss:$8 sps:$4 sm:$0xff]  }
 0x5c8   : > { %3313 = vmatpush1.bf16.msra.mxu1 %v13435_v32  ;;  %v13465_v32 = vld [vmem:[#allocation16 + $0x320] ss:$8 sps:$4 sm:$0xff]  }
 0x5c9   : > { %3314 = vmatprep.subr.bf16.mxu1 %v13440_v36  ;;  %v13470_v36 = vld [vmem:[#allocation16 + $0x334] ss:$8 sps:$4 sm:$0xff]   ;;  %8525 = vmatpush1.bf16.msra.mxu0 %v13555_v10  ;;  %v13516_v10 = vld [vmem:[#allocation16 + $0x430] ss:$8 sps:$4 sm:$0xff]  }
 0x5ca   : > { %8526 = vmatprep.subr.bf16.mxu0 %v13563_v42  ;;  %v13524_v42 = vld [vmem:[#allocation16 + $0x454] ss:$8 sps:$4 sm:$0xff]  }
 0x5cc   : > { %3315 = vmatpush1.bf16.msra.mxu1 %v13438_v43  ;;  %v13471_v43 = vld [vmem:[#allocation16 + $0x340] ss:$8 sps:$4 sm:$0xff]  }
 0x5cd   : > { %3316 = vmatprep.subr.bf16.mxu1 %v13443_v45  ;;  %v13476_v45 = vld [vmem:[#allocation16 + $0x354] ss:$8 sps:$4 sm:$0xff]   ;;  %8527 = vmatpush1.bf16.msra.mxu0 %v13561_v4  ;;  %v10939_v4 = vpack.c.bf16 %v15514_v1, %v16253_v59 }
 0x5ce   : > { %v13540_v59 = vld [vmem:[#allocation21 + $0x30] ss:$20 sps:$4 sm:$0xff]  }
 0x5d0   : > { %3317 = vmatpush1.bf16.msra.mxu1 %v13441_v35  ;;  %v13477_v35 = vld [vmem:[#allocation16 + $0x360] ss:$8 sps:$4 sm:$0xff]  }
 0x5d1   : > { %3318 = vmatprep.subr.bf16.mxu1 %v13446_v11  ;;  %v13482_v11 = vld [vmem:[#allocation16 + $0x374] ss:$8 sps:$4 sm:$0xff]  }
 0x5d4   : > { %3319 = vmatpush1.bf16.msra.mxu1 %v13444_v46  ;;  %v13593_v46 = vld [vmem:[#allocation21 + $0x194] ss:$20 sps:$4 sm:$0xff]  }
 0x5d5   : > { %3320 = vmatprep.subr.bf16.mxu1 %v13449_v13  ;;  %v13483_v13 = vld [vmem:[#allocation16 + $0x380] ss:$8 sps:$4 sm:$0xff]  }
 0x5d8   : > { %3321 = vmatpush1.bf16.msra.mxu1 %v13447_v51  ;;  %v13488_v51 = vld [vmem:[#allocation16 + $0x394] ss:$8 sps:$4 sm:$0xff]  }
 0x5d9   : > { %3322 = vmatprep.subr.bf16.mxu1 %v13452_v56  ;;  %v13591_v56 = vld [vmem:[#allocation21 + $0x190] ss:$20 sps:$4 sm:$0xff]  }
 0x5dc   : > { %3323 = vmatpush1.bf16.msra.mxu1 %v13450_v12  ;;  %v13491_v12 = vld [vmem:[#allocation16 + $0x3a4] ss:$8 sps:$4 sm:$0xff]  }
 0x5dd   : > { %3324 = vmatprep.subr.bf16.mxu1 %v13455_v8  ;;  %v13605_v8 = vld [vmem:[#allocation21 + $0x1e4] ss:$20 sps:$4 sm:$0xff]  }
 0x5e0   : > { %3325 = vmatpush1.bf16.msra.mxu1 %v13453_v33  ;;  %v13489_v33 = vld [vmem:[#allocation16 + $0x3a0] ss:$8 sps:$4 sm:$0xff]  }
 0x5e1   : > { %3326 = vmatprep.subr.bf16.mxu1 %v13458_v15  ;;  %v13494_v15 = vld [vmem:[#allocation16 + $0x3b4] ss:$8 sps:$4 sm:$0xff]  }
 0x5e4   : > { %3327 = vmatpush1.bf16.msra.mxu1 %v13456_v58  ;;  %v13497_v58 = vld [vmem:[#allocation16 + $0x3c4] ss:$8 sps:$4 sm:$0xff]  }
 0x5e5   : > { %3369 = vmatprep.subr.bf16.mxu1 %v13461_v14  ;;  %v13500_v14 = vld [vmem:[#allocation16 + $0x3d4] ss:$8 sps:$4 sm:$0xff]  }
 0x5e7   : > { %3329 = vmatmul.mubr.bf16.vlgmr.msra.gmra.mrb[32].mxu1 %v2263_v50  ;;  %v13468_v50 = vld [vmem:[#allocation16 + $0x330] ss:$8 sps:$4 sm:$0xff]  }
 0x5e8   : > { %3338 = vmatprep.mubr.bf16.mxu1 %v2270_v39  ;;  %3370 = vmatpush1.bf16.msra.mxu1 %v13459_v47  ;;  %v13569_v39 = vld [vmem:[#allocation21 + $0xf4] ss:$20 sps:$4 sm:$0xff]   ;;  %v13501_v47 = vld [vmem:[#allocation16 + $0x3e0] ss:$8 sps:$4 sm:$0xff]  }
 0x5e9   : > { %3371 = vmatprep.subr.bf16.mxu1 %v13464_v61  ;;  %8528 = vmatprep.subr.bf16.mxu0 %v13569_v39  ;;  %v13506_v61 = vld [vmem:[#allocation16 + $0x3f4] ss:$8 sps:$4 sm:$0xff]  }
 0x5ea   : > { %8529 = vmatpush1.bf16.msra.mxu0 %v13567_v3  ;;  %v13530_v39 = vld [vmem:[#allocation16 + $0x474] ss:$8 sps:$4 sm:$0xff]   ;;  %v13542_v3 = vld [vmem:[#allocation21 + $0x34] ss:$20 sps:$4 sm:$0xff]  }
 0x5eb   : > { %8530 = vmatprep.subr.bf16.mxu0 %v13575_v62  ;;  %v13548_v62 = vld [vmem:[#allocation21 + $0x5c] ss:$20 sps:$4 sm:$0xff]  }
 0x5ec   : > { %3372 = vmatpush1.bf16.msra.mxu1 %v13462_v41  ;;  %v13507_v41 = vld [vmem:[#allocation16 + $0x400] ss:$8 sps:$4 sm:$0xff]  }
 0x5ed   : > { %3373 = vmatprep.subr.bf16.mxu1 %v13467_v29  ;;  %v13512_v29 = vld [vmem:[#allocation16 + $0x414] ss:$8 sps:$4 sm:$0xff]  }
 0x5ee   : > { %8531 = vmatpush1.bf16.msra.mxu0 %v13573_v60  ;;  %v13552_v60 = vld [vmem:[#allocation21 + $0x80] ss:$20 sps:$4 sm:$0xff]  }
 0x5ef   : > { %3339 = vmatmul.mubr.bf16.gmra.mrb[36].mxu1 %v2269_v23  ;;  %v13474_v23 = vld [vmem:[#allocation16 + $0x350] ss:$8 sps:$4 sm:$0xff]  }
 0x5f0   : > { %3348 = vmatprep.mubr.bf16.mxu1 %v2276_v30  ;;  %3374 = vmatpush1.bf16.msra.mxu1 %v13465_v32  ;;  %v13581_v30 = vld [vmem:[#allocation21 + $0x144] ss:$20 sps:$4 sm:$0xff]  }
 0x5f1   : > { %3375 = vmatprep.subr.bf16.mxu1 %v13470_v36  ;;  %8532 = vmatprep.subr.bf16.mxu0 %v13581_v30  ;;  %v13513_v32 = vld [vmem:[#allocation16 + $0x420] ss:$8 sps:$4 sm:$0xff]   ;;  %v13518_v36 = vld [vmem:[#allocation16 + $0x434] ss:$8 sps:$4 sm:$0xff]   ;;  %v13560_v30 = vld [vmem:[#allocation21 + $0xac] ss:$20 sps:$4 sm:$0xff]  }
 0x5f2   : > { %8533 = vmatpush1.bf16.msra.mxu0 %v13579_v0  ;;  %v13572_v0 = vld [vmem:[#allocation21 + $0xfc] ss:$20 sps:$4 sm:$0xff]  }
 0x5f3   : > { %8534 = vmatprep.subr.bf16.mxu0 %v13587_v9  ;;  %v13570_v9 = vld [vmem:[#allocation21 + $0xf8] ss:$20 sps:$4 sm:$0xff]  }
 0x5f4   : > { %3376 = vmatpush1.bf16.msra.mxu1 %v13468_v50  ;;  %v2284_v50 = vpack.c.bf16 %v15586_v54, %v16295_v55  ;;  %v13528_v55 = vld [vmem:[#allocation16 + $0x470] ss:$8 sps:$4 sm:$0xff]  }
 0x5f5   : > { %3377 = vmatprep.subr.bf16.mxu1 %v13473_v40  ;;  %v13525_v40 = vld [vmem:[#allocation16 + $0x460] ss:$8 sps:$4 sm:$0xff]  }
 0x5f7   : > { %3349 = vmatmul.mubr.bf16.gmra.mrb[40].mxu1 %v2275_v63  ;;  %v13480_v63 = vld [vmem:[#allocation16 + $0x370] ss:$8 sps:$4 sm:$0xff]  }
 0x5f8   : > { %3358 = vmatprep.mubr.bf16.mxu1 %v2282_v2  ;;  %3378 = vmatpush1.bf16.msra.mxu1 %v13471_v43  ;;  %v13585_v2 = vld [vmem:[#allocation21 + $0x168] ss:$20 sps:$4 sm:$0xff]   ;;  %v15029_v43 = vmov 0  }
 0x5f9   : > { %3379 = vmatprep.subr.bf16.mxu1 %v13476_v45  ;;  %8535 = vmatpush1.bf16.msra.mxu0 %v13585_v2  ;;  %v13534_v45 = vld [vmem:[#allocation21 + $0x8] ss:$20 sps:$4 sm:$0xff]   ;;  %v13584_v2 = vld [vmem:[#allocation21 + $0x14c] ss:$20 sps:$4 sm:$0xff]  }
 0x5fa   : > { %8536 = vmatprep.subr.bf16.mxu0 %v13593_v46  ;;  %v13582_v46 = vld [vmem:[#allocation21 + $0x148] ss:$20 sps:$4 sm:$0xff]  }
 0x5fc   : > { %3380 = vmatpush1.bf16.msra.mxu1 %v13474_v23  ;;  %v13546_v23 = vld [vmem:[#allocation21 + $0x58] ss:$20 sps:$4 sm:$0xff]  }
 0x5fd   : > { %3381 = vmatprep.subr.bf16.mxu1 %v13479_v16  ;;  %8537 = vmatpush1.bf16.msra.mxu0 %v13591_v56  ;;  %v13554_v16 = vld [vmem:[#allocation21 + $0x84] ss:$20 sps:$4 sm:$0xff]  }
 0x5fe   : > { %8538 = vmatprep.subr.bf16.mxu0 %v13599_v52  ;;  %v13594_v56 = vld [vmem:[#allocation21 + $0x198] ss:$20 sps:$4 sm:$0xff]  }
 0x5ff   : > { %3359 = vmatmul.mubr.bf16.gmra.mrb[44].mxu1 %v2281_v20  ;;  %v13486_v20 = vld [vmem:[#allocation16 + $0x390] ss:$8 sps:$4 sm:$0xff]   ;;  %v13602_v52 = vld [vmem:[#allocation21 + $0x1c4] ss:$20 sps:$4 sm:$0xff]  }
 0x600   : > { %3382 = vmatpush1.bf16.msra.mxu1 %v13477_v35  ;;  %3401 = vmatprep.mubr.bf16.mxu1 %v16178_v6  ;;  %v13597_v6 = vld [vmem:[#allocation21 + $0x1b8] ss:$20 sps:$4 sm:$0xff]   ;;  %v13558_v35 = vld [vmem:[#allocation21 + $0xa8] ss:$20 sps:$4 sm:$0xff]  }
 0x601   : > { %3383 = vmatprep.subr.bf16.mxu1 %v13482_v11  ;;  %8539 = vmatpush1.bf16.msra.mxu0 %v13597_v6  ;;  %v13564_v11 = vld [vmem:[#allocation21 + $0xd0] ss:$20 sps:$4 sm:$0xff]   ;;  %v13611_v6 = vld [vmem:[#allocation21 + $0x20c] ss:$20 sps:$4 sm:$0xff]  }
 0x602   : > { %8540 = vmatprep.subr.bf16.mxu0 %v13605_v8  ;;  %v13614_v8 = vld [vmem:[#allocation21 + $0x214] ss:$20 sps:$4 sm:$0xff]  }
 0x604   : > { %3384 = vmatpush1.bf16.msra.mxu1 %v13480_v63  ;;  %v13578_v63 = vld [vmem:[#allocation21 + $0x124] ss:$20 sps:$4 sm:$0xff]  }
 0x605   : > { %3385 = vmatprep.subr.bf16.mxu1 %v13485_v5  ;;  %8541 = vmatpush1.bf16.msra.mxu0 %v13603_v48  ;;  %v13576_v5 = vld [vmem:[#allocation21 + $0x120] ss:$20 sps:$4 sm:$0xff]  }
 0x606   : > { %8542 = vmatprep.subr.bf16.mxu0 %v13611_v6  ;;  %v13617_v48 = vld [vmem:[#allocation21 + $0x234] ss:$20 sps:$4 sm:$0xff]  }
 0x608   : > { %3386 = vmatpush1.bf16.msra.mxu1 %v13483_v13  ;;  %v13588_v13 = vld [vmem:[#allocation21 + $0x170] ss:$20 sps:$4 sm:$0xff]  }
 0x609   : > { %3387 = vmatprep.subr.bf16.mxu1 %v13488_v51  ;;  %v13596_v51 = vld [vmem:[#allocation21 + $0x19c] ss:$20 sps:$4 sm:$0xff]  }
 0x60c   : > { %3388 = vmatpush1.bf16.msra.mxu1 %v13486_v20  ;;  %v13608_v20 = vld [vmem:[#allocation21 + $0x1ec] ss:$20 sps:$4 sm:$0xff]  }
 0x60d   : > { %3389 = vmatprep.subr.bf16.mxu1 %v13491_v12  ;;  %v13606_v12 = vld [vmem:[#allocation21 + $0x1e8] ss:$20 sps:$4 sm:$0xff]  }
 0x610   : > { %3390 = vmatpush1.bf16.msra.mxu1 %v13489_v33  ;;  %v13609_v33 = vld [vmem:[#allocation21 + $0x208] ss:$20 sps:$4 sm:$0xff]  }
 0x611   : > { %3391 = vmatprep.subr.bf16.mxu1 %v13494_v15  ;;  %v13612_v15 = vld [vmem:[#allocation21 + $0x210] ss:$20 sps:$4 sm:$0xff]   ;;  %8543 = vmatpush1.bf16.msra.mxu0 %v13609_v33 }
 0x612   : > { %8544 = vmatprep.subr.bf16.mxu0 %v13617_v48 }
 0x614   : > { %3392 = vmatpush1.bf16.msra.mxu1 %v13492_v38  ;;  %v13620_v38 = vld [vmem:[#allocation21 + $0x23c] ss:$20 sps:$4 sm:$0xff]  }
 0x615   : > { %3393 = vmatprep.subr.bf16.mxu1 %v13497_v58  ;;  %v13615_v58 = vld [vmem:[#allocation21 + $0x230] ss:$20 sps:$4 sm:$0xff]  }
 0x616   : > { %8545 = vmatpush1.bf16.msra.mxu0 %v13615_v58 }
 0x618   : > { %3394 = vmatpush1.bf16.msra.mxu1 %v13495_v24  ;;  %v13618_v24 = vld [vmem:[#allocation21 + $0x238] ss:$20 sps:$4 sm:$0xff]  }
 0x619   : > { %3395 = vmatprep.subr.bf16.mxu1 %v13500_v14  ;;  %v13623_v14 = vld [vmem:[#allocation21 + $0x25c] ss:$20 sps:$4 sm:$0xff]  }
 0x61a   : > { %8546 = vmatprep.subr.bf16.mxu0 %v13623_v14 }
 0x61c   : > { %3396 = vmatpush1.bf16.msra.mxu1 %v13498_v26  ;;  %v13626_v26 = vld [vmem:[#allocation21 + $0x264] ss:$20 sps:$4 sm:$0xff]  }
 0x61d   : > { %3397 = vmatprep.subr.bf16.mxu1 %v13503_v17  ;;  %v13621_v17 = vld [vmem:[#allocation21 + $0x258] ss:$20 sps:$4 sm:$0xff]  }
 0x61e   : > { %8547 = vmatpush1.bf16.msra.mxu0 %v13621_v17 }
 0x620   : > { %3398 = vmatpush1.bf16.msra.mxu1 %v13501_v47  ;;  %v13624_v47 = vld [vmem:[#allocation21 + $0x260] ss:$20 sps:$4 sm:$0xff]  }
 0x621   : > { %3399 = vmatprep.subr.bf16.mxu1 %v13506_v61  ;;  %v13629_v61 = vld [vmem:[#allocation21 + $0x284] ss:$20 sps:$4 sm:$0xff]  }
 0x622   : > { %8589 = vmatprep.subr.bf16.mxu0 %v13629_v61 }
 0x624   : > { %3400 = vmatpush1.bf16.msra.mxu1 %v13504_v34  ;;  %v13632_v34 = vld [vmem:[#allocation21 + $0x28c] ss:$20 sps:$4 sm:$0xff]  }
 0x625   : > { %3442 = vmatprep.subr.bf16.mxu1 %v13509_v27  ;;  %v3517_v27 = vlaneseq }
 0x627   : > { %10925 = vmatmul.mubr.msk.bf16.vlgmr.msra.gmra.mrb[32].mxu1 %vm16128_vm7, %v16162_v28  ;;  %v13521_v28 = vld [vmem:[#allocation16 + $0x444] ss:$8 sps:$4 sm:$0xff]  }
 0x628   : > { %3411 = vmatprep.mubr.bf16.mxu1 %v16233_v18  ;;  %3443 = vmatpush1.bf16.msra.mxu1 %v13507_v41  ;;  %v13519_v18 = vld [vmem:[#allocation16 + $0x440] ss:$8 sps:$4 sm:$0xff]   ;;  %v16374_v41 = vshrl.u32 %v3517_v27, 7 }
 0x629   : > { %3444 = vmatprep.subr.bf16.mxu1 %v13512_v29 }
 0x62a   : > { %17492 = vst [vmem:[#allocation36_spill] sm:$0xff] %v16374_v41  ;;  %v16377_v29 = vsub.s32 0, %v16374_v41 }
 0x62c   : > { %3445 = vmatpush1.bf16.msra.mxu1 %v13510_v37  ;;  %17493 = vst [vmem:[#allocation37_spill] sm:$0xff] %v16377_v29  ;;  %v3515_v37 = vld [vmem:[#allocation18] sm:$0x3] }
 0x62d   : > { %3446 = vmatprep.subr.bf16.mxu1 %v13515_v7  ;;  %v16380_v7 = vsub.s32 1, %v16374_v41 }
 0x62f   : > { %10930 = vmatmul.mubr.msk.bf16.gmra.mrb[36].mxu1 %vm16128_vm7, %v16217_v31  ;;  %v13522_v31 = vld [vmem:[#allocation16 + $0x450] ss:$8 sps:$4 sm:$0xff]   ;;  %17494 = vst [vmem:[#allocation38_spill] sm:$0xff] %v16380_v7 }
 0x630   : > { %3421 = vmatprep.mubr.bf16.mxu1 %v16282_v53  ;;  %3447 = vmatpush1.bf16.msra.mxu1 %v13513_v32  ;;  %v13527_v53 = vld [vmem:[#allocation16 + $0x464] ss:$8 sps:$4 sm:$0xff]   ;;  %v3543_v32 = vld [vmem:[#allocation19] sm:$0x3] }
 0x631   : > { %3448 = vmatprep.subr.bf16.mxu1 %v13518_v36  ;;  %v16383_v36 = vrot.slane %v3515_v37, %v16377_v29 }
 0x634   : > { %3449 = vmatpush1.bf16.msra.mxu1 %v13516_v10  ;;  %v16386_v10 = vrot.slane %v3515_v37, %v16380_v7 }
 0x635   : > { %3450 = vmatprep.subr.bf16.mxu1 %v13521_v28  ;;  %v16389_v28 = vrot.slane %v3543_v32, %v16377_v29 }
 0x637   : > { %10935 = vmatmul.mubr.msk.bf16.gmra.mrb[40].mxu1 %vm16128_vm7, %v16264_v21  ;;  %v13536_v21 = vld [vmem:[#allocation21 + $0xc] ss:$20 sps:$4 sm:$0xff]  }
 0x638   : > { %3431 = vmatprep.mubr.bf16.mxu1 %v2284_v50  ;;  %3451 = vmatpush1.bf16.msra.mxu1 %v13519_v18 }
 0x639   : > { %3452 = vmatprep.subr.bf16.mxu1 %v13524_v42  ;;  %v16392_v42 = vrot.slane %v3543_v32, %v16380_v7  ;;  %v13630_v32 = vld [vmem:[#allocation21 + $0x288] ss:$20 sps:$4 sm:$0xff]  }
 0x63c   : > { %3453 = vmatpush1.bf16.msra.mxu1 %v13522_v31 }
 0x63d   : > { %3454 = vmatprep.subr.bf16.mxu1 %v13527_v53 }
 0x63f   : > { %10940 = vmatmul.mubr.msk.bf16.gmra.mrb[44].mxu1 %vm16128_vm7, %v10939_v4 }
 0x640   : > { %3455 = vmatpush1.bf16.msra.mxu1 %v13525_v40  ;;  %3474 = vmatprep.mubr.bf16.mxu1 %v15029_v43 }
 0x641   : > { %3456 = vmatprep.subr.bf16.mxu1 %v13530_v39 }
 0x644   : > { %3457 = vmatpush1.bf16.msra.mxu1 %v13528_v55 }
 0x645   : > { %9173 = vmatprep.subr.bf16.mxu1 %v13536_v21 }
 0x647   : > { %3475 = vmatmul.mubr.bf16.vlgmr.msra.gmra.mrb[32].mxu1 %v16192_v22  ;;  %v13566_v22 = vld [vmem:[#allocation21 + $0xd4] ss:$20 sps:$4 sm:$0xff]  }
 0x648   : > { %3484 = vmatprep.mubr.bf16.mxu1 %v15029_v43  ;;  %9174 = vmatpush1.bf16.msra.mxu1 %v13534_v45 }
 0x649   : > { %9175 = vmatprep.subr.bf16.mxu1 %v13542_v3 }
 0x64c   : > { %9176 = vmatpush1.bf16.msra.mxu1 %v13540_v59 }
 0x64d   : > { %9177 = vmatprep.subr.bf16.mxu1 %v13548_v62 }
 0x64f   : > { %3485 = vmatmul.mubr.bf16.gmra.mrb[36].mxu1 %v16245_v19  ;;  %v2285_v19 = vpack.c.bf16 %v15537_v25, %v16289_v44  ;;  %v13600_v44 = vld [vmem:[#allocation21 + $0x1c0] ss:$20 sps:$4 sm:$0xff]  }
 0x650   : > { %3494 = vmatprep.mubr.bf16.mxu1 %v15029_v43  ;;  %9178 = vmatpush1.bf16.msra.mxu1 %v13546_v23 }
 0x651   : > { %9179 = vmatprep.subr.bf16.mxu1 %v13554_v16 }
 0x654   : > { %9180 = vmatpush1.bf16.msra.mxu1 %v13552_v60 }
 0x655   : > { %9181 = vmatprep.subr.bf16.mxu1 %v13560_v30 }
 0x657   : > { %3495 = vmatmul.mubr.bf16.gmra.mrb[40].mxu1 %v16286_v57  ;;  %v13590_v57 = vld [vmem:[#allocation21 + $0x174] ss:$20 sps:$4 sm:$0xff]  }
 0x658   : > { %3504 = vmatprep.mubr.bf16.mxu1 %v15029_v43  ;;  %9182 = vmatpush1.bf16.msra.mxu1 %v13558_v35 }
 0x659   : > { %9183 = vmatprep.subr.bf16.mxu1 %v13566_v22 }
 0x65c   : > { %9184 = vmatpush1.bf16.msra.mxu1 %v13564_v11 }
 0x65d   : > { %9185 = vmatprep.subr.bf16.mxu1 %v13572_v0 }
 0x65f   : > { %3505 = vmatmul.mubr.bf16.gmra.mrb[44].mxu1 %v2285_v19 }
 0x660   : > { %9186 = vmatpush1.bf16.msra.mxu1 %v13570_v9 }
 0x661   : > { %9187 = vmatprep.subr.bf16.mxu1 %v13578_v63 }
 0x664   : > { %9188 = vmatpush1.bf16.msra.mxu1 %v13576_v5 }
 0x665   : > { %9189 = vmatprep.subr.bf16.mxu1 %v13584_v2 }
 0x668   : > { %9190 = vmatpush1.bf16.msra.mxu1 %v13582_v46 }
 0x669   : > { %9191 = vmatprep.subr.bf16.mxu1 %v13590_v57 }
 0x66c   : > { %9192 = vmatpush1.bf16.msra.mxu1 %v13588_v13 }
 0x66d   : > { %9193 = vmatprep.subr.bf16.mxu1 %v13596_v51 }
 0x670   : > { %9194 = vmatpush1.bf16.msra.mxu1 %v13594_v56  ;;  %v13653_v56 = vld [vmem:[#allocation21 + $0x324] ss:$20 sps:$4 sm:$0xff]  }
 0x671   : > { %9195 = vmatprep.subr.bf16.mxu1 %v13602_v52 }
 0x674   : > { %9196 = vmatpush1.bf16.msra.mxu1 %v13600_v44 }
 0x675   : > { %9197 = vmatprep.subr.bf16.mxu1 %v13608_v20 }
 0x678   : > { %9198 = vmatpush1.bf16.msra.mxu1 %v13606_v12 }
 0x679   : > { %9199 = vmatprep.subr.bf16.mxu1 %v13614_v8 }
 0x67c   : > { %9200 = vmatpush1.bf16.msra.mxu1 %v13612_v15 }
 0x67d   : > { %9201 = vmatprep.subr.bf16.mxu1 %v13620_v38 }
 0x680   : > { %9202 = vmatpush1.bf16.msra.mxu1 %v13618_v24 }
 0x681   : > { %9203 = vmatprep.subr.bf16.mxu1 %v13626_v26 }
 0x684   : > { %9204 = vmatpush1.bf16.msra.mxu1 %v13624_v47  ;;  %v13627_v47 = vld [vmem:[#allocation21 + $0x280] ss:$20 sps:$4 sm:$0xff]  }
 0x685   : > { %9246 = vmatprep.subr.bf16.mxu1 %v13632_v34 }
 0x71a   : > { %v3476_v18 = vpop.f32.mrb[32].mxu1 }
 0x71b   : > { %v3527_v50 = vmul.f32 %v16383_v36, %v3476_v18  ;;  %v3478_v31 = vpop.f32.mrb[33].mxu1 }
 0x71c   : > { %v3528_v53 = vmul.f32 %v16386_v10, %v3478_v31  ;;  %v3480_v40 = vpop.f32.mrb[34].mxu1 }
 0x71d   : > { %v3555_v4 = vadd.f32 %v16389_v28, %v3527_v50  ;;  %v3529_v39 = vmul.f32 %v16383_v36, %v3480_v40  ;;  %v3482_v55 = vpop.f32.mrb[35].mxu1  ;;  %v13635_v50 = vld [vmem:[#allocation21 + $0x2ac] ss:$20 sps:$4 sm:$0xff]  }
 0x71e   : > { %v3556_v43 = vadd.f32 %v16392_v42, %v3528_v53  ;;  %v3530_v21 = vmul.f32 %v16386_v10, %v3482_v55 }
 0x71f   : > { %v3571_v45 = vmax.f32 %v3555_v4, 0.0  ;;  %v3557_v3 = vadd.f32 %v16389_v28, %v3529_v39  ;;  %v13638_v39 = vld [vmem:[#allocation21 + $0x2b4] ss:$20 sps:$4 sm:$0xff]  }
 0x720   : > { %v3572_v59 = vmax.f32 %v3556_v43, 0.0  ;;  %v3558_v62 = vadd.f32 %v16392_v42, %v3530_v21 }
 0x721   : > { %v3603_v23 = vrot.slane %v3571_v45, 7  ;;  %v3573_v16 = vmax.f32 %v3557_v3, 0.0 }
 0x722   : > { %v3574_v60 = vmax.f32 %v3558_v62, 0.0  ;;  %v3486_v30 = vpop.f32.mrb[36].mxu1  ;;  %v16414_v63 = vrot.slane %v3572_v59, 7 }
 0x723   : > { %v16403_v35 = vsel %vm730_vm0, 0.0, %v3603_v23  ;;  %v16406_v22 = vsel %vm730_vm0, %v3603_v23, 0.0  ;;  %v16408_v11 = vrot.slane %v3573_v16, 7  ;;  %v3488_v0 = vpop.f32.mrb[37].mxu1  ;;  %v16412_v19 = vpack.c.bf16 %v3603_v23, %v15514_v1 }
 0x724   : > { %v3490_v5 = vpop.f32.mrb[38].mxu1  ;;  %v16423_v13 = vrot.slane %v3574_v60, 7  ;;  %v3531_v8 = vmul.f32 %v16383_v36, %v3486_v30  ;;  %v3532_v33 = vmul.f32 %v16386_v10, %v3488_v0  ;;  %v16442_v37 = vpack.c.bf16 %v16414_v63, %v15514_v1 }
 0x725   : > { %17495 = vst [vmem:[#allocation39_spill] sm:$0xff] %v16412_v19  ;;  %v3637_v2 = vsel %vm730_vm0, 0.0, %v16408_v11  ;;  %v3653_v46 = vsel %vm730_vm0, %v16408_v11, 0.0  ;;  %v16421_v57 = vpack.c.bf16 %v16408_v11, %v3603_v23  ;;  %v3492_v51 = vpop.f32.mrb[39].mxu1  ;;  %v3533_v34 = vmul.f32 %v16383_v36, %v3490_v5 }
 0x726   : > { %v3701_v52 = vrot.slane %v3637_v2, 1  ;;  %v3757_v44 = vrot.slane %v3637_v2, 2  ;;  %v3758_v20 = vrot.slane %v3653_v46, 2  ;;  %v3638_v12 = vsel %vm730_vm0, 0.0, %v16423_v13  ;;  %17497 = vst [vmem:[#allocation41_spill] sm:$0xff] %v16442_v37  ;;  %11665 = vmatprep.mubr.msk.bf16.mxu0 %vm16128_vm7, %v16442_v37  ;;  %11785 = vmatprep.mubr.msk.bf16.mxu1 %vm16128_vm7, %v16442_v37 }
 0x727   : > { %17496 = vst [vmem:[#allocation40_spill] sm:$0xff] %v16421_v57  ;;  %v3654_v6 = vsel %vm730_vm0, %v16423_v13, 0.0  ;;  %v3702_v15 = vrot.slane %v3653_v46, 1  ;;  %v3704_v38 = vrot.slane %v3638_v12, 1  ;;  %v3760_v24 = vrot.slane %v3638_v12, 2  ;;  %11670 = vmatmul.mubr.msk.bf16.vlgmr.msra.gmra.mrb[24].mxu0 %vm16128_vm7, %v16412_v19  ;;  %11790 = vmatmul.mubr.msk.bf16.vlgmr.msra.gmra.mrb[48].mxu1 %vm16128_vm7, %v16412_v19 }
 0x728   : > { %v16433_v48 = vsel %vm790_vm1, %v3757_v44, %v3758_v20  ;;  %v3705_v58 = vrot.slane %v3654_v6, 1  ;;  %v3761_v14 = vrot.slane %v3654_v6, 2  ;;  %v3559_v26 = vadd.f32 %v16389_v28, %v3531_v8  ;;  %8590 = vmatpush1.bf16.msra.mxu0 %v13627_v47  ;;  %9247 = vmatpush1.bf16.msra.mxu1 %v13630_v32  ;;  %v13633_v46 = vld [vmem:[#allocation21 + $0x2a8] ss:$20 sps:$4 sm:$0xff]   ;;  %v13642_v47 = vld [vmem:[#allocation21 + $0x2d8] ss:$20 sps:$4 sm:$0xff]  }
 0x729   : > { %v3560_v17 = vadd.f32 %v16392_v42, %v3532_v33  ;;  %v3534_v27 = vmul.f32 %v16386_v10, %v3492_v51  ;;  %v3561_v21 = vadd.f32 %v16389_v28, %v3533_v34  ;;  %v16459_v62 = vsel %vm765_vm2, %v3701_v52, %v3702_v15  ;;  %v13636_v51 = vld [vmem:[#allocation21 + $0x2b0] ss:$20 sps:$4 sm:$0xff]   ;;  %8591 = vmatprep.subr.bf16.mxu0 %v13635_v50  ;;  %v13641_v8 = vld [vmem:[#allocation21 + $0x2d4] ss:$20 sps:$4 sm:$0xff]  }
 0x72a   : > { %v3496_v18 = vpop.f32.mrb[40].mxu1  ;;  %v16445_v31 = vsel %vm790_vm1, %v3760_v24, %v3761_v14  ;;  %v3575_v53 = vmax.f32 %v3559_v26, 0.0  ;;  %v16462_v23 = vsel %vm765_vm2, %v3704_v38, %v3705_v58  ;;  %9248 = vmatprep.subr.bf16.mxu1 %v13638_v39  ;;  %v13639_v24 = vld [vmem:[#allocation21 + $0x2d0] ss:$20 sps:$4 sm:$0xff]   ;;  %v16509_v34 = vsel %vm730_vm0, 0.0, %v16414_v63 }
 0x72b   : > { %v3576_v40 = vmax.f32 %v3560_v17, 0.0  ;;  %v3535_v4 = vmul.f32 %v16383_v36, %v3496_v18  ;;  %v3498_v55 = vpop.f32.mrb[41].mxu1  ;;  %v3562_v45 = vadd.f32 %v16392_v42, %v3534_v27  ;;  %v3577_v0 = vmax.f32 %v3561_v21, 0.0  ;;  %v13644_v14 = vld [vmem:[#allocation21 + $0x2dc] ss:$20 sps:$4 sm:$0xff]  }
 0x72c   : > { %v3536_v3 = vmul.f32 %v16386_v10, %v3498_v55  ;;  %v3500_v59 = vpop.f32.mrb[42].mxu1  ;;  %v16464_v16 = vrot.slane %v3575_v53, 7  ;;  %8592 = vmatpush1.bf16.msra.mxu0 %v13633_v46  ;;  %9249 = vmatpush1.bf16.msra.mxu1 %v13636_v51  ;;  %v17508_v57 = vrot.slane %v16406_v22, 1  ;;  %v17509_v49 = vrot.slane %v16403_v35, 1 }
 0x72d   : > { %v16466_v60 = vrot.slane %v3576_v40, 7  ;;  %v3502_v30 = vpop.f32.mrb[43].mxu1  ;;  %v3578_v5 = vmax.f32 %v3562_v45, 0.0  ;;  %v16475_v2 = vadd.f32 %v16389_v28, %v3535_v4  ;;  %v3537_v52 = vmul.f32 %v16383_v36, %v3500_v59  ;;  %v13647_v40 = vld [vmem:[#allocation21 + $0x2fc] ss:$20 sps:$4 sm:$0xff]   ;;  %8593 = vmatprep.subr.bf16.mxu0 %v13641_v8  ;;  %9250 = vmatprep.subr.bf16.mxu1 %v13644_v14 }
 0x72e   : > { %v16480_v44 = vsel %vm730_vm0, 0.0, %v16464_v16  ;;  %v16484_v20 = vsel %vm730_vm0, %v16464_v16, 0.0  ;;  %v16488_v12 = vpack.c.bf16 %v16464_v16, %v16408_v11  ;;  %v3564_v38 = vadd.f32 %v16392_v42, %v3536_v3 }
 0x72f   : > { %v16492_v6 = vsel %vm730_vm0, 0.0, %v16466_v60  ;;  %v3763_v33 = vrot.slane %v16480_v44, 2  ;;  %v3764_v15 = vrot.slane %v16484_v20, 2  ;;  %v3538_v58 = vmul.f32 %v16386_v10, %v3502_v30 }
 0x730   : > { %17498 = vst [vmem:[#allocation42_spill] sm:$0xff] %v16488_v12  ;;  %v16500_v11 = vsel %vm730_vm0, %v16466_v60, 0.0  ;;  %v3766_v26 = vrot.slane %v16492_v6, 2  ;;  %v16505_v17 = vpack.c.bf16 %v16466_v60, %v16423_v13  ;;  %v3707_v27 = vrot.slane %v16480_v44, 1  ;;  %8594 = vmatpush1.bf16.msra.mxu0 %v13639_v24  ;;  %9251 = vmatpush1.bf16.msra.mxu1 %v13642_v47  ;;  %v13656_v24 = vld [vmem:[#allocation21 + $0x32c] ss:$20 sps:$4 sm:$0xff]  }
 0x731   : > { %v3708_v32 = vrot.slane %v16484_v20, 1  ;;  %v16514_v18 = vsel %vm790_vm1, %v3763_v33, %v3764_v15  ;;  %v3767_v50 = vrot.slane %v16500_v11, 2  ;;  %v3710_v4 = vrot.slane %v16492_v6, 1  ;;  %8595 = vmatprep.subr.bf16.mxu0 %v13647_v40 }
 0x732   : > { %17499 = vst [vmem:[#allocation43_spill] sm:$0xff] %v16505_v17  ;;  %v16517_v53 = vpop.f32.mrb[44].mxu1  ;;  %v16520_v39 = vrot.slane %v3577_v0, 7  ;;  %v16522_v55 = vrot.slane %v3578_v5, 7  ;;  %v3579_v21 = vmax.f32 %v16475_v2, 0.0  ;;  %11675 = vmatprep.mubr.msk.bf16.mxu0 %vm16128_vm7, %v16505_v17  ;;  %v3580_v59 = vmax.f32 %v3564_v38, 0.0  ;;  %11795 = vmatprep.mubr.msk.bf16.mxu1 %vm16128_vm7, %v16505_v17 }
 0x733   : > { %v16528_v45 = vpop.f32.mrb[45].mxu1  ;;  %v16531_v3 = vsel %vm790_vm1, %v3766_v26, %v3767_v50  ;;  %v3565_v30 = vadd.f32 %v16389_v28, %v3537_v52  ;;  %v3566_v0 = vadd.f32 %v16392_v42, %v3538_v58  ;;  %v13645_v5 = vld [vmem:[#allocation21 + $0x2f8] ss:$20 sps:$4 sm:$0xff]   ;;  %11680 = vmatmul.mubr.msk.bf16.gmra.mrb[28].mxu0 %vm16128_vm7, %v16488_v12  ;;  %v3711_v8 = vrot.slane %v16500_v11, 1  ;;  %11800 = vmatmul.mubr.msk.bf16.gmra.mrb[52].mxu1 %vm16128_vm7, %v16488_v12  ;;  %v13648_v58 = vld [vmem:[#allocation21 + $0x300] ss:$20 sps:$4 sm:$0xff]  }
 0x734   : > { %v13650_v2 = vld [vmem:[#allocation21 + $0x304] ss:$20 sps:$4 sm:$0xff]   ;;  %v16538_v46 = vpop.f32.mrb[46].mxu1  ;;  %v3641_v51 = vsel %vm730_vm0, 0.0, %v16520_v39  ;;  %v3657_v44 = vsel %vm730_vm0, %v16520_v39, 0.0  ;;  %v3642_v20 = vsel %vm730_vm0, 0.0, %v16522_v55  ;;  %v16563_v7 = vsel %vm765_vm2, %v3707_v27, %v3708_v32  ;;  %8596 = vmatpush1.bf16.msra.mxu0 %v13645_v5 }
 0x735   : > { %v3658_v52 = vsel %vm730_vm0, %v16522_v55, 0.0  ;;  %v3512_v6 = vpop.f32.mrb[47].mxu1  ;;  %v3713_v33 = vrot.slane %v3641_v51, 1  ;;  %v3769_v15 = vrot.slane %v3641_v51, 2  ;;  %v3770_v38 = vrot.slane %v3657_v44, 2  ;;  %9252 = vmatprep.subr.bf16.mxu1 %v13650_v2  ;;  %8597 = vmatprep.subr.bf16.mxu0 %v13653_v56 }
 0x736   : > { %v3714_v26 = vrot.slane %v3657_v44, 1  ;;  %v3716_v50 = vrot.slane %v3642_v20, 1  ;;  %v3772_v9 = vrot.slane %v3642_v20, 2  ;;  %v3773_v14 = vrot.slane %v3658_v52, 2  ;;  %9253 = vmatpush1.bf16.msra.mxu1 %v13648_v58  ;;  %v13651_v5 = vld [vmem:[#allocation21 + $0x320] ss:$20 sps:$4 sm:$0xff]  }
 0x737   : > { %v16556_v61 = vsel %vm790_vm1, %v3769_v15, %v3770_v38  ;;  %v3717_v11 = vrot.slane %v3658_v52, 1  ;;  %v16558_v43 = vrot.slane %v3579_v21, 7  ;;  %v16560_v51 = vrot.slane %v3580_v59, 7  ;;  %9254 = vmatprep.subr.bf16.mxu1 %v13656_v24  ;;  %v13662_v24 = vld [vmem:[#allocation21 + $0x354] ss:$20 sps:$4 sm:$0xff]  }
 0x738   : > { %v16566_v44 = vsel %vm790_vm1, %v3772_v9, %v3773_v14  ;;  %v3581_v20 = vmax.f32 %v3565_v30, 0.0  ;;  %v3582_v47 = vmax.f32 %v3566_v0, 0.0  ;;  %v16581_v9 = vsel %vm765_vm2, %v3710_v4, %v3711_v8  ;;  %v13654_v8 = vld [vmem:[#allocation21 + $0x328] ss:$20 sps:$4 sm:$0xff]   ;;  %8598 = vmatpush1.bf16.msra.mxu0 %v13651_v5 }
 0x739   : > { %v3643_v40 = vsel %vm730_vm0, 0.0, %v16558_v43  ;;  %v3659_v52 = vsel %vm730_vm0, %v16558_v43, 0.0  ;;  %v16574_v21 = vpack.c.bf16 %v16558_v43, %v16520_v39  ;;  %v16578_v59 = vsel %vm730_vm0, 0.0, %v16560_v51 }
 0x73a   : > { %v16584_v27 = vsel %vm765_vm2, %v3713_v33, %v3714_v26  ;;  %v3775_v32 = vrot.slane %v3643_v40, 2  ;;  %v3776_v30 = vrot.slane %v3659_v52, 2  ;;  %v16587_v0 = vsel %vm765_vm2, %v3716_v50, %v3717_v11  ;;  %v13659_v26 = vld [vmem:[#allocation21 + $0x34c] ss:$20 sps:$4 sm:$0xff]   ;;  %9255 = vmatpush1.bf16.msra.mxu1 %v13654_v8 }
 0x73b   : > { %17500 = vst [vmem:[#allocation44_spill] sm:$0xff] %v16574_v21  ;;  %v16591_v2 = vsel %vm730_vm0, %v16560_v51, 0.0  ;;  %v3778_v15 = vrot.slane %v16578_v59, 2  ;;  %v16596_v4 = vpack.c.bf16 %v16560_v51, %v16522_v55  ;;  %v3719_v33 = vrot.slane %v3643_v40, 1  ;;  %8599 = vmatprep.subr.bf16.mxu0 %v13659_v26  ;;  %9256 = vmatprep.subr.bf16.mxu1 %v13662_v24 }
 0x73c   : > { %v3720_v38 = vrot.slane %v3659_v52, 1  ;;  %v16599_v56 = vsel %vm790_vm1, %v3775_v32, %v3776_v30  ;;  %v3779_v58 = vrot.slane %v16591_v2, 2  ;;  %v3722_v50 = vrot.slane %v16578_v59, 1  ;;  %v13657_v52 = vld [vmem:[#allocation21 + $0x348] ss:$20 sps:$4 sm:$0xff]  }
 0x73d   : > { %17501 = vst [vmem:[#allocation45_spill] sm:$0xff] %v16596_v4  ;;  %v16603_v14 = vrot.slane %v3581_v20, 7  ;;  %v16605_v11 = vrot.slane %v3582_v47, 7  ;;  %v3539_v29 = vmul.f32 %v16383_v36, %v16517_v53  ;;  %11685 = vmatprep.mubr.msk.bf16.mxu0 %vm16128_vm7, %v16596_v4  ;;  %11805 = vmatprep.mubr.msk.bf16.mxu1 %vm16128_vm7, %v16596_v4  ;;  %v3540_v20 = vmul.f32 %v16386_v10, %v16528_v45  ;;  %v13668_v4 = vld [vmem:[#allocation21 + $0x37c] ss:$20 sps:$4 sm:$0xff]  }
 0x73e   : > { %v16616_v40 = vsel %vm790_vm1, %v3778_v15, %v3779_v58  ;;  %v3541_v47 = vmul.f32 %v16383_v36, %v16538_v46  ;;  %v3542_v53 = vmul.f32 %v16386_v10, %v3512_v6  ;;  %11690 = vmatmul.mubr.msk.bf16.gmra.mrb[32].mxu0 %vm16128_vm7, %v16574_v21  ;;  %11810 = vmatmul.mubr.msk.bf16.gmra.mrb[56].mxu1 %vm16128_vm7, %v16574_v21  ;;  %v13660_v36 = vld [vmem:[#allocation21 + $0x350] ss:$20 sps:$4 sm:$0xff]   ;;  %v3723_v10 = vrot.slane %v16591_v2, 1  ;;  %v13665_v58 = vld [vmem:[#allocation21 + $0x374] ss:$20 sps:$4 sm:$0xff]  }
 0x73f   : > { %v3645_v59 = vsel %vm730_vm0, 0.0, %v16603_v14  ;;  %v3661_v32 = vsel %vm730_vm0, %v16603_v14, 0.0  ;;  %v3646_v30 = vsel %vm730_vm0, 0.0, %v16605_v11  ;;  %v3662_v45 = vsel %vm730_vm0, %v16605_v11, 0.0  ;;  %8600 = vmatpush1.bf16.msra.mxu0 %v13657_v52  ;;  %9257 = vmatpush1.bf16.msra.mxu1 %v13660_v36  ;;  %v13669_v36 = vld [vmem:[#allocation21 + $0x398] ss:$20 sps:$4 sm:$0xff]  }
 0x740   : > { %v3725_v46 = vrot.slane %v3645_v59, 1  ;;  %v3781_v6 = vrot.slane %v3645_v59, 2  ;;  %v3782_v15 = vrot.slane %v3661_v32, 2  ;;  %v3726_v41 = vrot.slane %v3661_v32, 1  ;;  %v13663_v32 = vld [vmem:[#allocation21 + $0x370] ss:$20 sps:$4 sm:$0xff]   ;;  %8601 = vmatprep.subr.bf16.mxu0 %v13665_v58  ;;  %9258 = vmatprep.subr.bf16.mxu1 %v13668_v4 }
 0x741   : > { %v3728_v19 = vrot.slane %v3646_v30, 1  ;;  %v3784_v37 = vrot.slane %v3646_v30, 2  ;;  %v3785_v1 = vrot.slane %v3662_v45, 2  ;;  %v3729_v12 = vrot.slane %v3662_v45, 1  ;;  %v13666_v30 = vld [vmem:[#allocation21 + $0x378] ss:$20 sps:$4 sm:$0xff]  }
 0x742   : > { %v16639_v5 = vsel %vm790_vm1, %v3781_v6, %v3782_v15  ;;  %v3567_v21 = vadd.f32 %v16389_v28, %v3539_v29  ;;  %v3568_v2 = vadd.f32 %v16392_v42, %v3540_v20  ;;  %v16644_v59 = vsel %vm765_vm2, %v3719_v33, %v3720_v38  ;;  %v13674_v38 = vld [vmem:[#allocation21 + $0x3a4] ss:$20 sps:$4 sm:$0xff]  }
 0x743   : > { %v16647_v8 = vsel %vm790_vm1, %v3784_v37, %v3785_v1  ;;  %v16650_v26 = vadd.f32 %v16389_v28, %v3541_v47  ;;  %v3570_v24 = vadd.f32 %v16392_v42, %v3542_v53  ;;  %v16655_v29 = vsel %vm730_vm0, %v16414_v63, 0.0  ;;  %v13671_v1 = vld [vmem:[#allocation21 + $0x39c] ss:$20 sps:$4 sm:$0xff]   ;;  %8602 = vmatpush1.bf16.msra.mxu0 %v13663_v32  ;;  %9259 = vmatpush1.bf16.msra.mxu1 %v13666_v30 }
 0x744   : > { %v3583_v6 = vmax.f32 %v3567_v21, 0.0  ;;  %v3584_v45 = vmax.f32 %v3568_v2, 0.0  ;;  %v3698_v33 = vrot.slane %v16509_v34, 1  ;;  %v16659_v37 = vsel %vm765_vm2, %v3722_v50, %v3723_v10  ;;  %8603 = vmatprep.subr.bf16.mxu0 %v13671_v1  ;;  %9260 = vmatprep.subr.bf16.mxu1 %v13674_v38  ;;  %v13677_v38 = vld [vmem:[#allocation21 + $0x3c4] ss:$20 sps:$4 sm:$0xff]  }
 0x745   : > { %v16662_v28 = vsel %vm765_vm2, %v3725_v46, %v3726_v41  ;;  %v3586_v42 = vmax.f32 %v3570_v24, 0.0  ;;  %v3699_v21 = vrot.slane %v16655_v29, 1  ;;  %v16666_v20 = vsel %vm765_vm2, %v3728_v19, %v3729_v12 }
 0x746   : > { %v16668_v47 = vrot.slane %v3583_v6, 7  ;;  %v16670_v53 = vrot.slane %v3584_v45, 7  ;;  %v16674_v52 = vpack.c.bf16 %v16581_v9, %v16462_v23  ;;  %v3585_v50 = vmax.f32 %v16650_v26, 0.0 }
 0x747   : > { %v16677_v41 = vrot.slane %v3586_v42, 7  ;;  %v16680_v4 = vsel %vm765_vm2, %v3698_v33, %v3699_v21  ;;  %v16684_v19 = vpack.c.bf16 %v16563_v7, %v16459_v62  ;;  %8604 = vmatpush1.bf16.msra.mxu0 %v13669_v36  ;;  %v16724_v36 = vpack.c.bf16 %v16644_v59, %v16584_v27 }
 0x748   : > { %v3647_v12 = vsel %vm730_vm0, 0.0, %v16668_v47  ;;  %v3663_v10 = vsel %vm730_vm0, %v16668_v47, 0.0  ;;  %v16692_v46 = vpack.c.bf16 %v16668_v47, %v16603_v14  ;;  %v3648_v15 = vsel %vm730_vm0, 0.0, %v16670_v53  ;;  %8605 = vmatprep.subr.bf16.mxu0 %v13677_v38 }
 0x749   : > { %v3731_v58 = vrot.slane %v3647_v12, 1  ;;  %v3732_v2 = vrot.slane %v3663_v10, 1  ;;  %v3787_v26 = vrot.slane %v3647_v12, 2  ;;  %v3788_v24 = vrot.slane %v3663_v10, 2  ;;  %v13672_v12 = vld [vmem:[#allocation21 + $0x3a0] ss:$20 sps:$4 sm:$0xff]  }
 0x74a   : > { %17502 = vst [vmem:[#allocation46_spill] sm:$0xff] %v16692_v46  ;;  %v3664_v32 = vsel %vm730_vm0, %v16670_v53, 0.0  ;;  %v3734_v6 = vrot.slane %v3648_v15, 1  ;;  %v3790_v45 = vrot.slane %v3648_v15, 2  ;;  %v16700_v33 = vpack.c.bf16 %v16670_v53, %v16605_v11  ;;  %v13675_v15 = vld [vmem:[#allocation21 + $0x3c0] ss:$20 sps:$4 sm:$0xff]   ;;  %9261 = vmatpush1.bf16.msra.mxu1 %v13672_v12 }
 0x74b   : > { %v16703_v42 = vsel %vm765_vm2, %v3731_v58, %v3732_v2  ;;  %v16706_v30 = vsel %vm790_vm1, %v3787_v26, %v3788_v24  ;;  %v3735_v1 = vrot.slane %v3664_v32, 1  ;;  %v3791_v21 = vrot.slane %v3664_v32, 2  ;;  %v13680_v58 = vld [vmem:[#allocation21 + $0x3cc] ss:$20 sps:$4 sm:$0xff]   ;;  %8606 = vmatpush1.bf16.msra.mxu0 %v13675_v15  ;;  %v13686_v12 = vld [vmem:[#allocation21 + $0x3f4] ss:$20 sps:$4 sm:$0xff]  }
 0x74c   : > { %17503 = vst [vmem:[#allocation47_spill] sm:$0xff] %v16700_v33  ;;  %11695 = vmatprep.mubr.msk.bf16.mxu0 %vm16128_vm7, %v16700_v33  ;;  %11815 = vmatprep.mubr.msk.bf16.mxu1 %vm16128_vm7, %v16700_v33  ;;  %v16716_v10 = vpack.c.bf16 %v16680_v4, %v15586_v54  ;;  %v16720_v2 = vpack.c.bf16 %v16659_v37, %v16587_v0  ;;  %v3754_v26 = vrot.slane %v16509_v34, 2  ;;  %v13683_v33 = vld [vmem:[#allocation21 + $0x3ec] ss:$20 sps:$4 sm:$0xff]   ;;  %v3755_v34 = vrot.slane %v16655_v29, 2 }
 0x74d   : > { %v16728_v24 = vsel %vm765_vm2, %v3734_v6, %v3735_v1  ;;  %v16731_v32 = vsel %vm790_vm1, %v3790_v45, %v3791_v21  ;;  %11700 = vmatmul.mubr.msk.bf16.gmra.mrb[36].mxu0 %vm16128_vm7, %v16692_v46  ;;  %11820 = vmatmul.mubr.msk.bf16.gmra.mrb[60].mxu1 %vm16128_vm7, %v16692_v46  ;;  %v16741_v17 = vpack.c.bf16 %v16703_v42, %v16662_v28  ;;  %v17506_v45 = vrot.slane %v16406_v22, 2 }
 0x74e   : > { %17504 = vst [vmem:[#allocation48_spill] sm:$0xff] %v16716_v10  ;;  %8621 = vmatprep.mubr.bf16.mxu0 %v16716_v10  ;;  %9278 = vmatprep.mubr.bf16.mxu1 %v16716_v10  ;;  %v16748_v6 = vpack.c.bf16 %v16728_v24, %v16666_v20  ;;  %v17507_v1 = vrot.slane %v16403_v35, 2  ;;  %v16759_v46 = vpack.c.bf16 %v16531_v3, %v16445_v31  ;;  %v16761_v29 = vrot.slane %v3585_v50, 7  ;;  %v13678_v10 = vld [vmem:[#allocation21 + $0x3c8] ss:$20 sps:$4 sm:$0xff]  }
 0x74f   : > { %17505 = vst [vmem:[#allocation49_spill] sm:$0xff] %v16741_v17  ;;  %v16768_v17 = vsel %vm765_vm2, %v17509_v49, %v17508_v57  ;;  %9262 = vmatprep.subr.bf16.mxu1 %v13680_v58  ;;  %v13681_v50 = vld [vmem:[#allocation21 + $0x3e8] ss:$20 sps:$4 sm:$0xff]   ;;  %v16779_v38 = vsel %vm790_vm1, %v3754_v26, %v3755_v34  ;;  %v16783_v35 = vpack.c.bf16 %v16616_v40, %v16566_v44  ;;  %v3666_v22 = vsel %vm730_vm0, %v16677_v41, 0.0 }
 0x750   : > { %v16755_v21 = vsel %vm790_vm1, %v17507_v1, %v17506_v45  ;;  %v16772_v45 = vpack.c.bf16 %v16514_v18, %v16433_v48  ;;  %v16776_v1 = vsel %vm730_vm0, 0.0, %v16677_v41  ;;  %v16787_v49 = vpack.c.bf16 %v16599_v56, %v16556_v61  ;;  %8607 = vmatprep.subr.bf16.mxu0 %v13683_v33  ;;  %v13689_v57 = vld [vmem:[#allocation21 + $0x414] ss:$20 sps:$4 sm:$0xff]   ;;  %9263 = vmatpush1.bf16.msra.mxu1 %v13678_v10 }
 0x751   : > { %v16793_v15 = vpack.c.bf16 %v16731_v32, %v16647_v8  ;;  %v16797_v58 = vpack.c.bf16 %v16706_v30, %v16639_v5  ;;  %v16801_v26 = vpack.c.bf16 %v16423_v13, %v16414_v63  ;;  %v16805_v34 = vpack.c.bf16 %v16522_v55, %v16466_v60  ;;  %v13684_v13 = vld [vmem:[#allocation21 + $0x3f0] ss:$20 sps:$4 sm:$0xff]   ;;  %9264 = vmatprep.subr.bf16.mxu1 %v13686_v12 }
 0x752   : > { %17510 = vst [vmem:[#allocation50_spill] sm:$0xff] %v16787_v49  ;;  %v16809_v33 = vpack.c.bf16 %v16520_v39, %v16464_v16  ;;  %v16813_v49 = vpack.c.bf16 %v16605_v11, %v16560_v51  ;;  %v16821_v63 = vpack.c.bf16 %v16677_v41, %v16670_v53  ;;  %v16825_v60 = vpack.c.bf16 %v16761_v29, %v16668_v47  ;;  %v13687_v55 = vld [vmem:[#allocation21 + $0x410] ss:$20 sps:$4 sm:$0xff]   ;;  %v13690_v53 = vld [vmem:[#allocation21 + $0x418] ss:$20 sps:$4 sm:$0xff]  }
 0x753   : > { %17511 = vst [vmem:[#allocation51_spill] sm:$0xff] %v16793_v15  ;;  %v16817_v15 = vpack.c.bf16 %v16603_v14, %v16558_v43  ;;  %v16829_v16 = vpack.c.bf16 %v16462_v23, %v16680_v4  ;;  %v16833_v39 = vpack.c.bf16 %v16459_v62, %v16768_v17  ;;  %v16837_v43 = vpack.c.bf16 %v16587_v0, %v16581_v9  ;;  %v13692_v51 = vld [vmem:[#allocation21 + $0x41c] ss:$20 sps:$4 sm:$0xff]  }
 0x754   : > { %8608 = vmatpush1.bf16.msra.mxu0 %v13681_v50  ;;  %v16841_v14 = vpack.c.bf16 %v16584_v27, %v16563_v7  ;;  %v16845_v23 = vpack.c.bf16 %v16666_v20, %v16659_v37  ;;  %v16849_v62 = vpack.c.bf16 %v16662_v28, %v16644_v59  ;;  %v3814_v11 = vrot.slane %v16776_v1, 1  ;;  %v13695_v9 = vld [vmem:[#allocation21 + $0x43c] ss:$20 sps:$4 sm:$0xff]   ;;  %9265 = vmatpush1.bf16.msra.mxu1 %v13684_v13 }
 0x755   : > { %8609 = vmatprep.subr.bf16.mxu0 %v13689_v57  ;;  %v3815_v0 = vrot.slane %v3666_v22, 1  ;;  %v3649_v47 = vsel %vm730_vm0, 0.0, %v16761_v29  ;;  %v3665_v7 = vsel %vm730_vm0, %v16761_v29, 0.0  ;;  %v16858_v27 = vpack.c.bf16 %v16445_v31, %v16779_v38  ;;  %9266 = vmatprep.subr.bf16.mxu1 %v13692_v51  ;;  %v13707_v51 = vld [vmem:[#allocation21 + $0x48c] ss:$20 sps:$4 sm:$0xff]  }
 0x756   : > { %v3811_v37 = vrot.slane %v3649_v47, 1  ;;  %v3812_v20 = vrot.slane %v3665_v7, 1  ;;  %v16862_v59 = vpack.c.bf16 %v16433_v48, %v16755_v21  ;;  %v16866_v28 = vpack.c.bf16 %v16566_v44, %v16531_v3  ;;  %v13693_v3 = vld [vmem:[#allocation21 + $0x438] ss:$20 sps:$4 sm:$0xff]  }
 0x757   : > { %v16869_v4 = vsel %vm765_vm2, %v3814_v11, %v3815_v0  ;;  %v16873_v10 = vpack.c.bf16 %v16556_v61, %v16514_v18  ;;  %v16877_v31 = vpack.c.bf16 %v16647_v8, %v16616_v40  ;;  %v16881_v48 = vpack.c.bf16 %v16639_v5, %v16599_v56  ;;  %v13698_v44 = vld [vmem:[#allocation21 + $0x444] ss:$20 sps:$4 sm:$0xff]   ;;  %v13702_v11 = vld [vmem:[#allocation21 + $0x468] ss:$20 sps:$4 sm:$0xff]  }
 0x758   : > { %8610 = vmatpush1.bf16.msra.mxu0 %v13687_v55  ;;  %v16885_v50 = vpack.c.bf16 %v16869_v4, %v16728_v24  ;;  %v16888_v12 = vsel %vm765_vm2, %v3811_v37, %v3812_v20  ;;  %v3822_v61 = vrot.slane %v16776_v1, 2  ;;  %v3823_v18 = vrot.slane %v3666_v22, 2  ;;  %v13701_v40 = vld [vmem:[#allocation21 + $0x464] ss:$20 sps:$4 sm:$0xff]   ;;  %9267 = vmatpush1.bf16.msra.mxu1 %v13690_v53  ;;  %v13696_v24 = vld [vmem:[#allocation21 + $0x440] ss:$20 sps:$4 sm:$0xff]  }
 0x759   : > { %8611 = vmatprep.subr.bf16.mxu0 %v13695_v9  ;;  %v16893_v56 = vpack.c.bf16 %v16888_v12, %v16703_v42  ;;  %v3819_v5 = vrot.slane %v3649_v47, 2  ;;  %v3820_v8 = vrot.slane %v3665_v7, 2  ;;  %9268 = vmatprep.subr.bf16.mxu1 %v13698_v44  ;;  %v13699_v22 = vld [vmem:[#allocation21 + $0x460] ss:$20 sps:$4 sm:$0xff]   ;;  %v13705_v9 = vld [vmem:[#allocation21 + $0x488] ss:$20 sps:$4 sm:$0xff]  }
 0x75a   : > { %v16896_v57 = vsel %vm790_vm1, %v3822_v61, %v3823_v18  ;;  %v13704_v55 = vld [vmem:[#allocation21 + $0x46c] ss:$20 sps:$4 sm:$0xff]   ;;  %v13713_v0 = vld [vmem:[#allocation21 + $0x4b4] ss:$20 sps:$4 sm:$0xff]   ;;  %v13708_v47 = vld [vmem:[#allocation21 + $0x490] ss:$20 sps:$4 sm:$0xff]  }
 0x75b   : > { %v16900_v13 = vpack.c.bf16 %v16896_v57, %v16731_v32  ;;  %v16903_v1 = vsel %vm790_vm1, %v3819_v5, %v3820_v8  ;;  %v13710_v32 = vld [vmem:[#allocation21 + $0x494] ss:$20 sps:$4 sm:$0xff]   ;;  %v13711_v7 = vld [vmem:[#allocation21 + $0x4b0] ss:$20 sps:$4 sm:$0xff]   ;;  %v13717_v53 = vld [vmem:[#allocation21 + $0x4d8] ss:$20 sps:$4 sm:$0xff]  }
 0x75c   : > { %8612 = vmatpush1.bf16.msra.mxu0 %v13693_v3  ;;  %v16907_v42 = vpack.c.bf16 %v16903_v1, %v16706_v30  ;;  %9269 = vmatpush1.bf16.msra.mxu1 %v13696_v24  ;;  %v13716_v37 = vld [vmem:[#allocation21 + $0x4bc] ss:$20 sps:$4 sm:$0xff]   ;;  %v13714_v30 = vld [vmem:[#allocation21 + $0x4b8] ss:$20 sps:$4 sm:$0xff]   ;;  %v13720_v61 = vld [vmem:[#allocation21 + $0x4e0] ss:$20 sps:$4 sm:$0xff]  }
 0x75d   : > { %17512 = vst [vmem:[#allocation52_spill] sm:$0xff] %v16900_v13  ;;  %8613 = vmatprep.subr.bf16.mxu0 %v13701_v40  ;;  %9270 = vmatprep.subr.bf16.mxu1 %v13704_v55  ;;  %v13719_v20 = vld [vmem:[#allocation21 + $0x4dc] ss:$20 sps:$4 sm:$0xff]   ;;  %v13722_v3 = vld [vmem:[#allocation21 + $0x4e4] ss:$20 sps:$4 sm:$0xff]   ;;  %v16911_v40 = vpack.c.bf16 %v16768_v17, %v15586_v54 }
 0x75e   : > { %17513 = vst [vmem:[#allocation53_spill] sm:$0xff] %v16907_v42  ;;  %v13725_v44 = vld [vmem:[#allocation21 + $0x504] ss:$20 sps:$4 sm:$0xff]   ;;  %v13728_v18 = vld [vmem:[#allocation21 + $0x50c] ss:$20 sps:$4 sm:$0xff]  }
 0x75f   : > { %v13723_v5 = vld [vmem:[#allocation21 + $0x500] ss:$20 sps:$4 sm:$0xff]   ;;  %v13726_v24 = vld [vmem:[#allocation21 + $0x508] ss:$20 sps:$4 sm:$0xff]   ;;  %v13732_v17 = vld [vmem:[#allocation21 + $0x530] ss:$20 sps:$4 sm:$0xff]  }
 0x760   : > { %8614 = vmatpush1.bf16.msra.mxu0 %v13699_v22  ;;  %9271 = vmatpush1.bf16.msra.mxu1 %v13702_v11  ;;  %v13731_v8 = vld [vmem:[#allocation21 + $0x52c] ss:$20 sps:$4 sm:$0xff]   ;;  %v13734_v22 = vld [vmem:[#allocation21 + $0x534] ss:$20 sps:$4 sm:$0xff]   ;;  %v13740_v11 = vld [vmem:[#allocation21 + $0x55c] ss:$20 sps:$4 sm:$0xff]  }
 0x761   : > { %8615 = vmatprep.subr.bf16.mxu0 %v13707_v51  ;;  %9272 = vmatprep.subr.bf16.mxu1 %v13710_v32  ;;  %v13729_v55 = vld [vmem:[#allocation21 + $0x528] ss:$20 sps:$4 sm:$0xff]  }
 0x762   : > { %v13737_v51 = vld [vmem:[#allocation21 + $0x554] ss:$20 sps:$4 sm:$0xff]   ;;  %v13743_v32 = vld [vmem:[#allocation21 + $0x57c] ss:$20 sps:$4 sm:$0xff]  }
 0x764   : > { %8616 = vmatpush1.bf16.msra.mxu0 %v13705_v9  ;;  %9273 = vmatpush1.bf16.msra.mxu1 %v13708_v47  ;;  %v13735_v9 = vld [vmem:[#allocation21 + $0x550] ss:$20 sps:$4 sm:$0xff]  }
 0x765   : > { %8617 = vmatprep.subr.bf16.mxu0 %v13713_v0  ;;  %9274 = vmatprep.subr.bf16.mxu1 %v13716_v37  ;;  %v13738_v0 = vld [vmem:[#allocation21 + $0x558] ss:$20 sps:$4 sm:$0xff]  }
 0x766   : > { %v13746_v47 = vld [vmem:[#allocation21 + $0x584] ss:$20 sps:$4 sm:$0xff]  }
 0x767   : > { %v13749_v37 = vld [vmem:[#allocation21 + $0x5a4] ss:$20 sps:$4 sm:$0xff]  }
 0x768   : > { %8618 = vmatpush1.bf16.msra.mxu0 %v13711_v7  ;;  %9275 = vmatpush1.bf16.msra.mxu1 %v13714_v30  ;;  %v13741_v7 = vld [vmem:[#allocation21 + $0x578] ss:$20 sps:$4 sm:$0xff]  }
 0x769   : > { %8619 = vmatprep.subr.bf16.mxu0 %v13719_v20  ;;  %9276 = vmatprep.subr.bf16.mxu1 %v13722_v3  ;;  %v13744_v20 = vld [vmem:[#allocation21 + $0x580] ss:$20 sps:$4 sm:$0xff]  }
 0x76a   : > { %v13752_v30 = vld [vmem:[#allocation21 + $0x5ac] ss:$20 sps:$4 sm:$0xff]  }
 0x76b   : > { %v13755_v3 = vld [vmem:[#allocation21 + $0x5cc] ss:$20 sps:$4 sm:$0xff]  }
 0x76c   : > { %8620 = vmatpush1.bf16.msra.mxu0 %v13717_v53  ;;  %9277 = vmatpush1.bf16.msra.mxu1 %v13720_v61  ;;  %v13747_v53 = vld [vmem:[#allocation21 + $0x5a0] ss:$20 sps:$4 sm:$0xff]  }
 0x76d   : > { %8662 = vmatprep.subr.bf16.mxu0 %v13725_v44  ;;  %9319 = vmatprep.subr.bf16.mxu1 %v13728_v18  ;;  %v13750_v44 = vld [vmem:[#allocation21 + $0x5a8] ss:$20 sps:$4 sm:$0xff]  }
 0x76e   : > { %v13758_v61 = vld [vmem:[#allocation21 + $0x5d4] ss:$20 sps:$4 sm:$0xff]  }
 0x76f   : > { %8622 = vmatmul.mubr.bf16.vlgmr.msra.gmra.mrb[24].mxu0 %v16911_v40  ;;  %9279 = vmatmul.mubr.bf16.vlgmr.msra.gmra.mrb[48].mxu1 %v16911_v40  ;;  %v13753_v18 = vld [vmem:[#allocation21 + $0x5c8] ss:$20 sps:$4 sm:$0xff]  }
 0x770   : > { %8631 = vmatprep.mubr.bf16.mxu0 %v16674_v52  ;;  %8663 = vmatpush1.bf16.msra.mxu0 %v13723_v5  ;;  %v13761_v5 = vld [vmem:[#allocation21 + $0x5f4] ss:$20 sps:$4 sm:$0xff]  }
 0x771   : > { %8664 = vmatprep.subr.bf16.mxu0 %v13731_v8  ;;  %9288 = vmatprep.mubr.bf16.mxu1 %v16674_v52  ;;  %v13756_v8 = vld [vmem:[#allocation21 + $0x5d0] ss:$20 sps:$4 sm:$0xff]  }
 0x772   : > { %9320 = vmatpush1.bf16.msra.mxu1 %v13726_v24  ;;  %v13764_v24 = vld [vmem:[#allocation21 + $0x5fc] ss:$20 sps:$4 sm:$0xff]  }
 0x773   : > { %9321 = vmatprep.subr.bf16.mxu1 %v13734_v22  ;;  %v13759_v22 = vld [vmem:[#allocation21 + $0x5f0] ss:$20 sps:$4 sm:$0xff]  }
 0x774   : > { %8665 = vmatpush1.bf16.msra.mxu0 %v13729_v55  ;;  %v16927_v55 = vpack.c.bf16 %v16779_v38, %v15537_v25  ;;  %v13768_v38 = vld [vmem:[#allocation21 + $0x620] ss:$20 sps:$4 sm:$0xff]  }
 0x775   : > { %8666 = vmatprep.subr.bf16.mxu0 %v13737_v51  ;;  %v13767_v51 = vld [vmem:[#allocation21 + $0x61c] ss:$20 sps:$4 sm:$0xff]  }
 0x776   : > { %9322 = vmatpush1.bf16.msra.mxu1 %v13732_v17  ;;  %v17514_v17 = vld [vmem:[#allocation49_spill] sm:$0xff] }
 0x777   : > { %8632 = vmatmul.mubr.bf16.gmra.mrb[28].mxu0 %v16684_v19  ;;  %9323 = vmatprep.subr.bf16.mxu1 %v13740_v11  ;;  %v13762_v11 = vld [vmem:[#allocation21 + $0x5f8] ss:$20 sps:$4 sm:$0xff]  }
 0x778   : > { %8641 = vmatprep.mubr.bf16.mxu0 %v16720_v2  ;;  %8667 = vmatpush1.bf16.msra.mxu0 %v13735_v9  ;;  %v13770_v9 = vld [vmem:[#allocation21 + $0x624] ss:$20 sps:$4 sm:$0xff]  }
 0x779   : > { %9289 = vmatmul.mubr.bf16.gmra.mrb[52].mxu1 %v16684_v19  ;;  %8668 = vmatprep.subr.bf16.mxu0 %v13743_v32  ;;  %v13765_v32 = vld [vmem:[#allocation21 + $0x618] ss:$20 sps:$4 sm:$0xff]  }
 0x77a   : > { %9298 = vmatprep.mubr.bf16.mxu1 %v16720_v2  ;;  %9324 = vmatpush1.bf16.msra.mxu1 %v13738_v0  ;;  %v13773_v0 = vld [vmem:[#allocation21 + $0x644] ss:$20 sps:$4 sm:$0xff]  }
 0x77b   : > { %9325 = vmatprep.subr.bf16.mxu1 %v13746_v47  ;;  %v13776_v47 = vld [vmem:[#allocation21 + $0x64c] ss:$20 sps:$4 sm:$0xff]  }
 0x77c   : > { %8669 = vmatpush1.bf16.msra.mxu0 %v13741_v7  ;;  %v13771_v7 = vld [vmem:[#allocation21 + $0x640] ss:$20 sps:$4 sm:$0xff]  }
 0x77d   : > { %8670 = vmatprep.subr.bf16.mxu0 %v13749_v37  ;;  %v13779_v37 = vld [vmem:[#allocation21 + $0x66c] ss:$20 sps:$4 sm:$0xff]  }
 0x77e   : > { %9326 = vmatpush1.bf16.msra.mxu1 %v13744_v20  ;;  %v13774_v20 = vld [vmem:[#allocation21 + $0x648] ss:$20 sps:$4 sm:$0xff]  }
 0x77f   : > { %8642 = vmatmul.mubr.bf16.gmra.mrb[32].mxu0 %v16724_v36  ;;  %9327 = vmatprep.subr.bf16.mxu1 %v13752_v30  ;;  %v13782_v30 = vld [vmem:[#allocation21 + $0x674] ss:$20 sps:$4 sm:$0xff]  }
 0x780   : > { %8651 = vmatprep.mubr.bf16.mxu0 %v16748_v6  ;;  %8671 = vmatpush1.bf16.msra.mxu0 %v13747_v53  ;;  %v13777_v53 = vld [vmem:[#allocation21 + $0x668] ss:$20 sps:$4 sm:$0xff]  }
 0x781   : > { %9299 = vmatmul.mubr.bf16.gmra.mrb[56].mxu1 %v16724_v36  ;;  %8672 = vmatprep.subr.bf16.mxu0 %v13755_v3  ;;  %v13785_v3 = vld [vmem:[#allocation21 + $0x694] ss:$20 sps:$4 sm:$0xff]  }
 0x782   : > { %9308 = vmatprep.mubr.bf16.mxu1 %v16748_v6  ;;  %9328 = vmatpush1.bf16.msra.mxu1 %v13750_v44  ;;  %v13780_v44 = vld [vmem:[#allocation21 + $0x670] ss:$20 sps:$4 sm:$0xff]  }
 0x783   : > { %9329 = vmatprep.subr.bf16.mxu1 %v13758_v61  ;;  %v13788_v61 = vld [vmem:[#allocation21 + $0x69c] ss:$20 sps:$4 sm:$0xff]  }
 0x784   : > { %8673 = vmatpush1.bf16.msra.mxu0 %v13753_v18  ;;  %v13783_v18 = vld [vmem:[#allocation21 + $0x690] ss:$20 sps:$4 sm:$0xff]  }
 0x785   : > { %8674 = vmatprep.subr.bf16.mxu0 %v13761_v5  ;;  %v13791_v5 = vld [vmem:[#allocation21 + $0x6bc] ss:$20 sps:$4 sm:$0xff]  }
 0x786   : > { %9330 = vmatpush1.bf16.msra.mxu1 %v13756_v8  ;;  %v13786_v8 = vld [vmem:[#allocation21 + $0x698] ss:$20 sps:$4 sm:$0xff]  }
 0x787   : > { %8652 = vmatmul.mubr.bf16.gmra.mrb[36].mxu0 %v17514_v17  ;;  %9331 = vmatprep.subr.bf16.mxu1 %v13764_v24  ;;  %v13794_v24 = vld [vmem:[#allocation21 + $0x6c4] ss:$20 sps:$4 sm:$0xff]  }
 0x788   : > { %8694 = vmatprep.mubr.bf16.mxu0 %v16927_v55  ;;  %8675 = vmatpush1.bf16.msra.mxu0 %v13759_v22  ;;  %v13789_v22 = vld [vmem:[#allocation21 + $0x6b8] ss:$20 sps:$4 sm:$0xff]  }
 0x789   : > { %9309 = vmatmul.mubr.bf16.gmra.mrb[60].mxu1 %v17514_v17  ;;  %8676 = vmatprep.subr.bf16.mxu0 %v13767_v51  ;;  %v13797_v51 = vld [vmem:[#allocation21 + $0x6e4] ss:$20 sps:$4 sm:$0xff]  }
 0x78a   : > { %9332 = vmatpush1.bf16.msra.mxu1 %v13762_v11  ;;  %9351 = vmatprep.mubr.bf16.mxu1 %v16927_v55  ;;  %v13792_v11 = vld [vmem:[#allocation21 + $0x6c0] ss:$20 sps:$4 sm:$0xff]  }
 0x78b   : > { %9333 = vmatprep.subr.bf16.mxu1 %v13770_v9  ;;  %v13800_v9 = vld [vmem:[#allocation21 + $0x6ec] ss:$20 sps:$4 sm:$0xff]  }
 0x78c   : > { %8677 = vmatpush1.bf16.msra.mxu0 %v13765_v32  ;;  %v13795_v32 = vld [vmem:[#allocation21 + $0x6e0] ss:$20 sps:$4 sm:$0xff]  }
 0x78d   : > { %8678 = vmatprep.subr.bf16.mxu0 %v13773_v0  ;;  %v13803_v0 = vld [vmem:[#allocation21 + $0x70c] ss:$20 sps:$4 sm:$0xff]  }
 0x78e   : > { %9334 = vmatpush1.bf16.msra.mxu1 %v13768_v38  ;;  %v13798_v38 = vld [vmem:[#allocation21 + $0x6e8] ss:$20 sps:$4 sm:$0xff]  }
 0x78f   : > { %9335 = vmatprep.subr.bf16.mxu1 %v13776_v47  ;;  %v13806_v47 = vld [vmem:[#allocation21 + $0x714] ss:$20 sps:$4 sm:$0xff]  }
 0x790   : > { %8679 = vmatpush1.bf16.msra.mxu0 %v13771_v7  ;;  %v13801_v7 = vld [vmem:[#allocation21 + $0x708] ss:$20 sps:$4 sm:$0xff]  }
 0x791   : > { %8680 = vmatprep.subr.bf16.mxu0 %v13779_v37  ;;  %v13809_v37 = vld [vmem:[#allocation21 + $0x734] ss:$20 sps:$4 sm:$0xff]  }
 0x792   : > { %9336 = vmatpush1.bf16.msra.mxu1 %v13774_v20  ;;  %v13804_v20 = vld [vmem:[#allocation21 + $0x710] ss:$20 sps:$4 sm:$0xff]  }
 0x793   : > { %9337 = vmatprep.subr.bf16.mxu1 %v13782_v30  ;;  %v13812_v30 = vld [vmem:[#allocation21 + $0x73c] ss:$20 sps:$4 sm:$0xff]  }
 0x794   : > { %8681 = vmatpush1.bf16.msra.mxu0 %v13777_v53  ;;  %v13807_v53 = vld [vmem:[#allocation21 + $0x730] ss:$20 sps:$4 sm:$0xff]  }
 0x795   : > { %8682 = vmatprep.subr.bf16.mxu0 %v13785_v3  ;;  %v13815_v3 = vld [vmem:[#allocation21 + $0x75c] ss:$20 sps:$4 sm:$0xff]  }
 0x796   : > { %9338 = vmatpush1.bf16.msra.mxu1 %v13780_v44  ;;  %v13810_v44 = vld [vmem:[#allocation21 + $0x738] ss:$20 sps:$4 sm:$0xff]  }
 0x797   : > { %9339 = vmatprep.subr.bf16.mxu1 %v13788_v61  ;;  %v13818_v61 = vld [vmem:[#allocation21 + $0x764] ss:$20 sps:$4 sm:$0xff]  }
 0x798   : > { %8683 = vmatpush1.bf16.msra.mxu0 %v13783_v18  ;;  %v13813_v18 = vld [vmem:[#allocation21 + $0x758] ss:$20 sps:$4 sm:$0xff]  }
 0x799   : > { %8684 = vmatprep.subr.bf16.mxu0 %v13791_v5  ;;  %v13821_v5 = vld [vmem:[#allocation21 + $0x784] ss:$20 sps:$4 sm:$0xff]  }
 0x79a   : > { %9340 = vmatpush1.bf16.msra.mxu1 %v13786_v8  ;;  %v13816_v8 = vld [vmem:[#allocation21 + $0x760] ss:$20 sps:$4 sm:$0xff]  }
 0x79b   : > { %9341 = vmatprep.subr.bf16.mxu1 %v13794_v24  ;;  %v13824_v24 = vld [vmem:[#allocation21 + $0x78c] ss:$20 sps:$4 sm:$0xff]  }
 0x79c   : > { %8685 = vmatpush1.bf16.msra.mxu0 %v13789_v22  ;;  %v13819_v22 = vld [vmem:[#allocation21 + $0x780] ss:$20 sps:$4 sm:$0xff]  }
 0x79d   : > { %8686 = vmatprep.subr.bf16.mxu0 %v13797_v51  ;;  %v16935_v51 = vpack.c.bf16 %v16755_v21, %v15537_v25  ;;  %v13828_v21 = vld [vmem:[#allocation21 + $0x7b0] ss:$20 sps:$4 sm:$0xff]  }
 0x79e   : > { %9342 = vmatpush1.bf16.msra.mxu1 %v13792_v11  ;;  %v13827_v11 = vld [vmem:[#allocation21 + $0x7ac] ss:$20 sps:$4 sm:$0xff]  }
 0x79f   : > { %9343 = vmatprep.subr.bf16.mxu1 %v13800_v9  ;;  %v13822_v9 = vld [vmem:[#allocation21 + $0x788] ss:$20 sps:$4 sm:$0xff]  }
 0x7a0   : > { %8687 = vmatpush1.bf16.msra.mxu0 %v13795_v32  ;;  %v13830_v32 = vld [vmem:[#allocation21 + $0x7b4] ss:$20 sps:$4 sm:$0xff]  }
 0x7a1   : > { %8688 = vmatprep.subr.bf16.mxu0 %v13803_v0  ;;  %v13825_v0 = vld [vmem:[#allocation21 + $0x7a8] ss:$20 sps:$4 sm:$0xff]  }
 0x7a2   : > { %9344 = vmatpush1.bf16.msra.mxu1 %v13798_v38  ;;  %v13833_v38 = vld [vmem:[#allocation21 + $0x7d4] ss:$20 sps:$4 sm:$0xff]  }
 0x7a3   : > { %9345 = vmatprep.subr.bf16.mxu1 %v13806_v47  ;;  %v13836_v47 = vld [vmem:[#allocation21 + $0x7dc] ss:$20 sps:$4 sm:$0xff]  }
 0x7a4   : > { %8689 = vmatpush1.bf16.msra.mxu0 %v13801_v7  ;;  %v13831_v7 = vld [vmem:[#allocation21 + $0x7d0] ss:$20 sps:$4 sm:$0xff]  }
 0x7a5   : > { %8690 = vmatprep.subr.bf16.mxu0 %v13809_v37  ;;  %v13839_v37 = vld [vmem:[#allocation21 + $0x7fc] ss:$20 sps:$4 sm:$0xff]  }
 0x7a6   : > { %9346 = vmatpush1.bf16.msra.mxu1 %v13804_v20  ;;  %v13834_v20 = vld [vmem:[#allocation21 + $0x7d8] ss:$20 sps:$4 sm:$0xff]  }
 0x7a7   : > { %9347 = vmatprep.subr.bf16.mxu1 %v13812_v30  ;;  %v13842_v30 = vld [vmem:[#allocation21 + $0x804] ss:$20 sps:$4 sm:$0xff]  }
 0x7a8   : > { %8691 = vmatpush1.bf16.msra.mxu0 %v13807_v53  ;;  %v13837_v53 = vld [vmem:[#allocation21 + $0x7f8] ss:$20 sps:$4 sm:$0xff]  }
 0x7a9   : > { %8692 = vmatprep.subr.bf16.mxu0 %v13815_v3  ;;  %v13845_v3 = vld [vmem:[#allocation21 + $0x824] ss:$20 sps:$4 sm:$0xff]  }
 0x7aa   : > { %9348 = vmatpush1.bf16.msra.mxu1 %v13810_v44  ;;  %v13840_v44 = vld [vmem:[#allocation21 + $0x800] ss:$20 sps:$4 sm:$0xff]  }
 0x7ab   : > { %9349 = vmatprep.subr.bf16.mxu1 %v13818_v61  ;;  %v13848_v61 = vld [vmem:[#allocation21 + $0x82c] ss:$20 sps:$4 sm:$0xff]  }
 0x7ac   : > { %8693 = vmatpush1.bf16.msra.mxu0 %v13813_v18  ;;  %v13843_v18 = vld [vmem:[#allocation21 + $0x820] ss:$20 sps:$4 sm:$0xff]  }
 0x7ad   : > { %8735 = vmatprep.subr.bf16.mxu0 %v13821_v5  ;;  %v13851_v5 = vld [vmem:[#allocation21 + $0x84c] ss:$20 sps:$4 sm:$0xff]  }
 0x7ae   : > { %9350 = vmatpush1.bf16.msra.mxu1 %v13816_v8  ;;  %v13846_v8 = vld [vmem:[#allocation21 + $0x828] ss:$20 sps:$4 sm:$0xff]  }
 0x7af   : > { %8695 = vmatmul.mubr.bf16.vlgmr.msra.gmra.mrb[24].mxu0 %v16935_v51  ;;  %9392 = vmatprep.subr.bf16.mxu1 %v13824_v24  ;;  %v17515_v24 = vld [vmem:[#allocation50_spill] sm:$0xff] }
 0x7b0   : > { %8704 = vmatprep.mubr.bf16.mxu0 %v16759_v46  ;;  %8736 = vmatpush1.bf16.msra.mxu0 %v13819_v22  ;;  %v13854_v22 = vld [vmem:[#allocation21 + $0x854] ss:$20 sps:$4 sm:$0xff]  }
 0x7b1   : > { %9352 = vmatmul.mubr.bf16.vlgmr.msra.gmra.mrb[48].mxu1 %v16935_v51  ;;  %8737 = vmatprep.subr.bf16.mxu0 %v13827_v11  ;;  %v17516_v11 = vld [vmem:[#allocation51_spill] sm:$0xff] }
 0x7b2   : > { %9361 = vmatprep.mubr.bf16.mxu1 %v16759_v46  ;;  %9393 = vmatpush1.bf16.msra.mxu1 %v13822_v9  ;;  %v13849_v9 = vld [vmem:[#allocation21 + $0x848] ss:$20 sps:$4 sm:$0xff]  }
 0x7b3   : > { %9394 = vmatprep.subr.bf16.mxu1 %v13830_v32  ;;  %v13857_v32 = vld [vmem:[#allocation21 + $0x874] ss:$20 sps:$4 sm:$0xff]  }
 0x7b4   : > { %8738 = vmatpush1.bf16.msra.mxu0 %v13825_v0  ;;  %v13852_v0 = vld [vmem:[#allocation21 + $0x850] ss:$20 sps:$4 sm:$0xff]  }
 0x7b5   : > { %8739 = vmatprep.subr.bf16.mxu0 %v13833_v38  ;;  %v13860_v38 = vld [vmem:[#allocation21 + $0x87c] ss:$20 sps:$4 sm:$0xff]  }
 0x7b6   : > { %9395 = vmatpush1.bf16.msra.mxu1 %v13828_v21  ;;  %v13855_v21 = vld [vmem:[#allocation21 + $0x870] ss:$20 sps:$4 sm:$0xff]  }
 0x7b7   : > { %8705 = vmatmul.mubr.bf16.gmra.mrb[28].mxu0 %v16772_v45  ;;  %9396 = vmatprep.subr.bf16.mxu1 %v13836_v47  ;;  %v13863_v47 = vld [vmem:[#allocation21 + $0x89c] ss:$20 sps:$4 sm:$0xff]  }
 0x7b8   : > { %8714 = vmatprep.mubr.bf16.mxu0 %v16783_v35  ;;  %8740 = vmatpush1.bf16.msra.mxu0 %v13831_v7  ;;  %v13858_v7 = vld [vmem:[#allocation21 + $0x878] ss:$20 sps:$4 sm:$0xff]  }
 0x7b9   : > { %9362 = vmatmul.mubr.bf16.gmra.mrb[52].mxu1 %v16772_v45  ;;  %8741 = vmatprep.subr.bf16.mxu0 %v13839_v37  ;;  %v13866_v37 = vld [vmem:[#allocation21 + $0x8a4] ss:$20 sps:$4 sm:$0xff]  }
 0x7ba   : > { %9371 = vmatprep.mubr.bf16.mxu1 %v16783_v35  ;;  %9397 = vmatpush1.bf16.msra.mxu1 %v13834_v20 }
 0x7bb   : > { %9398 = vmatprep.subr.bf16.mxu1 %v13842_v30  ;;  %v13861_v30 = vld [vmem:[#allocation21 + $0x898] ss:$20 sps:$4 sm:$0xff]  }
 0x7bc   : > { %8742 = vmatpush1.bf16.msra.mxu0 %v13837_v53  ;;  %v13869_v53 = vld [vmem:[#allocation21 + $0x8c4] ss:$20 sps:$4 sm:$0xff]  }
 0x7bd   : > { %8743 = vmatprep.subr.bf16.mxu0 %v13845_v3  ;;  %v13864_v3 = vld [vmem:[#allocation21 + $0x8a0] ss:$20 sps:$4 sm:$0xff]  }
 0x7be   : > { %9399 = vmatpush1.bf16.msra.mxu1 %v13840_v44  ;;  %v13872_v44 = vld [vmem:[#allocation21 + $0x8cc] ss:$20 sps:$4 sm:$0xff]  }
 0x7bf   : > { %8715 = vmatmul.mubr.bf16.gmra.mrb[32].mxu0 %v17515_v24  ;;  %9400 = vmatprep.subr.bf16.mxu1 %v13848_v61  ;;  %v13867_v61 = vld [vmem:[#allocation21 + $0x8c0] ss:$20 sps:$4 sm:$0xff]  }
 0x7c0   : > { %8724 = vmatprep.mubr.bf16.mxu0 %v17516_v11  ;;  %8744 = vmatpush1.bf16.msra.mxu0 %v13843_v18  ;;  %v13875_v18 = vld [vmem:[#allocation21 + $0x8ec] ss:$20 sps:$4 sm:$0xff]  }
 0x7c1   : > { %9372 = vmatmul.mubr.bf16.gmra.mrb[56].mxu1 %v17515_v24  ;;  %8745 = vmatprep.subr.bf16.mxu0 %v13851_v5  ;;  %v13870_v5 = vld [vmem:[#allocation21 + $0x8c8] ss:$20 sps:$4 sm:$0xff]  }
 0x7c2   : > { %9381 = vmatprep.mubr.bf16.mxu1 %v17516_v11  ;;  %9401 = vmatpush1.bf16.msra.mxu1 %v13846_v8  ;;  %v13878_v8 = vld [vmem:[#allocation21 + $0x8f4] ss:$20 sps:$4 sm:$0xff]  }
 0x7c3   : > { %9402 = vmatprep.subr.bf16.mxu1 %v13854_v22  ;;  %v13873_v22 = vld [vmem:[#allocation21 + $0x8e8] ss:$20 sps:$4 sm:$0xff]  }
 0x7c4   : > { %8746 = vmatpush1.bf16.msra.mxu0 %v13849_v9  ;;  %v13881_v9 = vld [vmem:[#allocation21 + $0x914] ss:$20 sps:$4 sm:$0xff]  }
 0x7c5   : > { %8747 = vmatprep.subr.bf16.mxu0 %v13857_v32  ;;  %v13876_v32 = vld [vmem:[#allocation21 + $0x8f0] ss:$20 sps:$4 sm:$0xff]  }
 0x7c6   : > { %9403 = vmatpush1.bf16.msra.mxu1 %v13852_v0  ;;  %v13884_v0 = vld [vmem:[#allocation21 + $0x91c] ss:$20 sps:$4 sm:$0xff]  }
 0x7c7   : > { %8725 = vmatmul.mubr.bf16.gmra.mrb[36].mxu0 %v16797_v58  ;;  %9404 = vmatprep.subr.bf16.mxu1 %v13860_v38  ;;  %v13879_v38 = vld [vmem:[#allocation21 + $0x910] ss:$20 sps:$4 sm:$0xff]  }
 0x7c8   : > { %8748 = vmatpush1.bf16.msra.mxu0 %v13855_v21  ;;  %11705 = vmatprep.mubr.msk.bf16.mxu0 %vm16128_vm7, %v16801_v26  ;;  %v13887_v21 = vld [vmem:[#allocation21 + $0x93c] ss:$20 sps:$4 sm:$0xff]  }
 0x7c9   : > { %9382 = vmatmul.mubr.bf16.gmra.mrb[60].mxu1 %v16797_v58  ;;  %8749 = vmatprep.subr.bf16.mxu0 %v13863_v47  ;;  %v13882_v47 = vld [vmem:[#allocation21 + $0x918] ss:$20 sps:$4 sm:$0xff]  }
 0x7ca   : > { %9405 = vmatpush1.bf16.msra.mxu1 %v13858_v7  ;;  %11825 = vmatprep.mubr.msk.bf16.mxu1 %vm16128_vm7, %v16801_v26  ;;  %v13890_v7 = vld [vmem:[#allocation21 + $0x944] ss:$20 sps:$4 sm:$0xff]  }
 0x7cb   : > { %9406 = vmatprep.subr.bf16.mxu1 %v13866_v37  ;;  %v13885_v37 = vld [vmem:[#allocation21 + $0x938] ss:$20 sps:$4 sm:$0xff]  }
 0x7cc   : > { %8750 = vmatpush1.bf16.msra.mxu0 %v13861_v30  ;;  %v13893_v30 = vld [vmem:[#allocation21 + $0x964] ss:$20 sps:$4 sm:$0xff]  }
 0x7cd   : > { %8751 = vmatprep.subr.bf16.mxu0 %v13869_v53  ;;  %v13888_v53 = vld [vmem:[#allocation21 + $0x940] ss:$20 sps:$4 sm:$0xff]  }
 0x7ce   : > { %9407 = vmatpush1.bf16.msra.mxu1 %v13864_v3  ;;  %v13896_v3 = vld [vmem:[#allocation21 + $0x96c] ss:$20 sps:$4 sm:$0xff]  }
 0x7cf   : > { %9408 = vmatprep.subr.bf16.mxu1 %v13872_v44  ;;  %v13891_v44 = vld [vmem:[#allocation21 + $0x960] ss:$20 sps:$4 sm:$0xff]  }
 0x7d0   : > { %8752 = vmatpush1.bf16.msra.mxu0 %v13867_v61  ;;  %v13899_v61 = vld [vmem:[#allocation21 + $0x98c] ss:$20 sps:$4 sm:$0xff]  }
 0x7d1   : > { %8753 = vmatprep.subr.bf16.mxu0 %v13875_v18  ;;  %v13894_v18 = vld [vmem:[#allocation21 + $0x968] ss:$20 sps:$4 sm:$0xff]  }
 0x7d2   : > { %9409 = vmatpush1.bf16.msra.mxu1 %v13870_v5  ;;  %v13902_v5 = vld [vmem:[#allocation21 + $0x994] ss:$20 sps:$4 sm:$0xff]  }
 0x7d3   : > { %9410 = vmatprep.subr.bf16.mxu1 %v13878_v8  ;;  %v13897_v8 = vld [vmem:[#allocation21 + $0x988] ss:$20 sps:$4 sm:$0xff]  }
 0x7d4   : > { %8754 = vmatpush1.bf16.msra.mxu0 %v13873_v22  ;;  %v13905_v22 = vld [vmem:[#allocation21 + $0x9b4] ss:$20 sps:$4 sm:$0xff]  }
 0x7d5   : > { %8755 = vmatprep.subr.bf16.mxu0 %v13881_v9  ;;  %v13900_v9 = vld [vmem:[#allocation21 + $0x990] ss:$20 sps:$4 sm:$0xff]  }
 0x7d6   : > { %9411 = vmatpush1.bf16.msra.mxu1 %v13876_v32  ;;  %v13908_v32 = vld [vmem:[#allocation21 + $0x9bc] ss:$20 sps:$4 sm:$0xff]  }
 0x7d7   : > { %9412 = vmatprep.subr.bf16.mxu1 %v13884_v0  ;;  %v13903_v0 = vld [vmem:[#allocation21 + $0x9b0] ss:$20 sps:$4 sm:$0xff]  }
 0x7d8   : > { %8756 = vmatpush1.bf16.msra.mxu0 %v13879_v38  ;;  %v13911_v38 = vld [vmem:[#allocation21 + $0x9dc] ss:$20 sps:$4 sm:$0xff]  }
 0x7d9   : > { %8757 = vmatprep.subr.bf16.mxu0 %v13887_v21  ;;  %v13906_v21 = vld [vmem:[#allocation21 + $0x9b8] ss:$20 sps:$4 sm:$0xff]  }
 0x7da   : > { %9413 = vmatpush1.bf16.msra.mxu1 %v13882_v47  ;;  %v13914_v47 = vld [vmem:[#allocation21 + $0x9e4] ss:$20 sps:$4 sm:$0xff]  }
 0x7db   : > { %9414 = vmatprep.subr.bf16.mxu1 %v13890_v7  ;;  %v13909_v7 = vld [vmem:[#allocation21 + $0x9d8] ss:$20 sps:$4 sm:$0xff]  }
 0x7dc   : > { %8758 = vmatpush1.bf16.msra.mxu0 %v13885_v37  ;;  %v13917_v37 = vld [vmem:[#allocation21 + $0xa04] ss:$20 sps:$4 sm:$0xff]  }
 0x7dd   : > { %8759 = vmatprep.subr.bf16.mxu0 %v13893_v30  ;;  %v13912_v30 = vld [vmem:[#allocation21 + $0x9e0] ss:$20 sps:$4 sm:$0xff]  }
 0x7de   : > { %9415 = vmatpush1.bf16.msra.mxu1 %v13888_v53  ;;  %v13920_v53 = vld [vmem:[#allocation21 + $0xa0c] ss:$20 sps:$4 sm:$0xff]  }
 0x7df   : > { %9416 = vmatprep.subr.bf16.mxu1 %v13896_v3  ;;  %v13915_v3 = vld [vmem:[#allocation21 + $0xa00] ss:$20 sps:$4 sm:$0xff]  }
 0x7e0   : > { %8760 = vmatpush1.bf16.msra.mxu0 %v13891_v44  ;;  %v13923_v44 = vld [vmem:[#allocation21 + $0xa2c] ss:$20 sps:$4 sm:$0xff]  }
 0x7e1   : > { %8761 = vmatprep.subr.bf16.mxu0 %v13899_v61  ;;  %v13918_v61 = vld [vmem:[#allocation21 + $0xa08] ss:$20 sps:$4 sm:$0xff]  }
 0x7e2   : > { %9417 = vmatpush1.bf16.msra.mxu1 %v13894_v18  ;;  %v17518_v18 = vld [vmem:[#allocation40_spill] sm:$0xff] }
 0x7e3   : > { %9418 = vmatprep.subr.bf16.mxu1 %v13902_v5  ;;  %v13926_v5 = vld [vmem:[#allocation21 + $0xa34] ss:$20 sps:$4 sm:$0xff]  }
 0x7e4   : > { %8762 = vmatpush1.bf16.msra.mxu0 %v13897_v8  ;;  %v13921_v8 = vld [vmem:[#allocation21 + $0xa28] ss:$20 sps:$4 sm:$0xff]  }
 0x7e5   : > { %8763 = vmatprep.subr.bf16.mxu0 %v13905_v22  ;;  %v13929_v22 = vld [vmem:[#allocation21 + $0xa54] ss:$20 sps:$4 sm:$0xff]  }
 0x7e6   : > { %9419 = vmatpush1.bf16.msra.mxu1 %v13900_v9  ;;  %v13924_v9 = vld [vmem:[#allocation21 + $0xa30] ss:$20 sps:$4 sm:$0xff]  }
 0x7e7   : > { %9420 = vmatprep.subr.bf16.mxu1 %v13908_v32  ;;  %v13932_v32 = vld [vmem:[#allocation21 + $0xa5c] ss:$20 sps:$4 sm:$0xff]  }
 0x7e8   : > { %8764 = vmatpush1.bf16.msra.mxu0 %v13903_v0  ;;  %v13927_v0 = vld [vmem:[#allocation21 + $0xa50] ss:$20 sps:$4 sm:$0xff]  }
 0x7e9   : > { %8765 = vmatprep.subr.bf16.mxu0 %v13911_v38  ;;  %v13935_v38 = vld [vmem:[#allocation21 + $0xa7c] ss:$20 sps:$4 sm:$0xff]  }
 0x7ea   : > { %9421 = vmatpush1.bf16.msra.mxu1 %v13906_v21  ;;  %v13930_v21 = vld [vmem:[#allocation21 + $0xa58] ss:$20 sps:$4 sm:$0xff]  }
 0x7eb   : > { %9422 = vmatprep.subr.bf16.mxu1 %v13914_v47  ;;  %v13938_v47 = vld [vmem:[#allocation21 + $0xa84] ss:$20 sps:$4 sm:$0xff]  }
 0x7ec   : > { %8766 = vmatpush1.bf16.msra.mxu0 %v13909_v7  ;;  %v13933_v7 = vld [vmem:[#allocation21 + $0xa78] ss:$20 sps:$4 sm:$0xff]  }
 0x7ed   : > { %8808 = vmatprep.subr.bf16.mxu0 %v13917_v37  ;;  %v13941_v37 = vld [vmem:[#allocation21 + $0xaa4] ss:$20 sps:$4 sm:$0xff]  }
 0x7ee   : > { %9423 = vmatpush1.bf16.msra.mxu1 %v13912_v30  ;;  %v13936_v30 = vld [vmem:[#allocation21 + $0xa80] ss:$20 sps:$4 sm:$0xff]  }
 0x7ef   : > { %11710 = vmatmul.mubr.msk.bf16.vlgmr.msra.gmra.mrb[24].mxu0 %vm16128_vm7, %v17518_v18  ;;  %9465 = vmatprep.subr.bf16.mxu1 %v13920_v53  ;;  %v13944_v53 = vld [vmem:[#allocation21 + $0xaac] ss:$20 sps:$4 sm:$0xff]  }
 0x7f0   : > { %11715 = vmatprep.mubr.msk.bf16.mxu0 %vm16128_vm7, %v16805_v34  ;;  %8809 = vmatpush1.bf16.msra.mxu0 %v13915_v3  ;;  %v13939_v3 = vld [vmem:[#allocation21 + $0xaa0] ss:$20 sps:$4 sm:$0xff]  }
 0x7f1   : > { %11830 = vmatmul.mubr.msk.bf16.vlgmr.msra.gmra.mrb[48].mxu1 %vm16128_vm7, %v17518_v18  ;;  %8810 = vmatprep.subr.bf16.mxu0 %v13923_v44  ;;  %v13947_v44 = vld [vmem:[#allocation21 + $0xacc] ss:$20 sps:$4 sm:$0xff]  }
 0x7f2   : > { %11835 = vmatprep.mubr.msk.bf16.mxu1 %vm16128_vm7, %v16805_v34  ;;  %9466 = vmatpush1.bf16.msra.mxu1 %v13918_v61  ;;  %v13942_v61 = vld [vmem:[#allocation21 + $0xaa8] ss:$20 sps:$4 sm:$0xff]  }
 0x7f3   : > { %9467 = vmatprep.subr.bf16.mxu1 %v13926_v5  ;;  %v13950_v5 = vld [vmem:[#allocation21 + $0xad4] ss:$20 sps:$4 sm:$0xff]  }
 0x7f4   : > { %8811 = vmatpush1.bf16.msra.mxu0 %v13921_v8  ;;  %v13945_v8 = vld [vmem:[#allocation21 + $0xac8] ss:$20 sps:$4 sm:$0xff]  }
 0x7f5   : > { %8812 = vmatprep.subr.bf16.mxu0 %v13929_v22  ;;  %v13953_v22 = vld [vmem:[#allocation21 + $0xaf4] ss:$20 sps:$4 sm:$0xff]  }
 0x7f6   : > { %9468 = vmatpush1.bf16.msra.mxu1 %v13924_v9  ;;  %v13948_v9 = vld [vmem:[#allocation21 + $0xad0] ss:$20 sps:$4 sm:$0xff]  }
 0x7f7   : > { %11720 = vmatmul.mubr.msk.bf16.gmra.mrb[28].mxu0 %vm16128_vm7, %v16809_v33  ;;  %9469 = vmatprep.subr.bf16.mxu1 %v13932_v32  ;;  %v13956_v32 = vld [vmem:[#allocation21 + $0xafc] ss:$20 sps:$4 sm:$0xff]  }
 0x7f8   : > { %11725 = vmatprep.mubr.msk.bf16.mxu0 %vm16128_vm7, %v16813_v49  ;;  %8813 = vmatpush1.bf16.msra.mxu0 %v13927_v0  ;;  %v13951_v0 = vld [vmem:[#allocation21 + $0xaf0] ss:$20 sps:$4 sm:$0xff]  }
 0x7f9   : > { %11840 = vmatmul.mubr.msk.bf16.gmra.mrb[52].mxu1 %vm16128_vm7, %v16809_v33  ;;  %8814 = vmatprep.subr.bf16.mxu0 %v13935_v38  ;;  %v13959_v38 = vld [vmem:[#allocation21 + $0xb1c] ss:$20 sps:$4 sm:$0xff]  }
 0x7fa   : > { %11845 = vmatprep.mubr.msk.bf16.mxu1 %vm16128_vm7, %v16813_v49  ;;  %9470 = vmatpush1.bf16.msra.mxu1 %v13930_v21  ;;  %v13954_v21 = vld [vmem:[#allocation21 + $0xaf8] ss:$20 sps:$4 sm:$0xff]  }
 0x7fb   : > { %9471 = vmatprep.subr.bf16.mxu1 %v13938_v47  ;;  %v13962_v47 = vld [vmem:[#allocation21 + $0xb24] ss:$20 sps:$4 sm:$0xff]  }
 0x7fc   : > { %8815 = vmatpush1.bf16.msra.mxu0 %v13933_v7  ;;  %v13957_v7 = vld [vmem:[#allocation21 + $0xb18] ss:$20 sps:$4 sm:$0xff]  }
 0x7fd   : > { %8816 = vmatprep.subr.bf16.mxu0 %v13941_v37  ;;  %v13965_v37 = vld [vmem:[#allocation21 + $0xb44] ss:$20 sps:$4 sm:$0xff]  }
 0x7fe   : > { %9472 = vmatpush1.bf16.msra.mxu1 %v13936_v30  ;;  %v13960_v30 = vld [vmem:[#allocation21 + $0xb20] ss:$20 sps:$4 sm:$0xff]  }
 0x7ff   : > { %11730 = vmatmul.mubr.msk.bf16.gmra.mrb[32].mxu0 %vm16128_vm7, %v16817_v15  ;;  %9473 = vmatprep.subr.bf16.mxu1 %v13944_v53  ;;  %v13968_v53 = vld [vmem:[#allocation21 + $0xb4c] ss:$20 sps:$4 sm:$0xff]  }
 0x800   : > { %11735 = vmatprep.mubr.msk.bf16.mxu0 %vm16128_vm7, %v16821_v63  ;;  %8817 = vmatpush1.bf16.msra.mxu0 %v13939_v3  ;;  %v13963_v3 = vld [vmem:[#allocation21 + $0xb40] ss:$20 sps:$4 sm:$0xff]  }
 0x801   : > { %11850 = vmatmul.mubr.msk.bf16.gmra.mrb[56].mxu1 %vm16128_vm7, %v16817_v15  ;;  %8818 = vmatprep.subr.bf16.mxu0 %v13947_v44  ;;  %v13971_v44 = vld [vmem:[#allocation21 + $0xb6c] ss:$20 sps:$4 sm:$0xff]  }
 0x802   : > { %11855 = vmatprep.mubr.msk.bf16.mxu1 %vm16128_vm7, %v16821_v63  ;;  %9474 = vmatpush1.bf16.msra.mxu1 %v13942_v61  ;;  %v13966_v61 = vld [vmem:[#allocation21 + $0xb48] ss:$20 sps:$4 sm:$0xff]  }
 0x803   : > { %9475 = vmatprep.subr.bf16.mxu1 %v13950_v5  ;;  %v13974_v5 = vld [vmem:[#allocation21 + $0xb74] ss:$20 sps:$4 sm:$0xff]  }
 0x804   : > { %8819 = vmatpush1.bf16.msra.mxu0 %v13945_v8  ;;  %v13969_v8 = vld [vmem:[#allocation21 + $0xb68] ss:$20 sps:$4 sm:$0xff]  }
 0x805   : > { %8820 = vmatprep.subr.bf16.mxu0 %v13953_v22  ;;  %v13977_v22 = vld [vmem:[#allocation21 + $0xb94] ss:$20 sps:$4 sm:$0xff]  }
 0x806   : > { %9476 = vmatpush1.bf16.msra.mxu1 %v13948_v9  ;;  %v13972_v9 = vld [vmem:[#allocation21 + $0xb70] ss:$20 sps:$4 sm:$0xff]  }
 0x807   : > { %11740 = vmatmul.mubr.msk.bf16.gmra.mrb[36].mxu0 %vm16128_vm7, %v16825_v60  ;;  %9477 = vmatprep.subr.bf16.mxu1 %v13956_v32  ;;  %v13980_v32 = vld [vmem:[#allocation21 + $0xb9c] ss:$20 sps:$4 sm:$0xff]  }
 0x808   : > { %8821 = vmatpush1.bf16.msra.mxu0 %v13951_v0  ;;  %8840 = vmatprep.mubr.bf16.mxu0 %v16829_v16  ;;  %v13975_v0 = vld [vmem:[#allocation21 + $0xb90] ss:$20 sps:$4 sm:$0xff]  }
 0x809   : > { %11860 = vmatmul.mubr.msk.bf16.gmra.mrb[60].mxu1 %vm16128_vm7, %v16825_v60  ;;  %8822 = vmatprep.subr.bf16.mxu0 %v13959_v38  ;;  %v13983_v38 = vld [vmem:[#allocation21 + $0xbbc] ss:$20 sps:$4 sm:$0xff]  }
 0x80a   : > { %9478 = vmatpush1.bf16.msra.mxu1 %v13954_v21  ;;  %9497 = vmatprep.mubr.bf16.mxu1 %v16829_v16  ;;  %v13978_v21 = vld [vmem:[#allocation21 + $0xb98] ss:$20 sps:$4 sm:$0xff]  }
 0x80b   : > { %9479 = vmatprep.subr.bf16.mxu1 %v13962_v47  ;;  %v13986_v47 = vld [vmem:[#allocation21 + $0xbc4] ss:$20 sps:$4 sm:$0xff]  }
 0x80c   : > { %8823 = vmatpush1.bf16.msra.mxu0 %v13957_v7  ;;  %v13981_v7 = vld [vmem:[#allocation21 + $0xbb8] ss:$20 sps:$4 sm:$0xff]  }
 0x80d   : > { %8824 = vmatprep.subr.bf16.mxu0 %v13965_v37  ;;  %v13989_v37 = vld [vmem:[#allocation21 + $0xbe4] ss:$20 sps:$4 sm:$0xff]  }
 0x80e   : > { %9480 = vmatpush1.bf16.msra.mxu1 %v13960_v30  ;;  %v13984_v30 = vld [vmem:[#allocation21 + $0xbc0] ss:$20 sps:$4 sm:$0xff]  }
 0x80f   : > { %9481 = vmatprep.subr.bf16.mxu1 %v13968_v53  ;;  %v13992_v53 = vld [vmem:[#allocation21 + $0xbec] ss:$20 sps:$4 sm:$0xff]  }
 0x810   : > { %8825 = vmatpush1.bf16.msra.mxu0 %v13963_v3  ;;  %v13987_v3 = vld [vmem:[#allocation21 + $0xbe0] ss:$20 sps:$4 sm:$0xff]  }
 0x811   : > { %8826 = vmatprep.subr.bf16.mxu0 %v13971_v44  ;;  %v13995_v44 = vld [vmem:[#allocation21 + $0xc0c] ss:$20 sps:$4 sm:$0xff]  }
 0x812   : > { %9482 = vmatpush1.bf16.msra.mxu1 %v13966_v61  ;;  %v13990_v61 = vld [vmem:[#allocation21 + $0xbe8] ss:$20 sps:$4 sm:$0xff]  }
 0x813   : > { %9483 = vmatprep.subr.bf16.mxu1 %v13974_v5  ;;  %v13998_v5 = vld [vmem:[#allocation21 + $0xc14] ss:$20 sps:$4 sm:$0xff]  }
 0x814   : > { %8827 = vmatpush1.bf16.msra.mxu0 %v13969_v8  ;;  %v13993_v8 = vld [vmem:[#allocation21 + $0xc08] ss:$20 sps:$4 sm:$0xff]  }
 0x815   : > { %8828 = vmatprep.subr.bf16.mxu0 %v13977_v22  ;;  %v14001_v22 = vld [vmem:[#allocation21 + $0xc34] ss:$20 sps:$4 sm:$0xff]  }
 0x816   : > { %9484 = vmatpush1.bf16.msra.mxu1 %v13972_v9  ;;  %v13996_v9 = vld [vmem:[#allocation21 + $0xc10] ss:$20 sps:$4 sm:$0xff]  }
 0x817   : > { %9485 = vmatprep.subr.bf16.mxu1 %v13980_v32  ;;  %v14004_v32 = vld [vmem:[#allocation21 + $0xc3c] ss:$20 sps:$4 sm:$0xff]  }
 0x818   : > { %8829 = vmatpush1.bf16.msra.mxu0 %v13975_v0  ;;  %v13999_v0 = vld [vmem:[#allocation21 + $0xc30] ss:$20 sps:$4 sm:$0xff]  }
 0x819   : > { %8830 = vmatprep.subr.bf16.mxu0 %v13983_v38  ;;  %v14007_v38 = vld [vmem:[#allocation21 + $0xc5c] ss:$20 sps:$4 sm:$0xff]  }
 0x81a   : > { %9486 = vmatpush1.bf16.msra.mxu1 %v13978_v21  ;;  %v14002_v21 = vld [vmem:[#allocation21 + $0xc38] ss:$20 sps:$4 sm:$0xff]  }
 0x81b   : > { %9487 = vmatprep.subr.bf16.mxu1 %v13986_v47  ;;  %v14010_v47 = vld [vmem:[#allocation21 + $0xc64] ss:$20 sps:$4 sm:$0xff]  }
 0x81c   : > { %8831 = vmatpush1.bf16.msra.mxu0 %v13981_v7  ;;  %v14005_v7 = vld [vmem:[#allocation21 + $0xc58] ss:$20 sps:$4 sm:$0xff]  }
 0x81d   : > { %8832 = vmatprep.subr.bf16.mxu0 %v13989_v37  ;;  %v14013_v37 = vld [vmem:[#allocation21 + $0xc84] ss:$20 sps:$4 sm:$0xff]  }
 0x81e   : > { %9488 = vmatpush1.bf16.msra.mxu1 %v13984_v30  ;;  %v14008_v30 = vld [vmem:[#allocation21 + $0xc60] ss:$20 sps:$4 sm:$0xff]  }
 0x81f   : > { %9489 = vmatprep.subr.bf16.mxu1 %v13992_v53  ;;  %v14016_v53 = vld [vmem:[#allocation21 + $0xc8c] ss:$20 sps:$4 sm:$0xff]  }
 0x820   : > { %8833 = vmatpush1.bf16.msra.mxu0 %v13987_v3  ;;  %v14011_v3 = vld [vmem:[#allocation21 + $0xc80] ss:$20 sps:$4 sm:$0xff]  }
 0x821   : > { %8834 = vmatprep.subr.bf16.mxu0 %v13995_v44  ;;  %v14019_v44 = vld [vmem:[#allocation21 + $0xcac] ss:$20 sps:$4 sm:$0xff]  }
 0x822   : > { %9490 = vmatpush1.bf16.msra.mxu1 %v13990_v61  ;;  %v14014_v61 = vld [vmem:[#allocation21 + $0xc88] ss:$20 sps:$4 sm:$0xff]  }
 0x823   : > { %9491 = vmatprep.subr.bf16.mxu1 %v13998_v5  ;;  %v14022_v5 = vld [vmem:[#allocation21 + $0xcb4] ss:$20 sps:$4 sm:$0xff]  }
 0x824   : > { %8835 = vmatpush1.bf16.msra.mxu0 %v13993_v8  ;;  %v14017_v8 = vld [vmem:[#allocation21 + $0xca8] ss:$20 sps:$4 sm:$0xff]  }
 0x825   : > { %8836 = vmatprep.subr.bf16.mxu0 %v14001_v22  ;;  %v14025_v22 = vld [vmem:[#allocation21 + $0xcd4] ss:$20 sps:$4 sm:$0xff]  }
 0x826   : > { %9492 = vmatpush1.bf16.msra.mxu1 %v13996_v9  ;;  %v14020_v9 = vld [vmem:[#allocation21 + $0xcb0] ss:$20 sps:$4 sm:$0xff]  }
 0x827   : > { %9493 = vmatprep.subr.bf16.mxu1 %v14004_v32  ;;  %v14028_v32 = vld [vmem:[#allocation21 + $0xcdc] ss:$20 sps:$4 sm:$0xff]  }
 0x828   : > { %8837 = vmatpush1.bf16.msra.mxu0 %v13999_v0  ;;  %v14023_v0 = vld [vmem:[#allocation21 + $0xcd0] ss:$20 sps:$4 sm:$0xff]  }
 0x829   : > { %8838 = vmatprep.subr.bf16.mxu0 %v14007_v38  ;;  %v14031_v38 = vld [vmem:[#allocation21 + $0xcfc] ss:$20 sps:$4 sm:$0xff]  }
 0x82a   : > { %9494 = vmatpush1.bf16.msra.mxu1 %v14002_v21  ;;  %v14026_v21 = vld [vmem:[#allocation21 + $0xcd8] ss:$20 sps:$4 sm:$0xff]  }
 0x82b   : > { %9495 = vmatprep.subr.bf16.mxu1 %v14010_v47  ;;  %v14034_v47 = vld [vmem:[#allocation21 + $0xd04] ss:$20 sps:$4 sm:$0xff]  }
 0x82c   : > { %8839 = vmatpush1.bf16.msra.mxu0 %v14005_v7  ;;  %v14029_v7 = vld [vmem:[#allocation21 + $0xcf8] ss:$20 sps:$4 sm:$0xff]  }
 0x82d   : > { %8881 = vmatprep.subr.bf16.mxu0 %v14013_v37  ;;  %v14037_v37 = vld [vmem:[#allocation21 + $0xd24] ss:$20 sps:$4 sm:$0xff]  }
 0x82e   : > { %9496 = vmatpush1.bf16.msra.mxu1 %v14008_v30  ;;  %v14032_v30 = vld [vmem:[#allocation21 + $0xd00] ss:$20 sps:$4 sm:$0xff]  }
 0x82f   : > { %8841 = vmatmul.mubr.bf16.vlgmr.msra.gmra.mrb[24].mxu0 %v16833_v39  ;;  %9538 = vmatprep.subr.bf16.mxu1 %v14016_v53  ;;  %v14040_v53 = vld [vmem:[#allocation21 + $0xd2c] ss:$20 sps:$4 sm:$0xff]  }
 0x830   : > { %8850 = vmatprep.mubr.bf16.mxu0 %v16837_v43  ;;  %8882 = vmatpush1.bf16.msra.mxu0 %v14011_v3  ;;  %v14035_v3 = vld [vmem:[#allocation21 + $0xd20] ss:$20 sps:$4 sm:$0xff]  }
 0x831   : > { %9498 = vmatmul.mubr.bf16.vlgmr.msra.gmra.mrb[48].mxu1 %v16833_v39  ;;  %8883 = vmatprep.subr.bf16.mxu0 %v14019_v44  ;;  %v14043_v44 = vld [vmem:[#allocation21 + $0xd4c] ss:$20 sps:$4 sm:$0xff]  }
 0x832   : > { %9507 = vmatprep.mubr.bf16.mxu1 %v16837_v43  ;;  %9539 = vmatpush1.bf16.msra.mxu1 %v14014_v61  ;;  %v14038_v61 = vld [vmem:[#allocation21 + $0xd28] ss:$20 sps:$4 sm:$0xff]  }
 0x833   : > { %9540 = vmatprep.subr.bf16.mxu1 %v14022_v5  ;;  %v14046_v5 = vld [vmem:[#allocation21 + $0xd54] ss:$20 sps:$4 sm:$0xff]  }
 0x834   : > { %8884 = vmatpush1.bf16.msra.mxu0 %v14017_v8  ;;  %v14041_v8 = vld [vmem:[#allocation21 + $0xd48] ss:$20 sps:$4 sm:$0xff]  }
 0x835   : > { %8885 = vmatprep.subr.bf16.mxu0 %v14025_v22  ;;  %v14049_v22 = vld [vmem:[#allocation21 + $0xd74] ss:$20 sps:$4 sm:$0xff]  }
 0x836   : > { %9541 = vmatpush1.bf16.msra.mxu1 %v14020_v9  ;;  %v14044_v9 = vld [vmem:[#allocation21 + $0xd50] ss:$20 sps:$4 sm:$0xff]  }
 0x837   : > { %8851 = vmatmul.mubr.bf16.gmra.mrb[28].mxu0 %v16841_v14  ;;  %9542 = vmatprep.subr.bf16.mxu1 %v14028_v32  ;;  %v14052_v32 = vld [vmem:[#allocation21 + $0xd7c] ss:$20 sps:$4 sm:$0xff]  }
 0x838   : > { %8860 = vmatprep.mubr.bf16.mxu0 %v16845_v23  ;;  %8886 = vmatpush1.bf16.msra.mxu0 %v14023_v0  ;;  %v14047_v0 = vld [vmem:[#allocation21 + $0xd70] ss:$20 sps:$4 sm:$0xff]  }
 0x839   : > { %9508 = vmatmul.mubr.bf16.gmra.mrb[52].mxu1 %v16841_v14  ;;  %8887 = vmatprep.subr.bf16.mxu0 %v14031_v38  ;;  %v14055_v38 = vld [vmem:[#allocation21 + $0xd9c] ss:$20 sps:$4 sm:$0xff]  }
 0x83a   : > { %9517 = vmatprep.mubr.bf16.mxu1 %v16845_v23  ;;  %9543 = vmatpush1.bf16.msra.mxu1 %v14026_v21  ;;  %v14050_v21 = vld [vmem:[#allocation21 + $0xd78] ss:$20 sps:$4 sm:$0xff]  }
 0x83b   : > { %9544 = vmatprep.subr.bf16.mxu1 %v14034_v47  ;;  %v14058_v47 = vld [vmem:[#allocation21 + $0xda4] ss:$20 sps:$4 sm:$0xff]  }
 0x83c   : > { %8888 = vmatpush1.bf16.msra.mxu0 %v14029_v7  ;;  %v14053_v7 = vld [vmem:[#allocation21 + $0xd98] ss:$20 sps:$4 sm:$0xff]  }
 0x83d   : > { %8889 = vmatprep.subr.bf16.mxu0 %v14037_v37  ;;  %v14061_v37 = vld [vmem:[#allocation21 + $0xdc4] ss:$20 sps:$4 sm:$0xff]  }
 0x83e   : > { %9545 = vmatpush1.bf16.msra.mxu1 %v14032_v30  ;;  %v14056_v30 = vld [vmem:[#allocation21 + $0xda0] ss:$20 sps:$4 sm:$0xff]  }
 0x83f   : > { %8861 = vmatmul.mubr.bf16.gmra.mrb[32].mxu0 %v16849_v62  ;;  %9546 = vmatprep.subr.bf16.mxu1 %v14040_v53  ;;  %v14064_v53 = vld [vmem:[#allocation21 + $0xdcc] ss:$20 sps:$4 sm:$0xff]  }
 0x840   : > { %8870 = vmatprep.mubr.bf16.mxu0 %v16885_v50  ;;  %8890 = vmatpush1.bf16.msra.mxu0 %v14035_v3  ;;  %v14059_v3 = vld [vmem:[#allocation21 + $0xdc0] ss:$20 sps:$4 sm:$0xff]  }
 0x841   : > { %9518 = vmatmul.mubr.bf16.gmra.mrb[56].mxu1 %v16849_v62  ;;  %8891 = vmatprep.subr.bf16.mxu0 %v14043_v44  ;;  %v14067_v44 = vld [vmem:[#allocation21 + $0xdec] ss:$20 sps:$4 sm:$0xff]  }
 0x842   : > { %9527 = vmatprep.mubr.bf16.mxu1 %v16885_v50  ;;  %9547 = vmatpush1.bf16.msra.mxu1 %v14038_v61  ;;  %v14062_v61 = vld [vmem:[#allocation21 + $0xdc8] ss:$20 sps:$4 sm:$0xff]  }
 0x843   : > { %9548 = vmatprep.subr.bf16.mxu1 %v14046_v5  ;;  %v14070_v5 = vld [vmem:[#allocation21 + $0xdf4] ss:$20 sps:$4 sm:$0xff]  }
 0x844   : > { %8892 = vmatpush1.bf16.msra.mxu0 %v14041_v8  ;;  %v14065_v8 = vld [vmem:[#allocation21 + $0xde8] ss:$20 sps:$4 sm:$0xff]  }
 0x845   : > { %8893 = vmatprep.subr.bf16.mxu0 %v14049_v22  ;;  %v14073_v22 = vld [vmem:[#allocation21 + $0xe14] ss:$20 sps:$4 sm:$0xff]  }
 0x846   : > { %9549 = vmatpush1.bf16.msra.mxu1 %v14044_v9  ;;  %v14068_v9 = vld [vmem:[#allocation21 + $0xdf0] ss:$20 sps:$4 sm:$0xff]  }
 0x847   : > { %8871 = vmatmul.mubr.bf16.gmra.mrb[36].mxu0 %v16893_v56  ;;  %9550 = vmatprep.subr.bf16.mxu1 %v14052_v32  ;;  %v14076_v32 = vld [vmem:[#allocation21 + $0xe1c] ss:$20 sps:$4 sm:$0xff]  }
 0x848   : > { %8894 = vmatpush1.bf16.msra.mxu0 %v14047_v0  ;;  %8913 = vmatprep.mubr.bf16.mxu0 %v16858_v27  ;;  %v14071_v0 = vld [vmem:[#allocation21 + $0xe10] ss:$20 sps:$4 sm:$0xff]  }
 0x849   : > { %9528 = vmatmul.mubr.bf16.gmra.mrb[60].mxu1 %v16893_v56  ;;  %8895 = vmatprep.subr.bf16.mxu0 %v14055_v38  ;;  %v14079_v38 = vld [vmem:[#allocation21 + $0xe3c] ss:$20 sps:$4 sm:$0xff]  }
 0x84a   : > { %9551 = vmatpush1.bf16.msra.mxu1 %v14050_v21  ;;  %9570 = vmatprep.mubr.bf16.mxu1 %v16858_v27  ;;  %v14074_v21 = vld [vmem:[#allocation21 + $0xe18] ss:$20 sps:$4 sm:$0xff]  }
 0x84b   : > { %9552 = vmatprep.subr.bf16.mxu1 %v14058_v47  ;;  %v14082_v47 = vld [vmem:[#allocation21 + $0xe44] ss:$20 sps:$4 sm:$0xff]  }
 0x84c   : > { %8896 = vmatpush1.bf16.msra.mxu0 %v14053_v7  ;;  %v14077_v7 = vld [vmem:[#allocation21 + $0xe38] ss:$20 sps:$4 sm:$0xff]  }
 0x84d   : > { %8897 = vmatprep.subr.bf16.mxu0 %v14061_v37  ;;  %v14085_v37 = vld [vmem:[#allocation21 + $0xe64] ss:$20 sps:$4 sm:$0xff]  }
 0x84e   : > { %9553 = vmatpush1.bf16.msra.mxu1 %v14056_v30  ;;  %v14080_v30 = vld [vmem:[#allocation21 + $0xe40] ss:$20 sps:$4 sm:$0xff]  }
 0x84f   : > { %9554 = vmatprep.subr.bf16.mxu1 %v14064_v53  ;;  %v14088_v53 = vld [vmem:[#allocation21 + $0xe6c] ss:$20 sps:$4 sm:$0xff]  }
 0x850   : > { %8898 = vmatpush1.bf16.msra.mxu0 %v14059_v3  ;;  %v14083_v3 = vld [vmem:[#allocation21 + $0xe60] ss:$20 sps:$4 sm:$0xff]  }
 0x851   : > { %8899 = vmatprep.subr.bf16.mxu0 %v14067_v44  ;;  %v14091_v44 = vld [vmem:[#allocation21 + $0xe8c] ss:$20 sps:$4 sm:$0xff]  }
 0x852   : > { %9555 = vmatpush1.bf16.msra.mxu1 %v14062_v61  ;;  %v14086_v61 = vld [vmem:[#allocation21 + $0xe68] ss:$20 sps:$4 sm:$0xff]  }
 0x853   : > { %9556 = vmatprep.subr.bf16.mxu1 %v14070_v5  ;;  %v14094_v5 = vld [vmem:[#allocation21 + $0xe94] ss:$20 sps:$4 sm:$0xff]  }
 0x854   : > { %8900 = vmatpush1.bf16.msra.mxu0 %v14065_v8  ;;  %v14089_v8 = vld [vmem:[#allocation21 + $0xe88] ss:$20 sps:$4 sm:$0xff]  }
 0x855   : > { %8901 = vmatprep.subr.bf16.mxu0 %v14073_v22  ;;  %v14097_v22 = vld [vmem:[#allocation21 + $0xeb4] ss:$20 sps:$4 sm:$0xff]  }
 0x856   : > { %9557 = vmatpush1.bf16.msra.mxu1 %v14068_v9  ;;  %v14092_v9 = vld [vmem:[#allocation21 + $0xe90] ss:$20 sps:$4 sm:$0xff]  }
 0x857   : > { %9558 = vmatprep.subr.bf16.mxu1 %v14076_v32  ;;  %v14100_v32 = vld [vmem:[#allocation21 + $0xebc] ss:$20 sps:$4 sm:$0xff]  }
 0x858   : > { %8902 = vmatpush1.bf16.msra.mxu0 %v14071_v0  ;;  %v14095_v0 = vld [vmem:[#allocation21 + $0xeb0] ss:$20 sps:$4 sm:$0xff]  }
 0x859   : > { %8903 = vmatprep.subr.bf16.mxu0 %v14079_v38  ;;  %v14103_v38 = vld [vmem:[#allocation21 + $0xedc] ss:$20 sps:$4 sm:$0xff]  }
 0x85a   : > { %9559 = vmatpush1.bf16.msra.mxu1 %v14074_v21  ;;  %v14098_v21 = vld [vmem:[#allocation21 + $0xeb8] ss:$20 sps:$4 sm:$0xff]  }
 0x85b   : > { %9560 = vmatprep.subr.bf16.mxu1 %v14082_v47  ;;  %v14106_v47 = vld [vmem:[#allocation21 + $0xee4] ss:$20 sps:$4 sm:$0xff]  }
 0x85c   : > { %8904 = vmatpush1.bf16.msra.mxu0 %v14077_v7  ;;  %v14101_v7 = vld [vmem:[#allocation21 + $0xed8] ss:$20 sps:$4 sm:$0xff]  }
 0x85d   : > { %8905 = vmatprep.subr.bf16.mxu0 %v14085_v37  ;;  %v14109_v37 = vld [vmem:[#allocation21 + $0xf04] ss:$20 sps:$4 sm:$0xff]  }
 0x85e   : > { %9561 = vmatpush1.bf16.msra.mxu1 %v14080_v30  ;;  %v14104_v30 = vld [vmem:[#allocation21 + $0xee0] ss:$20 sps:$4 sm:$0xff]  }
 0x85f   : > { %9562 = vmatprep.subr.bf16.mxu1 %v14088_v53  ;;  %v14112_v53 = vld [vmem:[#allocation21 + $0xf0c] ss:$20 sps:$4 sm:$0xff]  }
 0x860   : > { %8906 = vmatpush1.bf16.msra.mxu0 %v14083_v3  ;;  %v14107_v3 = vld [vmem:[#allocation21 + $0xf00] ss:$20 sps:$4 sm:$0xff]  }
 0x861   : > { %8907 = vmatprep.subr.bf16.mxu0 %v14091_v44  ;;  %v14115_v44 = vld [vmem:[#allocation21 + $0xf2c] ss:$20 sps:$4 sm:$0xff]  }
 0x862   : > { %9563 = vmatpush1.bf16.msra.mxu1 %v14086_v61  ;;  %v14110_v61 = vld [vmem:[#allocation21 + $0xf08] ss:$20 sps:$4 sm:$0xff]  }
 0x863   : > { %9564 = vmatprep.subr.bf16.mxu1 %v14094_v5  ;;  %v14118_v5 = vld [vmem:[#allocation21 + $0xf34] ss:$20 sps:$4 sm:$0xff]  }
 0x864   : > { %8908 = vmatpush1.bf16.msra.mxu0 %v14089_v8  ;;  %v14113_v8 = vld [vmem:[#allocation21 + $0xf28] ss:$20 sps:$4 sm:$0xff]  }
 0x865   : > { %8909 = vmatprep.subr.bf16.mxu0 %v14097_v22  ;;  %v14121_v22 = vld [vmem:[#allocation21 + $0xf54] ss:$20 sps:$4 sm:$0xff]  }
 0x866   : > { %9565 = vmatpush1.bf16.msra.mxu1 %v14092_v9  ;;  %v14116_v9 = vld [vmem:[#allocation21 + $0xf30] ss:$20 sps:$4 sm:$0xff]  }
 0x867   : > { %9566 = vmatprep.subr.bf16.mxu1 %v14100_v32  ;;  %v14124_v32 = vld [vmem:[#allocation21 + $0xf5c] ss:$20 sps:$4 sm:$0xff]  }
 0x868   : > { %8910 = vmatpush1.bf16.msra.mxu0 %v14095_v0  ;;  %v14119_v0 = vld [vmem:[#allocation21 + $0xf50] ss:$20 sps:$4 sm:$0xff]  }
 0x869   : > { %8911 = vmatprep.subr.bf16.mxu0 %v14103_v38  ;;  %v14127_v38 = vld [vmem:[#allocation21 + $0xf7c] ss:$20 sps:$4 sm:$0xff]  }
 0x86a   : > { %9567 = vmatpush1.bf16.msra.mxu1 %v14098_v21  ;;  %v14122_v21 = vld [vmem:[#allocation21 + $0xf58] ss:$20 sps:$4 sm:$0xff]  }
 0x86b   : > { %9568 = vmatprep.subr.bf16.mxu1 %v14106_v47  ;;  %v14130_v47 = vld [vmem:[#allocation21 + $0xf84] ss:$20 sps:$4 sm:$0xff]  }
 0x86c   : > { %8912 = vmatpush1.bf16.msra.mxu0 %v14101_v7  ;;  %v14125_v7 = vld [vmem:[#allocation21 + $0xf78] ss:$20 sps:$4 sm:$0xff]  }
 0x86d   : > { %8954 = vmatprep.subr.bf16.mxu0 %v14109_v37  ;;  %v14133_v37 = vld [vmem:[#allocation21 + $0xfa4] ss:$20 sps:$4 sm:$0xff]  }
 0x86e   : > { %9569 = vmatpush1.bf16.msra.mxu1 %v14104_v30  ;;  %v14128_v30 = vld [vmem:[#allocation21 + $0xf80] ss:$20 sps:$4 sm:$0xff]  }
 0x86f   : > { %8914 = vmatmul.mubr.bf16.vlgmr.msra.gmra.mrb[24].mxu0 %v16862_v59  ;;  %9611 = vmatprep.subr.bf16.mxu1 %v14112_v53  ;;  %v14136_v53 = vld [vmem:[#allocation21 + $0xfac] ss:$20 sps:$4 sm:$0xff]  }
 0x870   : > { %8923 = vmatprep.mubr.bf16.mxu0 %v16866_v28  ;;  %8955 = vmatpush1.bf16.msra.mxu0 %v14107_v3  ;;  %v14131_v3 = vld [vmem:[#allocation21 + $0xfa0] ss:$20 sps:$4 sm:$0xff]  }
 0x871   : > { %9571 = vmatmul.mubr.bf16.vlgmr.msra.gmra.mrb[48].mxu1 %v16862_v59  ;;  %8956 = vmatprep.subr.bf16.mxu0 %v14115_v44  ;;  %v14139_v44 = vld [vmem:[#allocation21 + $0xfcc] ss:$20 sps:$4 sm:$0xff]  }
 0x872   : > { %9580 = vmatprep.mubr.bf16.mxu1 %v16866_v28  ;;  %9612 = vmatpush1.bf16.msra.mxu1 %v14110_v61  ;;  %v14134_v61 = vld [vmem:[#allocation21 + $0xfa8] ss:$20 sps:$4 sm:$0xff]  }
 0x873   : > { %9613 = vmatprep.subr.bf16.mxu1 %v14118_v5  ;;  %v14142_v5 = vld [vmem:[#allocation21 + $0xfd4] ss:$20 sps:$4 sm:$0xff]  }
 0x874   : > { %8957 = vmatpush1.bf16.msra.mxu0 %v14113_v8  ;;  %v14137_v8 = vld [vmem:[#allocation21 + $0xfc8] ss:$20 sps:$4 sm:$0xff]  }
 0x875   : > { %8958 = vmatprep.subr.bf16.mxu0 %v14121_v22  ;;  %v14145_v22 = vld [vmem:[#allocation21 + $0xff4] ss:$20 sps:$4 sm:$0xff]  }
 0x876   : > { %9614 = vmatpush1.bf16.msra.mxu1 %v14116_v9  ;;  %v14140_v9 = vld [vmem:[#allocation21 + $0xfd0] ss:$20 sps:$4 sm:$0xff]  }
 0x877   : > { %8924 = vmatmul.mubr.bf16.gmra.mrb[28].mxu0 %v16873_v10  ;;  %9615 = vmatprep.subr.bf16.mxu1 %v14124_v32  ;;  %v14148_v32 = vld [vmem:[#allocation21 + $0xffc] ss:$20 sps:$4 sm:$0xff]  }
 0x878   : > { %8933 = vmatprep.mubr.bf16.mxu0 %v16877_v31  ;;  %8959 = vmatpush1.bf16.msra.mxu0 %v14119_v0  ;;  %v14143_v0 = vld [vmem:[#allocation21 + $0xff0] ss:$20 sps:$4 sm:$0xff]  }
 0x879   : > { %9581 = vmatmul.mubr.bf16.gmra.mrb[52].mxu1 %v16873_v10  ;;  %8960 = vmatprep.subr.bf16.mxu0 %v14127_v38  ;;  %v14151_v38 = vld [vmem:[#allocation21 + $0x101c] ss:$20 sps:$4 sm:$0xff]  }
 0x87a   : > { %9590 = vmatprep.mubr.bf16.mxu1 %v16877_v31  ;;  %9616 = vmatpush1.bf16.msra.mxu1 %v14122_v21  ;;  %v14146_v21 = vld [vmem:[#allocation21 + $0xff8] ss:$20 sps:$4 sm:$0xff]  }
 0x87b   : > { %9617 = vmatprep.subr.bf16.mxu1 %v14130_v47  ;;  %v14154_v47 = vld [vmem:[#allocation21 + $0x1024] ss:$20 sps:$4 sm:$0xff]  }
 0x87c   : > { %8961 = vmatpush1.bf16.msra.mxu0 %v14125_v7  ;;  %v17519_v7 = vld [vmem:[#allocation43_spill] sm:$0xff] }
 0x87d   : > { %8962 = vmatprep.subr.bf16.mxu0 %v14133_v37  ;;  %v14149_v37 = vld [vmem:[#allocation21 + $0x1018] ss:$20 sps:$4 sm:$0xff]  }
 0x87e   : > { %9618 = vmatpush1.bf16.msra.mxu1 %v14128_v30  ;;  %v14157_v30 = vld [vmem:[#allocation21 + $0x1044] ss:$20 sps:$4 sm:$0xff]  }
 0x87f   : > { %8934 = vmatmul.mubr.bf16.gmra.mrb[32].mxu0 %v16881_v48  ;;  %9619 = vmatprep.subr.bf16.mxu1 %v14136_v53  ;;  %v14152_v53 = vld [vmem:[#allocation21 + $0x1020] ss:$20 sps:$4 sm:$0xff]  }
 0x880   : > { %8943 = vmatprep.mubr.bf16.mxu0 %v16900_v13  ;;  %8963 = vmatpush1.bf16.msra.mxu0 %v14131_v3  ;;  %v14160_v3 = vld [vmem:[#allocation21 + $0x104c] ss:$20 sps:$4 sm:$0xff]  }
 0x881   : > { %9591 = vmatmul.mubr.bf16.gmra.mrb[56].mxu1 %v16881_v48  ;;  %8964 = vmatprep.subr.bf16.mxu0 %v14139_v44  ;;  %v14155_v44 = vld [vmem:[#allocation21 + $0x1040] ss:$20 sps:$4 sm:$0xff]  }
 0x882   : > { %9600 = vmatprep.mubr.bf16.mxu1 %v16900_v13  ;;  %9620 = vmatpush1.bf16.msra.mxu1 %v14134_v61  ;;  %v14163_v61 = vld [vmem:[#allocation21 + $0x106c] ss:$20 sps:$4 sm:$0xff]   ;;  %v14238_v13 = vld [vmem:[#allocation21 + $0x1254] ss:$20 sps:$4 sm:$0xff]  }
 0x883   : > { %9621 = vmatprep.subr.bf16.mxu1 %v14142_v5  ;;  %v14158_v5 = vld [vmem:[#allocation21 + $0x1048] ss:$20 sps:$4 sm:$0xff]  }
 0x884   : > { %8965 = vmatpush1.bf16.msra.mxu0 %v14137_v8  ;;  %v14166_v8 = vld [vmem:[#allocation21 + $0x1074] ss:$20 sps:$4 sm:$0xff]  }
 0x885   : > { %8966 = vmatprep.subr.bf16.mxu0 %v14145_v22  ;;  %v14161_v22 = vld [vmem:[#allocation21 + $0x1068] ss:$20 sps:$4 sm:$0xff]  }
 0x886   : > { %9622 = vmatpush1.bf16.msra.mxu1 %v14140_v9  ;;  %v14169_v9 = vld [vmem:[#allocation21 + $0x1094] ss:$20 sps:$4 sm:$0xff]  }
 0x887   : > { %8944 = vmatmul.mubr.bf16.gmra.mrb[36].mxu0 %v16907_v42  ;;  %9623 = vmatprep.subr.bf16.mxu1 %v14148_v32  ;;  %v14164_v32 = vld [vmem:[#allocation21 + $0x1070] ss:$20 sps:$4 sm:$0xff]  }
 0x888   : > { %8967 = vmatpush1.bf16.msra.mxu0 %v14143_v0  ;;  %11745 = vmatprep.mubr.msk.bf16.mxu0 %vm16128_vm7, %v17519_v7  ;;  %v14172_v0 = vld [vmem:[#allocation21 + $0x109c] ss:$20 sps:$4 sm:$0xff]  }
 0x889   : > { %9601 = vmatmul.mubr.bf16.gmra.mrb[60].mxu1 %v16907_v42  ;;  %8968 = vmatprep.subr.bf16.mxu0 %v14151_v38  ;;  %v14167_v38 = vld [vmem:[#allocation21 + $0x1090] ss:$20 sps:$4 sm:$0xff]  }
 0x88a   : > { %9624 = vmatpush1.bf16.msra.mxu1 %v14146_v21  ;;  %11865 = vmatprep.mubr.msk.bf16.mxu1 %vm16128_vm7, %v17519_v7  ;;  %v14175_v21 = vld [vmem:[#allocation21 + $0x10bc] ss:$20 sps:$4 sm:$0xff]  }
 0x88b   : > { %9625 = vmatprep.subr.bf16.mxu1 %v14154_v47  ;;  %v14170_v47 = vld [vmem:[#allocation21 + $0x1098] ss:$20 sps:$4 sm:$0xff]  }
 0x88c   : > { %8969 = vmatpush1.bf16.msra.mxu0 %v14149_v37  ;;  %v14178_v37 = vld [vmem:[#allocation21 + $0x10c4] ss:$20 sps:$4 sm:$0xff]  }
 0x88d   : > { %8970 = vmatprep.subr.bf16.mxu0 %v14157_v30  ;;  %v14173_v30 = vld [vmem:[#allocation21 + $0x10b8] ss:$20 sps:$4 sm:$0xff]  }
 0x88e   : > { %9626 = vmatpush1.bf16.msra.mxu1 %v14152_v53  ;;  %v14181_v53 = vld [vmem:[#allocation21 + $0x10e4] ss:$20 sps:$4 sm:$0xff]  }
 0x88f   : > { %9627 = vmatprep.subr.bf16.mxu1 %v14160_v3  ;;  %v14176_v3 = vld [vmem:[#allocation21 + $0x10c0] ss:$20 sps:$4 sm:$0xff]  }
 0x890   : > { %8971 = vmatpush1.bf16.msra.mxu0 %v14155_v44  ;;  %v14184_v44 = vld [vmem:[#allocation21 + $0x10ec] ss:$20 sps:$4 sm:$0xff]  }
 0x891   : > { %8972 = vmatprep.subr.bf16.mxu0 %v14163_v61  ;;  %v14179_v61 = vld [vmem:[#allocation21 + $0x10e0] ss:$20 sps:$4 sm:$0xff]  }
 0x892   : > { %9628 = vmatpush1.bf16.msra.mxu1 %v14158_v5  ;;  %v14187_v5 = vld [vmem:[#allocation21 + $0x110c] ss:$20 sps:$4 sm:$0xff]  }
 0x893   : > { %9629 = vmatprep.subr.bf16.mxu1 %v14166_v8  ;;  %v14182_v8 = vld [vmem:[#allocation21 + $0x10e8] ss:$20 sps:$4 sm:$0xff]  }
 0x894   : > { %8973 = vmatpush1.bf16.msra.mxu0 %v14161_v22  ;;  %v14190_v22 = vld [vmem:[#allocation21 + $0x1114] ss:$20 sps:$4 sm:$0xff]  }
 0x895   : > { %8974 = vmatprep.subr.bf16.mxu0 %v14169_v9  ;;  %v14185_v9 = vld [vmem:[#allocation21 + $0x1108] ss:$20 sps:$4 sm:$0xff]  }
 0x896   : > { %9630 = vmatpush1.bf16.msra.mxu1 %v14164_v32  ;;  %v14193_v32 = vld [vmem:[#allocation21 + $0x1134] ss:$20 sps:$4 sm:$0xff]  }
 0x897   : > { %9631 = vmatprep.subr.bf16.mxu1 %v14172_v0  ;;  %v14188_v0 = vld [vmem:[#allocation21 + $0x1110] ss:$20 sps:$4 sm:$0xff]  }
 0x898   : > { %8975 = vmatpush1.bf16.msra.mxu0 %v14167_v38  ;;  %v14196_v38 = vld [vmem:[#allocation21 + $0x113c] ss:$20 sps:$4 sm:$0xff]  }
 0x899   : > { %8976 = vmatprep.subr.bf16.mxu0 %v14175_v21  ;;  %v14191_v21 = vld [vmem:[#allocation21 + $0x1130] ss:$20 sps:$4 sm:$0xff]  }
 0x89a   : > { %9632 = vmatpush1.bf16.msra.mxu1 %v14170_v47  ;;  %v14199_v47 = vld [vmem:[#allocation21 + $0x115c] ss:$20 sps:$4 sm:$0xff]  }
 0x89b   : > { %9633 = vmatprep.subr.bf16.mxu1 %v14178_v37  ;;  %v14194_v37 = vld [vmem:[#allocation21 + $0x1138] ss:$20 sps:$4 sm:$0xff]  }
 0x89c   : > { %8977 = vmatpush1.bf16.msra.mxu0 %v14173_v30  ;;  %v14202_v30 = vld [vmem:[#allocation21 + $0x1164] ss:$20 sps:$4 sm:$0xff]  }
 0x89d   : > { %8978 = vmatprep.subr.bf16.mxu0 %v14181_v53  ;;  %v14197_v53 = vld [vmem:[#allocation21 + $0x1158] ss:$20 sps:$4 sm:$0xff]  }
 0x89e   : > { %9634 = vmatpush1.bf16.msra.mxu1 %v14176_v3  ;;  %v14205_v3 = vld [vmem:[#allocation21 + $0x1184] ss:$20 sps:$4 sm:$0xff]  }
 0x89f   : > { %9635 = vmatprep.subr.bf16.mxu1 %v14184_v44  ;;  %v14200_v44 = vld [vmem:[#allocation21 + $0x1160] ss:$20 sps:$4 sm:$0xff]  }
 0x8a0   : > { %8979 = vmatpush1.bf16.msra.mxu0 %v14179_v61  ;;  %v14208_v61 = vld [vmem:[#allocation21 + $0x118c] ss:$20 sps:$4 sm:$0xff]  }
 0x8a1   : > { %8980 = vmatprep.subr.bf16.mxu0 %v14187_v5  ;;  %v14203_v5 = vld [vmem:[#allocation21 + $0x1180] ss:$20 sps:$4 sm:$0xff]  }
 0x8a2   : > { %9636 = vmatpush1.bf16.msra.mxu1 %v14182_v8  ;;  %v14211_v8 = vld [vmem:[#allocation21 + $0x11ac] ss:$20 sps:$4 sm:$0xff]  }
 0x8a3   : > { %9637 = vmatprep.subr.bf16.mxu1 %v14190_v22  ;;  %v14206_v22 = vld [vmem:[#allocation21 + $0x1188] ss:$20 sps:$4 sm:$0xff]  }
 0x8a4   : > { %8981 = vmatpush1.bf16.msra.mxu0 %v14185_v9  ;;  %v17520_v9 = vld [vmem:[#allocation42_spill] sm:$0xff] }
 0x8a5   : > { %8982 = vmatprep.subr.bf16.mxu0 %v14193_v32  ;;  %v14214_v32 = vld [vmem:[#allocation21 + $0x11b4] ss:$20 sps:$4 sm:$0xff]  }
 0x8a6   : > { %9638 = vmatpush1.bf16.msra.mxu1 %v14188_v0  ;;  %v17521_v0 = vld [vmem:[#allocation45_spill] sm:$0xff] }
 0x8a7   : > { %9639 = vmatprep.subr.bf16.mxu1 %v14196_v38  ;;  %v14209_v38 = vld [vmem:[#allocation21 + $0x11a8] ss:$20 sps:$4 sm:$0xff]  }
 0x8a8   : > { %8983 = vmatpush1.bf16.msra.mxu0 %v14191_v21  ;;  %v14217_v21 = vld [vmem:[#allocation21 + $0x11d4] ss:$20 sps:$4 sm:$0xff]  }
 0x8a9   : > { %8984 = vmatprep.subr.bf16.mxu0 %v14199_v47  ;;  %v14212_v47 = vld [vmem:[#allocation21 + $0x11b0] ss:$20 sps:$4 sm:$0xff]  }
 0x8aa   : > { %9640 = vmatpush1.bf16.msra.mxu1 %v14194_v37  ;;  %v14220_v37 = vld [vmem:[#allocation21 + $0x11dc] ss:$20 sps:$4 sm:$0xff]  }
 0x8ab   : > { %9641 = vmatprep.subr.bf16.mxu1 %v14202_v30  ;;  %v14215_v30 = vld [vmem:[#allocation21 + $0x11d0] ss:$20 sps:$4 sm:$0xff]  }
 0x8ac   : > { %8985 = vmatpush1.bf16.msra.mxu0 %v14197_v53  ;;  %v14223_v53 = vld [vmem:[#allocation21 + $0x11fc] ss:$20 sps:$4 sm:$0xff]  }
 0x8ad   : > { %9027 = vmatprep.subr.bf16.mxu0 %v14205_v3  ;;  %v14218_v3 = vld [vmem:[#allocation21 + $0x11d8] ss:$20 sps:$4 sm:$0xff]  }
 0x8ae   : > { %9642 = vmatpush1.bf16.msra.mxu1 %v14200_v44  ;;  %v17522_v44 = vld [vmem:[#allocation44_spill] sm:$0xff] }
 0x8af   : > { %11750 = vmatmul.mubr.msk.bf16.vlgmr.msra.gmra.mrb[24].mxu0 %vm16128_vm7, %v17520_v9  ;;  %9684 = vmatprep.subr.bf16.mxu1 %v14208_v61  ;;  %v14226_v61 = vld [vmem:[#allocation21 + $0x1204] ss:$20 sps:$4 sm:$0xff]  }
 0x8b0   : > { %11755 = vmatprep.mubr.msk.bf16.mxu0 %vm16128_vm7, %v17521_v0  ;;  %9028 = vmatpush1.bf16.msra.mxu0 %v14203_v5  ;;  %v17523_v5 = vld [vmem:[#allocation47_spill] sm:$0xff] }
 0x8b1   : > { %11870 = vmatmul.mubr.msk.bf16.vlgmr.msra.gmra.mrb[48].mxu1 %vm16128_vm7, %v17520_v9  ;;  %9029 = vmatprep.subr.bf16.mxu0 %v14211_v8  ;;  %v14221_v8 = vld [vmem:[#allocation21 + $0x11f8] ss:$20 sps:$4 sm:$0xff]  }
 0x8b2   : > { %11875 = vmatprep.mubr.msk.bf16.mxu1 %vm16128_vm7, %v17521_v0  ;;  %9685 = vmatpush1.bf16.msra.mxu1 %v14206_v22  ;;  %v14229_v22 = vld [vmem:[#allocation21 + $0x1224] ss:$20 sps:$4 sm:$0xff]  }
 0x8b3   : > { %9686 = vmatprep.subr.bf16.mxu1 %v14214_v32  ;;  %v14224_v32 = vld [vmem:[#allocation21 + $0x1200] ss:$20 sps:$4 sm:$0xff]  }
 0x8b4   : > { %9030 = vmatpush1.bf16.msra.mxu0 %v14209_v38  ;;  %v14232_v38 = vld [vmem:[#allocation21 + $0x122c] ss:$20 sps:$4 sm:$0xff]  }
 0x8b5   : > { %9031 = vmatprep.subr.bf16.mxu0 %v14217_v21  ;;  %v14227_v21 = vld [vmem:[#allocation21 + $0x1220] ss:$20 sps:$4 sm:$0xff]  }
 0x8b6   : > { %9687 = vmatpush1.bf16.msra.mxu1 %v14212_v47  ;;  %v14235_v47 = vld [vmem:[#allocation21 + $0x124c] ss:$20 sps:$4 sm:$0xff]  }
 0x8b7   : > { %11760 = vmatmul.mubr.msk.bf16.gmra.mrb[28].mxu0 %vm16128_vm7, %v17522_v44  ;;  %9688 = vmatprep.subr.bf16.mxu1 %v14220_v37  ;;  %v14230_v37 = vld [vmem:[#allocation21 + $0x1228] ss:$20 sps:$4 sm:$0xff]  }
 0x8b8   : > { %11765 = vmatprep.mubr.msk.bf16.mxu0 %vm16128_vm7, %v17523_v5  ;;  %9032 = vmatpush1.bf16.msra.mxu0 %v14215_v30  ;;  %v17524_v30 = vld [vmem:[#allocation34_spill] sm:$0xff] }
 0x8b9   : > { %11880 = vmatmul.mubr.msk.bf16.gmra.mrb[52].mxu1 %vm16128_vm7, %v17522_v44  ;;  %9033 = vmatprep.subr.bf16.mxu0 %v14223_v53  ;;  %v17063_v42 = vpack.c.bf16 %v17524_v30, %v16677_v41  ;;  %v17526_v53 = vld [vmem:[#allocation46_spill] sm:$0xff] }
 0x8ba   : > { %11885 = vmatprep.mubr.msk.bf16.mxu1 %vm16128_vm7, %v17523_v5  ;;  %9689 = vmatpush1.bf16.msra.mxu1 %v14218_v3  ;;  %v14233_v3 = vld [vmem:[#allocation21 + $0x1248] ss:$20 sps:$4 sm:$0xff]   ;;  %v14236_v41 = vld [vmem:[#allocation21 + $0x1250] ss:$20 sps:$4 sm:$0xff]  }
 0x8bb   : > { %9690 = vmatprep.subr.bf16.mxu1 %v14226_v61  ;;  %17525 = vst [vmem:[#allocation49_spill] sm:$0xff] %v17063_v42  ;;  %v14241_v61 = vld [vmem:[#allocation21 + $0x1274] ss:$20 sps:$4 sm:$0xff]  }
 0x8bc   : > { %9034 = vmatpush1.bf16.msra.mxu0 %v14221_v8  ;;  %v14244_v8 = vld [vmem:[#allocation21 + $0x127c] ss:$20 sps:$4 sm:$0xff]  }
 0x8bd   : > { %9035 = vmatprep.subr.bf16.mxu0 %v14229_v22  ;;  %v14239_v22 = vld [vmem:[#allocation21 + $0x1270] ss:$20 sps:$4 sm:$0xff]  }
 0x8be   : > { %9691 = vmatpush1.bf16.msra.mxu1 %v14224_v32  ;;  %v17079_v32 = vpack.c.bf16 %v17524_v30, %v16761_v29  ;;  %v14253_v29 = vld [vmem:[#allocation21 + $0x12c4] ss:$20 sps:$4 sm:$0xff]   ;;  %v14256_v30 = vld [vmem:[#allocation21 + $0x12cc] ss:$20 sps:$4 sm:$0xff]  }
 0x8bf   : > { %11770 = vmatmul.mubr.msk.bf16.gmra.mrb[32].mxu0 %vm16128_vm7, %v17526_v53  ;;  %9692 = vmatprep.subr.bf16.mxu1 %v14232_v38  ;;  %v14247_v38 = vld [vmem:[#allocation21 + $0x129c] ss:$20 sps:$4 sm:$0xff]  }
 0x8c0   : > { %11775 = vmatprep.mubr.msk.bf16.mxu0 %vm16128_vm7, %v17063_v42  ;;  %9036 = vmatpush1.bf16.msra.mxu0 %v14227_v21  ;;  %17527 = vst [vmem:[#allocation50_spill] sm:$0xff] %v17079_v32  ;;  %v14242_v21 = vld [vmem:[#allocation21 + $0x1278] ss:$20 sps:$4 sm:$0xff]  }
 0x8c1   : > { %11890 = vmatmul.mubr.msk.bf16.gmra.mrb[56].mxu1 %vm16128_vm7, %v17526_v53  ;;  %9037 = vmatprep.subr.bf16.mxu0 %v14235_v47  ;;  %v14250_v47 = vld [vmem:[#allocation21 + $0x12a4] ss:$20 sps:$4 sm:$0xff]  }
 0x8c2   : > { %11895 = vmatprep.mubr.msk.bf16.mxu1 %vm16128_vm7, %v17063_v42  ;;  %9693 = vmatpush1.bf16.msra.mxu1 %v14230_v37  ;;  %v14248_v37 = vld [vmem:[#allocation21 + $0x12a0] ss:$20 sps:$4 sm:$0xff]   ;;  %v14263_v42 = vld [vmem:[#allocation21 + $0x1310] ss:$20 sps:$4 sm:$0xff]  }
 0x8c3   : > { %9694 = vmatprep.subr.bf16.mxu1 %v14238_v13  ;;  %v14245_v13 = vld [vmem:[#allocation21 + $0x1298] ss:$20 sps:$4 sm:$0xff]  }
 0x8c4   : > { %9038 = vmatpush1.bf16.msra.mxu0 %v14233_v3  ;;  %v14251_v3 = vld [vmem:[#allocation21 + $0x12c0] ss:$20 sps:$4 sm:$0xff]  }
 0x8c5   : > { %9039 = vmatprep.subr.bf16.mxu0 %v14241_v61  ;;  %v14259_v61 = vld [vmem:[#allocation21 + $0x12ec] ss:$20 sps:$4 sm:$0xff]  }
 0x8c6   : > { %9695 = vmatpush1.bf16.msra.mxu1 %v14236_v41  ;;  %v14254_v41 = vld [vmem:[#allocation21 + $0x12c8] ss:$20 sps:$4 sm:$0xff]  }
 0x8c7   : > { %11780 = vmatmul.mubr.msk.bf16.gmra.mrb[36].mxu0 %vm16128_vm7, %v17079_v32  ;;  %9696 = vmatprep.subr.bf16.mxu1 %v14244_v8  ;;  %v14262_v8 = vld [vmem:[#allocation21 + $0x12f4] ss:$20 sps:$4 sm:$0xff]  }
 0x8c8   : > { %9040 = vmatpush1.bf16.msra.mxu0 %v14239_v22  ;;  %9059 = vmatprep.mubr.bf16.mxu0 %v16674_v52  ;;  %v14257_v22 = vld [vmem:[#allocation21 + $0x12e8] ss:$20 sps:$4 sm:$0xff]  }
 0x8c9   : > { %11900 = vmatmul.mubr.msk.bf16.gmra.mrb[60].mxu1 %vm16128_vm7, %v17079_v32  ;;  %9041 = vmatprep.subr.bf16.mxu0 %v14247_v38  ;;  %v14265_v32 = vld [vmem:[#allocation21 + $0x1314] ss:$20 sps:$4 sm:$0xff]   ;;  %v14260_v38 = vld [vmem:[#allocation21 + $0x12f0] ss:$20 sps:$4 sm:$0xff]  }
 0x8ca   : > { %9697 = vmatpush1.bf16.msra.mxu1 %v14242_v21  ;;  %9716 = vmatprep.mubr.bf16.mxu1 %v16674_v52  ;;  %v14268_v21 = vld [vmem:[#allocation21 + $0x131c] ss:$20 sps:$4 sm:$0xff]  }
 0x8cb   : > { %9698 = vmatprep.subr.bf16.mxu1 %v14250_v47  ;;  %v14271_v47 = vld [vmem:[#allocation21 + $0x133c] ss:$20 sps:$4 sm:$0xff]  }
 0x8cc   : > { %9042 = vmatpush1.bf16.msra.mxu0 %v14245_v13  ;;  %v14266_v13 = vld [vmem:[#allocation21 + $0x1318] ss:$20 sps:$4 sm:$0xff]  }
 0x8cd   : > { %9043 = vmatprep.subr.bf16.mxu0 %v14253_v29  ;;  %v14274_v29 = vld [vmem:[#allocation21 + $0x1344] ss:$20 sps:$4 sm:$0xff]  }
 0x8ce   : > { %9699 = vmatpush1.bf16.msra.mxu1 %v14248_v37  ;;  %v14269_v37 = vld [vmem:[#allocation21 + $0x1338] ss:$20 sps:$4 sm:$0xff]  }
 0x8cf   : > { %9700 = vmatprep.subr.bf16.mxu1 %v14256_v30  ;;  %v14277_v30 = vld [vmem:[#allocation21 + $0x1364] ss:$20 sps:$4 sm:$0xff]  }
 0x8d0   : > { %9044 = vmatpush1.bf16.msra.mxu0 %v14251_v3  ;;  %v14272_v3 = vld [vmem:[#allocation21 + $0x1340] ss:$20 sps:$4 sm:$0xff]  }
 0x8d1   : > { %9045 = vmatprep.subr.bf16.mxu0 %v14259_v61  ;;  %v14280_v61 = vld [vmem:[#allocation21 + $0x136c] ss:$20 sps:$4 sm:$0xff]  }
 0x8d2   : > { %9701 = vmatpush1.bf16.msra.mxu1 %v14254_v41  ;;  %v14275_v41 = vld [vmem:[#allocation21 + $0x1360] ss:$20 sps:$4 sm:$0xff]  }
 0x8d3   : > { %9702 = vmatprep.subr.bf16.mxu1 %v14262_v8  ;;  %v14283_v8 = vld [vmem:[#allocation21 + $0x138c] ss:$20 sps:$4 sm:$0xff]  }
 0x8d4   : > { %9046 = vmatpush1.bf16.msra.mxu0 %v14257_v22  ;;  %v14278_v22 = vld [vmem:[#allocation21 + $0x1368] ss:$20 sps:$4 sm:$0xff]  }
 0x8d5   : > { %9047 = vmatprep.subr.bf16.mxu0 %v14265_v32  ;;  %v14286_v32 = vld [vmem:[#allocation21 + $0x1394] ss:$20 sps:$4 sm:$0xff]  }
 0x8d6   : > { %9703 = vmatpush1.bf16.msra.mxu1 %v14260_v38  ;;  %v14281_v38 = vld [vmem:[#allocation21 + $0x1388] ss:$20 sps:$4 sm:$0xff]  }
 0x8d7   : > { %9704 = vmatprep.subr.bf16.mxu1 %v14268_v21  ;;  %v14289_v21 = vld [vmem:[#allocation21 + $0x13b4] ss:$20 sps:$4 sm:$0xff]  }
 0x8d8   : > { %9048 = vmatpush1.bf16.msra.mxu0 %v14263_v42  ;;  %v14284_v42 = vld [vmem:[#allocation21 + $0x1390] ss:$20 sps:$4 sm:$0xff]  }
 0x8d9   : > { %9049 = vmatprep.subr.bf16.mxu0 %v14271_v47  ;;  %v14292_v47 = vld [vmem:[#allocation21 + $0x13bc] ss:$20 sps:$4 sm:$0xff]  }
 0x8da   : > { %9705 = vmatpush1.bf16.msra.mxu1 %v14266_v13  ;;  %v14287_v13 = vld [vmem:[#allocation21 + $0x13b0] ss:$20 sps:$4 sm:$0xff]  }
 0x8db   : > { %9706 = vmatprep.subr.bf16.mxu1 %v14274_v29  ;;  %v14295_v29 = vld [vmem:[#allocation21 + $0x13dc] ss:$20 sps:$4 sm:$0xff]  }
 0x8dc   : > { %9050 = vmatpush1.bf16.msra.mxu0 %v14269_v37  ;;  %v14290_v37 = vld [vmem:[#allocation21 + $0x13b8] ss:$20 sps:$4 sm:$0xff]  }
 0x8dd   : > { %9051 = vmatprep.subr.bf16.mxu0 %v14277_v30  ;;  %v14298_v30 = vld [vmem:[#allocation21 + $0x13e4] ss:$20 sps:$4 sm:$0xff]  }
 0x8de   : > { %9707 = vmatpush1.bf16.msra.mxu1 %v14272_v3  ;;  %v14293_v3 = vld [vmem:[#allocation21 + $0x13d8] ss:$20 sps:$4 sm:$0xff]  }
 0x8df   : > { %9708 = vmatprep.subr.bf16.mxu1 %v14280_v61  ;;  %v14301_v61 = vld [vmem:[#allocation21 + $0x1404] ss:$20 sps:$4 sm:$0xff]  }
 0x8e0   : > { %9052 = vmatpush1.bf16.msra.mxu0 %v14275_v41  ;;  %v14296_v41 = vld [vmem:[#allocation21 + $0x13e0] ss:$20 sps:$4 sm:$0xff]  }
 0x8e1   : > { %9053 = vmatprep.subr.bf16.mxu0 %v14283_v8  ;;  %v14304_v8 = vld [vmem:[#allocation21 + $0x140c] ss:$20 sps:$4 sm:$0xff]  }
 0x8e2   : > { %9709 = vmatpush1.bf16.msra.mxu1 %v14278_v22  ;;  %v14299_v22 = vld [vmem:[#allocation21 + $0x1400] ss:$20 sps:$4 sm:$0xff]  }
 0x8e3   : > { %9710 = vmatprep.subr.bf16.mxu1 %v14286_v32  ;;  %v14307_v32 = vld [vmem:[#allocation21 + $0x142c] ss:$20 sps:$4 sm:$0xff]  }
 0x8e4   : > { %9054 = vmatpush1.bf16.msra.mxu0 %v14281_v38  ;;  %v14302_v38 = vld [vmem:[#allocation21 + $0x1408] ss:$20 sps:$4 sm:$0xff]  }
 0x8e5   : > { %9055 = vmatprep.subr.bf16.mxu0 %v14289_v21  ;;  %v14310_v21 = vld [vmem:[#allocation21 + $0x1434] ss:$20 sps:$4 sm:$0xff]  }
 0x8e6   : > { %9711 = vmatpush1.bf16.msra.mxu1 %v14284_v42  ;;  %v14305_v42 = vld [vmem:[#allocation21 + $0x1428] ss:$20 sps:$4 sm:$0xff]  }
 0x8e7   : > { %9712 = vmatprep.subr.bf16.mxu1 %v14292_v47  ;;  %v14313_v47 = vld [vmem:[#allocation21 + $0x1454] ss:$20 sps:$4 sm:$0xff]  }
 0x8e8   : > { %9056 = vmatpush1.bf16.msra.mxu0 %v14287_v13  ;;  %v14308_v13 = vld [vmem:[#allocation21 + $0x1430] ss:$20 sps:$4 sm:$0xff]  }
 0x8e9   : > { %9057 = vmatprep.subr.bf16.mxu0 %v14295_v29  ;;  %v14316_v29 = vld [vmem:[#allocation21 + $0x145c] ss:$20 sps:$4 sm:$0xff]  }
 0x8ea   : > { %9713 = vmatpush1.bf16.msra.mxu1 %v14290_v37  ;;  %v14311_v37 = vld [vmem:[#allocation21 + $0x1450] ss:$20 sps:$4 sm:$0xff]  }
 0x8eb   : > { %9714 = vmatprep.subr.bf16.mxu1 %v14298_v30  ;;  %v14319_v30 = vld [vmem:[#allocation21 + $0x147c] ss:$20 sps:$4 sm:$0xff]  }
 0x8ec   : > { %9058 = vmatpush1.bf16.msra.mxu0 %v14293_v3  ;;  %v14314_v3 = vld [vmem:[#allocation21 + $0x1458] ss:$20 sps:$4 sm:$0xff]  }
 0x8ed   : > { %9100 = vmatprep.subr.bf16.mxu0 %v14301_v61  ;;  %v14322_v61 = vld [vmem:[#allocation21 + $0x1484] ss:$20 sps:$4 sm:$0xff]  }
 0x8ee   : > { %9715 = vmatpush1.bf16.msra.mxu1 %v14296_v41  ;;  %v14317_v41 = vld [vmem:[#allocation21 + $0x1478] ss:$20 sps:$4 sm:$0xff]  }
 0x8ef   : > { %9060 = vmatmul.mubr.bf16.vlgmr.msra.gmra.mrb[24].mxu0 %v16684_v19  ;;  %9757 = vmatprep.subr.bf16.mxu1 %v14304_v8  ;;  %v14325_v8 = vld [vmem:[#allocation21 + $0x14a4] ss:$20 sps:$4 sm:$0xff]  }
 0x8f0   : > { %9069 = vmatprep.mubr.bf16.mxu0 %v16720_v2  ;;  %9101 = vmatpush1.bf16.msra.mxu0 %v14299_v22  ;;  %v14320_v22 = vld [vmem:[#allocation21 + $0x1480] ss:$20 sps:$4 sm:$0xff]  }
 0x8f1   : > { %9717 = vmatmul.mubr.bf16.vlgmr.msra.gmra.mrb[48].mxu1 %v16684_v19  ;;  %9102 = vmatprep.subr.bf16.mxu0 %v14307_v32  ;;  %v14328_v32 = vld [vmem:[#allocation21 + $0x14ac] ss:$20 sps:$4 sm:$0xff]  }
 0x8f2   : > { %9726 = vmatprep.mubr.bf16.mxu1 %v16720_v2  ;;  %9758 = vmatpush1.bf16.msra.mxu1 %v14302_v38  ;;  %v14323_v38 = vld [vmem:[#allocation21 + $0x14a0] ss:$20 sps:$4 sm:$0xff]  }
 0x8f3   : > { %9759 = vmatprep.subr.bf16.mxu1 %v14310_v21  ;;  %v14331_v21 = vld [vmem:[#allocation21 + $0x14cc] ss:$20 sps:$4 sm:$0xff]  }
 0x8f4   : > { %9103 = vmatpush1.bf16.msra.mxu0 %v14305_v42  ;;  %v14326_v42 = vld [vmem:[#allocation21 + $0x14a8] ss:$20 sps:$4 sm:$0xff]  }
 0x8f5   : > { %9104 = vmatprep.subr.bf16.mxu0 %v14313_v47  ;;  %v17099_v47 = vpack.c.bf16 %v15586_v54, %v16869_v4  ;;  %v14335_v4 = vld [vmem:[#allocation21 + $0x14f0] ss:$20 sps:$4 sm:$0xff]  }
 0x8f6   : > { %9760 = vmatpush1.bf16.msra.mxu1 %v14308_v13  ;;  %v14334_v13 = vld [vmem:[#allocation21 + $0x14d4] ss:$20 sps:$4 sm:$0xff]  }
 0x8f7   : > { %9070 = vmatmul.mubr.bf16.gmra.mrb[28].mxu0 %v16724_v36  ;;  %9761 = vmatprep.subr.bf16.mxu1 %v14316_v29  ;;  %v14329_v29 = vld [vmem:[#allocation21 + $0x14c8] ss:$20 sps:$4 sm:$0xff]  }
 0x8f8   : > { %9079 = vmatprep.mubr.bf16.mxu0 %v16748_v6  ;;  %9105 = vmatpush1.bf16.msra.mxu0 %v14311_v37  ;;  %v14337_v37 = vld [vmem:[#allocation21 + $0x14f4] ss:$20 sps:$4 sm:$0xff]  }
 0x8f9   : > { %9727 = vmatmul.mubr.bf16.gmra.mrb[52].mxu1 %v16724_v36  ;;  %9106 = vmatprep.subr.bf16.mxu0 %v14319_v30  ;;  %v14332_v30 = vld [vmem:[#allocation21 + $0x14d0] ss:$20 sps:$4 sm:$0xff]  }
 0x8fa   : > { %9736 = vmatprep.mubr.bf16.mxu1 %v16748_v6  ;;  %9762 = vmatpush1.bf16.msra.mxu1 %v14314_v3  ;;  %v14340_v3 = vld [vmem:[#allocation21 + $0x14fc] ss:$20 sps:$4 sm:$0xff]  }
 0x8fb   : > { %9763 = vmatprep.subr.bf16.mxu1 %v14322_v61  ;;  %v17107_v61 = vpack.c.bf16 %v15586_v54, %v16888_v12  ;;  %v14344_v54 = vld [vmem:[#allocation21 + $0x1520] ss:$20 sps:$4 sm:$0xff]  }
 0x8fc   : > { %9107 = vmatpush1.bf16.msra.mxu0 %v14317_v41  ;;  %v14343_v41 = vld [vmem:[#allocation21 + $0x151c] ss:$20 sps:$4 sm:$0xff]   ;;  %v14352_v12 = vld [vmem:[#allocation21 + $0x154c] ss:$20 sps:$4 sm:$0xff]  }
 0x8fd   : > { %9108 = vmatprep.subr.bf16.mxu0 %v14325_v8  ;;  %v14338_v8 = vld [vmem:[#allocation21 + $0x14f8] ss:$20 sps:$4 sm:$0xff]  }
 0x8fe   : > { %9764 = vmatpush1.bf16.msra.mxu1 %v14320_v22  ;;  %v14346_v22 = vld [vmem:[#allocation21 + $0x1524] ss:$20 sps:$4 sm:$0xff]  }
 0x8ff   : > { %9080 = vmatmul.mubr.bf16.gmra.mrb[32].mxu0 %v17514_v17  ;;  %9765 = vmatprep.subr.bf16.mxu1 %v14328_v32  ;;  %v14341_v32 = vld [vmem:[#allocation21 + $0x1518] ss:$20 sps:$4 sm:$0xff]  }
 0x900   : > { %9089 = vmatprep.mubr.bf16.mxu0 %v17099_v47  ;;  %9109 = vmatpush1.bf16.msra.mxu0 %v14323_v38  ;;  %v14349_v38 = vld [vmem:[#allocation21 + $0x1544] ss:$20 sps:$4 sm:$0xff]  }
 0x901   : > { %9737 = vmatmul.mubr.bf16.gmra.mrb[56].mxu1 %v17514_v17  ;;  %9110 = vmatprep.subr.bf16.mxu0 %v14331_v21  ;;  %v14347_v21 = vld [vmem:[#allocation21 + $0x1540] ss:$20 sps:$4 sm:$0xff]  }
 0x902   : > { %9746 = vmatprep.mubr.bf16.mxu1 %v17099_v47  ;;  %9766 = vmatpush1.bf16.msra.mxu1 %v14326_v42  ;;  %v14355_v42 = vld [vmem:[#allocation21 + $0x156c] ss:$20 sps:$4 sm:$0xff]  }
 0x903   : > { %9767 = vmatprep.subr.bf16.mxu1 %v14334_v13  ;;  %v14350_v13 = vld [vmem:[#allocation21 + $0x1548] ss:$20 sps:$4 sm:$0xff]  }
 0x904   : > { %9111 = vmatpush1.bf16.msra.mxu0 %v14329_v29  ;;  %v14358_v29 = vld [vmem:[#allocation21 + $0x1574] ss:$20 sps:$4 sm:$0xff]  }
 0x905   : > { %9112 = vmatprep.subr.bf16.mxu0 %v14337_v37  ;;  %v14353_v37 = vld [vmem:[#allocation21 + $0x1568] ss:$20 sps:$4 sm:$0xff]  }
 0x906   : > { %9768 = vmatpush1.bf16.msra.mxu1 %v14332_v30  ;;  %v14361_v30 = vld [vmem:[#allocation21 + $0x1594] ss:$20 sps:$4 sm:$0xff]  }
 0x907   : > { %9090 = vmatmul.mubr.bf16.gmra.mrb[36].mxu0 %v17107_v61  ;;  %9769 = vmatprep.subr.bf16.mxu1 %v14340_v3  ;;  %v14356_v3 = vld [vmem:[#allocation21 + $0x1570] ss:$20 sps:$4 sm:$0xff]  }
 0x908   : > { %9113 = vmatpush1.bf16.msra.mxu0 %v14335_v4  ;;  %9132 = vmatprep.mubr.bf16.mxu0 %v16759_v46  ;;  %v14364_v4 = vld [vmem:[#allocation21 + $0x159c] ss:$20 sps:$4 sm:$0xff]  }
 0x909   : > { %9747 = vmatmul.mubr.bf16.gmra.mrb[60].mxu1 %v17107_v61  ;;  %9114 = vmatprep.subr.bf16.mxu0 %v14343_v41  ;;  %v14359_v41 = vld [vmem:[#allocation21 + $0x1590] ss:$20 sps:$4 sm:$0xff]  }
 0x90a   : > { %9770 = vmatpush1.bf16.msra.mxu1 %v14338_v8  ;;  %9789 = vmatprep.mubr.bf16.mxu1 %v16759_v46  ;;  %v14367_v8 = vld [vmem:[#allocation21 + $0x15bc] ss:$20 sps:$4 sm:$0xff]  }
 0x90b   : > { %9771 = vmatprep.subr.bf16.mxu1 %v14346_v22  ;;  %v14362_v22 = vld [vmem:[#allocation21 + $0x1598] ss:$20 sps:$4 sm:$0xff]  }
 0x90c   : > { %9115 = vmatpush1.bf16.msra.mxu0 %v14341_v32  ;;  %v14370_v32 = vld [vmem:[#allocation21 + $0x15c4] ss:$20 sps:$4 sm:$0xff]  }
 0x90d   : > { %9116 = vmatprep.subr.bf16.mxu0 %v14349_v38  ;;  %v14365_v38 = vld [vmem:[#allocation21 + $0x15b8] ss:$20 sps:$4 sm:$0xff]  }
 0x90e   : > { %9772 = vmatpush1.bf16.msra.mxu1 %v14344_v54  ;;  %v14373_v54 = vld [vmem:[#allocation21 + $0x15e4] ss:$20 sps:$4 sm:$0xff]  }
 0x90f   : > { %9773 = vmatprep.subr.bf16.mxu1 %v14352_v12  ;;  %v14368_v12 = vld [vmem:[#allocation21 + $0x15c0] ss:$20 sps:$4 sm:$0xff]  }
 0x910   : > { %9117 = vmatpush1.bf16.msra.mxu0 %v14347_v21  ;;  %v14376_v21 = vld [vmem:[#allocation21 + $0x15ec] ss:$20 sps:$4 sm:$0xff]  }
 0x911   : > { %9118 = vmatprep.subr.bf16.mxu0 %v14355_v42  ;;  %v14371_v42 = vld [vmem:[#allocation21 + $0x15e0] ss:$20 sps:$4 sm:$0xff]  }
 0x912   : > { %9774 = vmatpush1.bf16.msra.mxu1 %v14350_v13  ;;  %v14379_v13 = vld [vmem:[#allocation21 + $0x160c] ss:$20 sps:$4 sm:$0xff]  }
 0x913   : > { %9775 = vmatprep.subr.bf16.mxu1 %v14358_v29  ;;  %v14374_v29 = vld [vmem:[#allocation21 + $0x15e8] ss:$20 sps:$4 sm:$0xff]  }
 0x914   : > { %9119 = vmatpush1.bf16.msra.mxu0 %v14353_v37  ;;  %v14382_v37 = vld [vmem:[#allocation21 + $0x1614] ss:$20 sps:$4 sm:$0xff]  }
 0x915   : > { %9120 = vmatprep.subr.bf16.mxu0 %v14361_v30  ;;  %v14377_v30 = vld [vmem:[#allocation21 + $0x1608] ss:$20 sps:$4 sm:$0xff]  }
 0x916   : > { %9776 = vmatpush1.bf16.msra.mxu1 %v14356_v3  ;;  %v14385_v3 = vld [vmem:[#allocation21 + $0x1634] ss:$20 sps:$4 sm:$0xff]  }
 0x917   : > { %9777 = vmatprep.subr.bf16.mxu1 %v14364_v4  ;;  %v14380_v4 = vld [vmem:[#allocation21 + $0x1610] ss:$20 sps:$4 sm:$0xff]  }
 0x918   : > { %9121 = vmatpush1.bf16.msra.mxu0 %v14359_v41  ;;  %v14388_v41 = vld [vmem:[#allocation21 + $0x163c] ss:$20 sps:$4 sm:$0xff]  }
 0x919   : > { %9122 = vmatprep.subr.bf16.mxu0 %v14367_v8  ;;  %v14383_v8 = vld [vmem:[#allocation21 + $0x1630] ss:$20 sps:$4 sm:$0xff]  }
 0x91a   : > { %9778 = vmatpush1.bf16.msra.mxu1 %v14362_v22  ;;  %v14391_v22 = vld [vmem:[#allocation21 + $0x165c] ss:$20 sps:$4 sm:$0xff]  }
 0x91b   : > { %9779 = vmatprep.subr.bf16.mxu1 %v14370_v32  ;;  %v14386_v32 = vld [vmem:[#allocation21 + $0x1638] ss:$20 sps:$4 sm:$0xff]  }
 0x91c   : > { %9123 = vmatpush1.bf16.msra.mxu0 %v14365_v38  ;;  %v14394_v38 = vld [vmem:[#allocation21 + $0x1664] ss:$20 sps:$4 sm:$0xff]  }
 0x91d   : > { %9124 = vmatprep.subr.bf16.mxu0 %v14373_v54  ;;  %v14389_v54 = vld [vmem:[#allocation21 + $0x1658] ss:$20 sps:$4 sm:$0xff]  }
 0x91e   : > { %9780 = vmatpush1.bf16.msra.mxu1 %v14368_v12  ;;  %v14395_v12 = vld [vmem:[#allocation21 + $0x150] ss:$20 sps:$4 sm:$0xff]  }
 0x91f   : > { %9781 = vmatprep.subr.bf16.mxu1 %v14376_v21  ;;  %v14392_v21 = vld [vmem:[#allocation21 + $0x1660] ss:$20 sps:$4 sm:$0xff]  }
 0x920   : > { %9125 = vmatpush1.bf16.msra.mxu0 %v14371_v42  ;;  %v14396_v42 = vld [vmem:[#allocation21 + $0x10] ss:$20 sps:$4 sm:$0xff]  }
 0x921   : > { %9126 = vmatprep.subr.bf16.mxu0 %v14379_v13  ;;  %v14397_v13 = vld [vmem:[#allocation21 + $0x178] ss:$20 sps:$4 sm:$0xff]  }
 0x922   : > { %9782 = vmatpush1.bf16.msra.mxu1 %v14374_v29  ;;  %v14398_v29 = vld [vmem:[#allocation21 + $0x38] ss:$20 sps:$4 sm:$0xff]  }
 0x923   : > { %9783 = vmatprep.subr.bf16.mxu1 %v14382_v37  ;;  %v14399_v37 = vld [vmem:[#allocation21 + $0x1a0] ss:$20 sps:$4 sm:$0xff]  }
 0x924   : > { %9127 = vmatpush1.bf16.msra.mxu0 %v14377_v30  ;;  %v14400_v30 = vld [vmem:[#allocation21 + $0x60] ss:$20 sps:$4 sm:$0xff]  }
 0x925   : > { %9128 = vmatprep.subr.bf16.mxu0 %v14385_v3  ;;  %v14401_v3 = vld [vmem:[#allocation21 + $0x1c8] ss:$20 sps:$4 sm:$0xff]  }
 0x926   : > { %9784 = vmatpush1.bf16.msra.mxu1 %v14380_v4  ;;  %v14402_v4 = vld [vmem:[#allocation21 + $0x88] ss:$20 sps:$4 sm:$0xff]  }
 0x927   : > { %9785 = vmatprep.subr.bf16.mxu1 %v14388_v41  ;;  %v14403_v41 = vld [vmem:[#allocation21 + $0x1f0] ss:$20 sps:$4 sm:$0xff]  }
 0x928   : > { %9129 = vmatpush1.bf16.msra.mxu0 %v14383_v8  ;;  %v14404_v8 = vld [vmem:[#allocation21 + $0xb0] ss:$20 sps:$4 sm:$0xff]  }
 0x929   : > { %9130 = vmatprep.subr.bf16.mxu0 %v14391_v22  ;;  %v14405_v22 = vld [vmem:[#allocation21 + $0x218] ss:$20 sps:$4 sm:$0xff]  }
 0x92a   : > { %9786 = vmatpush1.bf16.msra.mxu1 %v14386_v32  ;;  %v17123_v32 = vpack.c.bf16 %v15537_v25, %v16896_v57  ;;  %v14409_v57 = vld [vmem:[#allocation21 + $0x268] ss:$20 sps:$4 sm:$0xff]  }
 0x92b   : > { %9787 = vmatprep.subr.bf16.mxu1 %v14394_v38  ;;  %v14406_v38 = vld [vmem:[#allocation21 + $0xd8] ss:$20 sps:$4 sm:$0xff]  }
 0x92c   : > { %9131 = vmatpush1.bf16.msra.mxu0 %v14389_v54  ;;  %v14407_v54 = vld [vmem:[#allocation21 + $0x240] ss:$20 sps:$4 sm:$0xff]  }
 0x92d   : > { %12122 = vmatprep.subr.bf16.mxu0 %v14395_v12  ;;  %v14408_v12 = vld [vmem:[#allocation21 + $0x100] ss:$20 sps:$4 sm:$0xff]  }
 0x92e   : > { %9788 = vmatpush1.bf16.msra.mxu1 %v14392_v21  ;;  %v17131_v21 = vpack.c.bf16 %v15537_v25, %v16903_v1  ;;  %v17529_v25 = vld [vmem:[#allocation39_spill] sm:$0xff] }
 0x92f   : > { %9133 = vmatmul.mubr.bf16.vlgmr.msra.gmra.mrb[24].mxu0 %v16772_v45  ;;  %v14414_v1 = vld [vmem:[#allocation21 + $0x2b8] ss:$20 sps:$4 sm:$0xff]  }
 0x930   : > { %9142 = vmatprep.mubr.bf16.mxu0 %v16783_v35  ;;  %12123 = vmatpush3.bf16.msra.mxu0 %v14396_v42  ;;  %v17528_v42 = vld [vmem:[#allocation41_spill] sm:$0xff] }
 0x931   : > { %9790 = vmatmul.mubr.bf16.vlgmr.msra.gmra.mrb[48].mxu1 %v16772_v45  ;;  %12124 = vmatprep.subr.bf16.mxu0 %v14397_v13  ;;  %v14410_v13 = vld [vmem:[#allocation21 + $0x128] ss:$20 sps:$4 sm:$0xff]  }
 0x932   : > { %9799 = vmatprep.mubr.bf16.mxu1 %v16783_v35 }
 0x934   : > { %12125 = vmatpush3.bf16.msra.mxu0 %v14398_v29  ;;  %v14411_v29 = vld [vmem:[#allocation21 + $0x3d0] ss:$20 sps:$4 sm:$0xff]  }
 0x935   : > { %12126 = vmatprep.subr.bf16.mxu0 %v14399_v37  ;;  %v14412_v37 = vld [vmem:[#allocation21 + $0x290] ss:$20 sps:$4 sm:$0xff]  }
 0x937   : > { %9143 = vmatmul.mubr.bf16.gmra.mrb[28].mxu0 %v17515_v24 }
 0x938   : > { %9152 = vmatprep.mubr.bf16.mxu0 %v17516_v11  ;;  %12127 = vmatpush3.bf16.msra.mxu0 %v14400_v30  ;;  %v14413_v30 = vld [vmem:[#allocation21 + $0x3f8] ss:$20 sps:$4 sm:$0xff]  }
 0x939   : > { %9800 = vmatmul.mubr.bf16.gmra.mrb[52].mxu1 %v17515_v24  ;;  %12128 = vmatprep.subr.bf16.mxu0 %v14401_v3  ;;  %v14415_v3 = vld [vmem:[#allocation21 + $0x420] ss:$20 sps:$4 sm:$0xff]  }
 0x93a   : > { %9809 = vmatprep.mubr.bf16.mxu1 %v17516_v11 }
 0x93c   : > { %12129 = vmatpush3.bf16.msra.mxu0 %v14402_v4  ;;  %v14416_v4 = vld [vmem:[#allocation21 + $0x2e0] ss:$20 sps:$4 sm:$0xff]  }
 0x93d   : > { %12130 = vmatprep.subr.bf16.mxu0 %v14403_v41  ;;  %v14417_v41 = vld [vmem:[#allocation21 + $0x448] ss:$20 sps:$4 sm:$0xff]  }
 0x93f   : > { %9153 = vmatmul.mubr.bf16.gmra.mrb[32].mxu0 %v16797_v58 }
 0x940   : > { %9162 = vmatprep.mubr.bf16.mxu0 %v17123_v32  ;;  %12131 = vmatpush3.bf16.msra.mxu0 %v14404_v8  ;;  %v14418_v8 = vld [vmem:[#allocation21 + $0x308] ss:$20 sps:$4 sm:$0xff]  }
 0x941   : > { %9810 = vmatmul.mubr.bf16.gmra.mrb[56].mxu1 %v16797_v58  ;;  %12132 = vmatprep.subr.bf16.mxu0 %v14405_v22  ;;  %v14419_v22 = vld [vmem:[#allocation21 + $0x470] ss:$20 sps:$4 sm:$0xff]  }
 0x942   : > { %9819 = vmatprep.mubr.bf16.mxu1 %v17123_v32 }
 0x944   : > { %12133 = vmatpush3.bf16.msra.mxu0 %v14406_v38  ;;  %v14420_v38 = vld [vmem:[#allocation21 + $0x330] ss:$20 sps:$4 sm:$0xff]  }
 0x945   : > { %12134 = vmatprep.subr.bf16.mxu0 %v14407_v54  ;;  %v14421_v54 = vld [vmem:[#allocation21 + $0x498] ss:$20 sps:$4 sm:$0xff]  }
 0x947   : > { %9163 = vmatmul.mubr.bf16.gmra.mrb[36].mxu0 %v17131_v21 }
 0x948   : > { %12135 = vmatpush3.bf16.msra.mxu0 %v14408_v12  ;;  %11905 = vmatprep.mubr.msk.bf16.mxu0 %vm16128_vm7, %v17528_v42  ;;  %v14422_v12 = vld [vmem:[#allocation21 + $0x358] ss:$20 sps:$4 sm:$0xff]   ;;  %v14424_v42 = vld [vmem:[#allocation21 + $0x380] ss:$20 sps:$4 sm:$0xff]  }
 0x949   : > { %9820 = vmatmul.mubr.bf16.gmra.mrb[60].mxu1 %v17131_v21  ;;  %12136 = vmatprep.subr.bf16.mxu0 %v14409_v57  ;;  %v14423_v57 = vld [vmem:[#allocation21 + $0x4c0] ss:$20 sps:$4 sm:$0xff]  }
 0x94c   : > { %12137 = vmatpush3.bf16.msra.mxu0 %v14410_v13  ;;  %v14425_v13 = vld [vmem:[#allocation21 + $0x4e8] ss:$20 sps:$4 sm:$0xff]  }
 0x94d   : > { %12162 = vmatprep.subr.bf16.mxu0 %v14411_v29  ;;  %v17530_v29 = vld [vmem:[#allocation48_spill] sm:$0xff] }
 0x94f   : > { %11910 = vmatmul.mubr.msk.bf16.vlgmr.msra.gmra.mrb[40].mxu0 %vm16128_vm7, %v17529_v25  ;;  %v14428_v25 = vld [vmem:[#allocation21 + $0x510] ss:$20 sps:$4 sm:$0xff]  }
 0x950   : > { %11915 = vmatprep.mubr.msk.bf16.mxu0 %vm16128_vm7, %v17519_v7  ;;  %12163 = vmatpush3.bf16.msra.mxu0 %v14412_v37  ;;  %v14426_v37 = vld [vmem:[#allocation21 + $0x3a8] ss:$20 sps:$4 sm:$0xff]  }
 0x951   : > { %12164 = vmatprep.subr.bf16.mxu0 %v14413_v30  ;;  %v14427_v30 = vld [vmem:[#allocation21 + $0x650] ss:$20 sps:$4 sm:$0xff]  }
 0x954   : > { %12165 = vmatpush3.bf16.msra.mxu0 %v14414_v1  ;;  %v14429_v1 = vld [vmem:[#allocation21 + $0x678] ss:$20 sps:$4 sm:$0xff]  }
 0x955   : > { %12166 = vmatprep.subr.bf16.mxu0 %v14415_v3  ;;  %v14430_v3 = vld [vmem:[#allocation21 + $0x538] ss:$20 sps:$4 sm:$0xff]  }
 0x957   : > { %11920 = vmatmul.mubr.msk.bf16.gmra.mrb[44].mxu0 %vm16128_vm7, %v17520_v9 }
 0x958   : > { %11925 = vmatprep.mubr.msk.bf16.mxu0 %vm16128_vm7, %v17521_v0  ;;  %12167 = vmatpush3.bf16.msra.mxu0 %v14416_v4  ;;  %v14431_v4 = vld [vmem:[#allocation21 + $0x6a0] ss:$20 sps:$4 sm:$0xff]  }
 0x959   : > { %12168 = vmatprep.subr.bf16.mxu0 %v14417_v41  ;;  %v14432_v41 = vld [vmem:[#allocation21 + $0x560] ss:$20 sps:$4 sm:$0xff]  }
 0x95c   : > { %12169 = vmatpush3.bf16.msra.mxu0 %v14418_v8  ;;  %v14433_v8 = vld [vmem:[#allocation21 + $0x6c8] ss:$20 sps:$4 sm:$0xff]  }
 0x95d   : > { %12170 = vmatprep.subr.bf16.mxu0 %v14419_v22  ;;  %v14434_v22 = vld [vmem:[#allocation21 + $0x588] ss:$20 sps:$4 sm:$0xff]  }
 0x95f   : > { %11930 = vmatmul.mubr.msk.bf16.gmra.mrb[48].mxu0 %vm16128_vm7, %v17522_v44 }
 0x960   : > { %11935 = vmatprep.mubr.msk.bf16.mxu0 %vm16128_vm7, %v17523_v5  ;;  %12171 = vmatpush3.bf16.msra.mxu0 %v14420_v38  ;;  %v14435_v38 = vld [vmem:[#allocation21 + $0x6f0] ss:$20 sps:$4 sm:$0xff]  }
 0x961   : > { %12172 = vmatprep.subr.bf16.mxu0 %v14421_v54  ;;  %v14437_v54 = vld [vmem:[#allocation21 + $0x718] ss:$20 sps:$4 sm:$0xff]  }
 0x964   : > { %12173 = vmatpush3.bf16.msra.mxu0 %v14422_v12  ;;  %v14438_v12 = vld [vmem:[#allocation21 + $0x5d8] ss:$20 sps:$4 sm:$0xff]  }
 0x965   : > { %12174 = vmatprep.subr.bf16.mxu0 %v14423_v57  ;;  %v14439_v57 = vld [vmem:[#allocation21 + $0x740] ss:$20 sps:$4 sm:$0xff]  }
 0x967   : > { %11940 = vmatmul.mubr.msk.bf16.gmra.mrb[52].mxu0 %vm16128_vm7, %v17526_v53 }
 0x968   : > { %12175 = vmatpush3.bf16.msra.mxu0 %v14424_v42  ;;  %9927 = vmatprep.mubr.bf16.mxu0 %v17530_v29  ;;  %v14440_v42 = vld [vmem:[#allocation21 + $0x600] ss:$20 sps:$4 sm:$0xff]   ;;  %v14442_v29 = vld [vmem:[#allocation21 + $0x628] ss:$20 sps:$4 sm:$0xff]  }
 0x969   : > { %12176 = vmatprep.subr.bf16.mxu0 %v14425_v13  ;;  %v14441_v13 = vld [vmem:[#allocation21 + $0x768] ss:$20 sps:$4 sm:$0xff]  }
 0x96c   : > { %12177 = vmatpush3.bf16.msra.mxu0 %v14426_v37  ;;  %v14443_v37 = vld [vmem:[#allocation21 + $0x8d0] ss:$20 sps:$4 sm:$0xff]  }
 0x96d   : > { %12202 = vmatprep.subr.bf16.mxu0 %v14427_v30  ;;  %v14444_v30 = vld [vmem:[#allocation21 + $0x790] ss:$20 sps:$4 sm:$0xff]  }
 0x96f   : > { %9928 = vmatmul.mubr.bf16.vlgmr.msra.gmra.mrb[56].mxu0 %v16911_v40  ;;  %v14436_v40 = vld [vmem:[#allocation21 + $0x5b0] ss:$20 sps:$4 sm:$0xff]  }
 0x970   : > { %9935 = vmatprep.mubr.bf16.mxu0 %v16674_v52  ;;  %12203 = vmatpush3.bf16.msra.mxu0 %v14428_v25  ;;  %v14445_v25 = vld [vmem:[#allocation21 + $0x8f8] ss:$20 sps:$4 sm:$0xff]  }
 0x971   : > { %12204 = vmatprep.subr.bf16.mxu0 %v14429_v1  ;;  %v14446_v1 = vld [vmem:[#allocation21 + $0x7b8] ss:$20 sps:$4 sm:$0xff]  }
 0x974   : > { %12205 = vmatpush3.bf16.msra.mxu0 %v14430_v3  ;;  %v14447_v3 = vld [vmem:[#allocation21 + $0x920] ss:$20 sps:$4 sm:$0xff]  }
 0x975   : > { %12206 = vmatprep.subr.bf16.mxu0 %v14431_v4  ;;  %v14448_v4 = vld [vmem:[#allocation21 + $0x7e0] ss:$20 sps:$4 sm:$0xff]  }
 0x977   : > { %9936 = vmatmul.mubr.bf16.gmra.mrb[60].mxu0 %v16684_v19 }
 0x978   : > { %9943 = vmatprep.mubr.bf16.mxu0 %v16720_v2  ;;  %12207 = vmatpush3.bf16.msra.mxu0 %v14432_v41  ;;  %v14449_v41 = vld [vmem:[#allocation21 + $0x948] ss:$20 sps:$4 sm:$0xff]  }
 0x979   : > { %12208 = vmatprep.subr.bf16.mxu0 %v14433_v8  ;;  %v14451_v8 = vld [vmem:[#allocation21 + $0x970] ss:$20 sps:$4 sm:$0xff]  }
 0x97c   : > { %12209 = vmatpush3.bf16.msra.mxu0 %v14434_v22  ;;  %v14453_v22 = vld [vmem:[#allocation21 + $0x998] ss:$20 sps:$4 sm:$0xff]  }
 0x97d   : > { %12210 = vmatprep.subr.bf16.mxu0 %v14435_v38  ;;  %v14454_v38 = vld [vmem:[#allocation21 + $0x858] ss:$20 sps:$4 sm:$0xff]  }
 0x97f   : > { %9944 = vmatmul.mubr.bf16.gmra.mrb[64].mxu0 %v16724_v36 }
 0x980   : > { %9951 = vmatprep.mubr.bf16.mxu0 %v16748_v6  ;;  %12211 = vmatpush3.bf16.msra.mxu0 %v14436_v40  ;;  %v14455_v40 = vld [vmem:[#allocation21 + $0x9c0] ss:$20 sps:$4 sm:$0xff]  }
 0x981   : > { %12212 = vmatprep.subr.bf16.mxu0 %v14437_v54  ;;  %v14456_v54 = vld [vmem:[#allocation21 + $0x880] ss:$20 sps:$4 sm:$0xff]  }
 0x984   : > { %12213 = vmatpush3.bf16.msra.mxu0 %v14438_v12  ;;  %v14457_v12 = vld [vmem:[#allocation21 + $0x9e8] ss:$20 sps:$4 sm:$0xff]  }
 0x985   : > { %12214 = vmatprep.subr.bf16.mxu0 %v14439_v57  ;;  %v14458_v57 = vld [vmem:[#allocation21 + $0x8a8] ss:$20 sps:$4 sm:$0xff]  }
 0x987   : > { %9952 = vmatmul.mubr.bf16.gmra.mrb[68].mxu0 %v17514_v17 }
 0x988   : > { %12215 = vmatpush3.bf16.msra.mxu0 %v14440_v42  ;;  %9992 = vmatprep.mubr.bf16.mxu0 %v16927_v55  ;;  %v14450_v55 = vld [vmem:[#allocation21 + $0x808] ss:$20 sps:$4 sm:$0xff]   ;;  %v14459_v42 = vld [vmem:[#allocation21 + $0xb50] ss:$20 sps:$4 sm:$0xff]  }
 0x989   : > { %12216 = vmatprep.subr.bf16.mxu0 %v14441_v13  ;;  %v14460_v13 = vld [vmem:[#allocation21 + $0xa10] ss:$20 sps:$4 sm:$0xff]  }
 0x98c   : > { %12217 = vmatpush3.bf16.msra.mxu0 %v14442_v29  ;;  %v14461_v29 = vld [vmem:[#allocation21 + $0xb78] ss:$20 sps:$4 sm:$0xff]  }
 0x98d   : > { %12242 = vmatprep.subr.bf16.mxu0 %v14443_v37  ;;  %v14462_v37 = vld [vmem:[#allocation21 + $0xa38] ss:$20 sps:$4 sm:$0xff]  }
 0x98f   : > { %9993 = vmatmul.mubr.bf16.vlgmr.msra.gmra.mrb[72].mxu0 %v16935_v51  ;;  %v14452_v51 = vld [vmem:[#allocation21 + $0x830] ss:$20 sps:$4 sm:$0xff]  }
 0x990   : > { %10000 = vmatprep.mubr.bf16.mxu0 %v16759_v46  ;;  %12243 = vmatpush3.bf16.msra.mxu0 %v14444_v30  ;;  %v14463_v30 = vld [vmem:[#allocation21 + $0xba0] ss:$20 sps:$4 sm:$0xff]  }
 0x991   : > { %12244 = vmatprep.subr.bf16.mxu0 %v14445_v25  ;;  %v14465_v25 = vld [vmem:[#allocation21 + $0xbc8] ss:$20 sps:$4 sm:$0xff]  }
 0x994   : > { %12245 = vmatpush3.bf16.msra.mxu0 %v14446_v1  ;;  %v14468_v1 = vld [vmem:[#allocation21 + $0xab0] ss:$20 sps:$4 sm:$0xff]  }
 0x995   : > { %12246 = vmatprep.subr.bf16.mxu0 %v14447_v3  ;;  %v14469_v3 = vld [vmem:[#allocation21 + $0xc18] ss:$20 sps:$4 sm:$0xff]  }
 0x997   : > { %10001 = vmatmul.mubr.bf16.gmra.mrb[76].mxu0 %v16772_v45 }
 0x998   : > { %10008 = vmatprep.mubr.bf16.mxu0 %v16783_v35  ;;  %12247 = vmatpush3.bf16.msra.mxu0 %v14448_v4  ;;  %v14472_v4 = vld [vmem:[#allocation21 + $0xb00] ss:$20 sps:$4 sm:$0xff]  }
 0x999   : > { %12248 = vmatprep.subr.bf16.mxu0 %v14449_v41  ;;  %v14473_v41 = vld [vmem:[#allocation21 + $0xc68] ss:$20 sps:$4 sm:$0xff]  }
 0x99c   : > { %12249 = vmatpush3.bf16.msra.mxu0 %v14450_v55  ;;  %v14475_v55 = vld [vmem:[#allocation21 + $0xdd0] ss:$20 sps:$4 sm:$0xff]  }
 0x99d   : > { %12250 = vmatprep.subr.bf16.mxu0 %v14451_v8  ;;  %v14477_v8 = vld [vmem:[#allocation21 + $0xdf8] ss:$20 sps:$4 sm:$0xff]  }
 0x99f   : > { %10009 = vmatmul.mubr.bf16.gmra.mrb[80].mxu0 %v17515_v24 }
 0x9a0   : > { %10016 = vmatprep.mubr.bf16.mxu0 %v17516_v11  ;;  %12251 = vmatpush3.bf16.msra.mxu0 %v14452_v51  ;;  %v14478_v51 = vld [vmem:[#allocation21 + $0xcb8] ss:$20 sps:$4 sm:$0xff]  }
 0x9a1   : > { %12252 = vmatprep.subr.bf16.mxu0 %v14453_v22  ;;  %v14479_v22 = vld [vmem:[#allocation21 + $0xe20] ss:$20 sps:$4 sm:$0xff]  }
 0x9a4   : > { %12253 = vmatpush3.bf16.msra.mxu0 %v14454_v38  ;;  %v14481_v38 = vld [vmem:[#allocation21 + $0xe48] ss:$20 sps:$4 sm:$0xff]  }
 0x9a5   : > { %12254 = vmatprep.subr.bf16.mxu0 %v14455_v40  ;;  %v14483_v40 = vld [vmem:[#allocation21 + $0xe70] ss:$20 sps:$4 sm:$0xff]  }
 0x9a7   : > { %10017 = vmatmul.mubr.bf16.gmra.mrb[84].mxu0 %v16797_v58 }
 0x9a8   : > { %12255 = vmatpush3.bf16.msra.mxu0 %v14456_v54  ;;  %11945 = vmatprep.mubr.msk.bf16.mxu0 %vm16128_vm7, %v16801_v26  ;;  %v14464_v26 = vld [vmem:[#allocation21 + $0xa60] ss:$20 sps:$4 sm:$0xff]   ;;  %v14486_v54 = vld [vmem:[#allocation21 + $0xd58] ss:$20 sps:$4 sm:$0xff]  }
 0x9a9   : > { %12256 = vmatprep.subr.bf16.mxu0 %v14457_v12  ;;  %v14487_v12 = vld [vmem:[#allocation21 + $0xec0] ss:$20 sps:$4 sm:$0xff]  }
 0x9ac   : > { %12257 = vmatpush3.bf16.msra.mxu0 %v14458_v57  ;;  %v14490_v57 = vld [vmem:[#allocation21 + $0xda8] ss:$20 sps:$4 sm:$0xff]  }
 0x9ad   : > { %12282 = vmatprep.subr.bf16.mxu0 %v14459_v42  ;;  %v14491_v42 = vld [vmem:[#allocation21 + $0x1050] ss:$20 sps:$4 sm:$0xff]  }
 0x9af   : > { %11950 = vmatmul.mubr.msk.bf16.vlgmr.msra.gmra.mrb[88].mxu0 %vm16128_vm7, %v17518_v18  ;;  %v14466_v18 = vld [vmem:[#allocation21 + $0xa88] ss:$20 sps:$4 sm:$0xff]  }
 0x9b0   : > { %11955 = vmatprep.mubr.msk.bf16.mxu0 %vm16128_vm7, %v16805_v34  ;;  %12283 = vmatpush3.bf16.msra.mxu0 %v14460_v13  ;;  %v14467_v34 = vld [vmem:[#allocation21 + $0xbf0] ss:$20 sps:$4 sm:$0xff]   ;;  %v14494_v13 = vld [vmem:[#allocation21 + $0xf38] ss:$20 sps:$4 sm:$0xff]  }
 0x9b1   : > { %12284 = vmatprep.subr.bf16.mxu0 %v14461_v29  ;;  %v14496_v29 = vld [vmem:[#allocation21 + $0xf60] ss:$20 sps:$4 sm:$0xff]  }
 0x9b4   : > { %12285 = vmatpush3.bf16.msra.mxu0 %v14462_v37  ;;  %v14498_v37 = vld [vmem:[#allocation21 + $0xf88] ss:$20 sps:$4 sm:$0xff]  }
 0x9b5   : > { %12286 = vmatprep.subr.bf16.mxu0 %v14463_v30  ;;  %v17214_v30 = vld [vmem:[#allocation22] sm:$0x1f] }
 0x9b7   : > { %11960 = vmatmul.mubr.msk.bf16.gmra.mrb[92].mxu0 %vm16128_vm7, %v16809_v33  ;;  %v14470_v33 = vld [vmem:[#allocation21 + $0xad8] ss:$20 sps:$4 sm:$0xff]  }
 0x9b8   : > { %11965 = vmatprep.mubr.msk.bf16.mxu0 %vm16128_vm7, %v16813_v49  ;;  %12287 = vmatpush3.bf16.msra.mxu0 %v14464_v26  ;;  %v14471_v49 = vld [vmem:[#allocation21 + $0xc40] ss:$20 sps:$4 sm:$0xff]  }
 0x9b9   : > { %12288 = vmatprep.subr.bf16.mxu0 %v14465_v25  ;;  %v17531_v26 = vld [vmem:[#allocation36_spill] sm:$0xff] }
 0x9ba   : > { %v4757_v25 = vsub.s32 2, %v17531_v26 }
 0x9bc   : > { %12289 = vmatpush3.bf16.msra.mxu0 %v14466_v18  ;;  %v14501_v18 = vld [vmem:[#allocation21 + $0x1118] ss:$20 sps:$4 sm:$0xff]  }
 0x9bd   : > { %12290 = vmatprep.subr.bf16.mxu0 %v14467_v34  ;;  %v4761_v34 = vsub.s32 3, %v17531_v26 }
 0x9bf   : > { %11970 = vmatmul.mubr.msk.bf16.gmra.mrb[96].mxu0 %vm16128_vm7, %v16817_v15  ;;  %v14474_v15 = vld [vmem:[#allocation21 + $0xb28] ss:$20 sps:$4 sm:$0xff]  }
 0x9c0   : > { %11975 = vmatprep.mubr.msk.bf16.mxu0 %vm16128_vm7, %v16821_v63  ;;  %12291 = vmatpush3.bf16.msra.mxu0 %v14468_v1  ;;  %v14476_v63 = vld [vmem:[#allocation21 + $0xc90] ss:$20 sps:$4 sm:$0xff]   ;;  %v17533_v1 = vld [vmem:[#allocation52_spill] sm:$0xff] }
 0x9c1   : > { %12292 = vmatprep.subr.bf16.mxu0 %v14469_v3  ;;  %v17534_v3 = vld [vmem:[#allocation38_spill] sm:$0xff] }
 0x9c4   : > { %12293 = vmatpush3.bf16.msra.mxu0 %v14470_v33  ;;  %v17226_v33 = vrot.slane %v17214_v30, %v17534_v3 }
 0x9c5   : > { %12294 = vmatprep.subr.bf16.mxu0 %v14471_v49  ;;  %v14502_v49 = vld [vmem:[#allocation21 + $0xfd8] ss:$20 sps:$4 sm:$0xff]  }
 0x9c7   : > { %11980 = vmatmul.mubr.msk.bf16.gmra.mrb[100].mxu0 %vm16128_vm7, %v16825_v60  ;;  %v14480_v60 = vld [vmem:[#allocation21 + $0xce0] ss:$20 sps:$4 sm:$0xff]  }
 0x9c8   : > { %12295 = vmatpush3.bf16.msra.mxu0 %v14472_v4  ;;  %10122 = vmatprep.mubr.bf16.mxu0 %v16829_v16  ;;  %v14482_v16 = vld [vmem:[#allocation21 + $0xd08] ss:$20 sps:$4 sm:$0xff]   ;;  %v17229_v4 = vrot.slane %v17214_v30, %v4757_v25  ;;  %v14508_v25 = vld [vmem:[#allocation21 + $0x1190] ss:$20 sps:$4 sm:$0xff]  }
 0x9c9   : > { %12296 = vmatprep.subr.bf16.mxu0 %v14473_v41  ;;  %v14503_v41 = vld [vmem:[#allocation21 + $0x1140] ss:$20 sps:$4 sm:$0xff]  }
 0x9cc   : > { %12297 = vmatpush3.bf16.msra.mxu0 %v14474_v15  ;;  %v17237_v15 = vrot.slane %v17214_v30, %v4761_v34 }
 0x9cd   : > { %12322 = vmatprep.subr.bf16.mxu0 %v14475_v55 }
 0x9cf   : > { %10123 = vmatmul.mubr.bf16.vlgmr.msra.gmra.mrb[104].mxu0 %v16833_v39  ;;  %v14484_v39 = vld [vmem:[#allocation21 + $0xd30] ss:$20 sps:$4 sm:$0xff]  }
 0x9d0   : > { %10130 = vmatprep.mubr.bf16.mxu0 %v16837_v43  ;;  %12323 = vmatpush3.bf16.msra.mxu0 %v14476_v63  ;;  %v14485_v43 = vld [vmem:[#allocation21 + $0xe98] ss:$20 sps:$4 sm:$0xff]  }
 0x9d1   : > { %12324 = vmatprep.subr.bf16.mxu0 %v14477_v8 }
 0x9d4   : > { %12325 = vmatpush3.bf16.msra.mxu0 %v14478_v51 }
 0x9d5   : > { %12326 = vmatprep.subr.bf16.mxu0 %v14479_v22 }
 0x9d7   : > { %10131 = vmatmul.mubr.bf16.gmra.mrb[108].mxu0 %v16841_v14  ;;  %v14488_v14 = vld [vmem:[#allocation21 + $0xd80] ss:$20 sps:$4 sm:$0xff]  }
 0x9d8   : > { %10138 = vmatprep.mubr.bf16.mxu0 %v16845_v23  ;;  %12327 = vmatpush3.bf16.msra.mxu0 %v14480_v60  ;;  %v14489_v23 = vld [vmem:[#allocation21 + $0xee8] ss:$20 sps:$4 sm:$0xff]   ;;  %v14504_v60 = vld [vmem:[#allocation21 + $0x1000] ss:$20 sps:$4 sm:$0xff]  }
 0x9d9   : > { %12328 = vmatprep.subr.bf16.mxu0 %v14481_v38 }
 0x9dc   : > { %12329 = vmatpush3.bf16.msra.mxu0 %v14482_v16 }
 0x9dd   : > { %12330 = vmatprep.subr.bf16.mxu0 %v14483_v40 }
 0x9df   : > { %10139 = vmatmul.mubr.bf16.gmra.mrb[112].mxu0 %v16849_v62  ;;  %v14492_v62 = vld [vmem:[#allocation21 + $0xf10] ss:$20 sps:$4 sm:$0xff]  }
 0x9e0   : > { %10146 = vmatprep.mubr.bf16.mxu0 %v16885_v50  ;;  %12331 = vmatpush3.bf16.msra.mxu0 %v14484_v39  ;;  %v14493_v50 = vld [vmem:[#allocation21 + $0x1078] ss:$20 sps:$4 sm:$0xff]  }
 0x9e1   : > { %12332 = vmatprep.subr.bf16.mxu0 %v14485_v43  ;;  %v14505_v43 = vld [vmem:[#allocation21 + $0x1168] ss:$20 sps:$4 sm:$0xff]  }
 0x9e4   : > { %12333 = vmatpush3.bf16.msra.mxu0 %v14486_v54 }
 0x9e5   : > { %12334 = vmatprep.subr.bf16.mxu0 %v14487_v12 }
 0x9e7   : > { %10147 = vmatmul.mubr.bf16.gmra.mrb[116].mxu0 %v16893_v56  ;;  %v14495_v56 = vld [vmem:[#allocation21 + $0x10a0] ss:$20 sps:$4 sm:$0xff]  }
 0x9e8   : > { %12335 = vmatpush3.bf16.msra.mxu0 %v14488_v14  ;;  %10187 = vmatprep.mubr.bf16.mxu0 %v16858_v27  ;;  %v14497_v27 = vld [vmem:[#allocation21 + $0x10c8] ss:$20 sps:$4 sm:$0xff]  }
 0x9e9   : > { %12336 = vmatprep.subr.bf16.mxu0 %v14489_v23 }
 0x9ec   : > { %12337 = vmatpush3.bf16.msra.mxu0 %v14490_v57 }
 0x9ed   : > { %12362 = vmatprep.subr.bf16.mxu0 %v14491_v42  ;;  %v17536_v42 = vld [vmem:[#allocation53_spill] sm:$0xff] }
 0x9ef   : > { %10188 = vmatmul.mubr.bf16.vlgmr.msra.gmra.mrb[120].mxu0 %v16862_v59  ;;  %v14499_v59 = vld [vmem:[#allocation21 + $0x10f0] ss:$20 sps:$4 sm:$0xff]  }
 0x9f0   : > { %10195 = vmatprep.mubr.bf16.mxu0 %v16866_v28  ;;  %12363 = vmatpush3.bf16.msra.mxu0 %v14492_v62  ;;  %v14500_v28 = vld [vmem:[#allocation21 + $0xfb0] ss:$20 sps:$4 sm:$0xff]  }
 0x9f1   : > { %12364 = vmatprep.subr.bf16.mxu0 %v14493_v50  ;;  %v14506_v50 = vld [vmem:[#allocation21 + $0x1028] ss:$20 sps:$4 sm:$0xff]  }
 0x9f4   : > { %12365 = vmatpush3.bf16.msra.mxu0 %v14494_v13  ;;  %v14507_v13 = vld [vmem:[#allocation21 + $0x12d0] ss:$20 sps:$4 sm:$0xff]  }
 0x9f5   : > { %12366 = vmatprep.subr.bf16.mxu0 %v14495_v56 }
 0x9f7   : > { %10196 = vmatmul.mubr.bf16.gmra.mrb[124].mxu0 %v16873_v10  ;;  %v17532_v10 = vld [vmem:[#allocation37_spill] sm:$0xff] }
 0x9f8   : > { %10203 = vmatprep.mubr.bf16.mxu0 %v16877_v31  ;;  %12367 = vmatpush3.bf16.msra.mxu0 %v14496_v29  ;;  %v17221_v31 = vrot.slane %v17214_v30, %v17532_v10 }
 0x9f9   : > { %12368 = vmatprep.subr.bf16.mxu0 %v14497_v27 }
 0x9fc   : > { %12369 = vmatpush3.bf16.msra.mxu0 %v14498_v37 }
 0x9fd   : > { %12370 = vmatprep.subr.bf16.mxu0 %v14499_v59 }
 0x9ff   : > { %10204 = vmatmul.mubr.bf16.gmra.mrb[128].mxu0 %v16881_v48 }
 0xa00   : > { %10211 = vmatprep.mubr.bf16.mxu0 %v17533_v1  ;;  %12371 = vmatpush3.bf16.msra.mxu0 %v14500_v28  ;;  %v14509_v1 = vld [vmem:[#allocation21 + $0x12f8] ss:$20 sps:$4 sm:$0xff]  }
 0xa01   : > { %12372 = vmatprep.subr.bf16.mxu0 %v14501_v18 }
 0xa02   : > { %v9134_v48 = vpop.f32.mrb[24].mxu0 }
 0xa03   : > { %v12518_v55 = vadd.f32 %v9134_v48, %v17221_v31  ;;  %v9136_v63 = vpop.f32.mrb[25].mxu0 }
 0xa04   : > { %v9791_v8 = vpop.f32.mrb[48].mxu1  ;;  %v12519_v51 = vadd.f32 %v9136_v63, %v17226_v33  ;;  %v9138_v22 = vpop.f32.mrb[26].mxu0  ;;  %12373 = vmatpush3.bf16.msra.mxu0 %v14502_v49 }
 0xa05   : > { %10415 = vst [vmem:[%s17234_s0] sm:$0xff] %v12518_v55  ;;  %v12534_v38 = vadd.f32 %v9791_v8, %v17229_v4  ;;  %v9793_v16 = vpop.f32.mrb[49].mxu1  ;;  %v12520_v40 = vadd.f32 %v9138_v22, %v17221_v31  ;;  %v9140_v39 = vpop.f32.mrb[27].mxu0  ;;  %12374 = vmatprep.subr.bf16.mxu0 %v14503_v41  ;;  %v14510_v8 = vld [vmem:[#allocation21 + $0x11b8] ss:$20 sps:$4 sm:$0xff]  }
 0xa06   : > { %10416 = vst [vmem:[%s17234_s0 + $0x8] sm:$0xff] %v12519_v51  ;;  %v12535_v54 = vadd.f32 %v9793_v16, %v17237_v15  ;;  %v9795_v12 = vpop.f32.mrb[50].mxu1  ;;  %v12521_v14 = vadd.f32 %v9140_v39, %v17226_v33  ;;  %v14511_v51 = vld [vmem:[#allocation21 + $0x1320] ss:$20 sps:$4 sm:$0xff]  }
 0xa07   : > { %10417 = vst [vmem:[%s17234_s0 + $0x10] sm:$0xff] %v12534_v38  ;;  %10420 = vst [vmem:[%s17234_s0 + $0x28] sm:$0xff] %v12520_v40  ;;  %v12536_v23 = vadd.f32 %v9795_v12, %v17229_v4  ;;  %v9797_v57 = vpop.f32.mrb[51].mxu1  ;;  %10212 = vmatmul.mubr.bf16.gmra.mrb[132].mxu0 %v17536_v42  ;;  %v14512_v39 = vld [vmem:[#allocation21 + $0x11e0] ss:$20 sps:$4 sm:$0xff]  }
 0xa08   : > { %10418 = vst [vmem:[%s17234_s0 + $0x18] sm:$0xff] %v12535_v54  ;;  %10421 = vst [vmem:[%s17234_s0 + $0x30] sm:$0xff] %v12521_v14  ;;  %v12537_v62 = vadd.f32 %v9797_v57, %v17237_v15  ;;  %12375 = vmatpush3.bf16.msra.mxu0 %v14504_v60  ;;  %11985 = vmatprep.mubr.msk.bf16.mxu0 %vm16128_vm7, %v17519_v7  ;;  %v14513_v14 = vld [vmem:[#allocation21 + $0x1348] ss:$20 sps:$4 sm:$0xff]  }
 0xa09   : > { %10422 = vst [vmem:[%s17234_s0 + $0x38] sm:$0xff] %v12536_v23  ;;  %12376 = vmatprep.subr.bf16.mxu0 %v14505_v43 }
 0xa0a   : > { %10423 = vst [vmem:[%s17234_s0 + $0x40] sm:$0xff] %v12537_v62  ;;  %v9144_v56 = vpop.f32.mrb[28].mxu0 }
 0xa0b   : > { %v12522_v29 = vadd.f32 %v9144_v56, %v17221_v31  ;;  %v9146_v27 = vpop.f32.mrb[29].mxu0  ;;  %v14514_v56 = vld [vmem:[#allocation21 + $0x1208] ss:$20 sps:$4 sm:$0xff]  }
 0xa0c   : > { %v9801_v37 = vpop.f32.mrb[52].mxu1  ;;  %v12523_v59 = vadd.f32 %v9146_v27, %v17226_v33  ;;  %v9148_v28 = vpop.f32.mrb[30].mxu0  ;;  %12377 = vmatpush3.bf16.msra.mxu0 %v14506_v50 }
 0xa0d   : > { %10425 = vst [vmem:[%s17234_s0 + $0x50] sm:$0xff] %v12522_v29  ;;  %v12538_v7 = vadd.f32 %v9801_v37, %v17229_v4  ;;  %v9803_v18 = vpop.f32.mrb[53].mxu1  ;;  %v12524_v34 = vadd.f32 %v9148_v28, %v17221_v31  ;;  %v9150_v10 = vpop.f32.mrb[31].mxu0  ;;  %12402 = vmatprep.subr.bf16.mxu0 %v14507_v13  ;;  %v14515_v29 = vld [vmem:[#allocation21 + $0x1370] ss:$20 sps:$4 sm:$0xff]  }
 0xa0e   : > { %10426 = vst [vmem:[%s17234_s0 + $0x58] sm:$0xff] %v12523_v59  ;;  %v12539_v3 = vadd.f32 %v9803_v18, %v17237_v15  ;;  %v9805_v49 = vpop.f32.mrb[54].mxu1  ;;  %v12525_v41 = vadd.f32 %v9150_v10, %v17226_v33 }
 0xa0f   : > { %10427 = vst [vmem:[%s17234_s0 + $0x60] sm:$0xff] %v12538_v7  ;;  %10430 = vst [vmem:[%s17234_s0 + $0x78] sm:$0xff] %v12524_v34  ;;  %v12540_v48 = vadd.f32 %v9805_v49, %v17229_v4  ;;  %v9807_v55 = vpop.f32.mrb[55].mxu1  ;;  %11990 = vmatmul.mubr.msk.bf16.vlgmr.msra.gmra.mrb[136].mxu0 %vm16128_vm7, %v17520_v9  ;;  %v14516_v7 = vld [vmem:[#allocation21 + $0x1230] ss:$20 sps:$4 sm:$0xff]  }
 0xa10   : > { %10428 = vst [vmem:[%s17234_s0 + $0x68] sm:$0xff] %v12539_v3  ;;  %10431 = vst [vmem:[%s17234_s0 + $0x80] sm:$0xff] %v12525_v41  ;;  %v12541_v63 = vadd.f32 %v9807_v55, %v17237_v15  ;;  %11995 = vmatprep.mubr.msk.bf16.mxu0 %vm16128_vm7, %v17521_v0  ;;  %12403 = vmatpush3.bf16.msra.mxu0 %v14508_v25 }
 0xa11   : > { %10432 = vst [vmem:[%s17234_s0 + $0x88] sm:$0xff] %v12540_v48  ;;  %12404 = vmatprep.subr.bf16.mxu0 %v14509_v1  ;;  %v14517_v1 = vld [vmem:[#allocation21 + $0x1398] ss:$20 sps:$4 sm:$0xff]   ;;  %v4765_v48 = vsub.s32 4, %v17531_v26  ;;  %v14519_v26 = vld [vmem:[#allocation21 + $0x13c0] ss:$20 sps:$4 sm:$0xff]  }
 0xa12   : > { %10433 = vst [vmem:[%s17234_s0 + $0x90] sm:$0xff] %v12541_v63  ;;  %v9154_v22 = vpop.f32.mrb[32].mxu0 }
 0xa13   : > { %v12526_v60 = vadd.f32 %v9154_v22, %v17221_v31  ;;  %v9156_v9 = vpop.f32.mrb[33].mxu0 }
 0xa14   : > { %v9811_v38 = vpop.f32.mrb[56].mxu1  ;;  %v12527_v16 = vadd.f32 %v9156_v9, %v17226_v33  ;;  %v9158_v40 = vpop.f32.mrb[34].mxu0  ;;  %12405 = vmatpush3.bf16.msra.mxu0 %v14510_v8  ;;  %v17537_v8 = vld [vmem:[#allocation49_spill] sm:$0xff] }
 0xa15   : > { %10435 = vst [vmem:[%s17234_s0 + $0xa0] sm:$0xff] %v12526_v60  ;;  %v12542_v0 = vadd.f32 %v9811_v38, %v17229_v4  ;;  %v9813_v43 = vpop.f32.mrb[57].mxu1  ;;  %v12528_v54 = vadd.f32 %v9158_v40, %v17221_v31  ;;  %v9160_v12 = vpop.f32.mrb[35].mxu0  ;;  %12406 = vmatprep.subr.bf16.mxu0 %v14511_v51  ;;  %v17327_v51 = vrot.slane %v17214_v30, %v4765_v48  ;;  %v14520_v9 = vld [vmem:[#allocation21 + $0x1280] ss:$20 sps:$4 sm:$0xff]  }
 0xa16   : > { %10436 = vst [vmem:[%s17234_s0 + $0xa8] sm:$0xff] %v12527_v16  ;;  %v12543_v23 = vadd.f32 %v9813_v43, %v17237_v15  ;;  %v9815_v57 = vpop.f32.mrb[58].mxu1  ;;  %v12529_v42 = vadd.f32 %v9160_v12, %v17226_v33  ;;  %v14521_v38 = vld [vmem:[#allocation21 + $0x13e8] ss:$20 sps:$4 sm:$0xff]   ;;  %v14523_v43 = vld [vmem:[#allocation21 + $0x1550] ss:$20 sps:$4 sm:$0xff]  }
 0xa17   : > { %10437 = vst [vmem:[%s17234_s0 + $0xb0] sm:$0xff] %v12542_v0  ;;  %10440 = vst [vmem:[%s17234_s0 + $0xc8] sm:$0xff] %v12528_v54  ;;  %v12544_v62 = vadd.f32 %v9815_v57, %v17229_v4  ;;  %v9817_v50 = vpop.f32.mrb[59].mxu1  ;;  %12000 = vmatmul.mubr.msk.bf16.gmra.mrb[140].mxu0 %vm16128_vm7, %v17522_v44  ;;  %v14522_v30 = vld [vmem:[#allocation21 + $0x12a8] ss:$20 sps:$4 sm:$0xff]  }
 0xa18   : > { %10438 = vst [vmem:[%s17234_s0 + $0xb8] sm:$0xff] %v12543_v23  ;;  %10441 = vst [vmem:[%s17234_s0 + $0xd0] sm:$0xff] %v12529_v42  ;;  %v12545_v13 = vadd.f32 %v9817_v50, %v17237_v15  ;;  %12005 = vmatprep.mubr.msk.bf16.mxu0 %vm16128_vm7, %v17523_v5  ;;  %12407 = vmatpush3.bf16.msra.mxu0 %v14512_v39  ;;  %v17538_v39 = vld [vmem:[#allocation50_spill] sm:$0xff] }
 0xa19   : > { %10442 = vst [vmem:[%s17234_s0 + $0xd8] sm:$0xff] %v12544_v62  ;;  %12408 = vmatprep.subr.bf16.mxu0 %v14513_v14  ;;  %v14524_v57 = vld [vmem:[#allocation21 + $0x1410] ss:$20 sps:$4 sm:$0xff]   ;;  %v14525_v62 = vld [vmem:[#allocation21 + $0x1578] ss:$20 sps:$4 sm:$0xff]  }
 0xa1a   : > { %10443 = vst [vmem:[%s17234_s0 + $0xe0] sm:$0xff] %v12545_v13  ;;  %v9164_v27 = vpop.f32.mrb[36].mxu0  ;;  %v14526_v13 = vld [vmem:[#allocation21 + $0x1438] ss:$20 sps:$4 sm:$0xff]  }
 0xa1b   : > { %v12530_v37 = vadd.f32 %v9164_v27, %v17221_v31  ;;  %v9166_v44 = vpop.f32.mrb[37].mxu0  ;;  %v14533_v48 = vld [vmem:[#allocation21 + $0x1618] ss:$20 sps:$4 sm:$0xff]  }
 0xa1c   : > { %v9821_v59 = vpop.f32.mrb[60].mxu1  ;;  %v12531_v28 = vadd.f32 %v9166_v44, %v17226_v33  ;;  %v9168_v25 = vpop.f32.mrb[38].mxu0  ;;  %12409 = vmatpush3.bf16.msra.mxu0 %v14514_v56  ;;  %v14527_v56 = vld [vmem:[#allocation21 + $0x15a0] ss:$20 sps:$4 sm:$0xff]  }
 0xa1d   : > { %10445 = vst [vmem:[%s17234_s0 + $0xf0] sm:$0xff] %v12530_v37  ;;  %v12546_v5 = vadd.f32 %v9821_v59, %v17229_v4  ;;  %v9823_v18 = vpop.f32.mrb[61].mxu1  ;;  %v12532_v34 = vadd.f32 %v9168_v25, %v17221_v31  ;;  %v9170_v10 = vpop.f32.mrb[39].mxu0  ;;  %12410 = vmatprep.subr.bf16.mxu0 %v14515_v29  ;;  %v14528_v59 = vld [vmem:[#allocation21 + $0x1460] ss:$20 sps:$4 sm:$0xff]  }
 0xa1e   : > { %10446 = vst [vmem:[%s17234_s0 + $0xf8] sm:$0xff] %v12531_v28  ;;  %v12547_v3 = vadd.f32 %v9823_v18, %v17237_v15  ;;  %v9825_v49 = vpop.f32.mrb[62].mxu1  ;;  %v12533_v41 = vadd.f32 %v9170_v10, %v17226_v33  ;;  %v14518_v33 = vld [vmem:[#allocation21 + $0x1258] ss:$20 sps:$4 sm:$0xff]   ;;  %v14529_v25 = vld [vmem:[#allocation21 + $0x15c8] ss:$20 sps:$4 sm:$0xff]  }
 0xa1f   : > { %10447 = vst [vmem:[%s17234_s0 + $0x100] sm:$0xff] %v12546_v5  ;;  %10450 = vst [vmem:[%s17234_s0 + $0x118] sm:$0xff] %v12532_v34  ;;  %v12548_v55 = vadd.f32 %v9825_v49, %v17229_v4  ;;  %v9827_v63 = vpop.f32.mrb[63].mxu1  ;;  %12010 = vmatmul.mubr.msk.bf16.gmra.mrb[144].mxu0 %vm16128_vm7, %v17526_v53  ;;  %v14530_v5 = vld [vmem:[#allocation21 + $0x1488] ss:$20 sps:$4 sm:$0xff]  }
 0xa20   : > { %10448 = vst [vmem:[%s17234_s0 + $0x108] sm:$0xff] %v12547_v3  ;;  %10451 = vst [vmem:[%s17234_s0 + $0x120] sm:$0xff] %v12533_v41  ;;  %v12549_v31 = vadd.f32 %v9827_v63, %v17237_v15  ;;  %12015 = vmatprep.mubr.msk.bf16.mxu0 %vm16128_vm7, %v17537_v8  ;;  %12411 = vmatpush3.bf16.msra.mxu0 %v14516_v7  ;;  %v14531_v18 = vld [vmem:[#allocation21 + $0x15f0] ss:$20 sps:$4 sm:$0xff]   ;;  %v14534_v63 = vld [vmem:[#allocation21 + $0x14d8] ss:$20 sps:$4 sm:$0xff]  }
 0xa21   : > { %10452 = vst [vmem:[%s17234_s0 + $0x128] sm:$0xff] %v12548_v55  ;;  %12412 = vmatprep.subr.bf16.mxu0 %v14517_v1  ;;  %v14532_v49 = vld [vmem:[#allocation21 + $0x14b0] ss:$20 sps:$4 sm:$0xff]  }
 0xa22   : > { %10453 = vst [vmem:[%s17234_s0 + $0x130] sm:$0xff] %v12549_v31  ;;  %v12138_v4 = vpop.f32.mrb[40].mxu0  ;;  %v14535_v31 = vld [vmem:[#allocation21 + $0x1640] ss:$20 sps:$4 sm:$0xff]  }
 0xa23   : > { %v12139_v22 = vpop.f32.mrb[41].mxu0 }
 0xa24   : > { %v12140_v53 = vadd.f32 %v12139_v22, %v12138_v4  ;;  %v12141_v60 = vpop.f32.mrb[42].mxu0  ;;  %12413 = vmatpush3.bf16.msra.mxu0 %v14518_v33  ;;  %v14536_v22 = vld [vmem:[#allocation21 + $0x1500] ss:$20 sps:$4 sm:$0xff]  }
 0xa25   : > { %v12142_v15 = vpop.f32.mrb[43].mxu0  ;;  %12414 = vmatprep.subr.bf16.mxu0 %v14519_v26 }
 0xa26   : > { %v17330_v16 = vadd.f32 %v12140_v53, %v17327_v51  ;;  %v12143_v40 = vadd.f32 %v12142_v15, %v12141_v60  ;;  %v14537_v60 = vld [vmem:[#allocation21 + $0x1668] ss:$20 sps:$4 sm:$0xff]  }
 0xa27   : > { %12020 = vmatmul.mubr.msk.bf16.gmra.mrb[148].mxu0 %vm16128_vm7, %v17538_v39 }
 0xa28   : > { %v17336_v0 = vadd.f32 %v12143_v40, %v17327_v51  ;;  %12415 = vmatpush3.bf16.msra.mxu0 %v14520_v9  ;;  %10317 = vmatprep.mubr.bf16.mxu0 %v16674_v52 }
 0xa29   : > { %12416 = vmatprep.subr.bf16.mxu0 %v14521_v38 }
 0xa2a   : > { %v12144_v54 = vpop.f32.mrb[44].mxu0 }
 0xa2b   : > { %v12145_v12 = vpop.f32.mrb[45].mxu0 }
 0xa2c   : > { %v12146_v14 = vadd.f32 %v12145_v12, %v12144_v54  ;;  %v12147_v23 = vpop.f32.mrb[46].mxu0  ;;  %12417 = vmatpush3.bf16.msra.mxu0 %v14522_v30 }
 0xa2d   : > { %v12148_v42 = vpop.f32.mrb[47].mxu0  ;;  %12442 = vmatprep.subr.bf16.mxu0 %v14523_v43 }
 0xa2e   : > { %v17340_v20 = vadd.f32 %v12146_v14, %v17327_v51  ;;  %v12149_v50 = vadd.f32 %v12148_v42, %v12147_v23 }
 0xa2f   : > { %10318 = vmatmul.mubr.bf16.vlgmr.msra.gmra.mrb[152].mxu0 %v16684_v19 }
 0xa30   : > { %v17344_v52 = vadd.f32 %v12149_v50, %v17327_v51  ;;  %10325 = vmatprep.mubr.bf16.mxu0 %v16720_v2  ;;  %12443 = vmatpush3.bf16.msra.mxu0 %v14524_v57 }
 0xa31   : > { %12444 = vmatprep.subr.bf16.mxu0 %v14525_v62 }
 0xa32   : > { %v12150_v29 = vpop.f32.mrb[48].mxu0 }
 0xa33   : > { %v12151_v27 = vpop.f32.mrb[49].mxu0 }
 0xa34   : > { %v12152_v37 = vadd.f32 %v12151_v27, %v12150_v29  ;;  %v12153_v44 = vpop.f32.mrb[50].mxu0  ;;  %12445 = vmatpush3.bf16.msra.mxu0 %v14526_v13 }
 0xa35   : > { %v12154_v28 = vpop.f32.mrb[51].mxu0  ;;  %12446 = vmatprep.subr.bf16.mxu0 %v14527_v56 }
 0xa36   : > { %v9881_v19 = vadd.f32 %v12152_v37, %v17327_v51  ;;  %v12155_v7 = vadd.f32 %v12154_v28, %v12153_v44 }
 0xa37   : > { %10326 = vmatmul.mubr.bf16.gmra.mrb[156].mxu0 %v16724_v36 }
 0xa38   : > { %v9884_v2 = vadd.f32 %v12155_v7, %v17327_v51  ;;  %10333 = vmatprep.mubr.bf16.mxu0 %v16748_v6  ;;  %12447 = vmatpush3.bf16.msra.mxu0 %v14528_v59 }
 0xa39   : > { %12448 = vmatprep.subr.bf16.mxu0 %v14529_v25 }
 0xa3a   : > { %v12156_v34 = vpop.f32.mrb[52].mxu0 }
 0xa3b   : > { %v12157_v10 = vpop.f32.mrb[53].mxu0 }
 0xa3c   : > { %v12158_v1 = vadd.f32 %v12157_v10, %v12156_v34  ;;  %v12159_v3 = vpop.f32.mrb[54].mxu0  ;;  %12449 = vmatpush3.bf16.msra.mxu0 %v14530_v5 }
 0xa3d   : > { %v12160_v41 = vpop.f32.mrb[55].mxu0  ;;  %12450 = vmatprep.subr.bf16.mxu0 %v14531_v18 }
 0xa3e   : > { %v9889_v55 = vadd.f32 %v12158_v1, %v17327_v51  ;;  %v12161_v36 = vadd.f32 %v12160_v41, %v12159_v3 }
 0xa3f   : > { %10334 = vmatmul.mubr.bf16.gmra.mrb[160].mxu0 %v17514_v17 }
 0xa40   : > { %v9892_v6 = vadd.f32 %v12161_v36, %v17327_v51  ;;  %10341 = vmatprep.mubr.bf16.mxu0 %v17099_v47  ;;  %12451 = vmatpush3.bf16.msra.mxu0 %v14532_v49  ;;  %v14538_v51 = vld [vmem:[#allocation21 + $0x1528] ss:$20 sps:$4 sm:$0xff]  }
 0xa41   : > { %12452 = vmatprep.subr.bf16.mxu0 %v14533_v48 }
 0xa42   : > { %v12178_v8 = vpop.f32.mrb[56].mxu0 }
 0xa43   : > { %v12179_v33 = vpop.f32.mrb[57].mxu0 }
 0xa44   : > { %v12180_v26 = vadd.f32 %v12179_v33, %v12178_v8  ;;  %v12181_v4 = vpop.f32.mrb[58].mxu0  ;;  %12453 = vmatpush3.bf16.msra.mxu0 %v14534_v63 }
 0xa45   : > { %v12182_v53 = vpop.f32.mrb[59].mxu0  ;;  %12454 = vmatprep.subr.bf16.mxu0 %v14535_v31 }
 0xa46   : > { %v9930_v9 = vadd.f32 %v12180_v26, %v17330_v16  ;;  %v12183_v17 = vadd.f32 %v12182_v53, %v12181_v4 }
 0xa47   : > { %10342 = vmatmul.mubr.bf16.gmra.mrb[164].mxu0 %v17107_v61 }
 0xa48   : > { %v9933_v47 = vadd.f32 %v12183_v17, %v17336_v0  ;;  %12455 = vmatpush3.bf16.msra.mxu0 %v14536_v22  ;;  %10382 = vmatprep.mubr.bf16.mxu0 %v16759_v46 }
 0xa49   : > { %12456 = vmatprep.subr.bf16.mxu0 %v14537_v60 }
 0xa4a   : > { %v12184_v15 = vpop.f32.mrb[60].mxu0 }
 0xa4b   : > { %v12185_v38 = vpop.f32.mrb[61].mxu0 }
 0xa4c   : > { %v12186_v40 = vadd.f32 %v12185_v38, %v12184_v15  ;;  %v12187_v39 = vpop.f32.mrb[62].mxu0  ;;  %12457 = vmatpush3.bf16.msra.mxu0 %v14538_v51 }
 0xa4d   : > { %v12188_v30 = vpop.f32.mrb[63].mxu0 }
 0xa4e   : > { %v9938_v43 = vadd.f32 %v12186_v40, %v17340_v20  ;;  %v12189_v54 = vadd.f32 %v12188_v30, %v12187_v39 }
 0xa4f   : > { %10383 = vmatmul.mubr.bf16.vlgmr.msra.gmra.mrb[168].mxu0 %v16772_v45 }
 0xa50   : > { %v9941_v61 = vadd.f32 %v12189_v54, %v17344_v52  ;;  %10390 = vmatprep.mubr.bf16.mxu0 %v16783_v35 }
 0xa52   : > { %v12190_v16 = vpop.f32.mrb[64].mxu0 }
 0xa53   : > { %v12191_v0 = vpop.f32.mrb[65].mxu0 }
 0xa54   : > { %v12192_v46 = vadd.f32 %v12191_v0, %v12190_v16  ;;  %v12193_v12 = vpop.f32.mrb[66].mxu0 }
 0xa55   : > { %v12194_v14 = vpop.f32.mrb[67].mxu0 }
 0xa56   : > { %v9946_v23 = vadd.f32 %v12192_v46, %v9881_v19  ;;  %v12195_v57 = vadd.f32 %v12194_v14, %v12193_v12 }
 0xa57   : > { %10391 = vmatmul.mubr.bf16.gmra.mrb[172].mxu0 %v17515_v24 }
 0xa58   : > { %v9949_v42 = vadd.f32 %v12195_v57, %v9884_v2  ;;  %10398 = vmatprep.mubr.bf16.mxu0 %v17516_v11 }
 0xa5a   : > { %v12196_v62 = vpop.f32.mrb[68].mxu0 }
 0xa5b   : > { %v12197_v20 = vpop.f32.mrb[69].mxu0 }
 0xa5c   : > { %v12198_v50 = vadd.f32 %v12197_v20, %v12196_v62  ;;  %v12199_v45 = vpop.f32.mrb[70].mxu0 }
 0xa5d   : > { %v12200_v13 = vpop.f32.mrb[71].mxu0 }
 0xa5e   : > { %v9954_v52 = vadd.f32 %v12198_v50, %v9889_v55  ;;  %v12201_v56 = vadd.f32 %v12200_v13, %v12199_v45 }
 0xa5f   : > { %10399 = vmatmul.mubr.bf16.gmra.mrb[176].mxu0 %v16797_v58 }
 0xa60   : > { %v9957_v35 = vadd.f32 %v12201_v56, %v9892_v6  ;;  %10406 = vmatprep.mubr.bf16.mxu0 %v17123_v32 }
 0xa62   : > { %v12218_v29 = vpop.f32.mrb[72].mxu0 }
 0xa63   : > { %v12219_v27 = vpop.f32.mrb[73].mxu0 }
 0xa64   : > { %v12220_v37 = vadd.f32 %v12219_v27, %v12218_v29  ;;  %v12221_v44 = vpop.f32.mrb[74].mxu0 }
 0xa65   : > { %v12222_v24 = vpop.f32.mrb[75].mxu0 }
 0xa66   : > { %v9995_v59 = vadd.f32 %v12220_v37, %v9930_v9  ;;  %v12223_v28 = vadd.f32 %v12222_v24, %v12221_v44 }
 0xa67   : > { %10407 = vmatmul.mubr.bf16.gmra.mrb[180].mxu0 %v17131_v21 }
 0xa68   : > { %v9998_v11 = vadd.f32 %v12223_v28, %v9933_v47 }
 0xa6a   : > { %v12224_v25 = vpop.f32.mrb[76].mxu0 }
 0xa6b   : > { %v12225_v19 = vpop.f32.mrb[77].mxu0 }
 0xa6c   : > { %v12226_v7 = vadd.f32 %v12225_v19, %v12224_v25  ;;  %v12227_v2 = vpop.f32.mrb[78].mxu0 }
 0xa6d   : > { %v12228_v5 = vpop.f32.mrb[79].mxu0 }
 0xa6e   : > { %v10003_v18 = vadd.f32 %v12226_v7, %v9938_v43  ;;  %v12229_v58 = vadd.f32 %v12228_v5, %v12227_v2 }
 0xa70   : > { %v10006_v34 = vadd.f32 %v12229_v58, %v9941_v61 }
 0xa72   : > { %v12230_v10 = vpop.f32.mrb[80].mxu0 }
 0xa73   : > { %v12231_v32 = vpop.f32.mrb[81].mxu0 }
 0xa74   : > { %v12232_v1 = vadd.f32 %v12231_v32, %v12230_v10  ;;  %v12233_v3 = vpop.f32.mrb[82].mxu0 }
 0xa75   : > { %v12234_v49 = vpop.f32.mrb[83].mxu0 }
 0xa76   : > { %v10011_v41 = vadd.f32 %v12232_v1, %v9946_v23  ;;  %v12235_v48 = vadd.f32 %v12234_v49, %v12233_v3 }
 0xa78   : > { %v10014_v55 = vadd.f32 %v12235_v48, %v9949_v42 }
 0xa7a   : > { %v12236_v36 = vpop.f32.mrb[84].mxu0 }
 0xa7b   : > { %v12237_v6 = vpop.f32.mrb[85].mxu0 }
 0xa7c   : > { %v12238_v21 = vadd.f32 %v12237_v6, %v12236_v36  ;;  %v12239_v63 = vpop.f32.mrb[86].mxu0 }
 0xa7d   : > { %v12240_v31 = vpop.f32.mrb[87].mxu0 }
 0xa7e   : > { %v10019_v8 = vadd.f32 %v12238_v21, %v9954_v52  ;;  %v12241_v33 = vadd.f32 %v12240_v31, %v12239_v63 }
 0xa80   : > { %v10022_v26 = vadd.f32 %v12241_v33, %v9957_v35 }
 0xa82   : > { %v12258_v4 = vpop.f32.mrb[88].mxu0 }
 0xa83   : > { %v12259_v22 = vpop.f32.mrb[89].mxu0 }
 0xa84   : > { %v12260_v53 = vadd.f32 %v12259_v22, %v12258_v4  ;;  %v12261_v60 = vpop.f32.mrb[90].mxu0 }
 0xa85   : > { %v12262_v9 = vpop.f32.mrb[91].mxu0 }
 0xa86   : > { %v10060_v17 = vadd.f32 %v12260_v53, %v9995_v59  ;;  %v12263_v47 = vadd.f32 %v12262_v9, %v12261_v60 }
 0xa88   : > { %v10063_v51 = vadd.f32 %v12263_v47, %v9998_v11 }
 0xa8a   : > { %v12264_v15 = vpop.f32.mrb[92].mxu0 }
 0xa8b   : > { %v12265_v38 = vpop.f32.mrb[93].mxu0 }
 0xa8c   : > { %v12266_v40 = vadd.f32 %v12265_v38, %v12264_v15  ;;  %v12267_v39 = vpop.f32.mrb[94].mxu0 }
 0xa8d   : > { %v12268_v30 = vpop.f32.mrb[95].mxu0 }
 0xa8e   : > { %v10068_v43 = vadd.f32 %v12266_v40, %v10003_v18  ;;  %v12269_v54 = vadd.f32 %v12268_v30, %v12267_v39 }
 0xa90   : > { %v10071_v61 = vadd.f32 %v12269_v54, %v10006_v34 }
 0xa92   : > { %v12270_v16 = vpop.f32.mrb[96].mxu0 }
 0xa93   : > { %v12271_v0 = vpop.f32.mrb[97].mxu0 }
 0xa94   : > { %v12272_v46 = vadd.f32 %v12271_v0, %v12270_v16  ;;  %v12273_v12 = vpop.f32.mrb[98].mxu0 }
 0xa95   : > { %v12274_v14 = vpop.f32.mrb[99].mxu0 }
 0xa96   : > { %v10076_v23 = vadd.f32 %v12272_v46, %v10011_v41  ;;  %v12275_v57 = vadd.f32 %v12274_v14, %v12273_v12 }
 0xa98   : > { %v10079_v42 = vadd.f32 %v12275_v57, %v10014_v55 }
 0xa9a   : > { %v12276_v62 = vpop.f32.mrb[100].mxu0 }
 0xa9b   : > { %v12277_v20 = vpop.f32.mrb[101].mxu0 }
 0xa9c   : > { %v12278_v50 = vadd.f32 %v12277_v20, %v12276_v62  ;;  %v12279_v45 = vpop.f32.mrb[102].mxu0 }
 0xa9d   : > { %v12280_v13 = vpop.f32.mrb[103].mxu0 }
 0xa9e   : > { %v10084_v52 = vadd.f32 %v12278_v50, %v10019_v8  ;;  %v12281_v56 = vadd.f32 %v12280_v13, %v12279_v45 }
 0xaa0   : > { %v10087_v35 = vadd.f32 %v12281_v56, %v10022_v26 }
 0xaa2   : > { %v12298_v29 = vpop.f32.mrb[104].mxu0 }
 0xaa3   : > { %v12299_v27 = vpop.f32.mrb[105].mxu0 }
 0xaa4   : > { %v12300_v37 = vadd.f32 %v12299_v27, %v12298_v29  ;;  %v12301_v44 = vpop.f32.mrb[106].mxu0 }
 0xaa5   : > { %v12302_v24 = vpop.f32.mrb[107].mxu0 }
 0xaa6   : > { %v10125_v59 = vadd.f32 %v12300_v37, %v10060_v17  ;;  %v12303_v28 = vadd.f32 %v12302_v24, %v12301_v44 }
 0xaa8   : > { %v10128_v11 = vadd.f32 %v12303_v28, %v10063_v51 }
 0xaaa   : > { %v12304_v25 = vpop.f32.mrb[108].mxu0 }
 0xaab   : > { %v12305_v19 = vpop.f32.mrb[109].mxu0 }
 0xaac   : > { %v12306_v7 = vadd.f32 %v12305_v19, %v12304_v25  ;;  %v12307_v2 = vpop.f32.mrb[110].mxu0 }
 0xaad   : > { %v12308_v5 = vpop.f32.mrb[111].mxu0 }
 0xaae   : > { %v10133_v18 = vadd.f32 %v12306_v7, %v10068_v43  ;;  %v12309_v58 = vadd.f32 %v12308_v5, %v12307_v2 }
 0xab0   : > { %v10136_v34 = vadd.f32 %v12309_v58, %v10071_v61 }
 0xab2   : > { %v12310_v10 = vpop.f32.mrb[112].mxu0 }
 0xab3   : > { %v12311_v32 = vpop.f32.mrb[113].mxu0 }
 0xab4   : > { %v12312_v1 = vadd.f32 %v12311_v32, %v12310_v10  ;;  %v12313_v3 = vpop.f32.mrb[114].mxu0 }
 0xab5   : > { %v12314_v49 = vpop.f32.mrb[115].mxu0 }
 0xab6   : > { %v10141_v41 = vadd.f32 %v12312_v1, %v10076_v23  ;;  %v12315_v48 = vadd.f32 %v12314_v49, %v12313_v3 }
 0xab8   : > { %v10144_v55 = vadd.f32 %v12315_v48, %v10079_v42 }
 0xaba   : > { %v12316_v36 = vpop.f32.mrb[116].mxu0 }
 0xabb   : > { %v12317_v6 = vpop.f32.mrb[117].mxu0 }
 0xabc   : > { %v12318_v21 = vadd.f32 %v12317_v6, %v12316_v36  ;;  %v12319_v63 = vpop.f32.mrb[118].mxu0 }
 0xabd   : > { %v12320_v31 = vpop.f32.mrb[119].mxu0 }
 0xabe   : > { %v10149_v8 = vadd.f32 %v12318_v21, %v10084_v52  ;;  %v12321_v33 = vadd.f32 %v12320_v31, %v12319_v63 }
 0xac0   : > { %v10152_v26 = vadd.f32 %v12321_v33, %v10087_v35 }
 0xac2   : > { %v12338_v4 = vpop.f32.mrb[120].mxu0 }
 0xac3   : > { %v12339_v22 = vpop.f32.mrb[121].mxu0 }
 0xac4   : > { %v12340_v53 = vadd.f32 %v12339_v22, %v12338_v4  ;;  %v12341_v60 = vpop.f32.mrb[122].mxu0 }
 0xac5   : > { %v12342_v9 = vpop.f32.mrb[123].mxu0 }
 0xac6   : > { %v10190_v17 = vadd.f32 %v12340_v53, %v10125_v59  ;;  %v12343_v47 = vadd.f32 %v12342_v9, %v12341_v60 }
 0xac8   : > { %v10193_v51 = vadd.f32 %v12343_v47, %v10128_v11 }
 0xaca   : > { %v12344_v15 = vpop.f32.mrb[124].mxu0 }
 0xacb   : > { %v12345_v38 = vpop.f32.mrb[125].mxu0 }
 0xacc   : > { %v12346_v40 = vadd.f32 %v12345_v38, %v12344_v15  ;;  %v12347_v39 = vpop.f32.mrb[126].mxu0 }
 0xacd   : > { %v12348_v30 = vpop.f32.mrb[127].mxu0 }
 0xace   : > { %v10198_v43 = vadd.f32 %v12346_v40, %v10133_v18  ;;  %v12349_v54 = vadd.f32 %v12348_v30, %v12347_v39 }
 0xad0   : > { %v10201_v61 = vadd.f32 %v12349_v54, %v10136_v34 }
 0xad2   : > { %v12350_v16 = vpop.f32.mrb[128].mxu0 }
 0xad3   : > { %v12351_v0 = vpop.f32.mrb[129].mxu0 }
 0xad4   : > { %v12352_v46 = vadd.f32 %v12351_v0, %v12350_v16  ;;  %v12353_v12 = vpop.f32.mrb[130].mxu0 }
 0xad5   : > { %v12354_v14 = vpop.f32.mrb[131].mxu0 }
 0xad6   : > { %v10206_v23 = vadd.f32 %v12352_v46, %v10141_v41  ;;  %v12355_v57 = vadd.f32 %v12354_v14, %v12353_v12 }
 0xad8   : > { %v10209_v42 = vadd.f32 %v12355_v57, %v10144_v55 }
 0xada   : > { %v12356_v62 = vpop.f32.mrb[132].mxu0 }
 0xadb   : > { %v12357_v20 = vpop.f32.mrb[133].mxu0 }
 0xadc   : > { %v12358_v50 = vadd.f32 %v12357_v20, %v12356_v62  ;;  %v12359_v45 = vpop.f32.mrb[134].mxu0 }
 0xadd   : > { %v12360_v13 = vpop.f32.mrb[135].mxu0 }
 0xade   : > { %v10214_v52 = vadd.f32 %v12358_v50, %v10149_v8  ;;  %v12361_v56 = vadd.f32 %v12360_v13, %v12359_v45 }
 0xae0   : > { %v10217_v35 = vadd.f32 %v12361_v56, %v10152_v26 }
 0xae2   : > { %v12378_v29 = vpop.f32.mrb[136].mxu0 }
 0xae3   : > { %v12379_v27 = vpop.f32.mrb[137].mxu0 }
 0xae4   : > { %v12380_v37 = vadd.f32 %v12379_v27, %v12378_v29  ;;  %v12381_v44 = vpop.f32.mrb[138].mxu0 }
 0xae5   : > { %v12382_v24 = vpop.f32.mrb[139].mxu0 }
 0xae6   : > { %v10255_v59 = vadd.f32 %v12380_v37, %v10190_v17  ;;  %v12383_v28 = vadd.f32 %v12382_v24, %v12381_v44 }
 0xae8   : > { %v10258_v11 = vadd.f32 %v12383_v28, %v10193_v51 }
 0xaea   : > { %v12384_v25 = vpop.f32.mrb[140].mxu0 }
 0xaeb   : > { %v12385_v19 = vpop.f32.mrb[141].mxu0 }
 0xaec   : > { %v12386_v7 = vadd.f32 %v12385_v19, %v12384_v25  ;;  %v12387_v2 = vpop.f32.mrb[142].mxu0 }
 0xaed   : > { %v12388_v5 = vpop.f32.mrb[143].mxu0 }
 0xaee   : > { %v10263_v18 = vadd.f32 %v12386_v7, %v10198_v43  ;;  %v12389_v58 = vadd.f32 %v12388_v5, %v12387_v2 }
 0xaf0   : > { %v10266_v34 = vadd.f32 %v12389_v58, %v10201_v61 }
 0xaf2   : > { %v12390_v10 = vpop.f32.mrb[144].mxu0 }
 0xaf3   : > { %v12391_v32 = vpop.f32.mrb[145].mxu0 }
 0xaf4   : > { %v12392_v1 = vadd.f32 %v12391_v32, %v12390_v10  ;;  %v12393_v3 = vpop.f32.mrb[146].mxu0 }
 0xaf5   : > { %v12394_v49 = vpop.f32.mrb[147].mxu0 }
 0xaf6   : > { %v10271_v41 = vadd.f32 %v12392_v1, %v10206_v23  ;;  %v12395_v48 = vadd.f32 %v12394_v49, %v12393_v3 }
 0xaf8   : > { %v10274_v55 = vadd.f32 %v12395_v48, %v10209_v42 }
 0xafa   : > { %v12396_v36 = vpop.f32.mrb[148].mxu0 }
 0xafb   : > { %v12397_v6 = vpop.f32.mrb[149].mxu0 }
 0xafc   : > { %v12398_v21 = vadd.f32 %v12397_v6, %v12396_v36  ;;  %v12399_v63 = vpop.f32.mrb[150].mxu0 }
 0xafd   : > { %v12400_v31 = vpop.f32.mrb[151].mxu0 }
 0xafe   : > { %v10279_v8 = vadd.f32 %v12398_v21, %v10214_v52  ;;  %v12401_v33 = vadd.f32 %v12400_v31, %v12399_v63 }
 0xb00   : > { %v10282_v26 = vadd.f32 %v12401_v33, %v10217_v35 }
 0xb02   : > { %v12418_v4 = vpop.f32.mrb[152].mxu0 }
 0xb03   : > { %v12419_v22 = vpop.f32.mrb[153].mxu0 }
 0xb04   : > { %v12420_v53 = vadd.f32 %v12419_v22, %v12418_v4  ;;  %v12421_v60 = vpop.f32.mrb[154].mxu0 }
 0xb05   : > { %v12422_v9 = vpop.f32.mrb[155].mxu0 }
 0xb06   : > { %v10320_v17 = vadd.f32 %v12420_v53, %v10255_v59  ;;  %v12423_v47 = vadd.f32 %v12422_v9, %v12421_v60 }
 0xb08   : > { %v10323_v51 = vadd.f32 %v12423_v47, %v10258_v11 }
 0xb0a   : > { %v12424_v15 = vpop.f32.mrb[156].mxu0 }
 0xb0b   : > { %v12425_v38 = vpop.f32.mrb[157].mxu0 }
 0xb0c   : > { %v12426_v40 = vadd.f32 %v12425_v38, %v12424_v15  ;;  %v12427_v39 = vpop.f32.mrb[158].mxu0 }
 0xb0d   : > { %v12428_v30 = vpop.f32.mrb[159].mxu0 }
 0xb0e   : > { %v10328_v43 = vadd.f32 %v12426_v40, %v10263_v18  ;;  %v12429_v54 = vadd.f32 %v12428_v30, %v12427_v39 }
 0xb10   : > { %v10331_v61 = vadd.f32 %v12429_v54, %v10266_v34 }
 0xb12   : > { %v12430_v16 = vpop.f32.mrb[160].mxu0 }
 0xb13   : > { %v12431_v0 = vpop.f32.mrb[161].mxu0 }
 0xb14   : > { %v12432_v46 = vadd.f32 %v12431_v0, %v12430_v16  ;;  %v12433_v12 = vpop.f32.mrb[162].mxu0 }
 0xb15   : > { %v12434_v14 = vpop.f32.mrb[163].mxu0 }
 0xb16   : > { %v10336_v23 = vadd.f32 %v12432_v46, %v10271_v41  ;;  %v12435_v57 = vadd.f32 %v12434_v14, %v12433_v12 }
 0xb18   : > { %v10339_v42 = vadd.f32 %v12435_v57, %v10274_v55 }
 0xb1a   : > { %v12436_v62 = vpop.f32.mrb[164].mxu0 }
 0xb1b   : > { %v12437_v20 = vpop.f32.mrb[165].mxu0 }
 0xb1c   : > { %v12438_v50 = vadd.f32 %v12437_v20, %v12436_v62  ;;  %v12439_v45 = vpop.f32.mrb[166].mxu0 }
 0xb1d   : > { %v12440_v13 = vpop.f32.mrb[167].mxu0 }
 0xb1e   : > { %v10344_v52 = vadd.f32 %v12438_v50, %v10279_v8  ;;  %v12441_v56 = vadd.f32 %v12440_v13, %v12439_v45 }
 0xb20   : > { %v10347_v35 = vadd.f32 %v12441_v56, %v10282_v26 }
 0xb22   : > { %v12458_v29 = vpop.f32.mrb[168].mxu0 }
 0xb23   : > { %v12459_v27 = vpop.f32.mrb[169].mxu0 }
 0xb24   : > { %v12460_v37 = vadd.f32 %v12459_v27, %v12458_v29  ;;  %v12461_v44 = vpop.f32.mrb[170].mxu0 }
 0xb25   : > { %v12462_v24 = vpop.f32.mrb[171].mxu0 }
 0xb26   : > { %v10385_v59 = vadd.f32 %v12460_v37, %v10320_v17  ;;  %v12463_v28 = vadd.f32 %v12462_v24, %v12461_v44 }
 0xb28   : > { %10419 = vst [vmem:[%s17234_s0 + $0x20] sm:$0xff] %v10385_v59  ;;  %v10388_v11 = vadd.f32 %v12463_v28, %v10323_v51 }
 0xb2a   : > { %10424 = vst [vmem:[%s17234_s0 + $0x48] sm:$0xff] %v10388_v11  ;;  %v12464_v25 = vpop.f32.mrb[172].mxu0 }
 0xb2b   : > { %v12465_v19 = vpop.f32.mrb[173].mxu0 }
 0xb2c   : > { %v12466_v7 = vadd.f32 %v12465_v19, %v12464_v25  ;;  %v12467_v2 = vpop.f32.mrb[174].mxu0 }
 0xb2d   : > { %v12468_v5 = vpop.f32.mrb[175].mxu0 }
 0xb2e   : > { %v10393_v18 = vadd.f32 %v12466_v7, %v10328_v43  ;;  %v12469_v58 = vadd.f32 %v12468_v5, %v12467_v2 }
 0xb30   : > { %10429 = vst [vmem:[%s17234_s0 + $0x70] sm:$0xff] %v10393_v18  ;;  %v10396_v34 = vadd.f32 %v12469_v58, %v10331_v61 }
 0xb32   : > { %10434 = vst [vmem:[%s17234_s0 + $0x98] sm:$0xff] %v10396_v34  ;;  %v12470_v10 = vpop.f32.mrb[176].mxu0 }
 0xb33   : > { %v12471_v32 = vpop.f32.mrb[177].mxu0 }
 0xb34   : > { %v12472_v1 = vadd.f32 %v12471_v32, %v12470_v10  ;;  %v12473_v3 = vpop.f32.mrb[178].mxu0 }
 0xb35   : > { %v12474_v49 = vpop.f32.mrb[179].mxu0 }
 0xb36   : > { %v10401_v41 = vadd.f32 %v12472_v1, %v10336_v23  ;;  %v12475_v48 = vadd.f32 %v12474_v49, %v12473_v3 }
 0xb38   : > { %10439 = vst [vmem:[%s17234_s0 + $0xc0] sm:$0xff] %v10401_v41  ;;  %v10404_v55 = vadd.f32 %v12475_v48, %v10339_v42 }
 0xb3a   : > { %10444 = vst [vmem:[%s17234_s0 + $0xe8] sm:$0xff] %v10404_v55  ;;  %v12476_v36 = vpop.f32.mrb[180].mxu0 }
 0xb3b   : > { %v12477_v6 = vpop.f32.mrb[181].mxu0 }
 0xb3c   : > { %v12478_v21 = vadd.f32 %v12477_v6, %v12476_v36  ;;  %v12479_v63 = vpop.f32.mrb[182].mxu0 }
 0xb3d   : > { %v12480_v31 = vpop.f32.mrb[183].mxu0 }
 0xb3e   : > { %v10409_v8 = vadd.f32 %v12478_v21, %v10344_v52  ;;  %v12481_v33 = vadd.f32 %v12480_v31, %v12479_v63 }
 0xb40   : > { %10449 = vst [vmem:[%s17234_s0 + $0x110] sm:$0xff] %v10409_v8  ;;  %v10412_v26 = vadd.f32 %v12481_v33, %v10347_v35 }
 0xb42   : > { %10454 = vst [vmem:[%s17234_s0 + $0x138] sm:$0xff] %v10412_v26 }
 0xb43 PF: > { %p32_p5 = scmp.ge.s32.totalorder %s15413_s29, 4   ;;  %s17539_s18 = smov %s14995_s19 }
 0xb44   : > { %s17540_s19 = smov %s14999_s20  ;;  %s17541_s20 = smov %s15424_s30 }
 0xb45   : > { %s17542_s21 = smov %s15413_s29  ;;  %34 = sbr.rel (!%p32_p5) target bundleno = 18 (0x12), region = 172 }
 0xb4c   :  { %10476 = vsyncpa [#allocation3], 1 }
 0xb4d   :  { %10478 = vsyncpa [#allocation3 + $0x1], 1 }
 0xb4e   :  { %10479 = vsyncpa [#allocation5], 1 }
 0xb4f   :  { %10480 = vsyncpa [#allocation8], 1 }
 0xb50   :  { %10481 = vsyncpa [#allocation11], 1 }
 0xb51   :  { %10482 = vsyncpa [#allocation14], 1 }
 0xb52   :  { %10483 = vsyncpa [#allocation17], 1 }
 0xb53   :  { %10484 = vsyncpa [#allocation20], 1 }
 0xb54   :  { %10485 = vsyncpa [#allocation23], 1 }

</bundles_post_ra>
